<compile_context>
chip_gen: v7x
topology: tpu7x:2x2x1
jax: 0.10.0
libtpu: 0.0.40
codegen_flags: <defaults>
</compile_context>

<pallas_src>
import functools
import math

import jax
import jax.numpy as jnp
import numpy as np
from jax.experimental import pallas as pl
from jax.experimental.pallas import tpu as pltpu


# ---------------------------------------------------------------------------
# Fused Pallas kernel: conv1+ReLU -> conv2+ReLU -> (conv3 (x) Linear), per
# batch-block.  All activations are 2-D slabs with row index = q*B + sample.
# ---------------------------------------------------------------------------
def _disc_fused_kernel(x_ref, w1_ref, b1_ref, w2_ref, b2_ref, v_ref, o_ref,
                       *, b, kh, ho2):
    # conv1 + ReLU.  The KH vertical taps were folded into the contraction dim
    # by the wrapper -> ONE MXU dot with K = KH*W*Cin, M = Ho1*B.
    xb = x_ref[0]                                                # (Ho1*B, KH*W*Cin) bf16
    h1 = jnp.dot(xb, w1_ref[...], preferred_element_type=jnp.float32)
    h1 = jnp.maximum(h1 + b1_ref[...], 0.0).astype(jnp.bfloat16)  # cast once

    # conv2 + ReLU: 3 row-tap dots against block-Toeplitz weights.  Tap i reads
    # rows [i*B, i*B + Ho2*B) of h1 — a 16-row-aligned static slice (free view
    # thanks to the batch-minor layout), M = Ho2*B per dot.
    m2 = ho2 * b
    acc = jnp.dot(h1[0:m2, :], w2_ref[0], preferred_element_type=jnp.float32)
    for i in range(1, kh):
        acc = acc + jnp.dot(h1[i * b:i * b + m2, :], w2_ref[i],
                            preferred_element_type=jnp.float32)
    h2 = jnp.maximum(acc + b2_ref[...], 0.0)                     # (Ho2*B, Wo2*64) f32

    # conv3 (no ReLU) + Linear head, pre-contracted into per-row coefficients V
    # (expanded to the slab layout by the wrapper): one elementwise multiply,
    # then cheap aligned row-group folds -> per-sample partial sums.
    part = h2 * v_ref[...]
    s = part[0:b, :]
    for p in range(1, ho2):
        s = s + part[p * b:(p + 1) * b, :]                       # (B, Wo2*64)

    # Fold the lane dim down to one 128-wide tile -> lane-dense, unmasked
    # full-tile stores.  (Final 128-lane sum + scalar const happen in wrapper.)
    nw = s.shape[1]
    if nw % 128 == 0 and nw > 128:
        r = s[:, 0:128]
        for t in range(1, nw // 128):
            r = r + s[:, t * 128:(t + 1) * 128]                  # (B, 128)
    else:
        r = s
    o_ref[0] = r


# ---------------------------------------------------------------------------
# Init-time weight preprocessing (hoisted out of the forward path)
# ---------------------------------------------------------------------------
def _conv_toeplitz(w_oihw, w_in, dtype=jnp.bfloat16):
    """Per-vertical-tap block-Toeplitz matrices for conv-as-row-matmul.

    Returns T of shape (KH, w_in*Cin, Wo*Cout) with
        T[i, w*Cin + c, wo*Cout + f] = w_oihw[f, c, i, w - wo]  for 0 <= w-wo < KW
    so that for a per-sample activation matrix X[h, w*Cin + c],
        out[ho, wo*Cout + f] = sum_i (X[ho+i, :] @ T[i])[wo*Cout + f]
    equals the valid (stride-1, no-padding) convolution.
    """
    cout, cin, kh, kw = w_oihw.shape
    wo = w_in - kw + 1
    w_perm = jnp.transpose(w_oihw, (2, 3, 1, 0)).astype(jnp.float32)  # (KH,KW,Cin,Cout)
    sel = (jnp.arange(w_in)[:, None, None]
           == jnp.arange(wo)[None, None, :] + jnp.arange(kw)[None, :, None]
           ).astype(jnp.float32)                                       # (w_in, KW, Wo)
    t = jnp.einsum("wjo,ijcf->iwcof", sel, w_perm)          # (KH, w_in, Cin, Wo, Cout)
    return t.reshape(kh, w_in * cin, wo * cout).astype(dtype)


def _fuse_conv3_fc(w3, b3, wfc, bfc, h_in, w_in):
    """Pre-contract conv3 (no ReLU) with the Linear head.

    Returns (U, const) with U of shape (KH, Ho3, w_in*Cin) and const (1, 1)
    such that, for the per-sample conv2 output matrix H2[h, w*Cin + c],
        y = const + sum_i sum(H2[i:i+Ho3, :] * U[i]).
    """
    cout3, cin3, kh, kw = w3.shape
    ho, wo = h_in - kh + 1, w_in - kw + 1
    g = wfc.reshape(cout3, ho, wo).astype(jnp.float32)      # torch CHW-flatten order
    vt = jnp.einsum("fhw,fcij->ijhwc", g, w3.astype(jnp.float32))
    sel = (jnp.arange(w_in)[:, None, None]
           == jnp.arange(wo)[None, None, :] + jnp.arange(kw)[None, :, None]
           ).astype(jnp.float32)                            # (w_in, KW, Wo)
    u = jnp.einsum("wjo,ijhoc->ihwc", sel, vt).reshape(kh, ho, w_in * cin3)
    const = (bfc.astype(jnp.float32).reshape(())
             + jnp.sum(b3.astype(jnp.float32) * jnp.sum(g, axis=(1, 2)))
             ).reshape(1, 1)
    return u.astype(jnp.float32), const


def preprocess_params(params, in_size):
    """One-time weight-layout work: Toeplitz convs + conv3/FC fusion."""
    c, h, w = in_size
    kh = 3
    ho2, wo2 = h - 4, w - 4
    u, const = _fuse_conv3_fc(params["w3"], params["b3"],
                              params["wfc"], params["bfc"], ho2, wo2)
    # Collapse the KH taps of the conv3(+FC) contraction into per-conv2-row
    # coefficients: V[p, :] = sum_i U[i, p - i, :].
    ho3 = ho2 - 2
    v = jnp.zeros((ho2, u.shape[-1]), jnp.float32)
    for i in range(kh):
        v = v.at[i:i + ho3, :].add(u[i])
    return {
        # conv1 Toeplitz with the KH taps folded into the contraction dim.
        "w1f": _conv_toeplitz(params["w1"], w).reshape(kh * w * c, -1),      # (3*W*Cin, Wo1*64) bf16
        "b1r": jnp.tile(params["b1"].astype(jnp.float32), (w - 2,))[None, :],
        "w2t": _conv_toeplitz(params["w2"], w - 2),                          # (3, Wo1*64, Wo2*64) bf16
        "b2r": jnp.tile(params["b2"].astype(jnp.float32), (w - 4,))[None, :],
        "v": v,                                                              # (Ho2, Wo2*64) f32
        "const": const,                                                      # (1, 1) f32
    }


# ---------------------------------------------------------------------------
# Forward pass: single fused, batch-blocked pallas_call
# ---------------------------------------------------------------------------
@jax.jit
def discriminator_forward(x_nchw, pp):
    n, c, h, w = x_nchw.shape
    kh = 3
    ho1, ho2 = h - 2, h - 4
    wo1, wo2 = w - 2, w - 4
    wc = w * c
    nw2 = wo2 * 64

    # Batch tile: multiple of 16 (bf16 sublane alignment of the slab).  32 for
    # larger batches so conv2's M = Ho2*B >= 256 (fills v6e/v7x MXU depth);
    # 16 for n <= 32 so tiny batches are not over-padded and n in (16, 32]
    # still gets a 2-step grid for v7x megacore.
    b_tile = 16 if n <= 32 else 32
    g = pl.cdiv(n, b_tile)
    n_pad = g * b_tile

    # ---- layout plumbing (cheap, once per call) ----
    x2 = jnp.transpose(x_nchw, (0, 2, 3, 1)).reshape(n, h, wc).astype(jnp.bfloat16)
    x2 = jnp.pad(x2, ((0, n_pad - n), (0, 0), (0, 0)))
    # Fold conv1's KH vertical taps into the contraction dim (K = KH*W*Cin).
    lhs = jnp.concatenate([x2[:, i:i + ho1, :] for i in range(kh)], axis=-1)
    # Batch-minor slab: within a block, row = image_row * B_tile + sample, so
    # every in-kernel tap slice starts on a multiple of B_tile (aligned view).
    lhs = (lhs.reshape(g, b_tile, ho1, kh * wc)
              .transpose(0, 2, 1, 3)
              .reshape(g, ho1 * b_tile, kh * wc))
    # Per-row conv3(+FC) coefficients expanded to the slab's row layout.
    vexp = jnp.repeat(pp["v"], b_tile, axis=0)                   # (Ho2*B, Wo2*64) f32

    out_w = 128 if (nw2 % 128 == 0 and nw2 > 128) else nw2

    flops = 2 * n_pad * (ho1 * (kh * wc) * (wo1 * 64)
                         + kh * ho2 * (wo1 * 64) * nw2)
    bytes_accessed = (lhs.size * 2 + pp["w1f"].size * 2 + pp["w2t"].size * 2
                      + vexp.size * 4 + n_pad * out_w * 4)

    out = pl.pallas_call(
        functools.partial(_disc_fused_kernel, b=b_tile, kh=kh, ho2=ho2),
        out_shape=jax.ShapeDtypeStruct((g, b_tile, out_w), jnp.float32),
        grid=(g,),
        in_specs=[
            pl.BlockSpec((1, ho1 * b_tile, kh * wc), lambda i: (i, 0, 0)),
            pl.BlockSpec(pp["w1f"].shape, lambda i: (0, 0)),
            pl.BlockSpec(pp["b1r"].shape, lambda i: (0, 0)),
            pl.BlockSpec(pp["w2t"].shape, lambda i: (0, 0, 0)),
            pl.BlockSpec(pp["b2r"].shape, lambda i: (0, 0)),
            pl.BlockSpec(vexp.shape, lambda i: (0, 0)),
        ],
        out_specs=pl.BlockSpec((1, b_tile, out_w), lambda i: (i, 0, 0)),
        compiler_params=pltpu.CompilerParams(
            dimension_semantics=("parallel",),
            vmem_limit_bytes=32 * 1024 * 1024,
        ),
        cost_estimate=pl.CostEstimate(flops=flops, transcendentals=0,
                                      bytes_accessed=bytes_accessed),
    )(lhs, pp["w1f"], pp["b1r"], pp["w2t"], pp["b2r"], vexp)

    # Final 128-lane fold of the lane-dense per-sample partials + the fused
    # conv3/FC scalar constant (one tiny XLA reduce on (n_pad, 128)).
    y = jnp.sum(out.reshape(n_pad, out_w), axis=1)[:n, None] + pp["const"]
    return y


# ---------------------------------------------------------------------------
# Pure-JAX reference (NCHW, PyTorch semantics) for validation
# ---------------------------------------------------------------------------
def reference_forward(x_nchw, params):
    def conv(x, w, b):
        y = jax.lax.conv_general_dilated(
            x, w, (1, 1), "VALID",
            dimension_numbers=("NCHW", "OIHW", "NCHW"),
            precision=jax.lax.Precision.HIGHEST)
        return y + b[None, :, None, None]

    h = jax.nn.relu(conv(x_nchw, params["w1"], params["b1"]))
    h = jax.nn.relu(conv(h, params["w2"], params["b2"]))
    h = conv(h, params["w3"], params["b3"])
    feat = h.reshape(h.shape[0], -1)  # NCHW flatten, like features.view(B, -1)
    return jnp.dot(feat, params["wfc"].T,
                   precision=jax.lax.Precision.HIGHEST) + params["bfc"]


# ---------------------------------------------------------------------------
# Deterministic parameter init (PyTorch-style uniform(-1/sqrt(fan_in), +))
# ---------------------------------------------------------------------------
def init_params(key, in_channels, h, w, out_channels=1024):
    ks = jax.random.split(key, 8)

    def u(k, shape, bound):
        return jax.random.uniform(k, shape, jnp.float32, -bound, bound)

    k1 = 1.0 / math.sqrt(in_channels * 9)
    k2 = 1.0 / math.sqrt(64 * 9)
    k3 = 1.0 / math.sqrt(64 * 9)
    hf, wf = h - 6, w - 6
    num_features = out_channels * hf * wf
    kfc = 1.0 / math.sqrt(num_features)
    return {
        "w1": u(ks[0], (64, in_channels, 3, 3), k1),
        "b1": u(ks[1], (64,), k1),
        "w2": u(ks[2], (64, 64, 3, 3), k2),
        "b2": u(ks[3], (64,), k2),
        "w3": u(ks[4], (out_channels, 64, 3, 3), k3),
        "b3": u(ks[5], (out_channels,), k3),
        # TODO(synk): PyTorch re-creates this Linear with fresh random weights on
        # every forward call; here it is instantiated once, deterministically.
        "wfc": u(ks[6], (1, num_features), kfc),
        "bfc": u(ks[7], (1,), kfc),
    }


if __name__ == "__main__":
    key = jax.random.PRNGKey(0)
    k_x, k_p = jax.random.split(key)

    N, C, H, W = 2, 4, 16, 16  # in_size = (4, 16, 16)
    x = jax.random.normal(k_x, (N, C, H, W), jnp.float32)
    params = init_params(k_p, C, H, W)
    pp = preprocess_params(params, (C, H, W))  # one-time weight preprocessing

    y = jax.block_until_ready(discriminator_forward(x, pp))
    y_ref = jax.block_until_ready(reference_forward(x, params))

    # bf16 matmuls with f32 accumulation vs. HIGHEST-precision f32 reference:
    # intentional precision trade-off for a GAN discriminator score.
    np.testing.assert_allclose(np.asarray(y), np.asarray(y_ref), rtol=1e-2, atol=1e-2)
    assert y.shape == (N, 1)

    print("KERNEL_OK")
</pallas_src>

<mosaic_0001>
module attributes {stable_mosaic.version = 11 : i64} {
  func.func @_disc_fused_kernel(%arg0: i32, %arg1: memref<1x224x192xbf16, #tpu.memory_space<vmem>>, %arg2: memref<192x896xbf16, #tpu.memory_space<vmem>>, %arg3: memref<1x896xf32, #tpu.memory_space<vmem>>, %arg4: memref<3x896x768xbf16, #tpu.memory_space<vmem>>, %arg5: memref<1x768xf32, #tpu.memory_space<vmem>>, %arg6: memref<192x768xf32, #tpu.memory_space<vmem>>, %arg7: memref<1x16x128xf32, #tpu.memory_space<vmem>>) attributes {dimension_semantics = [#tpu.dimension_semantics<parallel>], iteration_bounds = array<i64: 1>, scalar_prefetch = 0 : i64, scratch_operands = 0 : i64, tpu.core_type = #tpu.core_type<tc>, window_params = [{transform_indices = @transform_0, window_bounds = array<i64: 1, 224, 192>}, {pipeline_mode = #tpu.pipeline_mode<synchronous>, transform_indices = @transform_1, window_bounds = array<i64: 192, 896>}, {pipeline_mode = #tpu.pipeline_mode<synchronous>, transform_indices = @transform_2, window_bounds = array<i64: 1, 896>}, {pipeline_mode = #tpu.pipeline_mode<synchronous>, transform_indices = @transform_3, window_bounds = array<i64: 3, 896, 768>}, {pipeline_mode = #tpu.pipeline_mode<synchronous>, transform_indices = @transform_4, window_bounds = array<i64: 1, 768>}, {pipeline_mode = #tpu.pipeline_mode<synchronous>, transform_indices = @transform_5, window_bounds = array<i64: 192, 768>}, {transform_indices = @transform_6, window_bounds = array<i64: 1, 16, 128>}]} {
    %c0 = arith.constant 0 : index
    %c0_0 = arith.constant 0 : index
    %c0_1 = arith.constant 0 : index
    %0 = vector.load %arg1[%c0, %c0_0, %c0_1] : memref<1x224x192xbf16, #tpu.memory_space<vmem>>, vector<1x224x192xbf16>
    %1 = vector.shape_cast %0 : vector<1x224x192xbf16> to vector<224x192xbf16>
    %c0_2 = arith.constant 0 : index
    %c0_3 = arith.constant 0 : index
    %2 = vector.load %arg2[%c0_2, %c0_3] : memref<192x896xbf16, #tpu.memory_space<vmem>>, vector<192x896xbf16>
    %cst = arith.constant dense<0.000000e+00> : vector<224x896xf32>
    %3 = tpu.matmul %1, %2, %cst {dimension_numbers = #tpu.dot_dimension_numbers<[1], [0], [0], [1], [0, 0, 1, 1], [], []>} : vector<224x192xbf16>, vector<192x896xbf16>, vector<224x896xf32> -> vector<224x896xf32>
    %c0_4 = arith.constant 0 : index
    %c0_5 = arith.constant 0 : index
    %4 = vector.load %arg3[%c0_4, %c0_5] : memref<1x896xf32, #tpu.memory_space<vmem>>, vector<1x896xf32>
    %5 = vector.broadcast %4 : vector<1x896xf32> to vector<224x896xf32>
    %6 = arith.addf %3, %5 : vector<224x896xf32>
    %cst_6 = arith.constant 0.000000e+00 : f32
    %7 = vector.broadcast %cst_6 : f32 to vector<224x896xf32>
    %8 = arith.maximumf %6, %7 : vector<224x896xf32>
    %9 = arith.truncf %8 : vector<224x896xf32> to vector<224x896xbf16>
    %10 = vector.extract_strided_slice %9 {offsets = [0, 0], sizes = [192, 896], strides = [1, 1]} : vector<224x896xbf16> to vector<192x896xbf16>
    %c0_7 = arith.constant 0 : index
    %c0_8 = arith.constant 0 : index
    %c0_9 = arith.constant 0 : index
    %11 = vector.load %arg4[%c0_7, %c0_8, %c0_9] : memref<3x896x768xbf16, #tpu.memory_space<vmem>>, vector<1x896x768xbf16>
    %12 = vector.shape_cast %11 : vector<1x896x768xbf16> to vector<896x768xbf16>
    %cst_10 = arith.constant dense<0.000000e+00> : vector<192x768xf32>
    %13 = tpu.matmul %10, %12, %cst_10 {dimension_numbers = #tpu.dot_dimension_numbers<[1], [0], [0], [1], [0, 0, 1, 1], [], []>} : vector<192x896xbf16>, vector<896x768xbf16>, vector<192x768xf32> -> vector<192x768xf32>
    %14 = vector.extract_strided_slice %9 {offsets = [16, 0], sizes = [192, 896], strides = [1, 1]} : vector<224x896xbf16> to vector<192x896xbf16>
    %c1 = arith.constant 1 : index
    %c0_11 = arith.constant 0 : index
    %c0_12 = arith.constant 0 : index
    %15 = vector.load %arg4[%c1, %c0_11, %c0_12] : memref<3x896x768xbf16, #tpu.memory_space<vmem>>, vector<1x896x768xbf16>
    %16 = vector.shape_cast %15 : vector<1x896x768xbf16> to vector<896x768xbf16>
    %cst_13 = arith.constant dense<0.000000e+00> : vector<192x768xf32>
    %17 = tpu.matmul %14, %16, %cst_13 {dimension_numbers = #tpu.dot_dimension_numbers<[1], [0], [0], [1], [0, 0, 1, 1], [], []>} : vector<192x896xbf16>, vector<896x768xbf16>, vector<192x768xf32> -> vector<192x768xf32>
    %18 = arith.addf %13, %17 : vector<192x768xf32>
    %19 = vector.extract_strided_slice %9 {offsets = [32, 0], sizes = [192, 896], strides = [1, 1]} : vector<224x896xbf16> to vector<192x896xbf16>
    %c2 = arith.constant 2 : index
    %c0_14 = arith.constant 0 : index
    %c0_15 = arith.constant 0 : index
    %20 = vector.load %arg4[%c2, %c0_14, %c0_15] : memref<3x896x768xbf16, #tpu.memory_space<vmem>>, vector<1x896x768xbf16>
    %21 = vector.shape_cast %20 : vector<1x896x768xbf16> to vector<896x768xbf16>
    %cst_16 = arith.constant dense<0.000000e+00> : vector<192x768xf32>
    %22 = tpu.matmul %19, %21, %cst_16 {dimension_numbers = #tpu.dot_dimension_numbers<[1], [0], [0], [1], [0, 0, 1, 1], [], []>} : vector<192x896xbf16>, vector<896x768xbf16>, vector<192x768xf32> -> vector<192x768xf32>
    %23 = arith.addf %18, %22 : vector<192x768xf32>
    %c0_17 = arith.constant 0 : index
    %c0_18 = arith.constant 0 : index
    %24 = vector.load %arg5[%c0_17, %c0_18] : memref<1x768xf32, #tpu.memory_space<vmem>>, vector<1x768xf32>
    %25 = vector.broadcast %24 : vector<1x768xf32> to vector<192x768xf32>
    %26 = arith.addf %23, %25 : vector<192x768xf32>
    %cst_19 = arith.constant 0.000000e+00 : f32
    %27 = vector.broadcast %cst_19 : f32 to vector<192x768xf32>
    %28 = arith.maximumf %26, %27 : vector<192x768xf32>
    %c0_20 = arith.constant 0 : index
    %c0_21 = arith.constant 0 : index
    %29 = vector.load %arg6[%c0_20, %c0_21] : memref<192x768xf32, #tpu.memory_space<vmem>>, vector<192x768xf32>
    %30 = arith.mulf %28, %29 : vector<192x768xf32>
    %31 = vector.extract_strided_slice %30 {offsets = [0, 0], sizes = [16, 768], strides = [1, 1]} : vector<192x768xf32> to vector<16x768xf32>
    %32 = vector.extract_strided_slice %30 {offsets = [16, 0], sizes = [16, 768], strides = [1, 1]} : vector<192x768xf32> to vector<16x768xf32>
    %33 = arith.addf %31, %32 : vector<16x768xf32>
    %34 = vector.extract_strided_slice %30 {offsets = [32, 0], sizes = [16, 768], strides = [1, 1]} : vector<192x768xf32> to vector<16x768xf32>
    %35 = arith.addf %33, %34 : vector<16x768xf32>
    %36 = vector.extract_strided_slice %30 {offsets = [48, 0], sizes = [16, 768], strides = [1, 1]} : vector<192x768xf32> to vector<16x768xf32>
    %37 = arith.addf %35, %36 : vector<16x768xf32>
    %38 = vector.extract_strided_slice %30 {offsets = [64, 0], sizes = [16, 768], strides = [1, 1]} : vector<192x768xf32> to vector<16x768xf32>
    %39 = arith.addf %37, %38 : vector<16x768xf32>
    %40 = vector.extract_strided_slice %30 {offsets = [80, 0], sizes = [16, 768], strides = [1, 1]} : vector<192x768xf32> to vector<16x768xf32>
    %41 = arith.addf %39, %40 : vector<16x768xf32>
    %42 = vector.extract_strided_slice %30 {offsets = [96, 0], sizes = [16, 768], strides = [1, 1]} : vector<192x768xf32> to vector<16x768xf32>
    %43 = arith.addf %41, %42 : vector<16x768xf32>
    %44 = vector.extract_strided_slice %30 {offsets = [112, 0], sizes = [16, 768], strides = [1, 1]} : vector<192x768xf32> to vector<16x768xf32>
    %45 = arith.addf %43, %44 : vector<16x768xf32>
    %46 = vector.extract_strided_slice %30 {offsets = [128, 0], sizes = [16, 768], strides = [1, 1]} : vector<192x768xf32> to vector<16x768xf32>
    %47 = arith.addf %45, %46 : vector<16x768xf32>
    %48 = vector.extract_strided_slice %30 {offsets = [144, 0], sizes = [16, 768], strides = [1, 1]} : vector<192x768xf32> to vector<16x768xf32>
    %49 = arith.addf %47, %48 : vector<16x768xf32>
    %50 = vector.extract_strided_slice %30 {offsets = [160, 0], sizes = [16, 768], strides = [1, 1]} : vector<192x768xf32> to vector<16x768xf32>
    %51 = arith.addf %49, %50 : vector<16x768xf32>
    %52 = vector.extract_strided_slice %30 {offsets = [176, 0], sizes = [16, 768], strides = [1, 1]} : vector<192x768xf32> to vector<16x768xf32>
    %53 = arith.addf %51, %52 : vector<16x768xf32>
    %54 = vector.extract_strided_slice %53 {offsets = [0, 0], sizes = [16, 128], strides = [1, 1]} : vector<16x768xf32> to vector<16x128xf32>
    %55 = vector.extract_strided_slice %53 {offsets = [0, 128], sizes = [16, 128], strides = [1, 1]} : vector<16x768xf32> to vector<16x128xf32>
    %56 = arith.addf %54, %55 : vector<16x128xf32>
    %57 = vector.extract_strided_slice %53 {offsets = [0, 256], sizes = [16, 128], strides = [1, 1]} : vector<16x768xf32> to vector<16x128xf32>
    %58 = arith.addf %56, %57 : vector<16x128xf32>
    %59 = vector.extract_strided_slice %53 {offsets = [0, 384], sizes = [16, 128], strides = [1, 1]} : vector<16x768xf32> to vector<16x128xf32>
    %60 = arith.addf %58, %59 : vector<16x128xf32>
    %61 = vector.extract_strided_slice %53 {offsets = [0, 512], sizes = [16, 128], strides = [1, 1]} : vector<16x768xf32> to vector<16x128xf32>
    %62 = arith.addf %60, %61 : vector<16x128xf32>
    %63 = vector.extract_strided_slice %53 {offsets = [0, 640], sizes = [16, 128], strides = [1, 1]} : vector<16x768xf32> to vector<16x128xf32>
    %64 = arith.addf %62, %63 : vector<16x128xf32>
    %c0_22 = arith.constant 0 : index
    %c0_23 = arith.constant 0 : index
    %c0_24 = arith.constant 0 : index
    %65 = vector.load %arg7[%c0_22, %c0_23, %c0_24] : memref<1x16x128xf32, #tpu.memory_space<vmem>>, vector<1x16x128xf32>
    %66 = vector.shape_cast %65 : vector<1x16x128xf32> to vector<16x128xf32>
    %67 = vector.shape_cast %64 : vector<16x128xf32> to vector<1x16x128xf32>
    tpu.vector_store %arg7[%c0_22, %c0_23, %c0_24], %67 {strides = array<i32>} : memref<1x16x128xf32, #tpu.memory_space<vmem>>, vector<1x16x128xf32>,
    return
  }
  func.func @transform_0(%arg0: i32) -> (i32, i32, i32) {
    %c0_i32 = arith.constant 0 : i32
    %c0_i32_0 = arith.constant 0 : i32
    %c0_i32_1 = arith.constant 0 : i32
    return %arg0, %c0_i32, %c0_i32_0 : i32, i32, i32
  }
  func.func @transform_1(%arg0: i32) -> (i32, i32) {
    %c0_i32 = arith.constant 0 : i32
    %c0_i32_0 = arith.constant 0 : i32
    %c0_i32_1 = arith.constant 0 : i32
    return %c0_i32, %c0_i32_0 : i32, i32
  }
  func.func @transform_2(%arg0: i32) -> (i32, i32) {
    %c0_i32 = arith.constant 0 : i32
    %c0_i32_0 = arith.constant 0 : i32
    %c0_i32_1 = arith.constant 0 : i32
    return %c0_i32, %c0_i32_0 : i32, i32
  }
  func.func @transform_3(%arg0: i32) -> (i32, i32, i32) {
    %c0_i32 = arith.constant 0 : i32
    %c0_i32_0 = arith.constant 0 : i32
    %c0_i32_1 = arith.constant 0 : i32
    %c0_i32_2 = arith.constant 0 : i32
    return %c0_i32, %c0_i32_0, %c0_i32_1 : i32, i32, i32
  }
  func.func @transform_4(%arg0: i32) -> (i32, i32) {
    %c0_i32 = arith.constant 0 : i32
    %c0_i32_0 = arith.constant 0 : i32
    %c0_i32_1 = arith.constant 0 : i32
    return %c0_i32, %c0_i32_0 : i32, i32
  }
  func.func @transform_5(%arg0: i32) -> (i32, i32) {
    %c0_i32 = arith.constant 0 : i32
    %c0_i32_0 = arith.constant 0 : i32
    %c0_i32_1 = arith.constant 0 : i32
    return %c0_i32, %c0_i32_0 : i32, i32
  }
  func.func @transform_6(%arg0: i32) -> (i32, i32, i32) {
    %c0_i32 = arith.constant 0 : i32
    %c0_i32_0 = arith.constant 0 : i32
    %c0_i32_1 = arith.constant 0 : i32
    return %arg0, %c0_i32, %c0_i32_0 : i32, i32, i32
  }
}

</mosaic_0001>

<bundles_post_ra>
// kernel: discriminator_forward.1
= control target key start
LH: loop header
LB: loop body
LE: loop exit
PB: predicated region body
PF: predicated region fallthrough
CT: control target
= control target key end

     0   :  { %11 = vsyncpa [#allocation3], 0  ;;  %s21686_s0 = inlined_call_operand.vmem [shape: bf16[1,224,192], index: 0, kind: input, shape index: {}]   ;;  %s21687_s1 = inlined_call_operand.hbm [shape: bf16[192,896], index: 1, kind: input, shape index: {}]   ;;  %s21688_s2 = inlined_call_operand.hbm [shape: f32[1,896], index: 2, kind: input, shape index: {}]   ;;  %s21689_s3 = inlined_call_operand.hbm [shape: bf16[3,896,768], index: 3, kind: input, shape index: {}]   ;;  %s21690_s4 = inlined_call_operand.hbm [shape: f32[1,768], index: 4, kind: input, shape index: {}]   ;;  %s21691_s5 = inlined_call_operand.vmem [shape: f32[192,768], index: 5, kind: input, shape index: {}]   ;;  %s21692_s6 = inlined_call_operand.vmem [shape: f32[1,16,128], index: 6, kind: output, shape index: {}]  }
   0x1   :  { %12 = vsyncpa [#allocation5], 0 }
   0x2   :  { %13 = vsyncpa [#allocation8], 0  ;;  %s18911_s21 = smov [#allocation4]   ;;  %s18912_s23 = smov [#allocation2]  }
   0x3   :  { %s34_s22 = sshll.u32 %s18911_s21, 4  ;;  %s21_s24 = sshll.u32 %s18912_s23, 4  ;;  %s35_s22 = int_to_ptr.vmem [resolvable:$true] %s34_s22  ;;  %s18955_s24 = int_to_ptr.vmem [resolvable:$true] %s21_s24 }
   0x4   :  { %s18817_s27 = scalar_lea.hbm %s21688_s2, 112 }
   0x5   :  { %p18818_p0 = scmp.ne.s32.totalorder %s21688_s2, %s18817_s27  ;;  %p18821_p1 = scmp.lt.u32.totalorder %s18817_s27, %s21688_s2 }
   0x7   :  { %p18823_p2 = pnand %p18821_p1, %p18818_p0 }
   0x9   :  { %18826 = shalt.err (!%p18823_p2)
}
   0xa   :  { %s18827_s8 = scalar_lea.vmem %s35_s22, 112  ;;  %s18831_s9 = scalar_lea.vmem %s35_s22, 128 }
   0xb   :  { %p18828_p3 = scmp.ne.s32.totalorder %s35_s22, %s18827_s8  ;;  %p18832_p4 = scmp.lt.s32.totalorder %s35_s22, %s35_s22 }
   0xc   :  { %p18833_p5 = scmp.lt.s32.totalorder %s18831_s9, %s18827_s8 }
   0xe   :  { %p18834_p6 = por %p18833_p5, %p18832_p4 }
  0x10   :  { %p18835_p7 = pnand %p18834_p6, %p18828_p3 }
  0x12   :  { %18838 = shalt.err (!%p18835_p7)
}
  0x13   :  { %37 = dma.hbm_to_vmem [thread:$0]  %s21688_s2, 112, %s35_s22, [#allocation5]  }
  0x14   :  { %s18839_s14 = scalar_lea.hbm %s21687_s1, 10752 }
  0x15   :  { %p18840_p8 = scmp.ne.s32.totalorder %s21687_s1, %s18839_s14  ;;  %p18843_p9 = scmp.lt.u32.totalorder %s18839_s14, %s21687_s1 }
  0x17   :  { %p18845_p10 = pnand %p18843_p9, %p18840_p8 }
  0x19   :  { %18848 = shalt.err (!%p18845_p10)
}
  0x1a   :  { %s18849_s19 = scalar_lea.vmem %s18955_s24, 10752  ;;  %p18854_p12 = scmp.lt.s32.totalorder %s18955_s24, %s18955_s24 }
  0x1b   :  { %p18850_p11 = scmp.ne.s32.totalorder %s18955_s24, %s18849_s19  ;;  %p18855_p13 = scmp.lt.s32.totalorder %s18849_s19, %s18849_s19 }
  0x1d   :  { %p18856_p0 = por %p18855_p13, %p18854_p12 }
  0x1f   :  { %p18857_p1 = pnand %p18856_p0, %p18850_p11 }
  0x21   :  { %18860 = shalt.err (!%p18857_p1)
}
  0x22   :  { %s18913_s2 = smov 448   ;;  %s18914_s20 = smov 28  }
  0x23   :  { %27 = dma.hbm_to_vmem [thread:$0]  %s21687_s1, 10752, %s18955_s24, [#allocation3], %s18913_s2, %s18913_s2, %s18914_s20  }
  0x24   :  { %s18915_s23 = smov [#allocation6]   ;;  %s18861_s28 = scalar_lea.hbm %s21689_s3, 129024 }
  0x25   :  { %s43_s25 = sshll.u32 %s18915_s23, 4  ;;  %p18862_p2 = scmp.ne.s32.totalorder %s21689_s3, %s18861_s28  ;;  %s44_s25 = int_to_ptr.vmem [resolvable:$true] %s43_s25 }
  0x26   :  { %p18865_p3 = scmp.lt.u32.totalorder %s18861_s28, %s21689_s3 }
  0x28   :  { %p18867_p4 = pnand %p18865_p3, %p18862_p2 }
  0x2a   :  { %18870 = shalt.err (!%p18867_p4)
}
  0x2b   :  { %s18871_s9 = scalar_lea.vmem %s44_s25, 129024  ;;  %p18876_p6 = scmp.lt.s32.totalorder %s44_s25, %s44_s25 }
  0x2c   :  { %p18872_p5 = scmp.ne.s32.totalorder %s44_s25, %s18871_s9  ;;  %p18877_p7 = scmp.lt.s32.totalorder %s18871_s9, %s18871_s9 }
  0x2e   :  { %p18878_p8 = por %p18877_p7, %p18876_p6 }
  0x30   :  { %p18879_p9 = pnand %p18878_p8, %p18872_p5 }
  0x32   :  { %18882 = shalt.err (!%p18879_p9)
}
  0x33   :  { %s18916_s1 = smov 384   ;;  %s18917_s24 = smov 24  }
  0x34   :  { %49 = dma.hbm_to_vmem [thread:$0]  %s21689_s3, 129024, %s44_s25, [#allocation5], %s18916_s1, %s18916_s1, %s18917_s24  }
  0x35   :  { %s18918_s12 = smov [#allocation7]   ;;  %s18883_s16 = scalar_lea.hbm %s21690_s4, 96 }
  0x36   :  { %s56_s13 = sshll.u32 %s18918_s12, 4  ;;  %p18884_p10 = scmp.ne.s32.totalorder %s21690_s4, %s18883_s16  ;;  %s57_s13 = int_to_ptr.vmem [resolvable:$true] %s56_s13 }
  0x37   :  { %p18887_p11 = scmp.lt.u32.totalorder %s18883_s16, %s21690_s4 }
  0x39   :  { %p18889_p12 = pnand %p18887_p11, %p18884_p10 }
  0x3b   :  { %18892 = shalt.err (!%p18889_p12)
}
  0x3c   :  { %s18893_s20 = scalar_lea.vmem %s57_s13, 96  ;;  %p18898_p0 = scmp.lt.s32.totalorder %s57_s13, %s57_s13 }
  0x3d   :  { %p18894_p13 = scmp.ne.s32.totalorder %s57_s13, %s18893_s20  ;;  %p18899_p1 = scmp.lt.s32.totalorder %s18893_s20, %s18893_s20 }
  0x3f   :  { %p18900_p2 = por %p18899_p1, %p18898_p0 }
  0x41   :  { %p18901_p3 = pnand %p18900_p2, %p18894_p13 }
  0x43   :  { %18904 = shalt.err (!%p18901_p3)
}
  0x44   :  { %59 = dma.hbm_to_vmem [thread:$0]  %s21690_s4, 96, %s57_s13, [#allocation8]  }
  0x45   :  { %18905 = dma.done.wait [#allocation3], 10752  }
  0x46   :  { %18906 = vsyncadd [#allocation3], 4294956544 }
  0x47   :  { %18907 = dma.done.wait [#allocation5], 129136  }
  0x48   :  { %18908 = vsyncadd [#allocation5], 4294838160 }
  0x49   :  { %18909 = dma.done.wait [#allocation8], 96  }
  0x4a   :  { %18910 = vsyncadd [#allocation8], 4294967200  ;;  %v17057_v0 = vld [vmem:[#allocation2 + $0x4] ss:$28 sps:$4 sm:$0xff]   ;;  %v17060_v2 = vld [vmem:[#allocation2 + $0x3c] ss:$28 sps:$4 sm:$0xff]  }
  0x4b   :  { %v17059_v1 = vld [vmem:[#allocation2] ss:$28 sps:$4 sm:$0xff]   ;;  %837 = vmatprep.subr.bf16.mxu1 %v17057_v0  ;;  %v17062_v3 = vld [vmem:[#allocation2 + $0x38] ss:$28 sps:$4 sm:$0xff]   ;;  %v17065_v5 = vld [vmem:[#allocation2 + $0x70] ss:$28 sps:$4 sm:$0xff]  }
  0x4c   :  { %838 = vmatpush1.bf16.msra.mxu1 %v17059_v1  ;;  %v17063_v4 = vld [vmem:[#allocation2 + $0x74] ss:$28 sps:$4 sm:$0xff]   ;;  %v17066_v6 = vld [vmem:[#allocation2 + $0xac] ss:$28 sps:$4 sm:$0xff]   ;;  %v17069_v8 = vld [vmem:[#allocation2 + $0xe4] ss:$28 sps:$4 sm:$0xff]  }
  0x4d   :  { %839 = vmatprep.subr.bf16.mxu1 %v17060_v2  ;;  %v17068_v7 = vld [vmem:[#allocation2 + $0xa8] ss:$28 sps:$4 sm:$0xff]   ;;  %v17071_v9 = vld [vmem:[#allocation2 + $0xe0] ss:$28 sps:$4 sm:$0xff]   ;;  %vm794_vm0 = vcmask 523264  }
  0x4e   :  { %v17072_v10 = vld [vmem:[#allocation2 + $0x11c] ss:$28 sps:$4 sm:$0xff]   ;;  %v19013_v11 = vld [vmem:[%s21686_s0 + $0x4] ss:$8 sps:$4 sm:$0xff]   ;;  %v17075_v13 = vld [vmem:[#allocation2 + $0x154] ss:$28 sps:$4 sm:$0xff]  }
  0x4f   :  { %14368 = vmatprep.mubr.msk.bf16.mxu1 %vm794_vm0, %v19013_v11  ;;  %v17074_v12 = vld [vmem:[#allocation2 + $0x118] ss:$28 sps:$4 sm:$0xff]   ;;  %v17077_v14 = vld [vmem:[#allocation2 + $0x150] ss:$28 sps:$4 sm:$0xff]   ;;  %v17080_v16 = vld [vmem:[#allocation2 + $0x188] ss:$28 sps:$4 sm:$0xff]  }
  0x50   :  { %840 = vmatpush1.bf16.msra.mxu1 %v17062_v3  ;;  %v17078_v15 = vld [vmem:[#allocation2 + $0x18c] ss:$28 sps:$4 sm:$0xff]   ;;  %v17081_v17 = vld [vmem:[#allocation2 + $0x1c4] ss:$28 sps:$4 sm:$0xff]   ;;  %v17084_v19 = vld [vmem:[#allocation2 + $0x1fc] ss:$28 sps:$4 sm:$0xff]  }
  0x51   :  { %841 = vmatprep.subr.bf16.mxu1 %v17063_v4  ;;  %v17083_v18 = vld [vmem:[#allocation2 + $0x1c0] ss:$28 sps:$4 sm:$0xff]   ;;  %v17086_v20 = vld [vmem:[#allocation2 + $0x1f8] ss:$28 sps:$4 sm:$0xff]   ;;  %v17089_v22 = vld [vmem:[#allocation2 + $0x230] ss:$28 sps:$4 sm:$0xff]  }
  0x52   :  { %v17087_v21 = vld [vmem:[#allocation2 + $0x234] ss:$28 sps:$4 sm:$0xff]   ;;  %v17090_v23 = vld [vmem:[#allocation2 + $0x26c] ss:$28 sps:$4 sm:$0xff]   ;;  %v17104_v29 = vld [vmem:[#allocation2 + $0x44] ss:$28 sps:$4 sm:$0xff]  }
  0x53   :  { %v17092_v24 = vld [vmem:[#allocation2 + $0x268] ss:$28 sps:$4 sm:$0xff]   ;;  %v19025_v28 = vld [vmem:[%s21686_s0 + $0x14] ss:$8 sps:$4 sm:$0xff]   ;;  %v19033_v31 = vld [vmem:[%s21686_s0 + $0x10] ss:$8 sps:$4 sm:$0xff]  }
  0x54   :  { %842 = vmatpush1.bf16.msra.mxu1 %v17065_v5  ;;  %v17098_v25 = vld [vmem:[#allocation2 + $0xc] ss:$28 sps:$4 sm:$0xff]   ;;  %v17102_v30 = vld [vmem:[#allocation2 + $0x40] ss:$28 sps:$4 sm:$0xff]   ;;  %v17108_v34 = vld [vmem:[#allocation2 + $0x78] ss:$28 sps:$4 sm:$0xff]  }
  0x55   :  { %843 = vmatprep.subr.bf16.mxu1 %v17066_v6  ;;  %v19020_v26 = vld [vmem:[%s21686_s0] ss:$8 sps:$4 sm:$0xff]   ;;  %v17110_v32 = vld [vmem:[#allocation2 + $0x7c] ss:$28 sps:$4 sm:$0xff]   ;;  %v19038_v33 = vld [vmem:[%s21686_s0 + $0x24] ss:$8 sps:$4 sm:$0xff]  }
  0x56   :  { %v17096_v27 = vld [vmem:[#allocation2 + $0x8] ss:$28 sps:$4 sm:$0xff]   ;;  %v17116_v35 = vld [vmem:[#allocation2 + $0xb4] ss:$28 sps:$4 sm:$0xff]   ;;  %v17128_v42 = vld [vmem:[#allocation2 + $0x120] ss:$28 sps:$4 sm:$0xff]  }
  0x57   :  { %v17114_v36 = vld [vmem:[#allocation2 + $0xb0] ss:$28 sps:$4 sm:$0xff]   ;;  %v19046_v38 = vld [vmem:[%s21686_s0 + $0x20] ss:$8 sps:$4 sm:$0xff]   ;;  %v19051_v39 = vld [vmem:[%s21686_s0 + $0x34] ss:$8 sps:$4 sm:$0xff]  }
  0x58   :  { %844 = vmatpush1.bf16.msra.mxu1 %v17068_v7  ;;  %v17122_v37 = vld [vmem:[#allocation2 + $0xec] ss:$28 sps:$4 sm:$0xff]   ;;  %v17130_v41 = vld [vmem:[#allocation2 + $0x124] ss:$28 sps:$4 sm:$0xff]   ;;  %v17137_v43 = vld [vmem:[#allocation2 + $0x15c] ss:$28 sps:$4 sm:$0xff]  }
  0x59   :  { %845 = vmatprep.subr.bf16.mxu1 %v17069_v8  ;;  %v17120_v40 = vld [vmem:[#allocation2 + $0xe8] ss:$28 sps:$4 sm:$0xff]   ;;  %v19059_v44 = vld [vmem:[%s21686_s0 + $0x30] ss:$8 sps:$4 sm:$0xff]   ;;  %v19077_v51 = vld [vmem:[%s21686_s0 + $0x54] ss:$8 sps:$4 sm:$0xff]  }
  0x5a   :  { %v19064_v45 = vld [vmem:[%s21686_s0 + $0x44] ss:$8 sps:$4 sm:$0xff]   ;;  %v17135_v46 = vld [vmem:[#allocation2 + $0x158] ss:$28 sps:$4 sm:$0xff]   ;;  %v19072_v50 = vld [vmem:[%s21686_s0 + $0x40] ss:$8 sps:$4 sm:$0xff]  }
  0x5b   :  { %v17143_v47 = vld [vmem:[#allocation2 + $0x194] ss:$28 sps:$4 sm:$0xff]   ;;  %v17149_v49 = vld [vmem:[#allocation2 + $0x1cc] ss:$28 sps:$4 sm:$0xff]   ;;  %v17155_v53 = vld [vmem:[#allocation2 + $0x204] ss:$28 sps:$4 sm:$0xff]  }
  0x5c   :  { %846 = vmatpush1.bf16.msra.mxu1 %v17071_v9  ;;  %v17141_v48 = vld [vmem:[#allocation2 + $0x190] ss:$28 sps:$4 sm:$0xff]   ;;  %v17147_v52 = vld [vmem:[#allocation2 + $0x1c8] ss:$28 sps:$4 sm:$0xff]   ;;  %v17153_v54 = vld [vmem:[#allocation2 + $0x200] ss:$28 sps:$4 sm:$0xff]  }
  0x5d   :  { %847 = vmatprep.subr.bf16.mxu1 %v17072_v10  ;;  %v17161_v55 = vld [vmem:[#allocation2 + $0x23c] ss:$28 sps:$4 sm:$0xff]   ;;  %v19090_v57 = vld [vmem:[%s21686_s0 + $0x64] ss:$8 sps:$4 sm:$0xff]   ;;  %v17169_v59 = vld [vmem:[#allocation2 + $0x274] ss:$28 sps:$4 sm:$0xff]  }
  0x5e   :  { %v19085_v56 = vld [vmem:[%s21686_s0 + $0x50] ss:$8 sps:$4 sm:$0xff]   ;;  %v19098_v62 = vld [vmem:[%s21686_s0 + $0x60] ss:$8 sps:$4 sm:$0xff]   ;;  %v19103_v63 = vld [vmem:[%s21686_s0 + $0x74] ss:$8 sps:$4 sm:$0xff]  }
  0x5f   :  { %v17159_v58 = vld [vmem:[#allocation2 + $0x238] ss:$28 sps:$4 sm:$0xff]   ;;  %v17167_v60 = vld [vmem:[#allocation2 + $0x270] ss:$28 sps:$4 sm:$0xff]   ;;  %v19124_v2 = vld [vmem:[%s21686_s0 + $0x80] ss:$8 sps:$4 sm:$0xff]  }
  0x60   :  { %848 = vmatpush1.bf16.msra.mxu1 %v17074_v12  ;;  %v17173_v61 = vld [vmem:[#allocation2 + $0x14] ss:$28 sps:$4 sm:$0xff]   ;;  %v19116_v1 = vld [vmem:[%s21686_s0 + $0x84] ss:$8 sps:$4 sm:$0xff]   ;;  %v19150_v6 = vld [vmem:[%s21686_s0 + $0xa0] ss:$8 sps:$4 sm:$0xff]  }
  0x61   :  { %849 = vmatprep.subr.bf16.mxu1 %v17075_v13  ;;  %v19111_v0 = vld [vmem:[%s21686_s0 + $0x70] ss:$8 sps:$4 sm:$0xff]   ;;  %v19129_v3 = vld [vmem:[%s21686_s0 + $0x94] ss:$8 sps:$4 sm:$0xff]   ;;  %v19142_v5 = vld [vmem:[%s21686_s0 + $0xa4] ss:$8 sps:$4 sm:$0xff]  }
  0x62   :  { %v19137_v4 = vld [vmem:[%s21686_s0 + $0x90] ss:$8 sps:$4 sm:$0xff]   ;;  %v19155_v7 = vld [vmem:[%s21686_s0 + $0xb4] ss:$8 sps:$4 sm:$0xff]   ;;  %v19168_v9 = vld [vmem:[%s21686_s0 + $0xc4] ss:$8 sps:$4 sm:$0xff]  }
  0x63   :  { %v19163_v8 = vld [vmem:[%s21686_s0 + $0xb0] ss:$8 sps:$4 sm:$0xff]   ;;  %v19176_v10 = vld [vmem:[%s21686_s0 + $0xc0] ss:$8 sps:$4 sm:$0xff]   ;;  %v19181_v12 = vld [vmem:[%s21686_s0 + $0xd4] ss:$8 sps:$4 sm:$0xff]  }
  0x64   :  { %850 = vmatpush1.bf16.msra.mxu1 %v17077_v14  ;;  %v19189_v13 = vld [vmem:[%s21686_s0 + $0xd0] ss:$8 sps:$4 sm:$0xff]   ;;  %v21697_v14 = vmov 0  }
  0x65   :  { %851 = vmatprep.subr.bf16.mxu1 %v17078_v15  ;;  %4639 = vmatprep.mubr.bf16.mxu0 %v21697_v14  ;;  %v17171_v15 = vld [vmem:[#allocation2 + $0x10] ss:$28 sps:$4 sm:$0xff]  }
  0x68   :  { %852 = vmatpush1.bf16.msra.mxu1 %v17080_v16  ;;  %v17176_v16 = vld [vmem:[#allocation2 + $0x4c] ss:$28 sps:$4 sm:$0xff]  }
  0x69   :  { %853 = vmatprep.subr.bf16.mxu1 %v17081_v17  ;;  %v17174_v17 = vld [vmem:[#allocation2 + $0x48] ss:$28 sps:$4 sm:$0xff]  }
  0x6c   :  { %854 = vmatpush1.bf16.msra.mxu1 %v17083_v18  ;;  %v17179_v18 = vld [vmem:[#allocation2 + $0x84] ss:$28 sps:$4 sm:$0xff]  }
  0x6d   :  { %855 = vmatprep.subr.bf16.mxu1 %v17084_v19  ;;  %v17177_v19 = vld [vmem:[#allocation2 + $0x80] ss:$28 sps:$4 sm:$0xff]  }
  0x70   :  { %856 = vmatpush1.bf16.msra.mxu1 %v17086_v20  ;;  %v17182_v20 = vld [vmem:[#allocation2 + $0xbc] ss:$28 sps:$4 sm:$0xff]  }
  0x71   :  { %857 = vmatprep.subr.bf16.mxu1 %v17087_v21  ;;  %v17180_v21 = vld [vmem:[#allocation2 + $0xb8] ss:$28 sps:$4 sm:$0xff]  }
  0x74   :  { %858 = vmatpush1.bf16.msra.mxu1 %v17089_v22  ;;  %v17185_v22 = vld [vmem:[#allocation2 + $0xf4] ss:$28 sps:$4 sm:$0xff]  }
  0x75   :  { %859 = vmatprep.subr.bf16.mxu1 %v17090_v23  ;;  %v17188_v23 = vld [vmem:[#allocation2 + $0x12c] ss:$28 sps:$4 sm:$0xff]  }
  0x78   :  { %860 = vmatpush1.bf16.msra.mxu1 %v17092_v24  ;;  %v17186_v24 = vld [vmem:[#allocation2 + $0x128] ss:$28 sps:$4 sm:$0xff]  }
  0x79   :  { %1010 = vmatprep.subr.bf16.mxu1 %v17098_v25  ;;  %v17191_v25 = vld [vmem:[#allocation2 + $0x164] ss:$28 sps:$4 sm:$0xff]  }
  0x7b   :  { %870 = vmatmul.mubr.bf16.vlgmr.msra.gmra.mrb[0].mxu1 %v19020_v26 }
  0x7c   :  { %1011 = vmatpush1.bf16.msra.mxu1 %v17096_v27  ;;  %14369 = vmatprep.mubr.msk.bf16.mxu1 %vm794_vm0, %v19025_v28  ;;  %v17194_v27 = vld [vmem:[#allocation2 + $0x19c] ss:$28 sps:$4 sm:$0xff]  }
  0x7d   :  { %1012 = vmatprep.subr.bf16.mxu1 %v17104_v29  ;;  %v17197_v29 = vld [vmem:[#allocation2 + $0x1d4] ss:$28 sps:$4 sm:$0xff]  }
  0x80   :  { %1013 = vmatpush1.bf16.msra.mxu1 %v17102_v30  ;;  %v17195_v30 = vld [vmem:[#allocation2 + $0x1d0] ss:$28 sps:$4 sm:$0xff]  }
  0x81   :  { %1014 = vmatprep.subr.bf16.mxu1 %v17110_v32  ;;  %v17198_v32 = vld [vmem:[#allocation2 + $0x208] ss:$28 sps:$4 sm:$0xff]  }
  0x83   :  { %880 = vmatmul.mubr.bf16.gmra.mrb[4].mxu1 %v19033_v31 }
  0x84   :  { %14370 = vmatprep.mubr.msk.bf16.mxu1 %vm794_vm0, %v19038_v33  ;;  %1015 = vmatpush1.bf16.msra.mxu1 %v17108_v34  ;;  %v17201_v34 = vld [vmem:[#allocation2 + $0x240] ss:$28 sps:$4 sm:$0xff]  }
  0x85   :  { %1016 = vmatprep.subr.bf16.mxu1 %v17116_v35  ;;  %v17206_v35 = vld [vmem:[#allocation2 + $0x27c] ss:$28 sps:$4 sm:$0xff]  }
  0x88   :  { %1017 = vmatpush1.bf16.msra.mxu1 %v17114_v36  ;;  %v17204_v36 = vld [vmem:[#allocation2 + $0x278] ss:$28 sps:$4 sm:$0xff]  }
  0x89   :  { %1018 = vmatprep.subr.bf16.mxu1 %v17122_v37  ;;  %v201_v37 = vlaneseq }
  0x8b   :  { %890 = vmatmul.mubr.bf16.gmra.mrb[8].mxu1 %v19046_v38 }
  0x8c   :  { %14371 = vmatprep.mubr.msk.bf16.mxu1 %vm794_vm0, %v19051_v39  ;;  %1019 = vmatpush1.bf16.msra.mxu1 %v17120_v40 }
  0x8d   :  { %1020 = vmatprep.subr.bf16.mxu1 %v17130_v41 }
  0x90   :  { %1021 = vmatpush1.bf16.msra.mxu1 %v17128_v42 }
  0x91   :  { %1022 = vmatprep.subr.bf16.mxu1 %v17137_v43 }
  0x93   :  { %900 = vmatmul.mubr.bf16.gmra.mrb[12].mxu1 %v19059_v44 }
  0x94   :  { %14372 = vmatprep.mubr.msk.bf16.mxu1 %vm794_vm0, %v19064_v45  ;;  %1023 = vmatpush1.bf16.msra.mxu1 %v17135_v46 }
  0x95   :  { %1024 = vmatprep.subr.bf16.mxu1 %v17143_v47 }
  0x98   :  { %1025 = vmatpush1.bf16.msra.mxu1 %v17141_v48 }
  0x99   :  { %1026 = vmatprep.subr.bf16.mxu1 %v17149_v49 }
  0x9b   :  { %910 = vmatmul.mubr.bf16.gmra.mrb[16].mxu1 %v19072_v50 }
  0x9c   :  { %14373 = vmatprep.mubr.msk.bf16.mxu1 %vm794_vm0, %v19077_v51  ;;  %1027 = vmatpush1.bf16.msra.mxu1 %v17147_v52 }
  0x9d   :  { %1028 = vmatprep.subr.bf16.mxu1 %v17155_v53 }
  0xa0   :  { %1029 = vmatpush1.bf16.msra.mxu1 %v17153_v54  ;;  %v18731_v54 = vld [vmem:[%s21686_s0 + $0x4] ss:$8 sps:$4 sm:$0xff]  }
  0xa1   :  { %1030 = vmatprep.subr.bf16.mxu1 %v17161_v55 }
  0xa3   :  { %920 = vmatmul.mubr.bf16.gmra.mrb[20].mxu1 %v19085_v56 }
  0xa4   :  { %14374 = vmatprep.mubr.msk.bf16.mxu1 %vm794_vm0, %v19090_v57  ;;  %1031 = vmatpush1.bf16.msra.mxu1 %v17159_v58 }
  0xa5   :  { %1032 = vmatprep.subr.bf16.mxu1 %v17169_v59  ;;  %v17207_v59 = vld [vmem:[#allocation2 + $0x18] ss:$28 sps:$4 sm:$0xff]  }
  0xa8   :  { %1033 = vmatpush1.bf16.msra.mxu1 %v17167_v60 }
  0xa9   :  { %1183 = vmatprep.subr.bf16.mxu1 %v17173_v61 }
  0xab   :  { %930 = vmatmul.mubr.bf16.gmra.mrb[24].mxu1 %v19098_v62 }
  0xac   :  { %14375 = vmatprep.mubr.msk.bf16.mxu1 %vm794_vm0, %v19103_v63 }
  0xb3   :  { %940 = vmatmul.mubr.bf16.gmra.mrb[28].mxu1 %v19111_v0 }
  0xb4   :  { %14376 = vmatprep.mubr.msk.bf16.mxu1 %vm794_vm0, %v19116_v1 }
  0xbb   :  { %950 = vmatmul.mubr.bf16.gmra.mrb[32].mxu1 %v19124_v2 }
  0xbc   :  { %14377 = vmatprep.mubr.msk.bf16.mxu1 %vm794_vm0, %v19129_v3 }
  0xc3   :  { %960 = vmatmul.mubr.bf16.gmra.mrb[36].mxu1 %v19137_v4 }
  0xc4   :  { %14378 = vmatprep.mubr.msk.bf16.mxu1 %vm794_vm0, %v19142_v5 }
  0xcb   :  { %970 = vmatmul.mubr.bf16.gmra.mrb[40].mxu1 %v19150_v6 }
  0xcc   :  { %14379 = vmatprep.mubr.msk.bf16.mxu1 %vm794_vm0, %v19155_v7 }
  0xd3   :  { %980 = vmatmul.mubr.bf16.gmra.mrb[44].mxu1 %v19163_v8 }
  0xd4   :  { %14380 = vmatprep.mubr.msk.bf16.mxu1 %vm794_vm0, %v19168_v9 }
  0xdb   :  { %990 = vmatmul.mubr.bf16.gmra.mrb[48].mxu1 %v19176_v10 }
  0xdc   :  { %14381 = vmatprep.mubr.msk.bf16.mxu1 %vm794_vm0, %v19181_v12 }
  0xe3   :  { %1000 = vmatmul.mubr.bf16.gmra.mrb[52].mxu1 %v19189_v13 }
  0xe4   :  { %14382 = vmatprep.mubr.msk.bf16.mxu1 %vm794_vm0, %v19013_v11  ;;  %v17183_v11 = vld [vmem:[#allocation2 + $0xf0] ss:$28 sps:$4 sm:$0xff]  }
  0xeb   :  { %1043 = vmatmul.mubr.bf16.vlgmr.msra.gmra.mrb[56].mxu1 %v19020_v26  ;;  %v17189_v26 = vld [vmem:[#allocation2 + $0x160] ss:$28 sps:$4 sm:$0xff]  }
  0xec   :  { %1184 = vmatpush1.bf16.msra.mxu1 %v17171_v15  ;;  %14383 = vmatprep.mubr.msk.bf16.mxu1 %vm794_vm0, %v19025_v28  ;;  %v17192_v28 = vld [vmem:[#allocation2 + $0x198] ss:$28 sps:$4 sm:$0xff]  }
  0xed   :  { %1185 = vmatprep.subr.bf16.mxu1 %v17176_v16  ;;  %v17209_v16 = vld [vmem:[#allocation2 + $0x88] ss:$28 sps:$4 sm:$0xff]  }
  0xf0   :  { %1186 = vmatpush1.bf16.msra.mxu1 %v17174_v17 }
  0xf1   :  { %1187 = vmatprep.subr.bf16.mxu1 %v17179_v18 }
  0xf3   :  { %1053 = vmatmul.mubr.bf16.gmra.mrb[60].mxu1 %v19033_v31  ;;  %v17200_v31 = vld [vmem:[#allocation2 + $0x20c] ss:$28 sps:$4 sm:$0xff]  }
  0xf4   :  { %14384 = vmatprep.mubr.msk.bf16.mxu1 %vm794_vm0, %v19038_v33  ;;  %1188 = vmatpush1.bf16.msra.mxu1 %v17177_v19  ;;  %v17203_v33 = vld [vmem:[#allocation2 + $0x244] ss:$28 sps:$4 sm:$0xff]  }
  0xf5   :  { %1189 = vmatprep.subr.bf16.mxu1 %v17182_v20 }
  0xf8   :  { %1190 = vmatpush1.bf16.msra.mxu1 %v17180_v21 }
  0xf9   :  { %1191 = vmatprep.subr.bf16.mxu1 %v17185_v22 }
  0xfb   :  { %1063 = vmatmul.mubr.bf16.gmra.mrb[64].mxu1 %v19046_v38  ;;  %v19230_v38 = vshrl.u32 %v201_v37, 7 }
  0xfc   :  { %14385 = vmatprep.mubr.msk.bf16.mxu1 %vm794_vm0, %v19051_v39  ;;  %1192 = vmatpush1.bf16.msra.mxu1 %v17183_v11  ;;  %v199_v39 = vld [vmem:[#allocation4] sm:$0xff] }
  0xfd   :  { %1193 = vmatprep.subr.bf16.mxu1 %v17188_v23  ;;  %21970 = vst [vmem:[#allocation12_spill] sm:$0xff] %v19230_v38  ;;  %v21694_v40 = vsub.s32 0, %v19230_v38  ;;  %v21693_v41 = vsub.s32 1, %v19230_v38  ;;  %v17210_v23 = vld [vmem:[#allocation2 + $0xc0] ss:$28 sps:$4 sm:$0xff]  }
  0xff   :  { %v19239_v42 = vrot.slane %v199_v39, %v21694_v40  ;;  %v19245_v43 = vrot.slane %v199_v39, %v21693_v41 }
 0x100   :  { %1194 = vmatpush1.bf16.msra.mxu1 %v17186_v24 }
 0x101   :  { %1195 = vmatprep.subr.bf16.mxu1 %v17191_v25 }
 0x103   :  { %1073 = vmatmul.mubr.bf16.gmra.mrb[68].mxu1 %v19059_v44 }
 0x104   :  { %14386 = vmatprep.mubr.msk.bf16.mxu1 %vm794_vm0, %v19064_v45  ;;  %1196 = vmatpush1.bf16.msra.mxu1 %v17189_v26  ;;  %v18734_v26 = vld [vmem:[%s21686_s0 + $0x10] ss:$8 sps:$4 sm:$0xff]  }
 0x105   :  { %1197 = vmatprep.subr.bf16.mxu1 %v17194_v27 }
 0x108   :  { %1198 = vmatpush1.bf16.msra.mxu1 %v17192_v28 }
 0x109   :  { %1199 = vmatprep.subr.bf16.mxu1 %v17197_v29  ;;  %v18735_v29 = vld [vmem:[%s21686_s0 + $0x24] ss:$8 sps:$4 sm:$0xff]  }
 0x10b   :  { %1083 = vmatmul.mubr.bf16.gmra.mrb[72].mxu1 %v19072_v50 }
 0x10c   :  { %14387 = vmatprep.mubr.msk.bf16.mxu1 %vm794_vm0, %v19077_v51  ;;  %1200 = vmatpush1.bf16.msra.mxu1 %v17195_v30 }
 0x10d   :  { %1201 = vmatprep.subr.bf16.mxu1 %v17200_v31 }
 0x110   :  { %1202 = vmatpush1.bf16.msra.mxu1 %v17198_v32 }
 0x111   :  { %1203 = vmatprep.subr.bf16.mxu1 %v17203_v33  ;;  %v17211_v33 = vld [vmem:[#allocation2 + $0xf8] ss:$28 sps:$4 sm:$0xff]  }
 0x113   :  { %1093 = vmatmul.mubr.bf16.gmra.mrb[76].mxu1 %v19085_v56 }
 0x114   :  { %14388 = vmatprep.mubr.msk.bf16.mxu1 %vm794_vm0, %v19090_v57  ;;  %1204 = vmatpush1.bf16.msra.mxu1 %v17201_v34 }
 0x115   :  { %1205 = vmatprep.subr.bf16.mxu1 %v17206_v35 }
 0x118   :  { %1206 = vmatpush1.bf16.msra.mxu1 %v17204_v36 }
 0x119   :  { %1356 = vmatprep.subr.bf16.mxu1 %v21697_v14 }
 0x11b   :  { %1103 = vmatmul.mubr.bf16.gmra.mrb[80].mxu1 %v19098_v62 }
 0x11c   :  { %14389 = vmatprep.mubr.msk.bf16.mxu1 %vm794_vm0, %v19103_v63 }
 0x123   :  { %1113 = vmatmul.mubr.bf16.gmra.mrb[84].mxu1 %v19111_v0 }
 0x124   :  { %14390 = vmatprep.mubr.msk.bf16.mxu1 %vm794_vm0, %v19116_v1 }
 0x12b   :  { %1123 = vmatmul.mubr.bf16.gmra.mrb[88].mxu1 %v19124_v2 }
 0x12c   :  { %14391 = vmatprep.mubr.msk.bf16.mxu1 %vm794_vm0, %v19129_v3 }
 0x133   :  { %1133 = vmatmul.mubr.bf16.gmra.mrb[92].mxu1 %v19137_v4  ;;  %v17208_v4 = vld [vmem:[#allocation2 + $0x50] ss:$28 sps:$4 sm:$0xff]  }
 0x134   :  { %14392 = vmatprep.mubr.msk.bf16.mxu1 %vm794_vm0, %v19142_v5 }
 0x13b   :  { %1143 = vmatmul.mubr.bf16.gmra.mrb[96].mxu1 %v19150_v6 }
 0x13c   :  { %14393 = vmatprep.mubr.msk.bf16.mxu1 %vm794_vm0, %v19155_v7  ;;  %v18732_v7 = vld [vmem:[%s21686_s0] ss:$8 sps:$4 sm:$0xff]  }
 0x143   :  { %1153 = vmatmul.mubr.bf16.gmra.mrb[100].mxu1 %v19163_v8 }
 0x144   :  { %14394 = vmatprep.mubr.msk.bf16.mxu1 %vm794_vm0, %v19168_v9 }
 0x14b   :  { %1163 = vmatmul.mubr.bf16.gmra.mrb[104].mxu1 %v19176_v10  ;;  %v18733_v10 = vld [vmem:[%s21686_s0 + $0x14] ss:$8 sps:$4 sm:$0xff]  }
 0x14c   :  { %14395 = vmatprep.mubr.msk.bf16.mxu1 %vm794_vm0, %v19181_v12 }
 0x14e   :  { %v871_v44 = vpop.f32.mrb[0].mxu1 }
 0x14f   :  { %v872_v45 = vadd.f32 %v871_v44, %v19239_v42  ;;  %v873_v46 = vpop.f32.mrb[1].mxu1 }
 0x150   :  { %v875_v47 = vpop.f32.mrb[2].mxu1  ;;  %v874_v48 = vadd.f32 %v873_v46, %v19245_v43  ;;  %v17212_v46 = vld [vmem:[#allocation2 + $0x130] ss:$28 sps:$4 sm:$0xff]  }
 0x151   :  { %v876_v49 = vadd.f32 %v875_v47, %v19239_v42  ;;  %v877_v50 = vpop.f32.mrb[3].mxu1  ;;  %v1501_v52 = vmax.f32 %v872_v45, 0.0 }
 0x152   :  { %v878_v51 = vadd.f32 %v877_v50, %v19245_v43  ;;  %v1502_v55 = vmax.f32 %v874_v48, 0.0 }
 0x153   :  { %v1508_v53 = vmax.f32 %v876_v49, 0.0  ;;  %1173 = vmatmul.mubr.bf16.gmra.mrb[108].mxu1 %v19189_v13  ;;  %v18736_v49 = vld [vmem:[%s21686_s0 + $0x20] ss:$8 sps:$4 sm:$0xff]  }
 0x154   :  { %14396 = vmatprep.mubr.msk.bf16.mxu1 %vm794_vm0, %v18731_v54  ;;  %v1509_v56 = vmax.f32 %v878_v51, 0.0 }
 0x155   :  { %v19256_v57 = vpack.c.bf16 %v1508_v53, %v1501_v52  ;;  %v18737_v52 = vld [vmem:[%s21686_s0 + $0x34] ss:$8 sps:$4 sm:$0xff]  }
 0x156   :  { %v881_v58 = vpop.f32.mrb[4].mxu1  ;;  %v19258_v60 = vpack.c.bf16 %v1509_v56, %v1502_v55  ;;  %v17213_v56 = vld [vmem:[#allocation2 + $0x168] ss:$28 sps:$4 sm:$0xff]  }
 0x157   :  { %21971 = vst [vmem:[#allocation13_spill] sm:$0xff] %v19256_v57  ;;  %v882_v61 = vadd.f32 %v881_v58, %v19239_v42  ;;  %v883_v62 = vpop.f32.mrb[5].mxu1 }
 0x158   :  { %21972 = vst [vmem:[#allocation14_spill] sm:$0xff] %v19258_v60  ;;  %v884_v63 = vadd.f32 %v883_v62, %v19245_v43  ;;  %v885_v0 = vpop.f32.mrb[6].mxu1 }
 0x159   :  { %v886_v1 = vadd.f32 %v885_v0, %v19239_v42  ;;  %v887_v2 = vpop.f32.mrb[7].mxu1  ;;  %v1515_v5 = vmax.f32 %v882_v61, 0.0 }
 0x15a   :  { %v888_v3 = vadd.f32 %v887_v2, %v19245_v43  ;;  %v1516_v8 = vmax.f32 %v884_v63, 0.0 }
 0x15b   :  { %v1522_v6 = vmax.f32 %v886_v1, 0.0  ;;  %1216 = vmatmul.mubr.bf16.vlgmr.msra.gmra.mrb[112].mxu1 %v18732_v7  ;;  %v17214_v1 = vld [vmem:[#allocation2 + $0x1a0] ss:$28 sps:$4 sm:$0xff]  }
 0x15c   :  { %v1523_v9 = vmax.f32 %v888_v3, 0.0  ;;  %1357 = vmatpush1.bf16.msra.mxu1 %v17207_v59  ;;  %14397 = vmatprep.mubr.msk.bf16.mxu1 %vm794_vm0, %v18733_v10  ;;  %v18738_v3 = vld [vmem:[%s21686_s0 + $0x30] ss:$8 sps:$4 sm:$0xff]  }
 0x15d   :  { %v19271_v12 = vpack.c.bf16 %v1522_v6, %v1515_v5  ;;  %1358 = vmatprep.subr.bf16.mxu1 %v21697_v14  ;;  %v18739_v6 = vld [vmem:[%s21686_s0 + $0x44] ss:$8 sps:$4 sm:$0xff]  }
 0x15e   :  { %v19274_v13 = vpack.c.bf16 %v1523_v9, %v1516_v8  ;;  %v891_v15 = vpop.f32.mrb[8].mxu1 }
 0x15f   :  { %21973 = vst [vmem:[#allocation15_spill] sm:$0xff] %v19271_v12  ;;  %v892_v17 = vadd.f32 %v891_v15, %v19239_v42  ;;  %v893_v18 = vpop.f32.mrb[9].mxu1  ;;  %v17215_v15 = vld [vmem:[#allocation2 + $0x1d8] ss:$28 sps:$4 sm:$0xff]  }
 0x160   :  { %21974 = vst [vmem:[#allocation16_spill] sm:$0xff] %v19274_v13  ;;  %v894_v19 = vadd.f32 %v893_v18, %v19245_v43  ;;  %v895_v20 = vpop.f32.mrb[10].mxu1  ;;  %1359 = vmatpush1.bf16.msra.mxu1 %v17208_v4 }
 0x161   :  { %v896_v21 = vadd.f32 %v895_v20, %v19239_v42  ;;  %v897_v22 = vpop.f32.mrb[11].mxu1  ;;  %1360 = vmatprep.subr.bf16.mxu1 %v21697_v14  ;;  %v1529_v24 = vmax.f32 %v892_v17, 0.0 }
 0x162   :  { %v898_v11 = vadd.f32 %v897_v22, %v19245_v43  ;;  %v1530_v27 = vmax.f32 %v894_v19, 0.0 }
 0x163   :  { %v1536_v25 = vmax.f32 %v896_v21, 0.0  ;;  %1226 = vmatmul.mubr.bf16.gmra.mrb[116].mxu1 %v18734_v26 }
 0x164   :  { %v1537_v28 = vmax.f32 %v898_v11, 0.0  ;;  %14398 = vmatprep.mubr.msk.bf16.mxu1 %vm794_vm0, %v18735_v29  ;;  %1361 = vmatpush1.bf16.msra.mxu1 %v17209_v16  ;;  %v17216_v11 = vld [vmem:[#allocation2 + $0x210] ss:$28 sps:$4 sm:$0xff]  }
 0x165   :  { %v19288_v30 = vpack.c.bf16 %v1536_v25, %v1529_v24  ;;  %1362 = vmatprep.subr.bf16.mxu1 %v21697_v14  ;;  %v18740_v24 = vld [vmem:[%s21686_s0 + $0x40] ss:$8 sps:$4 sm:$0xff]  }
 0x166   :  { %v19291_v31 = vpack.c.bf16 %v1537_v28, %v1530_v27  ;;  %v901_v32 = vpop.f32.mrb[12].mxu1  ;;  %v18741_v27 = vld [vmem:[%s21686_s0 + $0x54] ss:$8 sps:$4 sm:$0xff]  }
 0x167   :  { %21975 = vst [vmem:[#allocation17_spill] sm:$0xff] %v19288_v30  ;;  %v902_v34 = vadd.f32 %v901_v32, %v19239_v42  ;;  %v903_v35 = vpop.f32.mrb[13].mxu1 }
 0x168   :  { %21976 = vst [vmem:[#allocation18_spill] sm:$0xff] %v19291_v31  ;;  %v904_v36 = vadd.f32 %v903_v35, %v19245_v43  ;;  %v905_v37 = vpop.f32.mrb[14].mxu1  ;;  %1363 = vmatpush1.bf16.msra.mxu1 %v17210_v23 }
 0x169   :  { %v906_v39 = vadd.f32 %v905_v37, %v19239_v42  ;;  %v907_v44 = vpop.f32.mrb[15].mxu1  ;;  %1364 = vmatprep.subr.bf16.mxu1 %v21697_v14  ;;  %v1543_v47 = vmax.f32 %v902_v34, 0.0  ;;  %v17217_v34 = vld [vmem:[#allocation2 + $0x248] ss:$28 sps:$4 sm:$0xff]  }
 0x16a   :  { %v908_v45 = vadd.f32 %v907_v44, %v19245_v43  ;;  %v1544_v50 = vmax.f32 %v904_v36, 0.0 }
 0x16b   :  { %v1550_v48 = vmax.f32 %v906_v39, 0.0  ;;  %1236 = vmatmul.mubr.bf16.gmra.mrb[120].mxu1 %v18736_v49  ;;  %v18742_v49 = vld [vmem:[%s21686_s0 + $0x50] ss:$8 sps:$4 sm:$0xff]  }
 0x16c   :  { %v1551_v51 = vmax.f32 %v908_v45, 0.0  ;;  %14399 = vmatprep.mubr.msk.bf16.mxu1 %vm794_vm0, %v18737_v52  ;;  %1365 = vmatpush1.bf16.msra.mxu1 %v17211_v33  ;;  %v18743_v52 = vld [vmem:[%s21686_s0 + $0x64] ss:$8 sps:$4 sm:$0xff]  }
 0x16d   :  { %v19305_v53 = vpack.c.bf16 %v1550_v48, %v1543_v47  ;;  %1366 = vmatprep.subr.bf16.mxu1 %v21697_v14  ;;  %v17218_v47 = vld [vmem:[#allocation2 + $0x280] ss:$28 sps:$4 sm:$0xff]  }
 0x16e   :  { %v19308_v54 = vpack.c.bf16 %v1551_v51, %v1544_v50  ;;  %v911_v55 = vpop.f32.mrb[16].mxu1 }
 0x16f   :  { %21977 = vst [vmem:[#allocation19_spill] sm:$0xff] %v19305_v53  ;;  %v913_v58 = vpop.f32.mrb[17].mxu1  ;;  %v912_v59 = vadd.f32 %v911_v55, %v19239_v42 }
 0x170   :  { %21978 = vst [vmem:[#allocation20_spill] sm:$0xff] %v19308_v54  ;;  %v915_v61 = vpop.f32.mrb[18].mxu1  ;;  %1367 = vmatpush1.bf16.msra.mxu1 %v17212_v46  ;;  %v914_v62 = vadd.f32 %v913_v58, %v19245_v43  ;;  %v17221_v58 = vld [vmem:[#allocation6 + $0xa84] ss:$24 sps:$4 sm:$0xff]  }
 0x171   :  { %v917_v63 = vpop.f32.mrb[19].mxu1  ;;  %1368 = vmatprep.subr.bf16.mxu1 %v21697_v14  ;;  %v916_v0 = vadd.f32 %v915_v61, %v19239_v42  ;;  %v1557_v4 = vmax.f32 %v912_v59, 0.0 }
 0x172   :  { %v918_v2 = vadd.f32 %v917_v63, %v19245_v43  ;;  %v1558_v7 = vmax.f32 %v914_v62, 0.0 }
 0x173   :  { %1246 = vmatmul.mubr.bf16.gmra.mrb[124].mxu1 %v18738_v3  ;;  %v1564_v5 = vmax.f32 %v916_v0, 0.0 }
 0x174   :  { %14400 = vmatprep.mubr.msk.bf16.mxu1 %vm794_vm0, %v18739_v6  ;;  %1369 = vmatpush1.bf16.msra.mxu1 %v17213_v56  ;;  %v1565_v8 = vmax.f32 %v918_v2, 0.0  ;;  %v18744_v6 = vld [vmem:[%s21686_s0 + $0x60] ss:$8 sps:$4 sm:$0xff]  }
 0x175   :  { %1370 = vmatprep.subr.bf16.mxu1 %v21697_v14  ;;  %v19323_v9 = vpack.c.bf16 %v1564_v5, %v1557_v4 }
 0x176   :  { %v921_v10 = vpop.f32.mrb[20].mxu1  ;;  %v19325_v16 = vpack.c.bf16 %v1565_v8, %v1558_v7 }
 0x177   :  { %21979 = vst [vmem:[#allocation21_spill] sm:$0xff] %v19323_v9  ;;  %v923_v17 = vpop.f32.mrb[21].mxu1  ;;  %v922_v18 = vadd.f32 %v921_v10, %v19239_v42  ;;  %v18745_v10 = vld [vmem:[%s21686_s0 + $0x74] ss:$8 sps:$4 sm:$0xff]  }
 0x178   :  { %21980 = vst [vmem:[#allocation22_spill] sm:$0xff] %v19325_v16  ;;  %v925_v19 = vpop.f32.mrb[22].mxu1  ;;  %1371 = vmatpush1.bf16.msra.mxu1 %v17214_v1  ;;  %v924_v20 = vadd.f32 %v923_v17, %v19245_v43 }
 0x179   :  { %v927_v21 = vpop.f32.mrb[23].mxu1  ;;  %1372 = vmatprep.subr.bf16.mxu1 %v21697_v14  ;;  %v926_v22 = vadd.f32 %v925_v19, %v19239_v42  ;;  %v1571_v25 = vmax.f32 %v922_v18, 0.0 }
 0x17a   :  { %v928_v23 = vadd.f32 %v927_v21, %v19245_v43  ;;  %v1572_v28 = vmax.f32 %v924_v20, 0.0 }
 0x17b   :  { %1256 = vmatmul.mubr.bf16.gmra.mrb[128].mxu1 %v18740_v24  ;;  %v1578_v26 = vmax.f32 %v926_v22, 0.0 }
 0x17c   :  { %14401 = vmatprep.mubr.msk.bf16.mxu1 %vm794_vm0, %v18741_v27  ;;  %1373 = vmatpush1.bf16.msra.mxu1 %v17215_v15  ;;  %v1579_v29 = vmax.f32 %v928_v23, 0.0  ;;  %v18746_v27 = vld [vmem:[%s21686_s0 + $0x70] ss:$8 sps:$4 sm:$0xff]  }
 0x17d   :  { %1374 = vmatprep.subr.bf16.mxu1 %v21697_v14  ;;  %v19340_v32 = vpack.c.bf16 %v1578_v26, %v1571_v25 }
 0x17e   :  { %v931_v33 = vpop.f32.mrb[24].mxu1  ;;  %v19342_v35 = vpack.c.bf16 %v1579_v29, %v1572_v28 }
 0x17f   :  { %21981 = vst [vmem:[#allocation23_spill] sm:$0xff] %v19340_v32  ;;  %v933_v36 = vpop.f32.mrb[25].mxu1  ;;  %v932_v37 = vadd.f32 %v931_v33, %v19239_v42  ;;  %v18747_v33 = vld [vmem:[%s21686_s0 + $0x84] ss:$8 sps:$4 sm:$0xff]  }
 0x180   :  { %21982 = vst [vmem:[#allocation24_spill] sm:$0xff] %v19342_v35  ;;  %v935_v39 = vpop.f32.mrb[26].mxu1  ;;  %1375 = vmatpush1.bf16.msra.mxu1 %v17216_v11  ;;  %v934_v44 = vadd.f32 %v933_v36, %v19245_v43 }
 0x181   :  { %v937_v45 = vpop.f32.mrb[27].mxu1  ;;  %1376 = vmatprep.subr.bf16.mxu1 %v21697_v14  ;;  %v936_v46 = vadd.f32 %v935_v39, %v19239_v42  ;;  %v1585_v50 = vmax.f32 %v932_v37, 0.0 }
 0x182   :  { %v938_v48 = vadd.f32 %v937_v45, %v19245_v43  ;;  %v1586_v55 = vmax.f32 %v934_v44, 0.0 }
 0x183   :  { %1266 = vmatmul.mubr.bf16.gmra.mrb[132].mxu1 %v18742_v49  ;;  %v1592_v51 = vmax.f32 %v936_v46, 0.0 }
 0x184   :  { %14402 = vmatprep.mubr.msk.bf16.mxu1 %vm794_vm0, %v18743_v52  ;;  %1377 = vmatpush1.bf16.msra.mxu1 %v17217_v34  ;;  %v1593_v56 = vmax.f32 %v938_v48, 0.0  ;;  %v18748_v52 = vld [vmem:[%s21686_s0 + $0x80] ss:$8 sps:$4 sm:$0xff]  }
 0x185   :  { %1378 = vmatprep.subr.bf16.mxu1 %v21697_v14  ;;  %v19357_v59 = vpack.c.bf16 %v1592_v51, %v1585_v50 }
 0x186   :  { %v941_v61 = vpop.f32.mrb[28].mxu1  ;;  %v19359_v62 = vpack.c.bf16 %v1593_v56, %v1586_v55 }
 0x187   :  { %21983 = vst [vmem:[#allocation25_spill] sm:$0xff] %v19357_v59  ;;  %v943_v63 = vpop.f32.mrb[29].mxu1  ;;  %v942_v0 = vadd.f32 %v941_v61, %v19239_v42 }
 0x188   :  { %21984 = vst [vmem:[#allocation26_spill] sm:$0xff] %v19359_v62  ;;  %v945_v1 = vpop.f32.mrb[30].mxu1  ;;  %1379 = vmatpush1.bf16.msra.mxu1 %v17218_v47  ;;  %v944_v2 = vadd.f32 %v943_v63, %v19245_v43 }
 0x189   :  { %v947_v3 = vpop.f32.mrb[31].mxu1  ;;  %4148 = vmatprep.subr.bf16.mxu1 %v17221_v58  ;;  %v946_v4 = vadd.f32 %v945_v1, %v19239_v42  ;;  %v1599_v7 = vmax.f32 %v942_v0, 0.0  ;;  %v18749_v58 = vld [vmem:[%s21686_s0 + $0x94] ss:$8 sps:$4 sm:$0xff]  }
 0x18a   :  { %v948_v5 = vadd.f32 %v947_v3, %v19245_v43  ;;  %v1600_v15 = vmax.f32 %v944_v2, 0.0 }
 0x18b   :  { %1276 = vmatmul.mubr.bf16.gmra.mrb[136].mxu1 %v18744_v6  ;;  %v1606_v8 = vmax.f32 %v946_v4, 0.0 }
 0x18c   :  { %14403 = vmatprep.mubr.msk.bf16.mxu1 %vm794_vm0, %v18745_v10  ;;  %v1607_v17 = vmax.f32 %v948_v5, 0.0 }
 0x18d   :  { %v19372_v18 = vpack.c.bf16 %v1606_v8, %v1599_v7 }
 0x18e   :  { %v951_v19 = vpop.f32.mrb[32].mxu1  ;;  %v19374_v20 = vpack.c.bf16 %v1607_v17, %v1600_v15  ;;  %v18750_v15 = vld [vmem:[%s21686_s0 + $0x90] ss:$8 sps:$4 sm:$0xff]  }
 0x18f   :  { %21985 = vst [vmem:[#allocation27_spill] sm:$0xff] %v19372_v18  ;;  %v953_v21 = vpop.f32.mrb[33].mxu1  ;;  %v952_v22 = vadd.f32 %v951_v19, %v19239_v42 }
 0x190   :  { %21986 = vst [vmem:[#allocation28_spill] sm:$0xff] %v19374_v20  ;;  %v955_v11 = vpop.f32.mrb[34].mxu1  ;;  %v954_v23 = vadd.f32 %v953_v21, %v19245_v43  ;;  %v18751_v21 = vld [vmem:[%s21686_s0 + $0xa4] ss:$8 sps:$4 sm:$0xff]  }
 0x191   :  { %v957_v24 = vpop.f32.mrb[35].mxu1  ;;  %v956_v25 = vadd.f32 %v955_v11, %v19239_v42  ;;  %v1613_v28 = vmax.f32 %v952_v22, 0.0 }
 0x192   :  { %v958_v26 = vadd.f32 %v957_v24, %v19245_v43  ;;  %v1614_v34 = vmax.f32 %v954_v23, 0.0 }
 0x193   :  { %1286 = vmatmul.mubr.bf16.gmra.mrb[140].mxu1 %v18746_v27  ;;  %v1620_v29 = vmax.f32 %v956_v25, 0.0 }
 0x194   :  { %14404 = vmatprep.mubr.msk.bf16.mxu1 %vm794_vm0, %v18747_v33  ;;  %v1621_v36 = vmax.f32 %v958_v26, 0.0 }
 0x195   :  { %v19387_v37 = vpack.c.bf16 %v1620_v29, %v1613_v28 }
 0x196   :  { %v961_v39 = vpop.f32.mrb[36].mxu1  ;;  %v19389_v44 = vpack.c.bf16 %v1621_v36, %v1614_v34 }
 0x197   :  { %21987 = vst [vmem:[#allocation29_spill] sm:$0xff] %v19387_v37  ;;  %v963_v45 = vpop.f32.mrb[37].mxu1  ;;  %v962_v46 = vadd.f32 %v961_v39, %v19239_v42  ;;  %v18752_v39 = vld [vmem:[%s21686_s0 + $0xa0] ss:$8 sps:$4 sm:$0xff]  }
 0x198   :  { %21988 = vst [vmem:[#allocation30_spill] sm:$0xff] %v19389_v44  ;;  %v965_v47 = vpop.f32.mrb[38].mxu1  ;;  %v964_v48 = vadd.f32 %v963_v45, %v19245_v43 }
 0x199   :  { %v967_v49 = vpop.f32.mrb[39].mxu1  ;;  %v966_v50 = vadd.f32 %v965_v47, %v19239_v42  ;;  %v1627_v55 = vmax.f32 %v962_v46, 0.0  ;;  %v18753_v47 = vld [vmem:[%s21686_s0 + $0xb4] ss:$8 sps:$4 sm:$0xff]  }
 0x19a   :  { %v968_v51 = vadd.f32 %v967_v49, %v19245_v43  ;;  %v1628_v61 = vmax.f32 %v964_v48, 0.0 }
 0x19b   :  { %1296 = vmatmul.mubr.bf16.gmra.mrb[144].mxu1 %v18748_v52  ;;  %v1634_v56 = vmax.f32 %v966_v50, 0.0 }
 0x19c   :  { %14405 = vmatprep.mubr.msk.bf16.mxu1 %vm794_vm0, %v18749_v58  ;;  %v1635_v63 = vmax.f32 %v968_v51, 0.0 }
 0x19d   :  { %v19402_v0 = vpack.c.bf16 %v1634_v56, %v1627_v55 }
 0x19e   :  { %v971_v1 = vpop.f32.mrb[40].mxu1  ;;  %v19404_v2 = vpack.c.bf16 %v1635_v63, %v1628_v61 }
 0x19f   :  { %21989 = vst [vmem:[#allocation31_spill] sm:$0xff] %v19402_v0  ;;  %v973_v3 = vpop.f32.mrb[41].mxu1  ;;  %v972_v4 = vadd.f32 %v971_v1, %v19239_v42 }
 0x1a0   :  { %21990 = vst [vmem:[#allocation32_spill] sm:$0xff] %v19404_v2  ;;  %v975_v5 = vpop.f32.mrb[42].mxu1  ;;  %v974_v6 = vadd.f32 %v973_v3, %v19245_v43 }
 0x1a1   :  { %v977_v7 = vpop.f32.mrb[43].mxu1  ;;  %v976_v8 = vadd.f32 %v975_v5, %v19239_v42  ;;  %v1641_v17 = vmax.f32 %v972_v4, 0.0  ;;  %v19443_v4 = vld [vmem:[%s21686_s0 + $0xb0] ss:$8 sps:$4 sm:$0xff]  }
 0x1a2   :  { %v978_v10 = vadd.f32 %v977_v7, %v19245_v43  ;;  %v1642_v22 = vmax.f32 %v974_v6, 0.0  ;;  %v19449_v7 = vld [vmem:[%s21686_s0 + $0xc4] ss:$8 sps:$4 sm:$0xff]  }
 0x1a3   :  { %1306 = vmatmul.mubr.bf16.gmra.mrb[148].mxu1 %v18750_v15  ;;  %v1648_v19 = vmax.f32 %v976_v8, 0.0 }
 0x1a4   :  { %14406 = vmatprep.mubr.msk.bf16.mxu1 %vm794_vm0, %v18751_v21  ;;  %v1649_v11 = vmax.f32 %v978_v10, 0.0 }
 0x1a5   :  { %v19417_v23 = vpack.c.bf16 %v1648_v19, %v1641_v17 }
 0x1a6   :  { %v981_v24 = vpop.f32.mrb[44].mxu1  ;;  %v19419_v25 = vpack.c.bf16 %v1649_v11, %v1642_v22  ;;  %v21696_v22 = vsub.s32 2, %v19230_v38 }
 0x1a7   :  { %21991 = vst [vmem:[#allocation33_spill] sm:$0xff] %v19417_v23  ;;  %v983_v26 = vpop.f32.mrb[45].mxu1  ;;  %v982_v27 = vadd.f32 %v981_v24, %v19239_v42 }
 0x1a8   :  { %21992 = vst [vmem:[#allocation34_spill] sm:$0xff] %v19419_v25  ;;  %v985_v28 = vpop.f32.mrb[46].mxu1  ;;  %v984_v29 = vadd.f32 %v983_v26, %v19245_v43  ;;  %v21695_v26 = vsub.s32 3, %v19230_v38 }
 0x1a9   :  { %v987_v33 = vpop.f32.mrb[47].mxu1  ;;  %v986_v34 = vadd.f32 %v985_v28, %v19239_v42  ;;  %v1655_v45 = vmax.f32 %v982_v27, 0.0 }
 0x1aa   :  { %v988_v36 = vadd.f32 %v987_v33, %v19245_v43  ;;  %v1656_v48 = vmax.f32 %v984_v29, 0.0 }
 0x1ab   :  { %1316 = vmatmul.mubr.bf16.gmra.mrb[152].mxu1 %v18752_v39  ;;  %v1662_v46 = vmax.f32 %v986_v34, 0.0  ;;  %v19466_v34 = vld [vmem:[%s21686_s0 + $0xc0] ss:$8 sps:$4 sm:$0xff]  }
 0x1ac   :  { %14407 = vmatprep.mubr.msk.bf16.mxu1 %vm794_vm0, %v18753_v47  ;;  %v1663_v49 = vmax.f32 %v988_v36, 0.0  ;;  %v19469_v36 = vld [vmem:[#allocation4] sm:$0xff] }
 0x1ad   :  { %v19432_v50 = vpack.c.bf16 %v1662_v46, %v1655_v45  ;;  %v19474_v39 = vrot.slane %v19469_v36, %v21696_v22 }
 0x1ae   :  { %v991_v51 = vpop.f32.mrb[48].mxu1  ;;  %v19434_v52 = vpack.c.bf16 %v1663_v49, %v1656_v48 }
 0x1af   :  { %21993 = vst [vmem:[#allocation35_spill] sm:$0xff] %v19432_v50  ;;  %v993_v55 = vpop.f32.mrb[49].mxu1  ;;  %v992_v56 = vadd.f32 %v991_v51, %v19239_v42 }
 0x1b0   :  { %21994 = vst [vmem:[#allocation36_spill] sm:$0xff] %v19434_v52  ;;  %v995_v58 = vpop.f32.mrb[50].mxu1  ;;  %v994_v61 = vadd.f32 %v993_v55, %v19245_v43 }
 0x1b1   :  { %v997_v63 = vpop.f32.mrb[51].mxu1  ;;  %v996_v1 = vadd.f32 %v995_v58, %v19239_v42  ;;  %v1669_v5 = vmax.f32 %v992_v56, 0.0 }
 0x1b2   :  { %v998_v3 = vadd.f32 %v997_v63, %v19245_v43  ;;  %v1670_v8 = vmax.f32 %v994_v61, 0.0 }
 0x1b3   :  { %1326 = vmatmul.mubr.bf16.gmra.mrb[156].mxu1 %v19443_v4  ;;  %v1676_v6 = vmax.f32 %v996_v1, 0.0 }
 0x1b4   :  { %14408 = vmatprep.mubr.msk.bf16.mxu1 %vm794_vm0, %v19449_v7  ;;  %v1677_v10 = vmax.f32 %v998_v3, 0.0 }
 0x1b5   :  { %v19453_v15 = vpack.c.bf16 %v1676_v6, %v1669_v5  ;;  %v19499_v6 = vld [vmem:[%s21686_s0 + $0xd0] ss:$8 sps:$4 sm:$0xff]  }
 0x1b6   :  { %v1001_v17 = vpop.f32.mrb[52].mxu1  ;;  %v19455_v19 = vpack.c.bf16 %v1677_v10, %v1670_v8 }
 0x1b7   :  { %21995 = vst [vmem:[#allocation37_spill] sm:$0xff] %v19453_v15  ;;  %v1003_v21 = vpop.f32.mrb[53].mxu1  ;;  %v1002_v11 = vadd.f32 %v1001_v17, %v19239_v42  ;;  %v18760_v17 = vld [vmem:[%s21686_s0 + $0x4] ss:$8 sps:$4 sm:$0xff]  }
 0x1b8   :  { %21996 = vst [vmem:[#allocation38_spill] sm:$0xff] %v19455_v19  ;;  %v1005_v24 = vpop.f32.mrb[54].mxu1  ;;  %v1004_v27 = vadd.f32 %v1003_v21, %v19245_v43 }
 0x1b9   :  { %v1007_v28 = vpop.f32.mrb[55].mxu1  ;;  %v1006_v29 = vadd.f32 %v1005_v24, %v19239_v42  ;;  %v1683_v45 = vmax.f32 %v1002_v11, 0.0  ;;  %v19479_v42 = vld [vmem:[%s21686_s0 + $0xd4] ss:$8 sps:$4 sm:$0xff]  }
 0x1ba   :  { %v1008_v33 = vadd.f32 %v1007_v28, %v19245_v43  ;;  %v19486_v43 = vrot.slane %v19469_v36, %v21695_v26  ;;  %v1684_v47 = vmax.f32 %v1004_v27, 0.0  ;;  %v17219_v28 = vld [vmem:[#allocation6 + $0xa80] ss:$24 sps:$4 sm:$0xff]  }
 0x1bb   :  { %1336 = vmatmul.mubr.bf16.gmra.mrb[160].mxu1 %v19466_v34  ;;  %v1690_v46 = vmax.f32 %v1006_v29, 0.0 }
 0x1bc   :  { %14409 = vmatprep.mubr.msk.bf16.mxu1 %vm794_vm0, %v19479_v42  ;;  %v1691_v48 = vmax.f32 %v1008_v33, 0.0 }
 0x1bd   :  { %v19488_v49 = vpack.c.bf16 %v1690_v46, %v1683_v45  ;;  %v17224_v45 = vld [vmem:[#allocation6 + $0xab4] ss:$24 sps:$4 sm:$0xff]  }
 0x1be   :  { %v1044_v51 = vpop.f32.mrb[56].mxu1  ;;  %v19490_v55 = vpack.c.bf16 %v1691_v48, %v1684_v47 }
 0x1bf   :  { %21997 = vst [vmem:[#allocation39_spill] sm:$0xff] %v19488_v49  ;;  %v1046_v56 = vpop.f32.mrb[57].mxu1  ;;  %v1045_v58 = vadd.f32 %v1044_v51, %v19474_v39 }
 0x1c0   :  { %21998 = vst [vmem:[#allocation40_spill] sm:$0xff] %v19490_v55  ;;  %v1048_v61 = vpop.f32.mrb[58].mxu1  ;;  %v1047_v63 = vadd.f32 %v1046_v56, %v19486_v43 }
 0x1c1   :  { %v1050_v1 = vpop.f32.mrb[59].mxu1  ;;  %v1049_v3 = vadd.f32 %v1048_v61, %v19474_v39  ;;  %v1503_v8 = vmax.f32 %v1045_v58, 0.0  ;;  %v17222_v58 = vld [vmem:[#allocation6 + $0xab0] ss:$24 sps:$4 sm:$0xff]  }
 0x1c2   :  { %v1051_v5 = vadd.f32 %v1050_v1, %v19486_v43  ;;  %v1504_v21 = vmax.f32 %v1047_v63, 0.0  ;;  %v18761_v63 = vld [vmem:[%s21686_s0] ss:$8 sps:$4 sm:$0xff]   ;;  %v17227_v1 = vld [vmem:[#allocation6 + $0xae4] ss:$24 sps:$4 sm:$0xff]  }
 0x1c3   :  { %1346 = vmatmul.mubr.bf16.gmra.mrb[164].mxu1 %v19499_v6  ;;  %v1510_v10 = vmax.f32 %v1049_v3, 0.0 }
 0x1c4   :  { %14410 = vmatprep.mubr.msk.bf16.mxu1 %vm794_vm0, %v18760_v17  ;;  %v1511_v11 = vmax.f32 %v1051_v5, 0.0 }
 0x1c5   :  { %v19506_v24 = vpack.c.bf16 %v1510_v10, %v1503_v8  ;;  %v18762_v8 = vld [vmem:[%s21686_s0 + $0x14] ss:$8 sps:$4 sm:$0xff]  }
 0x1c6   :  { %v1054_v27 = vpop.f32.mrb[60].mxu1  ;;  %v19508_v29 = vpack.c.bf16 %v1511_v11, %v1504_v21 }
 0x1c7   :  { %21999 = vst [vmem:[#allocation41_spill] sm:$0xff] %v19506_v24  ;;  %v1056_v33 = vpop.f32.mrb[61].mxu1  ;;  %v1055_v46 = vadd.f32 %v1054_v27, %v19474_v39  ;;  %v17225_v27 = vld [vmem:[#allocation6 + $0xae0] ss:$24 sps:$4 sm:$0xff]  }
 0x1c8   :  { %22000 = vst [vmem:[#allocation42_spill] sm:$0xff] %v19508_v29  ;;  %v1058_v47 = vpop.f32.mrb[62].mxu1  ;;  %v1057_v48 = vadd.f32 %v1056_v33, %v19486_v43 }
 0x1c9   :  { %v1060_v51 = vpop.f32.mrb[63].mxu1  ;;  %v1059_v56 = vadd.f32 %v1058_v47, %v19474_v39  ;;  %v1517_v3 = vmax.f32 %v1055_v46, 0.0 }
 0x1ca   :  { %v1061_v61 = vadd.f32 %v1060_v51, %v19486_v43  ;;  %v1518_v10 = vmax.f32 %v1057_v48, 0.0  ;;  %v17230_v51 = vld [vmem:[#allocation6 + $0xb14] ss:$24 sps:$4 sm:$0xff]   ;;  %v17228_v48 = vld [vmem:[#allocation6 + $0xb10] ss:$24 sps:$4 sm:$0xff]  }
 0x1cb   :  { %1389 = vmatmul.mubr.bf16.vlgmr.msra.gmra.mrb[168].mxu1 %v18761_v63  ;;  %v1524_v5 = vmax.f32 %v1059_v56, 0.0 }
 0x1cc   :  { %14411 = vmatprep.mubr.msk.bf16.mxu1 %vm794_vm0, %v18762_v8  ;;  %4149 = vmatpush1.bf16.msra.mxu1 %v17219_v28  ;;  %v1525_v17 = vmax.f32 %v1061_v61, 0.0 }
 0x1cd   :  { %4150 = vmatprep.subr.bf16.mxu1 %v17224_v45  ;;  %v19521_v21 = vpack.c.bf16 %v1524_v5, %v1517_v3  ;;  %v18763_v5 = vld [vmem:[%s21686_s0 + $0x10] ss:$8 sps:$4 sm:$0xff]  }
 0x1ce   :  { %v1064_v11 = vpop.f32.mrb[64].mxu1  ;;  %v19523_v33 = vpack.c.bf16 %v1525_v17, %v1518_v10  ;;  %v17233_v10 = vld [vmem:[#allocation6 + $0xb44] ss:$24 sps:$4 sm:$0xff]  }
 0x1cf   :  { %22001 = vst [vmem:[#allocation43_spill] sm:$0xff] %v19521_v21  ;;  %v1065_v47 = vadd.f32 %v1064_v11, %v19474_v39  ;;  %v1066_v46 = vpop.f32.mrb[65].mxu1 }
 0x1d0   :  { %22002 = vst [vmem:[#allocation44_spill] sm:$0xff] %v19523_v33  ;;  %v1067_v56 = vadd.f32 %v1066_v46, %v19486_v43  ;;  %v1068_v63 = vpop.f32.mrb[66].mxu1  ;;  %4151 = vmatpush1.bf16.msra.mxu1 %v17222_v58  ;;  %v18764_v58 = vld [vmem:[%s21686_s0 + $0x24] ss:$8 sps:$4 sm:$0xff]  }
 0x1d1   :  { %v1069_v8 = vadd.f32 %v1068_v63, %v19474_v39  ;;  %v1070_v28 = vpop.f32.mrb[67].mxu1  ;;  %4152 = vmatprep.subr.bf16.mxu1 %v17227_v1  ;;  %v1531_v61 = vmax.f32 %v1065_v47, 0.0  ;;  %v17231_v63 = vld [vmem:[#allocation6 + $0xb40] ss:$24 sps:$4 sm:$0xff]  }
 0x1d2   :  { %v1071_v45 = vadd.f32 %v1070_v28, %v19486_v43  ;;  %v1532_v17 = vmax.f32 %v1067_v56, 0.0 }
 0x1d3   :  { %v1538_v3 = vmax.f32 %v1069_v8, 0.0  ;;  %1397 = vmatmul.mubr.bf16.gmra.mrb[172].mxu1 %v18763_v5 }
 0x1d4   :  { %v1539_v11 = vmax.f32 %v1071_v45, 0.0  ;;  %14412 = vmatprep.mubr.msk.bf16.mxu1 %vm794_vm0, %v18764_v58  ;;  %4153 = vmatpush1.bf16.msra.mxu1 %v17225_v27  ;;  %v17236_v58 = vld [vmem:[#allocation6 + $0xb74] ss:$24 sps:$4 sm:$0xff]  }
 0x1d5   :  { %v19536_v1 = vpack.c.bf16 %v1538_v3, %v1531_v61  ;;  %4154 = vmatprep.subr.bf16.mxu1 %v17230_v51  ;;  %v17234_v61 = vld [vmem:[#allocation6 + $0xb70] ss:$24 sps:$4 sm:$0xff]  }
 0x1d6   :  { %v19538_v47 = vpack.c.bf16 %v1539_v11, %v1532_v17  ;;  %v1074_v46 = vpop.f32.mrb[68].mxu1  ;;  %v18765_v17 = vld [vmem:[%s21686_s0 + $0x20] ss:$8 sps:$4 sm:$0xff]  }
 0x1d7   :  { %22003 = vst [vmem:[#allocation45_spill] sm:$0xff] %v19536_v1  ;;  %v1075_v8 = vadd.f32 %v1074_v46, %v19474_v39  ;;  %v1076_v28 = vpop.f32.mrb[69].mxu1 }
 0x1d8   :  { %22004 = vst [vmem:[#allocation46_spill] sm:$0xff] %v19538_v47  ;;  %v1077_v56 = vadd.f32 %v1076_v28, %v19486_v43  ;;  %v1078_v45 = vpop.f32.mrb[70].mxu1  ;;  %4155 = vmatpush1.bf16.msra.mxu1 %v17228_v48  ;;  %v18766_v48 = vld [vmem:[%s21686_s0 + $0x34] ss:$8 sps:$4 sm:$0xff]  }
 0x1d9   :  { %v1079_v5 = vadd.f32 %v1078_v45, %v19474_v39  ;;  %v1080_v41 = vpop.f32.mrb[71].mxu1  ;;  %4156 = vmatprep.subr.bf16.mxu1 %v17233_v10  ;;  %v1545_v51 = vmax.f32 %v1075_v8, 0.0  ;;  %v17237_v45 = vld [vmem:[#allocation6 + $0xba0] ss:$24 sps:$4 sm:$0xff]  }
 0x1da   :  { %v1081_v27 = vadd.f32 %v1080_v41, %v19486_v43  ;;  %v1546_v11 = vmax.f32 %v1077_v56, 0.0  ;;  %v17239_v41 = vld [vmem:[#allocation6 + $0xba4] ss:$24 sps:$4 sm:$0xff]  }
 0x1db   :  { %v1552_v3 = vmax.f32 %v1079_v5, 0.0  ;;  %1405 = vmatmul.mubr.bf16.gmra.mrb[176].mxu1 %v18765_v17 }
 0x1dc   :  { %v1553_v46 = vmax.f32 %v1081_v27, 0.0  ;;  %14413 = vmatprep.mubr.msk.bf16.mxu1 %vm794_vm0, %v18766_v48  ;;  %4157 = vmatpush1.bf16.msra.mxu1 %v17231_v63  ;;  %v17242_v63 = vld [vmem:[#allocation6 + $0xbd4] ss:$24 sps:$4 sm:$0xff]  }
 0x1dd   :  { %v19551_v10 = vpack.c.bf16 %v1552_v3, %v1545_v51  ;;  %4158 = vmatprep.subr.bf16.mxu1 %v17236_v58  ;;  %v17240_v58 = vld [vmem:[#allocation6 + $0xbd0] ss:$24 sps:$4 sm:$0xff]  }
 0x1de   :  { %v19553_v8 = vpack.c.bf16 %v1553_v46, %v1546_v11  ;;  %v1084_v28 = vpop.f32.mrb[72].mxu1  ;;  %v18767_v46 = vld [vmem:[%s21686_s0 + $0x30] ss:$8 sps:$4 sm:$0xff]  }
 0x1df   :  { %22005 = vst [vmem:[#allocation47_spill] sm:$0xff] %v19551_v10  ;;  %v1085_v5 = vadd.f32 %v1084_v28, %v19474_v39  ;;  %v1086_v17 = vpop.f32.mrb[73].mxu1 }
 0x1e0   :  { %22006 = vst [vmem:[#allocation48_spill] sm:$0xff] %v19553_v8  ;;  %v1087_v56 = vadd.f32 %v1086_v17, %v19486_v43  ;;  %v1088_v27 = vpop.f32.mrb[74].mxu1  ;;  %4159 = vmatpush1.bf16.msra.mxu1 %v17234_v61  ;;  %v18768_v61 = vld [vmem:[%s21686_s0 + $0x44] ss:$8 sps:$4 sm:$0xff]   ;;  %v17243_v17 = vld [vmem:[#allocation6 + $0xc00] ss:$24 sps:$4 sm:$0xff]  }
 0x1e1   :  { %v1089_v40 = vadd.f32 %v1088_v27, %v19474_v39  ;;  %v1090_v26 = vpop.f32.mrb[75].mxu1  ;;  %4160 = vmatprep.subr.bf16.mxu1 %v17239_v41  ;;  %v1559_v3 = vmax.f32 %v1085_v5, 0.0 }
 0x1e2   :  { %v1091_v51 = vadd.f32 %v1090_v26, %v19486_v43  ;;  %v1560_v48 = vmax.f32 %v1087_v56, 0.0  ;;  %v17245_v26 = vld [vmem:[#allocation6 + $0xc04] ss:$24 sps:$4 sm:$0xff]  }
 0x1e3   :  { %v1566_v11 = vmax.f32 %v1089_v40, 0.0  ;;  %1413 = vmatmul.mubr.bf16.gmra.mrb[180].mxu1 %v18767_v46 }
 0x1e4   :  { %v1567_v28 = vmax.f32 %v1091_v51, 0.0  ;;  %14414 = vmatprep.mubr.msk.bf16.mxu1 %vm794_vm0, %v18768_v61  ;;  %4161 = vmatpush1.bf16.msra.mxu1 %v17237_v45  ;;  %v17248_v45 = vld [vmem:[#allocation6 + $0xc34] ss:$24 sps:$4 sm:$0xff]  }
 0x1e5   :  { %v19566_v41 = vpack.c.bf16 %v1566_v11, %v1559_v3  ;;  %4162 = vmatprep.subr.bf16.mxu1 %v17242_v63  ;;  %v17246_v63 = vld [vmem:[#allocation6 + $0xc30] ss:$24 sps:$4 sm:$0xff]  }
 0x1e6   :  { %v19568_v5 = vpack.c.bf16 %v1567_v28, %v1560_v48  ;;  %v1094_v40 = vpop.f32.mrb[76].mxu1  ;;  %v18769_v28 = vld [vmem:[%s21686_s0 + $0x40] ss:$8 sps:$4 sm:$0xff]  }
 0x1e7   :  { %22007 = vst [vmem:[#allocation49_spill] sm:$0xff] %v19566_v41  ;;  %v1095_v27 = vadd.f32 %v1094_v40, %v19474_v39  ;;  %v1096_v46 = vpop.f32.mrb[77].mxu1 }
 0x1e8   :  { %22008 = vst [vmem:[#allocation50_spill] sm:$0xff] %v19568_v5  ;;  %v1097_v56 = vadd.f32 %v1096_v46, %v19486_v43  ;;  %v1098_v51 = vpop.f32.mrb[78].mxu1  ;;  %4163 = vmatpush1.bf16.msra.mxu1 %v17240_v58  ;;  %v18770_v58 = vld [vmem:[%s21686_s0 + $0x54] ss:$8 sps:$4 sm:$0xff]   ;;  %v17249_v46 = vld [vmem:[#allocation6 + $0xc60] ss:$24 sps:$4 sm:$0xff]  }
 0x1e9   :  { %v1099_v22 = vadd.f32 %v1098_v51, %v19474_v39  ;;  %v1100_v14 = vpop.f32.mrb[79].mxu1  ;;  %4164 = vmatprep.subr.bf16.mxu1 %v17245_v26  ;;  %v1573_v11 = vmax.f32 %v1095_v27, 0.0 }
 0x1ea   :  { %v1101_v3 = vadd.f32 %v1100_v14, %v19486_v43  ;;  %v1574_v61 = vmax.f32 %v1097_v56, 0.0  ;;  %v17251_v14 = vld [vmem:[#allocation6 + $0xc64] ss:$24 sps:$4 sm:$0xff]  }
 0x1eb   :  { %v1580_v48 = vmax.f32 %v1099_v22, 0.0  ;;  %1421 = vmatmul.mubr.bf16.gmra.mrb[184].mxu1 %v18769_v28 }
 0x1ec   :  { %v1581_v40 = vmax.f32 %v1101_v3, 0.0  ;;  %14415 = vmatprep.mubr.msk.bf16.mxu1 %vm794_vm0, %v18770_v58  ;;  %4165 = vmatpush1.bf16.msra.mxu1 %v17243_v17  ;;  %v17254_v17 = vld [vmem:[#allocation6 + $0xc94] ss:$24 sps:$4 sm:$0xff]  }
 0x1ed   :  { %v19581_v26 = vpack.c.bf16 %v1580_v48, %v1573_v11  ;;  %4166 = vmatprep.subr.bf16.mxu1 %v17248_v45  ;;  %v17252_v45 = vld [vmem:[#allocation6 + $0xc90] ss:$24 sps:$4 sm:$0xff]  }
 0x1ee   :  { %v19583_v27 = vpack.c.bf16 %v1581_v40, %v1574_v61  ;;  %v1104_v22 = vpop.f32.mrb[80].mxu1  ;;  %v18771_v40 = vld [vmem:[%s21686_s0 + $0x50] ss:$8 sps:$4 sm:$0xff]  }
 0x1ef   :  { %22009 = vst [vmem:[#allocation51_spill] sm:$0xff] %v19581_v26  ;;  %v1105_v51 = vadd.f32 %v1104_v22, %v19474_v39  ;;  %v1106_v28 = vpop.f32.mrb[81].mxu1 }
 0x1f0   :  { %22010 = vst [vmem:[#allocation52_spill] sm:$0xff] %v19583_v27  ;;  %v1107_v56 = vadd.f32 %v1106_v28, %v19486_v43  ;;  %v1108_v3 = vpop.f32.mrb[82].mxu1  ;;  %4167 = vmatpush1.bf16.msra.mxu1 %v17246_v63  ;;  %v18772_v63 = vld [vmem:[%s21686_s0 + $0x64] ss:$8 sps:$4 sm:$0xff]  }
 0x1f1   :  { %v1109_v49 = vadd.f32 %v1108_v3, %v19474_v39  ;;  %v1110_v55 = vpop.f32.mrb[83].mxu1  ;;  %4168 = vmatprep.subr.bf16.mxu1 %v17251_v14  ;;  %v1587_v48 = vmax.f32 %v1105_v51, 0.0 }
 0x1f2   :  { %v1111_v11 = vadd.f32 %v1110_v55, %v19486_v43  ;;  %v1588_v58 = vmax.f32 %v1107_v56, 0.0  ;;  %v17257_v55 = vld [vmem:[#allocation6 + $0xcc4] ss:$24 sps:$4 sm:$0xff]  }
 0x1f3   :  { %v1594_v61 = vmax.f32 %v1109_v49, 0.0  ;;  %1429 = vmatmul.mubr.bf16.gmra.mrb[188].mxu1 %v18771_v40  ;;  %v17255_v40 = vld [vmem:[#allocation6 + $0xcc0] ss:$24 sps:$4 sm:$0xff]  }
 0x1f4   :  { %v1595_v22 = vmax.f32 %v1111_v11, 0.0  ;;  %14416 = vmatprep.mubr.msk.bf16.mxu1 %vm794_vm0, %v18772_v63  ;;  %4169 = vmatpush1.bf16.msra.mxu1 %v17249_v46  ;;  %v17260_v46 = vld [vmem:[#allocation6 + $0xcf4] ss:$24 sps:$4 sm:$0xff]  }
 0x1f5   :  { %v19596_v14 = vpack.c.bf16 %v1594_v61, %v1587_v48  ;;  %4170 = vmatprep.subr.bf16.mxu1 %v17254_v17 }
 0x1f6   :  { %v19598_v51 = vpack.c.bf16 %v1595_v22, %v1588_v58  ;;  %v1114_v49 = vpop.f32.mrb[84].mxu1  ;;  %v18773_v58 = vld [vmem:[%s21686_s0 + $0x60] ss:$8 sps:$4 sm:$0xff]  }
 0x1f7   :  { %22011 = vst [vmem:[#allocation53_spill] sm:$0xff] %v19596_v14  ;;  %v1115_v28 = vadd.f32 %v1114_v49, %v19474_v39  ;;  %v1116_v3 = vpop.f32.mrb[85].mxu1 }
 0x1f8   :  { %22012 = vst [vmem:[#allocation54_spill] sm:$0xff] %v19598_v51  ;;  %v1117_v56 = vadd.f32 %v1116_v3, %v19486_v43  ;;  %v1118_v11 = vpop.f32.mrb[86].mxu1  ;;  %4171 = vmatpush1.bf16.msra.mxu1 %v17252_v45  ;;  %v18774_v45 = vld [vmem:[%s21686_s0 + $0x74] ss:$8 sps:$4 sm:$0xff]  }
 0x1f9   :  { %v1119_v24 = vadd.f32 %v1118_v11, %v19474_v39  ;;  %v1120_v29 = vpop.f32.mrb[87].mxu1  ;;  %4172 = vmatprep.subr.bf16.mxu1 %v17257_v55  ;;  %v1601_v17 = vmax.f32 %v1115_v28, 0.0  ;;  %v17258_v55 = vld [vmem:[#allocation6 + $0xcf0] ss:$24 sps:$4 sm:$0xff]  }
 0x1fa   :  { %v1121_v48 = vadd.f32 %v1120_v29, %v19486_v43  ;;  %v1602_v22 = vmax.f32 %v1117_v56, 0.0  ;;  %v17263_v29 = vld [vmem:[#allocation6 + $0xd24] ss:$24 sps:$4 sm:$0xff]  }
 0x1fb   :  { %v1608_v61 = vmax.f32 %v1119_v24, 0.0  ;;  %1437 = vmatmul.mubr.bf16.gmra.mrb[192].mxu1 %v18773_v58  ;;  %v17261_v58 = vld [vmem:[#allocation6 + $0xd20] ss:$24 sps:$4 sm:$0xff]  }
 0x1fc   :  { %v1609_v63 = vmax.f32 %v1121_v48, 0.0  ;;  %14417 = vmatprep.mubr.msk.bf16.mxu1 %vm794_vm0, %v18774_v45  ;;  %4173 = vmatpush1.bf16.msra.mxu1 %v17255_v40  ;;  %v17266_v40 = vld [vmem:[#allocation6 + $0xd54] ss:$24 sps:$4 sm:$0xff]  }
 0x1fd   :  { %v19611_v49 = vpack.c.bf16 %v1608_v61, %v1601_v17  ;;  %4174 = vmatprep.subr.bf16.mxu1 %v17260_v46 }
 0x1fe   :  { %v19613_v24 = vpack.c.bf16 %v1609_v63, %v1602_v22  ;;  %v1124_v28 = vpop.f32.mrb[88].mxu1  ;;  %v18775_v22 = vld [vmem:[%s21686_s0 + $0x70] ss:$8 sps:$4 sm:$0xff]  }
 0x1ff   :  { %22013 = vst [vmem:[#allocation55_spill] sm:$0xff] %v19611_v49  ;;  %v1125_v3 = vadd.f32 %v1124_v28, %v19474_v39  ;;  %v1126_v11 = vpop.f32.mrb[89].mxu1 }
 0x200   :  { %22014 = vst [vmem:[#allocation56_spill] sm:$0xff] %v19613_v24  ;;  %v1127_v56 = vadd.f32 %v1126_v11, %v19486_v43  ;;  %v1128_v48 = vpop.f32.mrb[90].mxu1  ;;  %4175 = vmatpush1.bf16.msra.mxu1 %v17258_v55  ;;  %v18776_v55 = vld [vmem:[%s21686_s0 + $0x84] ss:$8 sps:$4 sm:$0xff]  }
 0x201   :  { %v1129_v57 = vadd.f32 %v1128_v48, %v19474_v39  ;;  %v1130_v45 = vpop.f32.mrb[91].mxu1  ;;  %4176 = vmatprep.subr.bf16.mxu1 %v17263_v29  ;;  %v1615_v46 = vmax.f32 %v1125_v3, 0.0  ;;  %v17264_v29 = vld [vmem:[#allocation6 + $0xd50] ss:$24 sps:$4 sm:$0xff]   ;;  %v17269_v3 = vld [vmem:[#allocation6 + $0xd84] ss:$24 sps:$4 sm:$0xff]  }
 0x202   :  { %v1131_v17 = vadd.f32 %v1130_v45, %v19486_v43  ;;  %v1616_v63 = vmax.f32 %v1127_v56, 0.0 }
 0x203   :  { %v1622_v61 = vmax.f32 %v1129_v57, 0.0  ;;  %1445 = vmatmul.mubr.bf16.gmra.mrb[196].mxu1 %v18775_v22 }
 0x204   :  { %v1623_v28 = vmax.f32 %v1131_v17, 0.0  ;;  %14418 = vmatprep.mubr.msk.bf16.mxu1 %vm794_vm0, %v18776_v55  ;;  %4177 = vmatpush1.bf16.msra.mxu1 %v17261_v58  ;;  %v18778_v55 = vld [vmem:[%s21686_s0 + $0x94] ss:$8 sps:$4 sm:$0xff]  }
 0x205   :  { %v19626_v11 = vpack.c.bf16 %v1622_v61, %v1615_v46  ;;  %4178 = vmatprep.subr.bf16.mxu1 %v17266_v40  ;;  %v18777_v40 = vld [vmem:[%s21686_s0 + $0x80] ss:$8 sps:$4 sm:$0xff]  }
 0x206   :  { %v19628_v57 = vpack.c.bf16 %v1623_v28, %v1616_v63  ;;  %v1134_v48 = vpop.f32.mrb[92].mxu1 }
 0x207   :  { %22015 = vst [vmem:[#allocation57_spill] sm:$0xff] %v19626_v11  ;;  %v1135_v45 = vadd.f32 %v1134_v48, %v19474_v39  ;;  %v1136_v22 = vpop.f32.mrb[93].mxu1  ;;  %v17315_v11 = vld [vmem:[#allocation6 + $0x13b4] ss:$24 sps:$4 sm:$0xff]  }
 0x208   :  { %22016 = vst [vmem:[#allocation58_spill] sm:$0xff] %v19628_v57  ;;  %v1137_v56 = vadd.f32 %v1136_v22, %v19486_v43  ;;  %v1138_v17 = vpop.f32.mrb[94].mxu1  ;;  %4179 = vmatpush1.bf16.msra.mxu1 %v17264_v29 }
 0x209   :  { %v1139_v60 = vadd.f32 %v1138_v17, %v19474_v39  ;;  %v1140_v49 = vpop.f32.mrb[95].mxu1  ;;  %4301 = vmatprep.subr.bf16.mxu1 %v17269_v3  ;;  %v1629_v46 = vmax.f32 %v1135_v45, 0.0  ;;  %v17309_v3 = vld [vmem:[#allocation6 + $0x1384] ss:$24 sps:$4 sm:$0xff]  }
 0x20a   :  { %v1141_v58 = vadd.f32 %v1140_v49, %v19486_v43  ;;  %v1630_v63 = vmax.f32 %v1137_v56, 0.0  ;;  %4607 = vmatprep.subr.bf16.mxu0 %v17309_v3 }
 0x20b   :  { %v1636_v61 = vmax.f32 %v1139_v60, 0.0  ;;  %1453 = vmatmul.mubr.bf16.gmra.mrb[200].mxu1 %v18777_v40  ;;  %v17311_v60 = vld [vmem:[#allocation6 + $0x1380] ss:$24 sps:$4 sm:$0xff]  }
 0x20c   :  { %v1637_v28 = vmax.f32 %v1141_v58, 0.0  ;;  %14419 = vmatprep.mubr.msk.bf16.mxu1 %vm794_vm0, %v18778_v55  ;;  %4608 = vmatpush1.bf16.msra.mxu0 %v17311_v60  ;;  %v18780_v60 = vld [vmem:[%s21686_s0 + $0xa4] ss:$8 sps:$4 sm:$0xff]  }
 0x20d   :  { %v19641_v29 = vpack.c.bf16 %v1636_v61, %v1629_v46  ;;  %v17317_v61 = vld [vmem:[#allocation6 + $0x13b0] ss:$24 sps:$4 sm:$0xff]   ;;  %4609 = vmatprep.subr.bf16.mxu0 %v17315_v11 }
 0x20e   :  { %v19643_v48 = vpack.c.bf16 %v1637_v28, %v1630_v63  ;;  %v1144_v49 = vpop.f32.mrb[96].mxu1  ;;  %v18779_v28 = vld [vmem:[%s21686_s0 + $0x90] ss:$8 sps:$4 sm:$0xff]  }
 0x20f   :  { %22017 = vst [vmem:[#allocation59_spill] sm:$0xff] %v19641_v29  ;;  %v1145_v45 = vadd.f32 %v1144_v49, %v19474_v39  ;;  %v1146_v22 = vpop.f32.mrb[97].mxu1 }
 0x210   :  { %22018 = vst [vmem:[#allocation60_spill] sm:$0xff] %v19643_v48  ;;  %v1147_v56 = vadd.f32 %v1146_v22, %v19486_v43  ;;  %v1148_v17 = vpop.f32.mrb[98].mxu1  ;;  %4610 = vmatpush1.bf16.msra.mxu0 %v17317_v61 }
 0x211   :  { %v1149_v58 = vadd.f32 %v1148_v17, %v19474_v39  ;;  %v1150_v40 = vpop.f32.mrb[99].mxu1  ;;  %v1643_v55 = vmax.f32 %v1145_v45, 0.0  ;;  %v17321_v17 = vld [vmem:[#allocation6 + $0x13e4] ss:$24 sps:$4 sm:$0xff]  }
 0x212   :  { %v1151_v46 = vadd.f32 %v1150_v40, %v19486_v43  ;;  %v1644_v3 = vmax.f32 %v1147_v56, 0.0  ;;  %v17323_v40 = vld [vmem:[#allocation6 + $0x13e0] ss:$24 sps:$4 sm:$0xff]   ;;  %4611 = vmatprep.subr.bf16.mxu0 %v17321_v17 }
 0x213   :  { %v1650_v63 = vmax.f32 %v1149_v58, 0.0  ;;  %1461 = vmatmul.mubr.bf16.gmra.mrb[204].mxu1 %v18779_v28 }
 0x214   :  { %v1651_v49 = vmax.f32 %v1151_v46, 0.0  ;;  %14420 = vmatprep.mubr.msk.bf16.mxu1 %vm794_vm0, %v18780_v60  ;;  %4612 = vmatpush1.bf16.msra.mxu0 %v17323_v40  ;;  %v17324_v60 = vld [vmem:[#allocation6 + $0x1414] ss:$24 sps:$4 sm:$0xff]  }
 0x215   :  { %v19656_v22 = vpack.c.bf16 %v1650_v63, %v1643_v55  ;;  %v17326_v55 = vld [vmem:[#allocation6 + $0x1410] ss:$24 sps:$4 sm:$0xff]   ;;  %4613 = vmatprep.subr.bf16.mxu0 %v17324_v60  ;;  %v18782_v40 = vld [vmem:[%s21686_s0 + $0xb4] ss:$8 sps:$4 sm:$0xff]  }
 0x216   :  { %v19658_v45 = vpack.c.bf16 %v1651_v49, %v1644_v3  ;;  %v1154_v58 = vpop.f32.mrb[100].mxu1  ;;  %v18781_v49 = vld [vmem:[%s21686_s0 + $0xa0] ss:$8 sps:$4 sm:$0xff]  }
 0x217   :  { %22019 = vst [vmem:[#allocation61_spill] sm:$0xff] %v19656_v22  ;;  %v1155_v29 = vadd.f32 %v1154_v58, %v19474_v39  ;;  %v1156_v28 = vpop.f32.mrb[101].mxu1 }
 0x218   :  { %22020 = vst [vmem:[#allocation62_spill] sm:$0xff] %v19658_v45  ;;  %v1157_v11 = vadd.f32 %v1156_v28, %v19486_v43  ;;  %v1158_v56 = vpop.f32.mrb[102].mxu1  ;;  %4614 = vmatpush1.bf16.msra.mxu0 %v17326_v55 }
 0x219   :  { %v1159_v46 = vadd.f32 %v1158_v56, %v19474_v39  ;;  %v1160_v48 = vpop.f32.mrb[103].mxu1  ;;  %v1657_v63 = vmax.f32 %v1155_v29, 0.0 }
 0x21a   :  { %v1161_v61 = vadd.f32 %v1160_v48, %v19486_v43  ;;  %v1658_v17 = vmax.f32 %v1157_v11, 0.0  ;;  %v17327_v48 = vld [vmem:[#allocation6 + $0x1444] ss:$24 sps:$4 sm:$0xff]  }
 0x21b   :  { %v1664_v3 = vmax.f32 %v1159_v46, 0.0  ;;  %1469 = vmatmul.mubr.bf16.gmra.mrb[208].mxu1 %v18781_v49  ;;  %v17329_v46 = vld [vmem:[#allocation6 + $0x1440] ss:$24 sps:$4 sm:$0xff]   ;;  %4615 = vmatprep.subr.bf16.mxu0 %v17327_v48 }
 0x21c   :  { %v1665_v58 = vmax.f32 %v1161_v61, 0.0  ;;  %14421 = vmatprep.mubr.msk.bf16.mxu1 %vm794_vm0, %v18782_v40  ;;  %4616 = vmatpush1.bf16.msra.mxu0 %v17329_v46  ;;  %v17330_v40 = vld [vmem:[#allocation6 + $0x1474] ss:$24 sps:$4 sm:$0xff]   ;;  %v17333_v46 = vld [vmem:[#allocation6 + $0x14a4] ss:$24 sps:$4 sm:$0xff]  }
 0x21d   :  { %v19671_v28 = vpack.c.bf16 %v1664_v3, %v1657_v63  ;;  %v17332_v63 = vld [vmem:[#allocation6 + $0x1470] ss:$24 sps:$4 sm:$0xff]   ;;  %4617 = vmatprep.subr.bf16.mxu0 %v17330_v40  ;;  %v21712_v40 = vsub.s32 5, %v19230_v38 }
 0x21e   :  { %v19673_v29 = vpack.c.bf16 %v1665_v58, %v1658_v17  ;;  %v1164_v56 = vpop.f32.mrb[104].mxu1 }
 0x21f   :  { %22021 = vst [vmem:[#allocation63_spill] sm:$0xff] %v19671_v28  ;;  %v1165_v22 = vadd.f32 %v1164_v56, %v19474_v39  ;;  %v1166_v49 = vpop.f32.mrb[105].mxu1  ;;  %v17335_v28 = vld [vmem:[#allocation6 + $0x14a0] ss:$24 sps:$4 sm:$0xff]  }
 0x220   :  { %22022 = vst [vmem:[#allocation64_spill] sm:$0xff] %v19673_v29  ;;  %v1167_v11 = vadd.f32 %v1166_v49, %v19486_v43  ;;  %v1168_v60 = vpop.f32.mrb[106].mxu1  ;;  %4618 = vmatpush1.bf16.msra.mxu0 %v17332_v63  ;;  %v17336_v63 = vld [vmem:[#allocation6 + $0x14d4] ss:$24 sps:$4 sm:$0xff]  }
 0x221   :  { %v1169_v61 = vadd.f32 %v1168_v60, %v19474_v39  ;;  %v1170_v45 = vpop.f32.mrb[107].mxu1  ;;  %v1671_v3 = vmax.f32 %v1165_v22, 0.0  ;;  %4619 = vmatprep.subr.bf16.mxu0 %v17333_v46 }
 0x222   :  { %v1171_v55 = vadd.f32 %v1170_v45, %v19486_v43  ;;  %v1672_v58 = vmax.f32 %v1167_v11, 0.0 }
 0x223   :  { %v1678_v17 = vmax.f32 %v1169_v61, 0.0  ;;  %1477 = vmatmul.mubr.bf16.gmra.mrb[212].mxu1 %v19443_v4  ;;  %v21713_v61 = vsub.s32 4, %v19230_v38 }
 0x224   :  { %v1679_v56 = vmax.f32 %v1171_v55, 0.0  ;;  %14422 = vmatprep.mubr.msk.bf16.mxu1 %vm794_vm0, %v19449_v7  ;;  %4620 = vmatpush1.bf16.msra.mxu0 %v17335_v28 }
 0x225   :  { %v19682_v48 = vpack.c.bf16 %v1678_v17, %v1671_v3  ;;  %v17338_v17 = vld [vmem:[#allocation6 + $0x14d0] ss:$24 sps:$4 sm:$0xff]   ;;  %v19696_v46 = vrot.slane %v19469_v36, %v21713_v61  ;;  %4621 = vmatprep.subr.bf16.mxu0 %v17336_v63 }
 0x226   :  { %v19684_v49 = vpack.c.bf16 %v1679_v56, %v1672_v58  ;;  %v1174_v60 = vpop.f32.mrb[108].mxu1 }
 0x227   :  { %22023 = vst [vmem:[#allocation65_spill] sm:$0xff] %v19682_v48  ;;  %v1175_v45 = vadd.f32 %v1174_v60, %v19474_v39  ;;  %v1176_v22 = vpop.f32.mrb[109].mxu1 }
 0x228   :  { %22024 = vst [vmem:[#allocation66_spill] sm:$0xff] %v19684_v49  ;;  %v1177_v4 = vadd.f32 %v1176_v22, %v19486_v43  ;;  %v1178_v11 = vpop.f32.mrb[110].mxu1  ;;  %4622 = vmatpush1.bf16.msra.mxu0 %v17338_v17 }
 0x229   :  { %v1179_v7 = vadd.f32 %v1178_v11, %v19474_v39  ;;  %v1180_v55 = vpop.f32.mrb[111].mxu1  ;;  %v1685_v58 = vmax.f32 %v1175_v45, 0.0  ;;  %v19701_v39 = vrot.slane %v19469_v36, %v21712_v40  ;;  %v17341_v36 = vld [vmem:[#allocation6 + $0xa94] ss:$24 sps:$4 sm:$0xff]  }
 0x22a   :  { %v1181_v3 = vadd.f32 %v1180_v55, %v19486_v43  ;;  %v1686_v60 = vmax.f32 %v1177_v4, 0.0  ;;  %5372 = vmatprep.subr.bf16.mxu0 %v17341_v36  ;;  %v17272_v36 = vld [vmem:[#allocation6 + $0xdb4] ss:$24 sps:$4 sm:$0xff]  }
 0x22b   :  { %v1692_v56 = vmax.f32 %v1179_v7, 0.0  ;;  %1485 = vmatmul.mubr.bf16.gmra.mrb[216].mxu1 %v19466_v34 }
 0x22c   :  { %v1693_v22 = vmax.f32 %v1181_v3, 0.0  ;;  %14423 = vmatprep.mubr.msk.bf16.mxu1 %vm794_vm0, %v19479_v42 }
 0x22d   :  { %v19705_v43 = vpack.c.bf16 %v1692_v56, %v1685_v58 }
 0x22e   :  { %v19707_v34 = vpack.c.bf16 %v1693_v22, %v1686_v60  ;;  %v1217_v28 = vpop.f32.mrb[112].mxu1 }
 0x22f   :  { %22025 = vst [vmem:[#allocation67_spill] sm:$0xff] %v19705_v43  ;;  %v1218_v45 = vadd.f32 %v1217_v28, %v19696_v46  ;;  %v1219_v11 = vpop.f32.mrb[113].mxu1 }
 0x230   :  { %22026 = vst [vmem:[#allocation68_spill] sm:$0xff] %v19707_v34  ;;  %v1220_v4 = vadd.f32 %v1219_v11, %v19701_v39  ;;  %v1221_v7 = vpop.f32.mrb[114].mxu1 }
 0x231   :  { %v1222_v55 = vadd.f32 %v1221_v7, %v19696_v46  ;;  %v1223_v63 = vpop.f32.mrb[115].mxu1  ;;  %v1505_v40 = vmax.f32 %v1218_v45, 0.0  ;;  %v17267_v45 = vld [vmem:[#allocation6 + $0xd80] ss:$24 sps:$4 sm:$0xff]  }
 0x232   :  { %v1224_v3 = vadd.f32 %v1223_v63, %v19701_v39  ;;  %v1506_v17 = vmax.f32 %v1220_v4, 0.0 }
 0x233   :  { %v1512_v42 = vmax.f32 %v1222_v55, 0.0  ;;  %1493 = vmatmul.mubr.bf16.gmra.mrb[220].mxu1 %v19499_v6 }
 0x234   :  { %v1513_v58 = vmax.f32 %v1224_v3, 0.0  ;;  %4180 = vmatprep.mubr.bf16.mxu1 %v19274_v13 }
 0x235   :  { %v19715_v56 = vpack.c.bf16 %v1512_v42, %v1505_v40 }
 0x236   :  { %v19717_v60 = vpack.c.bf16 %v1513_v58, %v1506_v17  ;;  %v1227_v22 = vpop.f32.mrb[116].mxu1  ;;  %v17270_v17 = vld [vmem:[#allocation6 + $0xdb0] ss:$24 sps:$4 sm:$0xff]  }
 0x237   :  { %22027 = vst [vmem:[#allocation69_spill] sm:$0xff] %v19715_v56  ;;  %v1228_v28 = vadd.f32 %v1227_v22, %v19696_v46  ;;  %v1229_v11 = vpop.f32.mrb[117].mxu1  ;;  %v17275_v22 = vld [vmem:[#allocation6 + $0xde4] ss:$24 sps:$4 sm:$0xff]  }
 0x238   :  { %22028 = vst [vmem:[#allocation70_spill] sm:$0xff] %v19717_v60  ;;  %v1230_v7 = vadd.f32 %v1229_v11, %v19701_v39  ;;  %v1231_v63 = vpop.f32.mrb[118].mxu1 }
 0x239   :  { %v1232_v55 = vadd.f32 %v1231_v63, %v19696_v46  ;;  %v1233_v6 = vpop.f32.mrb[119].mxu1  ;;  %v1519_v3 = vmax.f32 %v1228_v28, 0.0 }
 0x23a   :  { %v1234_v4 = vadd.f32 %v1233_v6, %v19701_v39  ;;  %v1520_v40 = vmax.f32 %v1230_v7, 0.0  ;;  %v17273_v7 = vld [vmem:[#allocation6 + $0xde0] ss:$24 sps:$4 sm:$0xff]  }
 0x23b   :  { %v1526_v61 = vmax.f32 %v1232_v55, 0.0  ;;  %4181 = vmatmul.mubr.bf16.vlgmr.msra.gmra.mrb[224].mxu1 %v19271_v12 }
 0x23c   :  { %v1527_v42 = vmax.f32 %v1234_v4, 0.0  ;;  %4190 = vmatprep.mubr.bf16.mxu1 %v19291_v31  ;;  %4302 = vmatpush1.bf16.msra.mxu1 %v17267_v45  ;;  %v17278_v45 = vld [vmem:[#allocation6 + $0xe14] ss:$24 sps:$4 sm:$0xff]  }
 0x23d   :  { %v19725_v58 = vpack.c.bf16 %v1526_v61, %v1519_v3  ;;  %4303 = vmatprep.subr.bf16.mxu1 %v17272_v36 }
 0x23e   :  { %v19727_v11 = vpack.c.bf16 %v1527_v42, %v1520_v40  ;;  %v1237_v63 = vpop.f32.mrb[120].mxu1 }
 0x23f   :  { %22029 = vst [vmem:[#allocation71_spill] sm:$0xff] %v19725_v58  ;;  %v1238_v43 = vadd.f32 %v1237_v63, %v19696_v46  ;;  %v1239_v6 = vpop.f32.mrb[121].mxu1  ;;  %v17276_v63 = vld [vmem:[#allocation6 + $0xe10] ss:$24 sps:$4 sm:$0xff]  }
 0x240   :  { %22030 = vst [vmem:[#allocation72_spill] sm:$0xff] %v19727_v11  ;;  %v1240_v28 = vadd.f32 %v1239_v6, %v19701_v39  ;;  %v1241_v55 = vpop.f32.mrb[122].mxu1  ;;  %4304 = vmatpush1.bf16.msra.mxu1 %v17270_v17  ;;  %v17281_v17 = vld [vmem:[#allocation6 + $0xe44] ss:$24 sps:$4 sm:$0xff]  }
 0x241   :  { %v1242_v4 = vadd.f32 %v1241_v55, %v19696_v46  ;;  %v1243_v34 = vpop.f32.mrb[123].mxu1  ;;  %4305 = vmatprep.subr.bf16.mxu1 %v17275_v22  ;;  %v1533_v36 = vmax.f32 %v1238_v43, 0.0 }
 0x242   :  { %v1244_v61 = vadd.f32 %v1243_v34, %v19701_v39  ;;  %v1534_v40 = vmax.f32 %v1240_v28, 0.0  ;;  %v17279_v28 = vld [vmem:[#allocation6 + $0xe40] ss:$24 sps:$4 sm:$0xff]  }
 0x243   :  { %v1540_v3 = vmax.f32 %v1242_v4, 0.0  ;;  %4191 = vmatmul.mubr.bf16.gmra.mrb[228].mxu1 %v19288_v30 }
 0x244   :  { %v1541_v42 = vmax.f32 %v1244_v61, 0.0  ;;  %4200 = vmatprep.mubr.bf16.mxu1 %v19308_v54  ;;  %4306 = vmatpush1.bf16.msra.mxu1 %v17273_v7  ;;  %v17284_v7 = vld [vmem:[#allocation6 + $0xe74] ss:$24 sps:$4 sm:$0xff]  }
 0x245   :  { %v19735_v6 = vpack.c.bf16 %v1540_v3, %v1533_v36  ;;  %4307 = vmatprep.subr.bf16.mxu1 %v17278_v45 }
 0x246   :  { %v19737_v55 = vpack.c.bf16 %v1541_v42, %v1534_v40  ;;  %v1247_v22 = vpop.f32.mrb[124].mxu1 }
 0x247   :  { %22031 = vst [vmem:[#allocation73_spill] sm:$0xff] %v19735_v6  ;;  %v1248_v56 = vadd.f32 %v1247_v22, %v19696_v46  ;;  %v1249_v34 = vpop.f32.mrb[125].mxu1  ;;  %v17282_v22 = vld [vmem:[#allocation6 + $0xe70] ss:$24 sps:$4 sm:$0xff]  }
 0x248   :  { %22032 = vst [vmem:[#allocation74_spill] sm:$0xff] %v19737_v55  ;;  %v1250_v43 = vadd.f32 %v1249_v34, %v19701_v39  ;;  %v1251_v4 = vpop.f32.mrb[126].mxu1  ;;  %4308 = vmatpush1.bf16.msra.mxu1 %v17276_v63  ;;  %v17287_v63 = vld [vmem:[#allocation6 + $0xea4] ss:$24 sps:$4 sm:$0xff]  }
 0x249   :  { %v1252_v61 = vadd.f32 %v1251_v4, %v19696_v46  ;;  %v1253_v60 = vpop.f32.mrb[127].mxu1  ;;  %4309 = vmatprep.subr.bf16.mxu1 %v17281_v17  ;;  %v1547_v45 = vmax.f32 %v1248_v56, 0.0 }
 0x24a   :  { %v1254_v36 = vadd.f32 %v1253_v60, %v19701_v39  ;;  %v1548_v40 = vmax.f32 %v1250_v43, 0.0  ;;  %v17285_v43 = vld [vmem:[#allocation6 + $0xea0] ss:$24 sps:$4 sm:$0xff]  }
 0x24b   :  { %v1554_v3 = vmax.f32 %v1252_v61, 0.0  ;;  %4201 = vmatmul.mubr.bf16.gmra.mrb[232].mxu1 %v19305_v53 }
 0x24c   :  { %v1555_v42 = vmax.f32 %v1254_v36, 0.0  ;;  %4210 = vmatprep.mubr.bf16.mxu1 %v19325_v16  ;;  %4310 = vmatpush1.bf16.msra.mxu1 %v17279_v28  ;;  %v17290_v28 = vld [vmem:[#allocation6 + $0xed4] ss:$24 sps:$4 sm:$0xff]  }
 0x24d   :  { %v19745_v34 = vpack.c.bf16 %v1554_v3, %v1547_v45  ;;  %4311 = vmatprep.subr.bf16.mxu1 %v17284_v7 }
 0x24e   :  { %v19747_v4 = vpack.c.bf16 %v1555_v42, %v1548_v40  ;;  %v1257_v17 = vpop.f32.mrb[128].mxu1 }
 0x24f   :  { %22033 = vst [vmem:[#allocation75_spill] sm:$0xff] %v19745_v34  ;;  %v1258_v54 = vadd.f32 %v1257_v17, %v19696_v46  ;;  %v1259_v60 = vpop.f32.mrb[129].mxu1  ;;  %v17288_v17 = vld [vmem:[#allocation6 + $0xed0] ss:$24 sps:$4 sm:$0xff]  }
 0x250   :  { %22034 = vst [vmem:[#allocation76_spill] sm:$0xff] %v19747_v4  ;;  %v1260_v56 = vadd.f32 %v1259_v60, %v19701_v39  ;;  %v1261_v61 = vpop.f32.mrb[130].mxu1  ;;  %4312 = vmatpush1.bf16.msra.mxu1 %v17282_v22  ;;  %v17293_v22 = vld [vmem:[#allocation6 + $0xf04] ss:$24 sps:$4 sm:$0xff]  }
 0x251   :  { %v1262_v36 = vadd.f32 %v1261_v61, %v19696_v46  ;;  %v1263_v16 = vpop.f32.mrb[131].mxu1  ;;  %4313 = vmatprep.subr.bf16.mxu1 %v17287_v63  ;;  %v1561_v7 = vmax.f32 %v1258_v54, 0.0 }
 0x252   :  { %v1264_v45 = vadd.f32 %v1263_v16, %v19701_v39  ;;  %v1562_v40 = vmax.f32 %v1260_v56, 0.0  ;;  %v17291_v56 = vld [vmem:[#allocation6 + $0xf00] ss:$24 sps:$4 sm:$0xff]  }
 0x253   :  { %v1568_v3 = vmax.f32 %v1262_v36, 0.0  ;;  %4211 = vmatmul.mubr.bf16.gmra.mrb[236].mxu1 %v19323_v9 }
 0x254   :  { %v1569_v42 = vmax.f32 %v1264_v45, 0.0  ;;  %4220 = vmatprep.mubr.bf16.mxu1 %v19342_v35  ;;  %4314 = vmatpush1.bf16.msra.mxu1 %v17285_v43  ;;  %v17296_v43 = vld [vmem:[#allocation6 + $0xf34] ss:$24 sps:$4 sm:$0xff]  }
 0x255   :  { %v19755_v60 = vpack.c.bf16 %v1568_v3, %v1561_v7  ;;  %4315 = vmatprep.subr.bf16.mxu1 %v17290_v28 }
 0x256   :  { %v19757_v61 = vpack.c.bf16 %v1569_v42, %v1562_v40  ;;  %v1267_v63 = vpop.f32.mrb[132].mxu1 }
 0x257   :  { %22035 = vst [vmem:[#allocation77_spill] sm:$0xff] %v19755_v60  ;;  %v1268_v53 = vadd.f32 %v1267_v63, %v19696_v46  ;;  %v1269_v16 = vpop.f32.mrb[133].mxu1  ;;  %v17294_v63 = vld [vmem:[#allocation6 + $0xf30] ss:$24 sps:$4 sm:$0xff]  }
 0x258   :  { %22036 = vst [vmem:[#allocation78_spill] sm:$0xff] %v19757_v61  ;;  %v1270_v54 = vadd.f32 %v1269_v16, %v19701_v39  ;;  %v1271_v36 = vpop.f32.mrb[134].mxu1  ;;  %4316 = vmatpush1.bf16.msra.mxu1 %v17288_v17  ;;  %v17299_v17 = vld [vmem:[#allocation6 + $0xf64] ss:$24 sps:$4 sm:$0xff]  }
 0x259   :  { %v1272_v45 = vadd.f32 %v1271_v36, %v19696_v46  ;;  %v1273_v35 = vpop.f32.mrb[135].mxu1  ;;  %4317 = vmatprep.subr.bf16.mxu1 %v17293_v22  ;;  %v1575_v28 = vmax.f32 %v1268_v53, 0.0 }
 0x25a   :  { %v1274_v7 = vadd.f32 %v1273_v35, %v19701_v39  ;;  %v1576_v40 = vmax.f32 %v1270_v54, 0.0  ;;  %v17297_v54 = vld [vmem:[#allocation6 + $0xf60] ss:$24 sps:$4 sm:$0xff]  }
 0x25b   :  { %v1582_v3 = vmax.f32 %v1272_v45, 0.0  ;;  %4221 = vmatmul.mubr.bf16.gmra.mrb[240].mxu1 %v19340_v32 }
 0x25c   :  { %v1583_v42 = vmax.f32 %v1274_v7, 0.0  ;;  %4230 = vmatprep.mubr.bf16.mxu1 %v19359_v62  ;;  %4318 = vmatpush1.bf16.msra.mxu1 %v17291_v56  ;;  %v17302_v56 = vld [vmem:[#allocation6 + $0xf94] ss:$24 sps:$4 sm:$0xff]  }
 0x25d   :  { %v19765_v16 = vpack.c.bf16 %v1582_v3, %v1575_v28  ;;  %4319 = vmatprep.subr.bf16.mxu1 %v17296_v43 }
 0x25e   :  { %v19767_v36 = vpack.c.bf16 %v1583_v42, %v1576_v40  ;;  %v1277_v22 = vpop.f32.mrb[136].mxu1 }
 0x25f   :  { %v1278_v9 = vadd.f32 %v1277_v22, %v19696_v46  ;;  %v1279_v35 = vpop.f32.mrb[137].mxu1  ;;  %v17300_v22 = vld [vmem:[#allocation6 + $0xf90] ss:$24 sps:$4 sm:$0xff]  }
 0x260   :  { %22037 = vst [vmem:[#allocation79_spill] sm:$0xff] %v19767_v36  ;;  %v1280_v53 = vadd.f32 %v1279_v35, %v19701_v39  ;;  %v1281_v45 = vpop.f32.mrb[138].mxu1  ;;  %4320 = vmatpush1.bf16.msra.mxu1 %v17294_v63  ;;  %v17305_v63 = vld [vmem:[#allocation6 + $0xfc4] ss:$24 sps:$4 sm:$0xff]  }
 0x261   :  { %v1282_v7 = vadd.f32 %v1281_v45, %v19696_v46  ;;  %v1283_v62 = vpop.f32.mrb[139].mxu1  ;;  %4321 = vmatprep.subr.bf16.mxu1 %v17299_v17  ;;  %v1589_v43 = vmax.f32 %v1278_v9, 0.0 }
 0x262   :  { %v1284_v28 = vadd.f32 %v1283_v62, %v19701_v39  ;;  %v1590_v40 = vmax.f32 %v1280_v53, 0.0  ;;  %v17303_v53 = vld [vmem:[#allocation6 + $0xfc0] ss:$24 sps:$4 sm:$0xff]  }
 0x263   :  { %v1596_v3 = vmax.f32 %v1282_v7, 0.0  ;;  %4231 = vmatmul.mubr.bf16.gmra.mrb[244].mxu1 %v19357_v59 }
 0x264   :  { %v1597_v42 = vmax.f32 %v1284_v28, 0.0  ;;  %4240 = vmatprep.mubr.bf16.mxu1 %v19374_v20  ;;  %4322 = vmatpush1.bf16.msra.mxu1 %v17297_v54  ;;  %v17308_v54 = vld [vmem:[#allocation6 + $0xff4] ss:$24 sps:$4 sm:$0xff]  }
 0x265   :  { %v19775_v35 = vpack.c.bf16 %v1596_v3, %v1589_v43  ;;  %4323 = vmatprep.subr.bf16.mxu1 %v17302_v56 }
 0x266   :  { %v19777_v45 = vpack.c.bf16 %v1597_v42, %v1590_v40  ;;  %v1287_v17 = vpop.f32.mrb[140].mxu1 }
 0x267   :  { %22038 = vst [vmem:[#allocation80_spill] sm:$0xff] %v19775_v35  ;;  %v1288_v32 = vadd.f32 %v1287_v17, %v19696_v46  ;;  %v1289_v62 = vpop.f32.mrb[141].mxu1  ;;  %v17306_v17 = vld [vmem:[#allocation6 + $0xff0] ss:$24 sps:$4 sm:$0xff]  }
 0x268   :  { %22039 = vst [vmem:[#allocation81_spill] sm:$0xff] %v19777_v45  ;;  %v1290_v9 = vadd.f32 %v1289_v62, %v19701_v39  ;;  %v1291_v7 = vpop.f32.mrb[142].mxu1  ;;  %4324 = vmatpush1.bf16.msra.mxu1 %v17300_v22  ;;  %v17314_v22 = vld [vmem:[#allocation6 + $0x1024] ss:$24 sps:$4 sm:$0xff]  }
 0x269   :  { %v1292_v28 = vadd.f32 %v1291_v7, %v19696_v46  ;;  %v1293_v20 = vpop.f32.mrb[143].mxu1  ;;  %4325 = vmatprep.subr.bf16.mxu1 %v17305_v63  ;;  %v1603_v56 = vmax.f32 %v1288_v32, 0.0 }
 0x26a   :  { %v1294_v43 = vadd.f32 %v1293_v20, %v19701_v39  ;;  %v1604_v40 = vmax.f32 %v1290_v9, 0.0  ;;  %v17312_v9 = vld [vmem:[#allocation6 + $0x1020] ss:$24 sps:$4 sm:$0xff]  }
 0x26b   :  { %v1610_v3 = vmax.f32 %v1292_v28, 0.0  ;;  %4241 = vmatmul.mubr.bf16.gmra.mrb[248].mxu1 %v19372_v18 }
 0x26c   :  { %v1611_v42 = vmax.f32 %v1294_v43, 0.0  ;;  %4250 = vmatprep.mubr.bf16.mxu1 %v19389_v44  ;;  %4326 = vmatpush1.bf16.msra.mxu1 %v17303_v53  ;;  %v17320_v53 = vld [vmem:[#allocation6 + $0x1054] ss:$24 sps:$4 sm:$0xff]  }
 0x26d   :  { %v19785_v62 = vpack.c.bf16 %v1610_v3, %v1603_v56  ;;  %4327 = vmatprep.subr.bf16.mxu1 %v17308_v54 }
 0x26e   :  { %v19787_v7 = vpack.c.bf16 %v1611_v42, %v1604_v40  ;;  %v1297_v63 = vpop.f32.mrb[144].mxu1 }
 0x26f   :  { %22040 = vst [vmem:[#allocation82_spill] sm:$0xff] %v19785_v62  ;;  %v1298_v59 = vadd.f32 %v1297_v63, %v19696_v46  ;;  %v1299_v20 = vpop.f32.mrb[145].mxu1  ;;  %v17318_v63 = vld [vmem:[#allocation6 + $0x1050] ss:$24 sps:$4 sm:$0xff]  }
 0x270   :  { %22041 = vst [vmem:[#allocation83_spill] sm:$0xff] %v19787_v7  ;;  %v1300_v32 = vadd.f32 %v1299_v20, %v19701_v39  ;;  %v1301_v28 = vpop.f32.mrb[146].mxu1  ;;  %4328 = vmatpush1.bf16.msra.mxu1 %v17306_v17  ;;  %v17347_v17 = vld [vmem:[#allocation6 + $0x1084] ss:$24 sps:$4 sm:$0xff]  }
 0x271   :  { %v1302_v43 = vadd.f32 %v1301_v28, %v19696_v46  ;;  %v1303_v44 = vpop.f32.mrb[147].mxu1  ;;  %4329 = vmatprep.subr.bf16.mxu1 %v17314_v22  ;;  %v1617_v54 = vmax.f32 %v1298_v59, 0.0 }
 0x272   :  { %v1304_v56 = vadd.f32 %v1303_v44, %v19701_v39  ;;  %v1618_v40 = vmax.f32 %v1300_v32, 0.0 }
 0x273   :  { %v1624_v3 = vmax.f32 %v1302_v43, 0.0  ;;  %4251 = vmatmul.mubr.bf16.gmra.mrb[252].mxu1 %v19387_v37 }
 0x274   :  { %v1625_v42 = vmax.f32 %v1304_v56, 0.0  ;;  %4260 = vmatprep.mubr.bf16.mxu1 %v19404_v2  ;;  %4330 = vmatpush1.bf16.msra.mxu1 %v17312_v9 }
 0x275   :  { %v19795_v20 = vpack.c.bf16 %v1624_v3, %v1617_v54  ;;  %4331 = vmatprep.subr.bf16.mxu1 %v17320_v53 }
 0x276   :  { %v19797_v28 = vpack.c.bf16 %v1625_v42, %v1618_v40  ;;  %v1307_v22 = vpop.f32.mrb[148].mxu1 }
 0x277   :  { %22042 = vst [vmem:[#allocation84_spill] sm:$0xff] %v19795_v20  ;;  %v1308_v18 = vadd.f32 %v1307_v22, %v19696_v46  ;;  %v1309_v44 = vpop.f32.mrb[149].mxu1 }
 0x278   :  { %22043 = vst [vmem:[#allocation85_spill] sm:$0xff] %v19797_v28  ;;  %v1310_v59 = vadd.f32 %v1309_v44, %v19701_v39  ;;  %v1311_v43 = vpop.f32.mrb[150].mxu1  ;;  %4332 = vmatpush1.bf16.msra.mxu1 %v17318_v63 }
 0x279   :  { %v1312_v32 = vadd.f32 %v1311_v43, %v19696_v46  ;;  %v1313_v56 = vpop.f32.mrb[151].mxu1  ;;  %4454 = vmatprep.subr.bf16.mxu1 %v17347_v17  ;;  %v1631_v54 = vmax.f32 %v1308_v18, 0.0 }
 0x27a   :  { %v1314_v9 = vadd.f32 %v1313_v56, %v19701_v39  ;;  %v1632_v53 = vmax.f32 %v1310_v59, 0.0 }
 0x27b   :  { %v1638_v3 = vmax.f32 %v1312_v32, 0.0  ;;  %4261 = vmatmul.mubr.bf16.gmra.mrb[0].mxu1 %v19402_v0 }
 0x27c   :  { %v1639_v40 = vmax.f32 %v1314_v9, 0.0  ;;  %4270 = vmatprep.mubr.bf16.mxu1 %v19419_v25 }
 0x27d   :  { %v19805_v42 = vpack.c.bf16 %v1638_v3, %v1631_v54 }
 0x27e   :  { %v19807_v22 = vpack.c.bf16 %v1639_v40, %v1632_v53  ;;  %v1317_v44 = vpop.f32.mrb[152].mxu1 }
 0x27f   :  { %22044 = vst [vmem:[#allocation86_spill] sm:$0xff] %v19805_v42  ;;  %v1318_v63 = vadd.f32 %v1317_v44, %v19696_v46  ;;  %v1319_v43 = vpop.f32.mrb[153].mxu1 }
 0x280   :  { %22045 = vst [vmem:[#allocation87_spill] sm:$0xff] %v19807_v22  ;;  %v1320_v17 = vadd.f32 %v1319_v43, %v19701_v39  ;;  %v1321_v2 = vpop.f32.mrb[154].mxu1 }
 0x281   :  { %v1322_v18 = vadd.f32 %v1321_v2, %v19696_v46  ;;  %v1323_v32 = vpop.f32.mrb[155].mxu1  ;;  %v1645_v59 = vmax.f32 %v1318_v63, 0.0 }
 0x282   :  { %v1324_v56 = vadd.f32 %v1323_v32, %v19701_v39  ;;  %v1646_v54 = vmax.f32 %v1320_v17, 0.0 }
 0x283   :  { %v1652_v9 = vmax.f32 %v1322_v18, 0.0  ;;  %4271 = vmatmul.mubr.bf16.gmra.mrb[4].mxu1 %v19417_v23 }
 0x284   :  { %v1653_v3 = vmax.f32 %v1324_v56, 0.0  ;;  %4280 = vmatprep.mubr.bf16.mxu1 %v19434_v52 }
 0x285   :  { %v19815_v53 = vpack.c.bf16 %v1652_v9, %v1645_v59 }
 0x286   :  { %v19817_v40 = vpack.c.bf16 %v1653_v3, %v1646_v54  ;;  %v1327_v44 = vpop.f32.mrb[156].mxu1 }
 0x287   :  { %22046 = vst [vmem:[#allocation88_spill] sm:$0xff] %v19815_v53  ;;  %v1328_v43 = vadd.f32 %v1327_v44, %v19696_v46  ;;  %v1329_v25 = vpop.f32.mrb[157].mxu1 }
 0x288   :  { %22047 = vst [vmem:[#allocation89_spill] sm:$0xff] %v19817_v40  ;;  %v1330_v2 = vadd.f32 %v1329_v25, %v19701_v39  ;;  %v1331_v0 = vpop.f32.mrb[158].mxu1 }
 0x289   :  { %v1332_v63 = vadd.f32 %v1331_v0, %v19696_v46  ;;  %v1333_v18 = vpop.f32.mrb[159].mxu1  ;;  %v1659_v17 = vmax.f32 %v1328_v43, 0.0 }
 0x28a   :  { %v1334_v32 = vadd.f32 %v1333_v18, %v19701_v39  ;;  %v1660_v59 = vmax.f32 %v1330_v2, 0.0 }
 0x28b   :  { %v1666_v56 = vmax.f32 %v1332_v63, 0.0  ;;  %4281 = vmatmul.mubr.bf16.gmra.mrb[8].mxu1 %v19432_v50 }
 0x28c   :  { %v1667_v9 = vmax.f32 %v1334_v32, 0.0  ;;  %4290 = vmatprep.mubr.bf16.mxu1 %v19455_v19 }
 0x28d   :  { %v19825_v54 = vpack.c.bf16 %v1666_v56, %v1659_v17 }
 0x28e   :  { %v19827_v3 = vpack.c.bf16 %v1667_v9, %v1660_v59  ;;  %v1337_v44 = vpop.f32.mrb[160].mxu1 }
 0x28f   :  { %22048 = vst [vmem:[#allocation90_spill] sm:$0xff] %v19825_v54  ;;  %v1338_v25 = vadd.f32 %v1337_v44, %v19696_v46  ;;  %v1339_v52 = vpop.f32.mrb[161].mxu1 }
 0x290   :  { %22049 = vst [vmem:[#allocation91_spill] sm:$0xff] %v19827_v3  ;;  %v1340_v0 = vadd.f32 %v1339_v52, %v19701_v39  ;;  %v1341_v23 = vpop.f32.mrb[162].mxu1 }
 0x291   :  { %v1342_v43 = vadd.f32 %v1341_v23, %v19696_v46  ;;  %v1343_v63 = vpop.f32.mrb[163].mxu1  ;;  %v1673_v2 = vmax.f32 %v1338_v25, 0.0  ;;  %v227_v23 = vsub.s32 6, %v19230_v38 }
 0x292   :  { %v1344_v18 = vadd.f32 %v1343_v63, %v19701_v39  ;;  %v1674_v17 = vmax.f32 %v1340_v0, 0.0 }
 0x293   :  { %v1680_v32 = vmax.f32 %v1342_v43, 0.0  ;;  %4291 = vmatmul.mubr.bf16.gmra.mrb[12].mxu1 %v19453_v15  ;;  %v17345_v43 = vld [vmem:[#allocation6 + $0x1080] ss:$24 sps:$4 sm:$0xff]  }
 0x294   :  { %v1681_v56 = vmax.f32 %v1344_v18, 0.0  ;;  %4333 = vmatprep.mubr.bf16.mxu1 %v19523_v33  ;;  %v17353_v18 = vld [vmem:[#allocation6 + $0x10b4] ss:$24 sps:$4 sm:$0xff]  }
 0x295   :  { %v19835_v59 = vpack.c.bf16 %v1680_v32, %v1673_v2 }
 0x296   :  { %v19837_v9 = vpack.c.bf16 %v1681_v56, %v1674_v17  ;;  %v1347_v44 = vpop.f32.mrb[164].mxu1  ;;  %v18783_v17 = vld [vmem:[#allocation4] sm:$0xff] }
 0x297   :  { %22050 = vst [vmem:[#allocation92_spill] sm:$0xff] %v19835_v59  ;;  %v1348_v52 = vadd.f32 %v1347_v44, %v19696_v46  ;;  %v1349_v19 = vpop.f32.mrb[165].mxu1  ;;  %v19845_v56 = vrot.slane %v18783_v17, %v227_v23  ;;  %v17357_v23 = vld [vmem:[#allocation6 + $0x10e0] ss:$24 sps:$4 sm:$0xff]   ;;  %v17362_v17 = vld [vmem:[#allocation6 + $0x1114] ss:$24 sps:$4 sm:$0xff]  }
 0x298   :  { %22051 = vst [vmem:[#allocation93_spill] sm:$0xff] %v19837_v9  ;;  %v1350_v63 = vadd.f32 %v1349_v19, %v19701_v39  ;;  %v1351_v25 = vpop.f32.mrb[166].mxu1  ;;  %v17351_v19 = vld [vmem:[#allocation6 + $0x10b0] ss:$24 sps:$4 sm:$0xff]  }
 0x299   :  { %v1352_v15 = vadd.f32 %v1351_v25, %v19696_v46  ;;  %v1353_v0 = vpop.f32.mrb[167].mxu1  ;;  %v1687_v2 = vmax.f32 %v1348_v52, 0.0  ;;  %v17359_v46 = vld [vmem:[#allocation6 + $0x10e4] ss:$24 sps:$4 sm:$0xff]  }
 0x29a   :  { %v1354_v33 = vadd.f32 %v1353_v0, %v19701_v39  ;;  %v1688_v44 = vmax.f32 %v1350_v63, 0.0 }
 0x29b   :  { %v1694_v32 = vmax.f32 %v1352_v15, 0.0  ;;  %4334 = vmatmul.mubr.bf16.vlgmr.msra.gmra.mrb[224].mxu1 %v19521_v21 }
 0x29c   :  { %v1695_v50 = vmax.f32 %v1354_v33, 0.0  ;;  %4343 = vmatprep.mubr.bf16.mxu1 %v19538_v47  ;;  %4455 = vmatpush1.bf16.msra.mxu1 %v17345_v43 }
 0x29d   :  { %v19848_v38 = vpack.c.bf16 %v1694_v32, %v1687_v2  ;;  %4456 = vmatprep.subr.bf16.mxu1 %v17353_v18  ;;  %v17368_v2 = vld [vmem:[#allocation6 + $0x1144] ss:$24 sps:$4 sm:$0xff]  }
 0x29e   :  { %v19850_v25 = vpack.c.bf16 %v1695_v50, %v1688_v44  ;;  %v1390_v39 = vpop.f32.mrb[168].mxu1  ;;  %v17360_v50 = vld [vmem:[#allocation6 + $0x1110] ss:$24 sps:$4 sm:$0xff]  }
 0x29f   :  { %22052 = vst [vmem:[#allocation94_spill] sm:$0xff] %v19848_v38  ;;  %v1391_v15 = vadd.f32 %v1390_v39, %v19845_v56  ;;  %v1392_v52 = vpop.f32.mrb[169].mxu1 }
 0x2a0   :  { %22053 = vst [vmem:[#allocation95_spill] sm:$0xff] %v19850_v25  ;;  %v1393_v0 = vpop.f32.mrb[170].mxu1  ;;  %4457 = vmatpush1.bf16.msra.mxu1 %v17351_v19 }
 0x2a1   :  { %v1394_v63 = vadd.f32 %v1393_v0, %v19845_v56  ;;  %v1395_v33 = vpop.f32.mrb[171].mxu1  ;;  %4458 = vmatprep.subr.bf16.mxu1 %v17359_v46  ;;  %v1507_v43 = vmax.f32 %v1391_v15, 0.0  ;;  %v17366_v46 = vld [vmem:[#allocation6 + $0x1140] ss:$24 sps:$4 sm:$0xff]   ;;  %v17374_v0 = vld [vmem:[#allocation6 + $0x1174] ss:$24 sps:$4 sm:$0xff]  }
 0x2a3   :  { %v1514_v47 = vmax.f32 %v1394_v63, 0.0  ;;  %4344 = vmatmul.mubr.bf16.gmra.mrb[228].mxu1 %v19536_v1 }
 0x2a4   :  { %4353 = vmatprep.mubr.bf16.mxu1 %v19553_v8  ;;  %4459 = vmatpush1.bf16.msra.mxu1 %v17357_v23 }
 0x2a5   :  { %v19856_v18 = vpack.c.bf16 %v1514_v47, %v1507_v43  ;;  %4460 = vmatprep.subr.bf16.mxu1 %v17362_v17  ;;  %v17339_v47 = vld [vmem:[#allocation6 + $0xa90] ss:$24 sps:$4 sm:$0xff]   ;;  %v17344_v17 = vld [vmem:[#allocation6 + $0xac4] ss:$24 sps:$4 sm:$0xff]  }
 0x2a6   :  { %v1398_v32 = vpop.f32.mrb[172].mxu1  ;;  %v17372_v43 = vld [vmem:[#allocation6 + $0x1170] ss:$24 sps:$4 sm:$0xff]  }
 0x2a7   :  { %22054 = vst [vmem:[#allocation96_spill] sm:$0xff] %v19856_v18  ;;  %v1399_v44 = vadd.f32 %v1398_v32, %v19845_v56  ;;  %v1400_v19 = vpop.f32.mrb[173].mxu1  ;;  %v17377_v32 = vld [vmem:[#allocation6 + $0x11a4] ss:$24 sps:$4 sm:$0xff]  }
 0x2a8   :  { %v1401_v39 = vpop.f32.mrb[174].mxu1  ;;  %4461 = vmatpush1.bf16.msra.mxu1 %v17360_v50 }
 0x2a9   :  { %v1402_v15 = vadd.f32 %v1401_v39, %v19845_v56  ;;  %v1403_v52 = vpop.f32.mrb[175].mxu1  ;;  %4462 = vmatprep.subr.bf16.mxu1 %v17368_v2  ;;  %v1521_v63 = vmax.f32 %v1399_v44, 0.0  ;;  %v17342_v44 = vld [vmem:[#allocation6 + $0xac0] ss:$24 sps:$4 sm:$0xff]  }
 0x2ab   :  { %v1528_v33 = vmax.f32 %v1402_v15, 0.0  ;;  %4354 = vmatmul.mubr.bf16.gmra.mrb[232].mxu1 %v19551_v10  ;;  %v22056_v15 = vmov 0  }
 0x2ac   :  { %4363 = vmatprep.mubr.bf16.mxu1 %v19568_v5  ;;  %4463 = vmatpush1.bf16.msra.mxu1 %v17366_v46 }
 0x2ad   :  { %v19862_v23 = vpack.c.bf16 %v1528_v33, %v1521_v63  ;;  %4464 = vmatprep.subr.bf16.mxu1 %v17374_v0  ;;  %v17350_v63 = vld [vmem:[#allocation6 + $0xaf4] ss:$24 sps:$4 sm:$0xff]   ;;  %v17375_v33 = vld [vmem:[#allocation6 + $0x11a0] ss:$24 sps:$4 sm:$0xff]  }
 0x2ae   :  { %v1406_v50 = vpop.f32.mrb[176].mxu1  ;;  %v17383_v0 = vld [vmem:[#allocation6 + $0x11d4] ss:$24 sps:$4 sm:$0xff]  }
 0x2af   :  { %22055 = vst [vmem:[#allocation97_spill] sm:$0xff] %v19862_v23  ;;  %v1407_v19 = vadd.f32 %v1406_v50, %v19845_v56  ;;  %v1408_v39 = vpop.f32.mrb[177].mxu1  ;;  %4640 = vmatmul.mubr.bf16.vlgmr.msra.gmra.mrb[0].mxu0 %v19862_v23 }
 0x2b0   :  { %v1409_v2 = vpop.f32.mrb[178].mxu1  ;;  %5373 = vmatpush1.bf16.msra.mxu0 %v17339_v47  ;;  %4649 = vmatprep.mubr.bf16.mxu0 %v22056_v15  ;;  %v17348_v47 = vld [vmem:[#allocation6 + $0xaf0] ss:$24 sps:$4 sm:$0xff]   ;;  %v17356_v39 = vld [vmem:[#allocation6 + $0xb24] ss:$24 sps:$4 sm:$0xff]  }
 0x2b1   :  { %v1410_v52 = vadd.f32 %v1409_v2, %v19845_v56  ;;  %v1411_v46 = vpop.f32.mrb[179].mxu1  ;;  %5374 = vmatprep.subr.bf16.mxu0 %v17344_v17  ;;  %4465 = vmatpush1.bf16.msra.mxu1 %v17372_v43  ;;  %v1535_v38 = vmax.f32 %v1407_v19, 0.0  ;;  %v17381_v2 = vld [vmem:[#allocation6 + $0x11d0] ss:$24 sps:$4 sm:$0xff]   ;;  %v17389_v43 = vld [vmem:[#allocation6 + $0x1204] ss:$24 sps:$4 sm:$0xff]  }
 0x2b2   :  { %4466 = vmatprep.subr.bf16.mxu1 %v17377_v32 }
 0x2b3   :  { %v1542_v25 = vmax.f32 %v1410_v52, 0.0  ;;  %4364 = vmatmul.mubr.bf16.gmra.mrb[236].mxu1 %v19566_v41  ;;  %v17365_v52 = vld [vmem:[#allocation6 + $0xb54] ss:$24 sps:$4 sm:$0xff]  }
 0x2b4   :  { %4373 = vmatprep.mubr.bf16.mxu1 %v19583_v27  ;;  %5375 = vmatpush1.bf16.msra.mxu0 %v17342_v44  ;;  %v17354_v44 = vld [vmem:[#allocation6 + $0xb20] ss:$24 sps:$4 sm:$0xff]  }
 0x2b5   :  { %v19870_v50 = vpack.c.bf16 %v1542_v25, %v1535_v38  ;;  %5376 = vmatprep.subr.bf16.mxu0 %v17350_v63  ;;  %4467 = vmatpush1.bf16.msra.mxu1 %v17375_v33  ;;  %v17387_v63 = vld [vmem:[#allocation6 + $0x1200] ss:$24 sps:$4 sm:$0xff]   ;;  %v17392_v33 = vld [vmem:[#allocation6 + $0x1234] ss:$24 sps:$4 sm:$0xff]  }
 0x2b6   :  { %v1414_v17 = vpop.f32.mrb[180].mxu1  ;;  %4468 = vmatprep.subr.bf16.mxu1 %v17383_v0 }
 0x2b7   :  { %22057 = vst [vmem:[#allocation98_spill] sm:$0xff] %v19870_v50  ;;  %v1415_v32 = vadd.f32 %v1414_v17, %v19845_v56  ;;  %v1416_v46 = vpop.f32.mrb[181].mxu1  ;;  %4650 = vmatmul.mubr.bf16.gmra.mrb[4].mxu0 %v19870_v50 }
 0x2b8   :  { %v1417_v19 = vpop.f32.mrb[182].mxu1  ;;  %5377 = vmatpush1.bf16.msra.mxu0 %v17348_v47  ;;  %4659 = vmatprep.mubr.bf16.mxu0 %v22056_v15  ;;  %v17363_v47 = vld [vmem:[#allocation6 + $0xb50] ss:$24 sps:$4 sm:$0xff]   ;;  %v17371_v46 = vld [vmem:[#allocation6 + $0xb84] ss:$24 sps:$4 sm:$0xff]  }
 0x2b9   :  { %v1418_v38 = vadd.f32 %v1417_v19, %v19845_v56  ;;  %v1419_v25 = vpop.f32.mrb[183].mxu1  ;;  %5378 = vmatprep.subr.bf16.mxu0 %v17356_v39  ;;  %4469 = vmatpush1.bf16.msra.mxu1 %v17381_v2  ;;  %v1549_v0 = vmax.f32 %v1415_v32, 0.0  ;;  %v17390_v19 = vld [vmem:[#allocation6 + $0x1230] ss:$24 sps:$4 sm:$0xff]   ;;  %v17398_v2 = vld [vmem:[#allocation6 + $0x1264] ss:$24 sps:$4 sm:$0xff]  }
 0x2ba   :  { %4470 = vmatprep.subr.bf16.mxu1 %v17389_v43 }
 0x2bb   :  { %v1556_v18 = vmax.f32 %v1418_v38, 0.0  ;;  %4374 = vmatmul.mubr.bf16.gmra.mrb[240].mxu1 %v19581_v26 }
 0x2bc   :  { %4383 = vmatprep.mubr.bf16.mxu1 %v19598_v51  ;;  %5379 = vmatpush1.bf16.msra.mxu0 %v17354_v44  ;;  %v17369_v44 = vld [vmem:[#allocation6 + $0xb80] ss:$24 sps:$4 sm:$0xff]  }
 0x2bd   :  { %v19878_v17 = vpack.c.bf16 %v1556_v18, %v1549_v0  ;;  %5380 = vmatprep.subr.bf16.mxu0 %v17365_v52  ;;  %4471 = vmatpush1.bf16.msra.mxu1 %v17387_v63  ;;  %v17380_v52 = vld [vmem:[#allocation6 + $0xbb4] ss:$24 sps:$4 sm:$0xff]   ;;  %v17396_v63 = vld [vmem:[#allocation6 + $0x1260] ss:$24 sps:$4 sm:$0xff]  }
 0x2be   :  { %v1422_v39 = vpop.f32.mrb[184].mxu1  ;;  %4472 = vmatprep.subr.bf16.mxu1 %v17392_v33  ;;  %v17404_v33 = vld [vmem:[#allocation6 + $0x1294] ss:$24 sps:$4 sm:$0xff]  }
 0x2bf   :  { %22058 = vst [vmem:[#allocation99_spill] sm:$0xff] %v19878_v17  ;;  %v1423_v43 = vadd.f32 %v1422_v39, %v19845_v56  ;;  %v1424_v25 = vpop.f32.mrb[185].mxu1  ;;  %4660 = vmatmul.mubr.bf16.gmra.mrb[8].mxu0 %v19878_v17  ;;  %v17378_v39 = vld [vmem:[#allocation6 + $0xbb0] ss:$24 sps:$4 sm:$0xff]  }
 0x2c0   :  { %v1425_v32 = vpop.f32.mrb[186].mxu1  ;;  %4669 = vmatprep.mubr.bf16.mxu0 %v22056_v15  ;;  %5381 = vmatpush1.bf16.msra.mxu0 %v17363_v47  ;;  %v17386_v47 = vld [vmem:[#allocation6 + $0xbe4] ss:$24 sps:$4 sm:$0xff]  }
 0x2c1   :  { %v1426_v18 = vadd.f32 %v1425_v32, %v19845_v56  ;;  %v1427_v38 = vpop.f32.mrb[187].mxu1  ;;  %5382 = vmatprep.subr.bf16.mxu0 %v17371_v46  ;;  %4473 = vmatpush1.bf16.msra.mxu1 %v17390_v19  ;;  %v1563_v0 = vmax.f32 %v1423_v43, 0.0  ;;  %v17402_v32 = vld [vmem:[#allocation6 + $0x1290] ss:$24 sps:$4 sm:$0xff]   ;;  %v17407_v19 = vld [vmem:[#allocation6 + $0x12c4] ss:$24 sps:$4 sm:$0xff]  }
 0x2c2   :  { %4474 = vmatprep.subr.bf16.mxu1 %v17398_v2 }
 0x2c3   :  { %v1570_v50 = vmax.f32 %v1426_v18, 0.0  ;;  %4384 = vmatmul.mubr.bf16.gmra.mrb[244].mxu1 %v19596_v14 }
 0x2c4   :  { %4393 = vmatprep.mubr.bf16.mxu1 %v19613_v24  ;;  %5383 = vmatpush1.bf16.msra.mxu0 %v17369_v44  ;;  %v17384_v44 = vld [vmem:[#allocation6 + $0xbe0] ss:$24 sps:$4 sm:$0xff]  }
 0x2c5   :  { %v19886_v25 = vpack.c.bf16 %v1570_v50, %v1563_v0  ;;  %5384 = vmatprep.subr.bf16.mxu0 %v17380_v52  ;;  %4475 = vmatpush1.bf16.msra.mxu1 %v17396_v63  ;;  %v17395_v52 = vld [vmem:[#allocation6 + $0xc14] ss:$24 sps:$4 sm:$0xff]   ;;  %v17405_v63 = vld [vmem:[#allocation6 + $0x12c0] ss:$24 sps:$4 sm:$0xff]  }
 0x2c6   :  { %v1430_v46 = vpop.f32.mrb[188].mxu1  ;;  %4476 = vmatprep.subr.bf16.mxu1 %v17404_v33  ;;  %v17413_v33 = vld [vmem:[#allocation6 + $0x12f4] ss:$24 sps:$4 sm:$0xff]  }
 0x2c7   :  { %22059 = vst [vmem:[#allocation100_spill] sm:$0xff] %v19886_v25  ;;  %v1431_v2 = vadd.f32 %v1430_v46, %v19845_v56  ;;  %v1432_v38 = vpop.f32.mrb[189].mxu1  ;;  %4670 = vmatmul.mubr.bf16.gmra.mrb[12].mxu0 %v19886_v25  ;;  %v22060_v46 = vld [vmem:[#allocation55_spill] sm:$0xff] }
 0x2c8   :  { %v1433_v43 = vpop.f32.mrb[190].mxu1  ;;  %4679 = vmatprep.mubr.bf16.mxu0 %v22056_v15  ;;  %5385 = vmatpush1.bf16.msra.mxu0 %v17378_v39  ;;  %v17393_v38 = vld [vmem:[#allocation6 + $0xc10] ss:$24 sps:$4 sm:$0xff]   ;;  %v17401_v39 = vld [vmem:[#allocation6 + $0xc44] ss:$24 sps:$4 sm:$0xff]  }
 0x2c9   :  { %v1434_v50 = vadd.f32 %v1433_v43, %v19845_v56  ;;  %v1435_v18 = vpop.f32.mrb[191].mxu1  ;;  %5386 = vmatprep.subr.bf16.mxu0 %v17386_v47  ;;  %4477 = vmatpush1.bf16.msra.mxu1 %v17402_v32  ;;  %v1577_v0 = vmax.f32 %v1431_v2, 0.0  ;;  %v17411_v43 = vld [vmem:[#allocation6 + $0x12f0] ss:$24 sps:$4 sm:$0xff]   ;;  %v17419_v32 = vld [vmem:[#allocation6 + $0x1324] ss:$24 sps:$4 sm:$0xff]  }
 0x2ca   :  { %4478 = vmatprep.subr.bf16.mxu1 %v17407_v19 }
 0x2cb   :  { %v1584_v17 = vmax.f32 %v1434_v50, 0.0  ;;  %4394 = vmatmul.mubr.bf16.gmra.mrb[248].mxu1 %v22060_v46 }
 0x2cc   :  { %4403 = vmatprep.mubr.bf16.mxu1 %v19628_v57  ;;  %5387 = vmatpush1.bf16.msra.mxu0 %v17384_v44  ;;  %v17399_v44 = vld [vmem:[#allocation6 + $0xc40] ss:$24 sps:$4 sm:$0xff]  }
 0x2cd   :  { %v19894_v25 = vpack.c.bf16 %v1584_v17, %v1577_v0  ;;  %5388 = vmatprep.subr.bf16.mxu0 %v17395_v52  ;;  %4479 = vmatpush1.bf16.msra.mxu1 %v17405_v63  ;;  %v17410_v52 = vld [vmem:[#allocation6 + $0xc74] ss:$24 sps:$4 sm:$0xff]   ;;  %v17417_v63 = vld [vmem:[#allocation6 + $0x1320] ss:$24 sps:$4 sm:$0xff]  }
 0x2ce   :  { %v1438_v47 = vpop.f32.mrb[192].mxu1  ;;  %4480 = vmatprep.subr.bf16.mxu1 %v17413_v33  ;;  %v17422_v33 = vld [vmem:[#allocation6 + $0x1354] ss:$24 sps:$4 sm:$0xff]  }
 0x2cf   :  { %22061 = vst [vmem:[#allocation101_spill] sm:$0xff] %v19894_v25  ;;  %v1439_v19 = vadd.f32 %v1438_v47, %v19845_v56  ;;  %v1440_v18 = vpop.f32.mrb[193].mxu1  ;;  %4680 = vmatmul.mubr.bf16.gmra.mrb[16].mxu0 %v19894_v25  ;;  %v22062_v47 = vld [vmem:[#allocation57_spill] sm:$0xff] }
 0x2d0   :  { %v1441_v2 = vpop.f32.mrb[194].mxu1  ;;  %4689 = vmatprep.mubr.bf16.mxu0 %v22056_v15  ;;  %5389 = vmatpush1.bf16.msra.mxu0 %v17393_v38  ;;  %v22063_v18 = vld [vmem:[#allocation60_spill] sm:$0xff] }
 0x2d1   :  { %v1442_v17 = vadd.f32 %v1441_v2, %v19845_v56  ;;  %v1443_v50 = vpop.f32.mrb[195].mxu1  ;;  %5390 = vmatprep.subr.bf16.mxu0 %v17401_v39  ;;  %4481 = vmatpush1.bf16.msra.mxu1 %v17411_v43  ;;  %v1591_v0 = vmax.f32 %v1439_v19, 0.0  ;;  %v17408_v25 = vld [vmem:[#allocation6 + $0xc70] ss:$24 sps:$4 sm:$0xff]   ;;  %v17416_v38 = vld [vmem:[#allocation6 + $0xca4] ss:$24 sps:$4 sm:$0xff]  }
 0x2d2   :  { %4482 = vmatprep.subr.bf16.mxu1 %v17419_v32  ;;  %v17420_v2 = vld [vmem:[#allocation6 + $0x1350] ss:$24 sps:$4 sm:$0xff]   ;;  %v17443_v43 = vld [vmem:[#allocation6 + $0xa8c] ss:$24 sps:$4 sm:$0xff]  }
 0x2d3   :  { %v1598_v23 = vmax.f32 %v1442_v17, 0.0  ;;  %4404 = vmatmul.mubr.bf16.gmra.mrb[252].mxu1 %v22062_v47 }
 0x2d4   :  { %4413 = vmatprep.mubr.bf16.mxu1 %v22063_v18  ;;  %5391 = vmatpush1.bf16.msra.mxu0 %v17399_v44  ;;  %v17414_v44 = vld [vmem:[#allocation6 + $0xca0] ss:$24 sps:$4 sm:$0xff]  }
 0x2d5   :  { %v19902_v57 = vpack.c.bf16 %v1598_v23, %v1591_v0  ;;  %5392 = vmatprep.subr.bf16.mxu0 %v17410_v52  ;;  %4483 = vmatpush1.bf16.msra.mxu1 %v17417_v63  ;;  %v17425_v52 = vld [vmem:[#allocation6 + $0xcd4] ss:$24 sps:$4 sm:$0xff]   ;;  %v22065_v0 = vld [vmem:[#allocation59_spill] sm:$0xff] }
 0x2d6   :  { %v1446_v39 = vpop.f32.mrb[196].mxu1  ;;  %4484 = vmatprep.subr.bf16.mxu1 %v17422_v33 }
 0x2d7   :  { %22064 = vst [vmem:[#allocation102_spill] sm:$0xff] %v19902_v57  ;;  %v1447_v32 = vadd.f32 %v1446_v39, %v19845_v56  ;;  %v1448_v50 = vpop.f32.mrb[197].mxu1  ;;  %4690 = vmatmul.mubr.bf16.gmra.mrb[20].mxu0 %v19902_v57  ;;  %v22066_v39 = vld [vmem:[#allocation62_spill] sm:$0xff] }
 0x2d8   :  { %v1449_v19 = vpop.f32.mrb[198].mxu1  ;;  %4699 = vmatprep.mubr.bf16.mxu0 %v22056_v15  ;;  %5393 = vmatpush1.bf16.msra.mxu0 %v17408_v25  ;;  %v17423_v50 = vld [vmem:[#allocation6 + $0xcd0] ss:$24 sps:$4 sm:$0xff]   ;;  %v17428_v25 = vld [vmem:[#allocation6 + $0xd04] ss:$24 sps:$4 sm:$0xff]  }
 0x2d9   :  { %v1450_v23 = vadd.f32 %v1449_v19, %v19845_v56  ;;  %v1451_v17 = vpop.f32.mrb[199].mxu1  ;;  %5394 = vmatprep.subr.bf16.mxu0 %v17416_v38  ;;  %4485 = vmatpush1.bf16.msra.mxu1 %v17420_v2  ;;  %v1605_v63 = vmax.f32 %v1447_v32, 0.0  ;;  %v17426_v2 = vld [vmem:[#allocation6 + $0xd00] ss:$24 sps:$4 sm:$0xff]  }
 0x2da   :  { %4760 = vmatprep.subr.bf16.mxu1 %v17443_v43 }
 0x2db   :  { %v1612_v33 = vmax.f32 %v1450_v23, 0.0  ;;  %4414 = vmatmul.mubr.bf16.gmra.mrb[0].mxu1 %v22065_v0 }
 0x2dc   :  { %4423 = vmatprep.mubr.bf16.mxu1 %v22066_v39  ;;  %5395 = vmatpush1.bf16.msra.mxu0 %v17414_v44  ;;  %v17431_v44 = vld [vmem:[#allocation6 + $0xd34] ss:$24 sps:$4 sm:$0xff]  }
 0x2dd   :  { %v19910_v57 = vpack.c.bf16 %v1612_v33, %v1605_v63  ;;  %5396 = vmatprep.subr.bf16.mxu0 %v17425_v52  ;;  %v22068_v52 = vld [vmem:[#allocation61_spill] sm:$0xff] }
 0x2de   :  { %v1454_v18 = vpop.f32.mrb[200].mxu1 }
 0x2df   :  { %22067 = vst [vmem:[#allocation103_spill] sm:$0xff] %v19910_v57  ;;  %v1455_v19 = vadd.f32 %v1454_v18, %v19845_v56  ;;  %v1456_v17 = vpop.f32.mrb[201].mxu1  ;;  %4700 = vmatmul.mubr.bf16.gmra.mrb[24].mxu0 %v19910_v57  ;;  %v17429_v18 = vld [vmem:[#allocation6 + $0xd30] ss:$24 sps:$4 sm:$0xff]  }
 0x2e0   :  { %v1457_v38 = vpop.f32.mrb[202].mxu1  ;;  %4709 = vmatprep.mubr.bf16.mxu0 %v22056_v15  ;;  %5397 = vmatpush1.bf16.msra.mxu0 %v17423_v50  ;;  %v17434_v17 = vld [vmem:[#allocation6 + $0xd64] ss:$24 sps:$4 sm:$0xff]  }
 0x2e1   :  { %v1458_v43 = vadd.f32 %v1457_v38, %v19845_v56  ;;  %v1459_v32 = vpop.f32.mrb[203].mxu1  ;;  %5398 = vmatprep.subr.bf16.mxu0 %v17428_v25  ;;  %v1619_v23 = vmax.f32 %v1455_v19, 0.0  ;;  %v17432_v19 = vld [vmem:[#allocation6 + $0xd60] ss:$24 sps:$4 sm:$0xff]  }
 0x2e3   :  { %v1626_v63 = vmax.f32 %v1458_v43, 0.0  ;;  %4424 = vmatmul.mubr.bf16.gmra.mrb[4].mxu1 %v22068_v52 }
 0x2e4   :  { %4433 = vmatprep.mubr.bf16.mxu1 %v19673_v29  ;;  %5399 = vmatpush1.bf16.msra.mxu0 %v17426_v2  ;;  %v17437_v2 = vld [vmem:[#allocation6 + $0xd94] ss:$24 sps:$4 sm:$0xff]  }
 0x2e5   :  { %v19918_v33 = vpack.c.bf16 %v1626_v63, %v1619_v23  ;;  %5400 = vmatprep.subr.bf16.mxu0 %v17431_v44  ;;  %v22070_v44 = vld [vmem:[#allocation63_spill] sm:$0xff] }
 0x2e6   :  { %v1462_v57 = vpop.f32.mrb[204].mxu1 }
 0x2e7   :  { %22069 = vst [vmem:[#allocation104_spill] sm:$0xff] %v19918_v33  ;;  %v1463_v50 = vadd.f32 %v1462_v57, %v19845_v56  ;;  %v1464_v39 = vpop.f32.mrb[205].mxu1  ;;  %4710 = vmatmul.mubr.bf16.gmra.mrb[28].mxu0 %v19918_v33 }
 0x2e8   :  { %v1465_v25 = vpop.f32.mrb[206].mxu1  ;;  %4719 = vmatprep.mubr.bf16.mxu0 %v22056_v15  ;;  %5401 = vmatpush1.bf16.msra.mxu0 %v17429_v18 }
 0x2e9   :  { %v1466_v38 = vadd.f32 %v1465_v25, %v19845_v56  ;;  %v1467_v43 = vpop.f32.mrb[207].mxu1  ;;  %5402 = vmatprep.subr.bf16.mxu0 %v17434_v17  ;;  %v1633_v32 = vmax.f32 %v1463_v50, 0.0 }
 0x2eb   :  { %v1640_v23 = vmax.f32 %v1466_v38, 0.0  ;;  %4434 = vmatmul.mubr.bf16.gmra.mrb[8].mxu1 %v22070_v44 }
 0x2ec   :  { %4443 = vmatprep.mubr.bf16.mxu1 %v19684_v49  ;;  %5403 = vmatpush1.bf16.msra.mxu0 %v17432_v19 }
 0x2ed   :  { %v19926_v57 = vpack.c.bf16 %v1640_v23, %v1633_v32  ;;  %5525 = vmatprep.subr.bf16.mxu0 %v17437_v2 }
 0x2ee   :  { %v1470_v39 = vpop.f32.mrb[208].mxu1 }
 0x2ef   :  { %22071 = vst [vmem:[#allocation105_spill] sm:$0xff] %v19926_v57  ;;  %v1471_v63 = vadd.f32 %v1470_v39, %v19845_v56  ;;  %v1472_v18 = vpop.f32.mrb[209].mxu1  ;;  %4720 = vmatmul.mubr.bf16.gmra.mrb[32].mxu0 %v19926_v57 }
 0x2f0   :  { %v1473_v25 = vpop.f32.mrb[210].mxu1  ;;  %4729 = vmatprep.mubr.bf16.mxu0 %v22056_v15  ;;  %v17441_v18 = vld [vmem:[#allocation6 + $0xa88] ss:$24 sps:$4 sm:$0xff]  }
 0x2f1   :  { %v1474_v17 = vadd.f32 %v1473_v25, %v19845_v56  ;;  %v1475_v50 = vpop.f32.mrb[211].mxu1  ;;  %v1647_v38 = vmax.f32 %v1471_v63, 0.0 }
 0x2f3   :  { %v1654_v43 = vmax.f32 %v1474_v17, 0.0  ;;  %4444 = vmatmul.mubr.bf16.gmra.mrb[12].mxu1 %v19682_v48  ;;  %v17449_v17 = vld [vmem:[#allocation6 + $0xabc] ss:$24 sps:$4 sm:$0xff]  }
 0x2f4   :  { %4486 = vmatprep.mubr.bf16.mxu1 %v19727_v11 }
 0x2f5   :  { %v19934_v19 = vpack.c.bf16 %v1654_v43, %v1647_v38  ;;  %v17447_v38 = vld [vmem:[#allocation6 + $0xab8] ss:$24 sps:$4 sm:$0xff]  }
 0x2f6   :  { %v1478_v2 = vpop.f32.mrb[212].mxu1 }
 0x2f7   :  { %22072 = vst [vmem:[#allocation106_spill] sm:$0xff] %v19934_v19  ;;  %v1479_v32 = vadd.f32 %v1478_v2, %v19845_v56  ;;  %v1480_v23 = vpop.f32.mrb[213].mxu1  ;;  %4730 = vmatmul.mubr.bf16.gmra.mrb[36].mxu0 %v19934_v19  ;;  %v17455_v2 = vld [vmem:[#allocation6 + $0xaec] ss:$24 sps:$4 sm:$0xff]  }
 0x2f8   :  { %v1481_v39 = vpop.f32.mrb[214].mxu1  ;;  %4739 = vmatprep.mubr.bf16.mxu0 %v22056_v15 }
 0x2f9   :  { %v1482_v25 = vadd.f32 %v1481_v39, %v19845_v56  ;;  %v1483_v63 = vpop.f32.mrb[215].mxu1  ;;  %v1661_v50 = vmax.f32 %v1479_v32, 0.0  ;;  %v17453_v32 = vld [vmem:[#allocation6 + $0xae8] ss:$24 sps:$4 sm:$0xff]  }
 0x2fb   :  { %v1668_v57 = vmax.f32 %v1482_v25, 0.0  ;;  %4487 = vmatmul.mubr.bf16.vlgmr.msra.gmra.mrb[224].mxu1 %v19725_v58 }
 0x2fc   :  { %4496 = vmatprep.mubr.bf16.mxu1 %v19737_v55  ;;  %4761 = vmatpush1.bf16.msra.mxu1 %v17441_v18  ;;  %v17458_v18 = vld [vmem:[#allocation6 + $0xb1c] ss:$24 sps:$4 sm:$0xff]  }
 0x2fd   :  { %v19942_v43 = vpack.c.bf16 %v1668_v57, %v1661_v50  ;;  %4762 = vmatprep.subr.bf16.mxu1 %v17449_v17 }
 0x2fe   :  { %v1486_v23 = vpop.f32.mrb[216].mxu1 }
 0x2ff   :  { %22073 = vst [vmem:[#allocation107_spill] sm:$0xff] %v19942_v43  ;;  %v1487_v19 = vadd.f32 %v1486_v23, %v19845_v56  ;;  %v1488_v33 = vpop.f32.mrb[217].mxu1  ;;  %4740 = vmatmul.mubr.bf16.gmra.mrb[40].mxu0 %v19942_v43  ;;  %v17464_v23 = vld [vmem:[#allocation6 + $0xb4c] ss:$24 sps:$4 sm:$0xff]   ;;  %v17492_v43 = vld [vmem:[#allocation6 + $0xc68] ss:$24 sps:$4 sm:$0xff]  }
 0x300   :  { %v1489_v39 = vpop.f32.mrb[218].mxu1  ;;  %4749 = vmatprep.mubr.bf16.mxu0 %v22056_v15  ;;  %4763 = vmatpush1.bf16.msra.mxu1 %v17447_v38  ;;  %v17456_v33 = vld [vmem:[#allocation6 + $0xb18] ss:$24 sps:$4 sm:$0xff]   ;;  %v17462_v38 = vld [vmem:[#allocation6 + $0xb48] ss:$24 sps:$4 sm:$0xff]  }
 0x301   :  { %v1490_v25 = vadd.f32 %v1489_v39, %v19845_v56  ;;  %v1491_v63 = vpop.f32.mrb[219].mxu1  ;;  %4764 = vmatprep.subr.bf16.mxu1 %v17455_v2  ;;  %v1675_v57 = vmax.f32 %v1487_v19, 0.0  ;;  %v17470_v2 = vld [vmem:[#allocation6 + $0xb7c] ss:$24 sps:$4 sm:$0xff]   ;;  %v17435_v19 = vld [vmem:[#allocation6 + $0xd90] ss:$24 sps:$4 sm:$0xff]  }
 0x302   :  { %v17440_v39 = vld [vmem:[#allocation6 + $0xdc4] ss:$24 sps:$4 sm:$0xff]   ;;  %v17438_v63 = vld [vmem:[#allocation6 + $0xdc0] ss:$24 sps:$4 sm:$0xff]  }
 0x303   :  { %v1682_v50 = vmax.f32 %v1490_v25, 0.0  ;;  %4497 = vmatmul.mubr.bf16.gmra.mrb[228].mxu1 %v19735_v6  ;;  %v17473_v25 = vld [vmem:[#allocation6 + $0xbac] ss:$24 sps:$4 sm:$0xff]   ;;  %v17500_v15 = vld [vmem:[#allocation6 + $0xc9c] ss:$24 sps:$4 sm:$0xff]  }
 0x304   :  { %4506 = vmatprep.mubr.bf16.mxu1 %v19747_v4  ;;  %4765 = vmatpush1.bf16.msra.mxu1 %v17453_v32  ;;  %v17468_v32 = vld [vmem:[#allocation6 + $0xb78] ss:$24 sps:$4 sm:$0xff]  }
 0x305   :  { %v19950_v17 = vpack.c.bf16 %v1682_v50, %v1675_v57  ;;  %4766 = vmatprep.subr.bf16.mxu1 %v17458_v18  ;;  %v17446_v18 = vld [vmem:[#allocation6 + $0xdf4] ss:$24 sps:$4 sm:$0xff]   ;;  %v17471_v57 = vld [vmem:[#allocation6 + $0xba8] ss:$24 sps:$4 sm:$0xff]  }
 0x306   :  { %v17479_v50 = vld [vmem:[#allocation6 + $0xbdc] ss:$24 sps:$4 sm:$0xff]  }
 0x307   :  { %22074 = vst [vmem:[#allocation108_spill] sm:$0xff] %v19950_v17  ;;  %4750 = vmatmul.mubr.bf16.gmra.mrb[44].mxu0 %v19950_v17  ;;  %v17488_v17 = vld [vmem:[#allocation6 + $0xc3c] ss:$24 sps:$4 sm:$0xff]  }
 0x308   :  { %5404 = vmatprep.mubr.bf16.mxu0 %v19274_v13  ;;  %4767 = vmatpush1.bf16.msra.mxu1 %v17456_v33  ;;  %v17444_v33 = vld [vmem:[#allocation6 + $0xdf0] ss:$24 sps:$4 sm:$0xff]  }
 0x309   :  { %4768 = vmatprep.subr.bf16.mxu1 %v17464_v23  ;;  %v17452_v23 = vld [vmem:[#allocation6 + $0xe24] ss:$24 sps:$4 sm:$0xff]  }
 0x30b   :  { %4507 = vmatmul.mubr.bf16.gmra.mrb[232].mxu1 %v19745_v34 }
 0x30c   :  { %4516 = vmatprep.mubr.bf16.mxu1 %v19757_v61  ;;  %4769 = vmatpush1.bf16.msra.mxu1 %v17462_v38  ;;  %v17477_v38 = vld [vmem:[#allocation6 + $0xbd8] ss:$24 sps:$4 sm:$0xff]  }
 0x30d   :  { %4770 = vmatprep.subr.bf16.mxu1 %v17470_v2  ;;  %v17485_v2 = vld [vmem:[#allocation6 + $0xc0c] ss:$24 sps:$4 sm:$0xff]  }
 0x30f   :  { %5405 = vmatmul.mubr.bf16.vlgmr.msra.gmra.mrb[48].mxu0 %v19271_v12 }
 0x310   :  { %5414 = vmatprep.mubr.bf16.mxu0 %v19291_v31  ;;  %5526 = vmatpush1.bf16.msra.mxu0 %v17435_v19  ;;  %v22075_v19 = vld [vmem:[#allocation20_spill] sm:$0xff] }
 0x311   :  { %5527 = vmatprep.subr.bf16.mxu0 %v17440_v39  ;;  %4771 = vmatpush1.bf16.msra.mxu1 %v17468_v32  ;;  %v17450_v39 = vld [vmem:[#allocation6 + $0xe20] ss:$24 sps:$4 sm:$0xff]   ;;  %v17461_v32 = vld [vmem:[#allocation6 + $0xe54] ss:$24 sps:$4 sm:$0xff]  }
 0x312   :  { %4772 = vmatprep.subr.bf16.mxu1 %v17473_v25  ;;  %v17483_v25 = vld [vmem:[#allocation6 + $0xc08] ss:$24 sps:$4 sm:$0xff]  }
 0x313   :  { %4517 = vmatmul.mubr.bf16.gmra.mrb[236].mxu1 %v19755_v60 }
 0x314   :  { %4526 = vmatprep.mubr.bf16.mxu1 %v19767_v36  ;;  %5528 = vmatpush1.bf16.msra.mxu0 %v17438_v63  ;;  %v17459_v63 = vld [vmem:[#allocation6 + $0xe50] ss:$24 sps:$4 sm:$0xff]  }
 0x315   :  { %5529 = vmatprep.subr.bf16.mxu0 %v17446_v18  ;;  %4773 = vmatpush1.bf16.msra.mxu1 %v17471_v57  ;;  %v17467_v18 = vld [vmem:[#allocation6 + $0xe84] ss:$24 sps:$4 sm:$0xff]   ;;  %v17486_v57 = vld [vmem:[#allocation6 + $0xc38] ss:$24 sps:$4 sm:$0xff]  }
 0x316   :  { %4774 = vmatprep.subr.bf16.mxu1 %v17479_v50  ;;  %v17494_v50 = vld [vmem:[#allocation6 + $0xc6c] ss:$24 sps:$4 sm:$0xff]  }
 0x317   :  { %5415 = vmatmul.mubr.bf16.gmra.mrb[52].mxu0 %v19288_v30 }
 0x318   :  { %5424 = vmatprep.mubr.bf16.mxu0 %v22075_v19  ;;  %5530 = vmatpush1.bf16.msra.mxu0 %v17444_v33  ;;  %v22076_v33 = vld [vmem:[#allocation19_spill] sm:$0xff] }
 0x319   :  { %5531 = vmatprep.subr.bf16.mxu0 %v17452_v23  ;;  %4775 = vmatpush1.bf16.msra.mxu1 %v17477_v38  ;;  %v22077_v23 = vld [vmem:[#allocation22_spill] sm:$0xff] }
 0x31a   :  { %4776 = vmatprep.subr.bf16.mxu1 %v17485_v2  ;;  %v17465_v38 = vld [vmem:[#allocation6 + $0xe80] ss:$24 sps:$4 sm:$0xff]   ;;  %v17476_v2 = vld [vmem:[#allocation6 + $0xeb4] ss:$24 sps:$4 sm:$0xff]  }
 0x31b   :  { %4527 = vmatmul.mubr.bf16.gmra.mrb[240].mxu1 %v19765_v16 }
 0x31c   :  { %4536 = vmatprep.mubr.bf16.mxu1 %v19777_v45  ;;  %5532 = vmatpush1.bf16.msra.mxu0 %v17450_v39  ;;  %v17474_v39 = vld [vmem:[#allocation6 + $0xeb0] ss:$24 sps:$4 sm:$0xff]  }
 0x31d   :  { %5533 = vmatprep.subr.bf16.mxu0 %v17461_v32  ;;  %4777 = vmatpush1.bf16.msra.mxu1 %v17483_v25  ;;  %v17498_v32 = vld [vmem:[#allocation6 + $0xc98] ss:$24 sps:$4 sm:$0xff]   ;;  %v17503_v25 = vld [vmem:[#allocation6 + $0xccc] ss:$24 sps:$4 sm:$0xff]  }
 0x31e   :  { %4778 = vmatprep.subr.bf16.mxu1 %v17488_v17  ;;  %v17482_v17 = vld [vmem:[#allocation6 + $0xee4] ss:$24 sps:$4 sm:$0xff]  }
 0x31f   :  { %5425 = vmatmul.mubr.bf16.gmra.mrb[56].mxu0 %v22076_v33 }
 0x320   :  { %5434 = vmatprep.mubr.bf16.mxu0 %v22077_v23  ;;  %5534 = vmatpush1.bf16.msra.mxu0 %v17459_v63  ;;  %v22078_v63 = vld [vmem:[#allocation21_spill] sm:$0xff] }
 0x321   :  { %5535 = vmatprep.subr.bf16.mxu0 %v17467_v18  ;;  %4779 = vmatpush1.bf16.msra.mxu1 %v17486_v57  ;;  %v22079_v18 = vld [vmem:[#allocation24_spill] sm:$0xff]  ;;  %v17480_v57 = vld [vmem:[#allocation6 + $0xee0] ss:$24 sps:$4 sm:$0xff]  }
 0x322   :  { %4780 = vmatprep.subr.bf16.mxu1 %v17494_v50  ;;  %v17491_v50 = vld [vmem:[#allocation6 + $0xf14] ss:$24 sps:$4 sm:$0xff]  }
 0x323   :  { %4537 = vmatmul.mubr.bf16.gmra.mrb[244].mxu1 %v19775_v35  ;;  %v17501_v35 = vld [vmem:[#allocation6 + $0xcc8] ss:$24 sps:$4 sm:$0xff]  }
 0x324   :  { %4546 = vmatprep.mubr.bf16.mxu1 %v19787_v7  ;;  %5536 = vmatpush1.bf16.msra.mxu0 %v17465_v38  ;;  %v17509_v7 = vld [vmem:[#allocation6 + $0xcfc] ss:$24 sps:$4 sm:$0xff]   ;;  %v17507_v38 = vld [vmem:[#allocation6 + $0xcf8] ss:$24 sps:$4 sm:$0xff]  }
 0x325   :  { %5537 = vmatprep.subr.bf16.mxu0 %v17476_v2  ;;  %4781 = vmatpush1.bf16.msra.mxu1 %v17492_v43  ;;  %v17489_v43 = vld [vmem:[#allocation6 + $0xf10] ss:$24 sps:$4 sm:$0xff]   ;;  %v17515_v2 = vld [vmem:[#allocation6 + $0xd2c] ss:$24 sps:$4 sm:$0xff]  }
 0x326   :  { %4782 = vmatprep.subr.bf16.mxu1 %v17500_v15  ;;  %v17497_v15 = vld [vmem:[#allocation6 + $0xf44] ss:$24 sps:$4 sm:$0xff]  }
 0x327   :  { %5435 = vmatmul.mubr.bf16.gmra.mrb[60].mxu0 %v22078_v63 }
 0x328   :  { %5444 = vmatprep.mubr.bf16.mxu0 %v22079_v18  ;;  %5538 = vmatpush1.bf16.msra.mxu0 %v17474_v39  ;;  %v22080_v39 = vld [vmem:[#allocation23_spill] sm:$0xff] }
 0x329   :  { %5539 = vmatprep.subr.bf16.mxu0 %v17482_v17  ;;  %4783 = vmatpush1.bf16.msra.mxu1 %v17498_v32  ;;  %v22081_v17 = vld [vmem:[#allocation26_spill] sm:$0xff] }
 0x32a   :  { %4784 = vmatprep.subr.bf16.mxu1 %v17503_v25  ;;  %v17495_v32 = vld [vmem:[#allocation6 + $0xf40] ss:$24 sps:$4 sm:$0xff]   ;;  %v17506_v25 = vld [vmem:[#allocation6 + $0xf74] ss:$24 sps:$4 sm:$0xff]  }
 0x32b   :  { %4547 = vmatmul.mubr.bf16.gmra.mrb[248].mxu1 %v19785_v62  ;;  %v17513_v62 = vld [vmem:[#allocation6 + $0xd28] ss:$24 sps:$4 sm:$0xff]  }
 0x32c   :  { %4556 = vmatprep.mubr.bf16.mxu1 %v19797_v28  ;;  %5540 = vmatpush1.bf16.msra.mxu0 %v17480_v57  ;;  %v17518_v28 = vld [vmem:[#allocation6 + $0xd5c] ss:$24 sps:$4 sm:$0xff]   ;;  %v17516_v57 = vld [vmem:[#allocation6 + $0xd58] ss:$24 sps:$4 sm:$0xff]  }
 0x32d   :  { %5541 = vmatprep.subr.bf16.mxu0 %v17491_v50  ;;  %4785 = vmatpush1.bf16.msra.mxu1 %v17501_v35  ;;  %v17504_v35 = vld [vmem:[#allocation6 + $0xf70] ss:$24 sps:$4 sm:$0xff]   ;;  %v17539_v50 = vld [vmem:[#allocation6 + $0xd8c] ss:$24 sps:$4 sm:$0xff]  }
 0x32e   :  { %4786 = vmatprep.subr.bf16.mxu1 %v17509_v7  ;;  %v17512_v7 = vld [vmem:[#allocation6 + $0xfa4] ss:$24 sps:$4 sm:$0xff]  }
 0x32f   :  { %5445 = vmatmul.mubr.bf16.gmra.mrb[64].mxu0 %v22080_v39 }
 0x330   :  { %5454 = vmatprep.mubr.bf16.mxu0 %v22081_v17  ;;  %5542 = vmatpush1.bf16.msra.mxu0 %v17489_v43  ;;  %v22082_v43 = vld [vmem:[#allocation25_spill] sm:$0xff] }
 0x331   :  { %5543 = vmatprep.subr.bf16.mxu0 %v17497_v15  ;;  %4787 = vmatpush1.bf16.msra.mxu1 %v17507_v38  ;;  %v22083_v15 = vld [vmem:[#allocation28_spill] sm:$0xff]  ;;  %v17510_v38 = vld [vmem:[#allocation6 + $0xfa0] ss:$24 sps:$4 sm:$0xff]  }
 0x332   :  { %4788 = vmatprep.subr.bf16.mxu1 %v17515_v2  ;;  %v17521_v2 = vld [vmem:[#allocation6 + $0xfd4] ss:$24 sps:$4 sm:$0xff]  }
 0x333   :  { %4557 = vmatmul.mubr.bf16.gmra.mrb[252].mxu1 %v19795_v20  ;;  %v22088_v20 = vld [vmem:[#allocation34_spill] sm:$0xff] }
 0x334   :  { %4566 = vmatprep.mubr.bf16.mxu1 %v19807_v22  ;;  %5544 = vmatpush1.bf16.msra.mxu0 %v17495_v32  ;;  %v17519_v32 = vld [vmem:[#allocation6 + $0xfd0] ss:$24 sps:$4 sm:$0xff]   ;;  %v17522_v22 = vld [vmem:[#allocation6 + $0x1000] ss:$24 sps:$4 sm:$0xff]  }
 0x335   :  { %5545 = vmatprep.subr.bf16.mxu0 %v17506_v25  ;;  %4789 = vmatpush1.bf16.msra.mxu1 %v17513_v62  ;;  %v17524_v62 = vld [vmem:[#allocation6 + $0x1004] ss:$24 sps:$4 sm:$0xff]  }
 0x336   :  { %4790 = vmatprep.subr.bf16.mxu1 %v17518_v28  ;;  %v22084_v28 = vld [vmem:[#allocation27_spill] sm:$0xff]  ;;  %v22085_v25 = vld [vmem:[#allocation30_spill] sm:$0xff] }
 0x337   :  { %5455 = vmatmul.mubr.bf16.gmra.mrb[68].mxu0 %v22082_v43 }
 0x338   :  { %5464 = vmatprep.mubr.bf16.mxu0 %v22083_v15  ;;  %5546 = vmatpush1.bf16.msra.mxu0 %v17504_v35  ;;  %v17527_v35 = vld [vmem:[#allocation6 + $0x1034] ss:$24 sps:$4 sm:$0xff]  }
 0x339   :  { %5547 = vmatprep.subr.bf16.mxu0 %v17512_v7  ;;  %4791 = vmatpush1.bf16.msra.mxu1 %v17516_v57  ;;  %v17525_v7 = vld [vmem:[#allocation6 + $0x1030] ss:$24 sps:$4 sm:$0xff]   ;;  %v17530_v57 = vld [vmem:[#allocation6 + $0x1064] ss:$24 sps:$4 sm:$0xff]  }
 0x33a   :  { %4913 = vmatprep.subr.bf16.mxu1 %v17539_v50  ;;  %v22086_v50 = vld [vmem:[#allocation32_spill] sm:$0xff] }
 0x33b   :  { %4567 = vmatmul.mubr.bf16.gmra.mrb[0].mxu1 %v19805_v42 }
 0x33c   :  { %4576 = vmatprep.mubr.bf16.mxu1 %v19817_v40  ;;  %5548 = vmatpush1.bf16.msra.mxu0 %v17510_v38  ;;  %v17528_v38 = vld [vmem:[#allocation6 + $0x1060] ss:$24 sps:$4 sm:$0xff]  }
 0x33d   :  { %5549 = vmatprep.subr.bf16.mxu0 %v17521_v2  ;;  %v1494_v2 = vpop.f32.mrb[220].mxu1 }
 0x33e   :  { %v1496_v40 = vpop.f32.mrb[221].mxu1 }
 0x33f   :  { %5465 = vmatmul.mubr.bf16.gmra.mrb[72].mxu0 %v22084_v28  ;;  %v22090_v40 = vld [vmem:[#allocation33_spill] sm:$0xff] }
 0x340   :  { %5474 = vmatprep.mubr.bf16.mxu0 %v22085_v25  ;;  %5550 = vmatpush1.bf16.msra.mxu0 %v17519_v32  ;;  %v17533_v32 = vld [vmem:[#allocation6 + $0x1094] ss:$24 sps:$4 sm:$0xff]  }
 0x341   :  { %5551 = vmatprep.subr.bf16.mxu0 %v17524_v62  ;;  %v1495_v62 = vadd.f32 %v1494_v2, %v19845_v56  ;;  %v22091_v2 = vld [vmem:[#allocation36_spill] sm:$0xff] }
 0x343   :  { %4577 = vmatmul.mubr.bf16.gmra.mrb[4].mxu1 %v19815_v53  ;;  %v1497_v53 = vpop.f32.mrb[222].mxu1 }
 0x344   :  { %4586 = vmatprep.mubr.bf16.mxu1 %v19827_v3  ;;  %5552 = vmatpush1.bf16.msra.mxu0 %v17522_v22  ;;  %v1689_v22 = vmax.f32 %v1495_v62, 0.0  ;;  %v1499_v3 = vpop.f32.mrb[223].mxu1  ;;  %v17545_v62 = vld [vmem:[#allocation6 + $0xdbc] ss:$24 sps:$4 sm:$0xff]  }
 0x345   :  { %5553 = vmatprep.subr.bf16.mxu0 %v17527_v35  ;;  %v1498_v35 = vadd.f32 %v1497_v53, %v19845_v56  ;;  %v17543_v53 = vld [vmem:[#allocation6 + $0xdb8] ss:$24 sps:$4 sm:$0xff]   ;;  %v17551_v3 = vld [vmem:[#allocation6 + $0xdec] ss:$24 sps:$4 sm:$0xff]  }
 0x346   :  { %v22093_v56 = vld [vmem:[#allocation38_spill] sm:$0xff] }
 0x347   :  { %5475 = vmatmul.mubr.bf16.gmra.mrb[76].mxu0 %v19387_v37  ;;  %v1696_v42 = vmax.f32 %v1498_v35, 0.0  ;;  %v17552_v35 = vld [vmem:[#allocation6 + $0xe18] ss:$24 sps:$4 sm:$0xff]  }
 0x348   :  { %5484 = vmatprep.mubr.bf16.mxu0 %v22086_v50  ;;  %5554 = vmatpush1.bf16.msra.mxu0 %v17525_v7  ;;  %v22087_v7 = vld [vmem:[#allocation31_spill] sm:$0xff] }
 0x349   :  { %5555 = vmatprep.subr.bf16.mxu0 %v17530_v57  ;;  %v19992_v57 = vpack.c.bf16 %v1696_v42, %v1689_v22  ;;  %v22092_v42 = vld [vmem:[#allocation35_spill] sm:$0xff] }
 0x34a   :  { %v17554_v22 = vld [vmem:[#allocation6 + $0xe1c] ss:$24 sps:$4 sm:$0xff]  }
 0x34b   :  { %4587 = vmatmul.mubr.bf16.gmra.mrb[8].mxu1 %v19825_v54  ;;  %22089 = vst [vmem:[#allocation109_spill] sm:$0xff] %v19992_v57  ;;  %v17560_v57 = vld [vmem:[#allocation6 + $0xe4c] ss:$24 sps:$4 sm:$0xff]  }
 0x34c   :  { %4596 = vmatprep.mubr.bf16.mxu1 %v19837_v9  ;;  %5556 = vmatpush1.bf16.msra.mxu0 %v17528_v38  ;;  %v17537_v38 = vld [vmem:[#allocation6 + $0xd88] ss:$24 sps:$4 sm:$0xff]  }
 0x34d   :  { %5678 = vmatprep.subr.bf16.mxu0 %v17533_v32  ;;  %v17549_v32 = vld [vmem:[#allocation6 + $0xde8] ss:$24 sps:$4 sm:$0xff]  }
 0x34f   :  { %5485 = vmatmul.mubr.bf16.gmra.mrb[80].mxu0 %v22087_v7 }
 0x350   :  { %5494 = vmatprep.mubr.bf16.mxu0 %v22088_v20 }
 0x353   :  { %4597 = vmatmul.mubr.bf16.gmra.mrb[12].mxu1 %v19835_v59 }
 0x354   :  { %4792 = vmatprep.mubr.bf16.mxu1 %v19274_v13  ;;  %v17581_v13 = vld [vmem:[#allocation6 + $0xf0c] ss:$24 sps:$4 sm:$0xff]  }
 0x357   :  { %5495 = vmatmul.mubr.bf16.gmra.mrb[84].mxu0 %v22090_v40 }
 0x358   :  { %5504 = vmatprep.mubr.bf16.mxu0 %v22091_v2 }
 0x35b   :  { %4793 = vmatmul.mubr.bf16.vlgmr.msra.gmra.mrb[16].mxu1 %v19271_v12  ;;  %v17566_v12 = vld [vmem:[#allocation6 + $0xe7c] ss:$24 sps:$4 sm:$0xff]  }
 0x35c   :  { %4802 = vmatprep.mubr.bf16.mxu1 %v19291_v31  ;;  %4914 = vmatpush1.bf16.msra.mxu1 %v17537_v38  ;;  %v22094_v38 = vld [vmem:[#allocation37_spill] sm:$0xff]  ;;  %v17558_v31 = vld [vmem:[#allocation6 + $0xe48] ss:$24 sps:$4 sm:$0xff]  }
 0x35d   :  { %4915 = vmatprep.subr.bf16.mxu1 %v17545_v62  ;;  %v22095_v62 = vld [vmem:[#allocation44_spill] sm:$0xff] }
 0x35f   :  { %5505 = vmatmul.mubr.bf16.gmra.mrb[88].mxu0 %v22092_v42 }
 0x360   :  { %5514 = vmatprep.mubr.bf16.mxu0 %v22093_v56  ;;  %4916 = vmatpush1.bf16.msra.mxu1 %v17543_v53  ;;  %v17531_v53 = vld [vmem:[#allocation6 + $0x1090] ss:$24 sps:$4 sm:$0xff]  }
 0x361   :  { %4917 = vmatprep.subr.bf16.mxu1 %v17551_v3  ;;  %v17536_v3 = vld [vmem:[#allocation6 + $0x10c4] ss:$24 sps:$4 sm:$0xff]  }
 0x363   :  { %4803 = vmatmul.mubr.bf16.gmra.mrb[20].mxu1 %v19288_v30  ;;  %v17534_v30 = vld [vmem:[#allocation6 + $0x10c0] ss:$24 sps:$4 sm:$0xff]  }
 0x364   :  { %4812 = vmatprep.mubr.bf16.mxu1 %v22075_v19  ;;  %4918 = vmatpush1.bf16.msra.mxu1 %v17549_v32  ;;  %v17564_v19 = vld [vmem:[#allocation6 + $0xe78] ss:$24 sps:$4 sm:$0xff]   ;;  %v17569_v32 = vld [vmem:[#allocation6 + $0xeac] ss:$24 sps:$4 sm:$0xff]  }
 0x365   :  { %4919 = vmatprep.subr.bf16.mxu1 %v17554_v22  ;;  %v22096_v22 = vld [vmem:[#allocation46_spill] sm:$0xff] }
 0x367   :  { %5515 = vmatmul.mubr.bf16.gmra.mrb[92].mxu0 %v22094_v38 }
 0x368   :  { %5557 = vmatprep.mubr.bf16.mxu0 %v22095_v62  ;;  %4920 = vmatpush1.bf16.msra.mxu1 %v17552_v35  ;;  %v17542_v35 = vld [vmem:[#allocation6 + $0x10f4] ss:$24 sps:$4 sm:$0xff]  }
 0x369   :  { %4921 = vmatprep.subr.bf16.mxu1 %v17560_v57  ;;  %v17567_v57 = vld [vmem:[#allocation6 + $0xea8] ss:$24 sps:$4 sm:$0xff]  }
 0x36b   :  { %4813 = vmatmul.mubr.bf16.gmra.mrb[24].mxu1 %v22076_v33  ;;  %v17575_v33 = vld [vmem:[#allocation6 + $0xedc] ss:$24 sps:$4 sm:$0xff]  }
 0x36c   :  { %4822 = vmatprep.mubr.bf16.mxu1 %v22077_v23  ;;  %4922 = vmatpush1.bf16.msra.mxu1 %v17558_v31  ;;  %v17540_v31 = vld [vmem:[#allocation6 + $0x10f0] ss:$24 sps:$4 sm:$0xff]  }
 0x36d   :  { %4923 = vmatprep.subr.bf16.mxu1 %v17566_v12  ;;  %v17548_v12 = vld [vmem:[#allocation6 + $0x1124] ss:$24 sps:$4 sm:$0xff]   ;;  %v17573_v23 = vld [vmem:[#allocation6 + $0xed8] ss:$24 sps:$4 sm:$0xff]  }
 0x36f   :  { %5558 = vmatmul.mubr.bf16.vlgmr.msra.gmra.mrb[48].mxu0 %v19521_v21 }
 0x370   :  { %5567 = vmatprep.mubr.bf16.mxu0 %v22096_v22  ;;  %5679 = vmatpush1.bf16.msra.mxu0 %v17531_v53  ;;  %v17557_v53 = vld [vmem:[#allocation6 + $0x1154] ss:$24 sps:$4 sm:$0xff]  }
 0x371   :  { %5680 = vmatprep.subr.bf16.mxu0 %v17536_v3  ;;  %4924 = vmatpush1.bf16.msra.mxu1 %v17564_v19  ;;  %v17546_v19 = vld [vmem:[#allocation6 + $0x1120] ss:$24 sps:$4 sm:$0xff]  }
 0x372   :  { %4925 = vmatprep.subr.bf16.mxu1 %v17569_v32  ;;  %v17579_v3 = vld [vmem:[#allocation6 + $0xf08] ss:$24 sps:$4 sm:$0xff]   ;;  %v17584_v32 = vld [vmem:[#allocation6 + $0xf3c] ss:$24 sps:$4 sm:$0xff]  }
 0x373   :  { %4823 = vmatmul.mubr.bf16.gmra.mrb[28].mxu1 %v22078_v63 }
 0x374   :  { %4832 = vmatprep.mubr.bf16.mxu1 %v22079_v18  ;;  %5681 = vmatpush1.bf16.msra.mxu0 %v17534_v30  ;;  %v17555_v30 = vld [vmem:[#allocation6 + $0x1150] ss:$24 sps:$4 sm:$0xff]  }
 0x375   :  { %5682 = vmatprep.subr.bf16.mxu0 %v17542_v35  ;;  %4926 = vmatpush1.bf16.msra.mxu1 %v17567_v57  ;;  %v17582_v35 = vld [vmem:[#allocation6 + $0xf38] ss:$24 sps:$4 sm:$0xff]   ;;  %v17590_v57 = vld [vmem:[#allocation6 + $0xf6c] ss:$24 sps:$4 sm:$0xff]  }
 0x376   :  { %4927 = vmatprep.subr.bf16.mxu1 %v17575_v33  ;;  %v17563_v33 = vld [vmem:[#allocation6 + $0x1184] ss:$24 sps:$4 sm:$0xff]  }
 0x377   :  { %5568 = vmatmul.mubr.bf16.gmra.mrb[52].mxu0 %v19536_v1 }
 0x378   :  { %5577 = vmatprep.mubr.bf16.mxu0 %v19553_v8  ;;  %5683 = vmatpush1.bf16.msra.mxu0 %v17540_v31  ;;  %v17588_v31 = vld [vmem:[#allocation6 + $0xf68] ss:$24 sps:$4 sm:$0xff]  }
 0x379   :  { %5684 = vmatprep.subr.bf16.mxu0 %v17548_v12  ;;  %4928 = vmatpush1.bf16.msra.mxu1 %v17573_v23  ;;  %v17561_v23 = vld [vmem:[#allocation6 + $0x1180] ss:$24 sps:$4 sm:$0xff]   ;;  %v17596_v12 = vld [vmem:[#allocation6 + $0xf9c] ss:$24 sps:$4 sm:$0xff]  }
 0x37a   :  { %4929 = vmatprep.subr.bf16.mxu1 %v17581_v13  ;;  %v17572_v13 = vld [vmem:[#allocation6 + $0x11b4] ss:$24 sps:$4 sm:$0xff]  }
 0x37b   :  { %4833 = vmatmul.mubr.bf16.gmra.mrb[32].mxu1 %v22080_v39 }
 0x37c   :  { %4842 = vmatprep.mubr.bf16.mxu1 %v22081_v17  ;;  %5685 = vmatpush1.bf16.msra.mxu0 %v17546_v19  ;;  %v17570_v19 = vld [vmem:[#allocation6 + $0x11b0] ss:$24 sps:$4 sm:$0xff]  }
 0x37d   :  { %5686 = vmatprep.subr.bf16.mxu0 %v17557_v53  ;;  %4930 = vmatpush1.bf16.msra.mxu1 %v17579_v3  ;;  %v17578_v53 = vld [vmem:[#allocation6 + $0x11e4] ss:$24 sps:$4 sm:$0xff]   ;;  %v17594_v3 = vld [vmem:[#allocation6 + $0xf98] ss:$24 sps:$4 sm:$0xff]  }
 0x37e   :  { %4931 = vmatprep.subr.bf16.mxu1 %v17584_v32  ;;  %v17599_v32 = vld [vmem:[#allocation6 + $0xfcc] ss:$24 sps:$4 sm:$0xff]  }
 0x37f   :  { %5578 = vmatmul.mubr.bf16.gmra.mrb[56].mxu0 %v19551_v10 }
 0x380   :  { %5587 = vmatprep.mubr.bf16.mxu0 %v19568_v5  ;;  %5687 = vmatpush1.bf16.msra.mxu0 %v17555_v30  ;;  %v17576_v30 = vld [vmem:[#allocation6 + $0x11e0] ss:$24 sps:$4 sm:$0xff]  }
 0x381   :  { %5688 = vmatprep.subr.bf16.mxu0 %v17563_v33  ;;  %4932 = vmatpush1.bf16.msra.mxu1 %v17582_v35  ;;  %v17587_v33 = vld [vmem:[#allocation6 + $0x1214] ss:$24 sps:$4 sm:$0xff]   ;;  %v17597_v35 = vld [vmem:[#allocation6 + $0xfc8] ss:$24 sps:$4 sm:$0xff]  }
 0x382   :  { %4933 = vmatprep.subr.bf16.mxu1 %v17590_v57  ;;  %v17605_v57 = vld [vmem:[#allocation6 + $0xffc] ss:$24 sps:$4 sm:$0xff]  }
 0x383   :  { %4843 = vmatmul.mubr.bf16.gmra.mrb[36].mxu1 %v22082_v43 }
 0x384   :  { %4852 = vmatprep.mubr.bf16.mxu1 %v22083_v15  ;;  %5689 = vmatpush1.bf16.msra.mxu0 %v17561_v23  ;;  %v17585_v23 = vld [vmem:[#allocation6 + $0x1210] ss:$24 sps:$4 sm:$0xff]  }
 0x385   :  { %5690 = vmatprep.subr.bf16.mxu0 %v17572_v13  ;;  %4934 = vmatpush1.bf16.msra.mxu1 %v17588_v31  ;;  %v17593_v13 = vld [vmem:[#allocation6 + $0x1244] ss:$24 sps:$4 sm:$0xff]   ;;  %v17603_v31 = vld [vmem:[#allocation6 + $0xff8] ss:$24 sps:$4 sm:$0xff]  }
 0x386   :  { %4935 = vmatprep.subr.bf16.mxu1 %v17596_v12  ;;  %v17611_v12 = vld [vmem:[#allocation6 + $0x102c] ss:$24 sps:$4 sm:$0xff]  }
 0x387   :  { %5588 = vmatmul.mubr.bf16.gmra.mrb[60].mxu0 %v19566_v41 }
 0x388   :  { %5597 = vmatprep.mubr.bf16.mxu0 %v19583_v27  ;;  %5691 = vmatpush1.bf16.msra.mxu0 %v17570_v19  ;;  %v17591_v19 = vld [vmem:[#allocation6 + $0x1240] ss:$24 sps:$4 sm:$0xff]  }
 0x389   :  { %5692 = vmatprep.subr.bf16.mxu0 %v17578_v53  ;;  %4936 = vmatpush1.bf16.msra.mxu1 %v17594_v3  ;;  %v17602_v53 = vld [vmem:[#allocation6 + $0x1274] ss:$24 sps:$4 sm:$0xff]   ;;  %v17609_v3 = vld [vmem:[#allocation6 + $0x1028] ss:$24 sps:$4 sm:$0xff]  }
 0x38a   :  { %4937 = vmatprep.subr.bf16.mxu1 %v17599_v32  ;;  %v17614_v32 = vld [vmem:[#allocation6 + $0x105c] ss:$24 sps:$4 sm:$0xff]  }
 0x38b   :  { %4853 = vmatmul.mubr.bf16.gmra.mrb[40].mxu1 %v22084_v28 }
 0x38c   :  { %4862 = vmatprep.mubr.bf16.mxu1 %v22085_v25  ;;  %5693 = vmatpush1.bf16.msra.mxu0 %v17576_v30  ;;  %v17600_v30 = vld [vmem:[#allocation6 + $0x1270] ss:$24 sps:$4 sm:$0xff]  }
 0x38d   :  { %5694 = vmatprep.subr.bf16.mxu0 %v17587_v33  ;;  %4938 = vmatpush1.bf16.msra.mxu1 %v17597_v35  ;;  %v17608_v33 = vld [vmem:[#allocation6 + $0x12a4] ss:$24 sps:$4 sm:$0xff]   ;;  %v17612_v35 = vld [vmem:[#allocation6 + $0x1058] ss:$24 sps:$4 sm:$0xff]  }
 0x38e   :  { %4939 = vmatprep.subr.bf16.mxu1 %v17605_v57  ;;  %v17632_v57 = vld [vmem:[#allocation6 + $0x108c] ss:$24 sps:$4 sm:$0xff]  }
 0x38f   :  { %5598 = vmatmul.mubr.bf16.gmra.mrb[64].mxu0 %v19581_v26 }
 0x390   :  { %5607 = vmatprep.mubr.bf16.mxu0 %v19598_v51  ;;  %5695 = vmatpush1.bf16.msra.mxu0 %v17585_v23  ;;  %v17606_v23 = vld [vmem:[#allocation6 + $0x12a0] ss:$24 sps:$4 sm:$0xff]  }
 0x391   :  { %5696 = vmatprep.subr.bf16.mxu0 %v17593_v13  ;;  %4940 = vmatpush1.bf16.msra.mxu1 %v17603_v31  ;;  %v17617_v13 = vld [vmem:[#allocation6 + $0x12d4] ss:$24 sps:$4 sm:$0xff]   ;;  %v17615_v31 = vld [vmem:[#allocation6 + $0x12d0] ss:$24 sps:$4 sm:$0xff]  }
 0x392   :  { %4941 = vmatprep.subr.bf16.mxu1 %v17611_v12  ;;  %v17620_v12 = vld [vmem:[#allocation6 + $0x1304] ss:$24 sps:$4 sm:$0xff]  }
 0x393   :  { %4863 = vmatmul.mubr.bf16.gmra.mrb[44].mxu1 %v19387_v37 }
 0x394   :  { %4872 = vmatprep.mubr.bf16.mxu1 %v22086_v50  ;;  %5697 = vmatpush1.bf16.msra.mxu0 %v17591_v19  ;;  %v22097_v19 = vld [vmem:[#allocation58_spill] sm:$0xff] }
 0x395   :  { %5698 = vmatprep.subr.bf16.mxu0 %v17602_v53  ;;  %4942 = vmatpush1.bf16.msra.mxu1 %v17609_v3  ;;  %v17618_v53 = vld [vmem:[#allocation6 + $0x1300] ss:$24 sps:$4 sm:$0xff]   ;;  %v17623_v3 = vld [vmem:[#allocation6 + $0x1334] ss:$24 sps:$4 sm:$0xff]  }
 0x396   :  { %4943 = vmatprep.subr.bf16.mxu1 %v17614_v32  ;;  %v17621_v32 = vld [vmem:[#allocation6 + $0x1330] ss:$24 sps:$4 sm:$0xff]  }
 0x397   :  { %5608 = vmatmul.mubr.bf16.gmra.mrb[68].mxu0 %v19596_v14 }
 0x398   :  { %5617 = vmatprep.mubr.bf16.mxu0 %v19613_v24  ;;  %5699 = vmatpush1.bf16.msra.mxu0 %v17600_v30  ;;  %v17626_v30 = vld [vmem:[#allocation6 + $0x1364] ss:$24 sps:$4 sm:$0xff]  }
 0x399   :  { %5700 = vmatprep.subr.bf16.mxu0 %v17608_v33  ;;  %4944 = vmatpush1.bf16.msra.mxu1 %v17612_v35  ;;  %v22098_v33 = vld [vmem:[#allocation60_spill] sm:$0xff]  ;;  %v17624_v35 = vld [vmem:[#allocation6 + $0x1360] ss:$24 sps:$4 sm:$0xff]  }
 0x39a   :  { %5066 = vmatprep.subr.bf16.mxu1 %v17632_v57  ;;  %v17629_v57 = vld [vmem:[#allocation6 + $0x1394] ss:$24 sps:$4 sm:$0xff]  }
 0x39b   :  { %4873 = vmatmul.mubr.bf16.gmra.mrb[48].mxu1 %v22087_v7 }
 0x39c   :  { %4882 = vmatprep.mubr.bf16.mxu1 %v22088_v20  ;;  %5701 = vmatpush1.bf16.msra.mxu0 %v17606_v23  ;;  %v22099_v23 = vld [vmem:[#allocation62_spill] sm:$0xff] }
 0x39d   :  { %5702 = vmatprep.subr.bf16.mxu0 %v17617_v13  ;;  %v17630_v13 = vld [vmem:[#allocation6 + $0x1088] ss:$24 sps:$4 sm:$0xff]  }
 0x39f   :  { %5618 = vmatmul.mubr.bf16.gmra.mrb[72].mxu0 %v22060_v46 }
 0x3a0   :  { %5627 = vmatprep.mubr.bf16.mxu0 %v22097_v19  ;;  %5703 = vmatpush1.bf16.msra.mxu0 %v17615_v31  ;;  %v17638_v31 = vld [vmem:[#allocation6 + $0x10bc] ss:$24 sps:$4 sm:$0xff]  }
 0x3a1   :  { %5704 = vmatprep.subr.bf16.mxu0 %v17620_v12  ;;  %v17636_v12 = vld [vmem:[#allocation6 + $0x10b8] ss:$24 sps:$4 sm:$0xff]  }
 0x3a3   :  { %4883 = vmatmul.mubr.bf16.gmra.mrb[52].mxu1 %v22090_v40 }
 0x3a4   :  { %4892 = vmatprep.mubr.bf16.mxu1 %v22091_v2  ;;  %5705 = vmatpush1.bf16.msra.mxu0 %v17618_v53  ;;  %v17641_v53 = vld [vmem:[#allocation6 + $0x10ec] ss:$24 sps:$4 sm:$0xff]  }
 0x3a5   :  { %5706 = vmatprep.subr.bf16.mxu0 %v17623_v3  ;;  %v17639_v3 = vld [vmem:[#allocation6 + $0x10e8] ss:$24 sps:$4 sm:$0xff]  }
 0x3a7   :  { %5628 = vmatmul.mubr.bf16.gmra.mrb[76].mxu0 %v22062_v47 }
 0x3a8   :  { %5637 = vmatprep.mubr.bf16.mxu0 %v22098_v33  ;;  %5707 = vmatpush1.bf16.msra.mxu0 %v17621_v32  ;;  %v17644_v32 = vld [vmem:[#allocation6 + $0x111c] ss:$24 sps:$4 sm:$0xff]  }
 0x3a9   :  { %5708 = vmatprep.subr.bf16.mxu0 %v17626_v30  ;;  %v17642_v30 = vld [vmem:[#allocation6 + $0x1118] ss:$24 sps:$4 sm:$0xff]  }
 0x3ab   :  { %4893 = vmatmul.mubr.bf16.gmra.mrb[56].mxu1 %v22092_v42 }
 0x3ac   :  { %4902 = vmatprep.mubr.bf16.mxu1 %v22093_v56  ;;  %5709 = vmatpush1.bf16.msra.mxu0 %v17624_v35  ;;  %v17650_v35 = vld [vmem:[#allocation6 + $0x114c] ss:$24 sps:$4 sm:$0xff]  }
 0x3ad   :  { %5831 = vmatprep.subr.bf16.mxu0 %v17629_v57  ;;  %v17648_v57 = vld [vmem:[#allocation6 + $0x1148] ss:$24 sps:$4 sm:$0xff]  }
 0x3af   :  { %5638 = vmatmul.mubr.bf16.gmra.mrb[80].mxu0 %v22065_v0 }
 0x3b0   :  { %5647 = vmatprep.mubr.bf16.mxu0 %v22099_v23 }
 0x3b3   :  { %4903 = vmatmul.mubr.bf16.gmra.mrb[60].mxu1 %v22094_v38 }
 0x3b4   :  { %4945 = vmatprep.mubr.bf16.mxu1 %v22095_v62 }
 0x3b7   :  { %5648 = vmatmul.mubr.bf16.gmra.mrb[84].mxu0 %v22068_v52 }
 0x3b8   :  { %5657 = vmatprep.mubr.bf16.mxu0 %v19673_v29 }
 0x3bb   :  { %4946 = vmatmul.mubr.bf16.vlgmr.msra.gmra.mrb[16].mxu1 %v19521_v21 }
 0x3bc   :  { %4955 = vmatprep.mubr.bf16.mxu1 %v22096_v22  ;;  %5067 = vmatpush1.bf16.msra.mxu1 %v17630_v13  ;;  %v17653_v13 = vld [vmem:[#allocation6 + $0x117c] ss:$24 sps:$4 sm:$0xff]  }
 0x3bd   :  { %5068 = vmatprep.subr.bf16.mxu1 %v17638_v31  ;;  %v17627_v31 = vld [vmem:[#allocation6 + $0x1390] ss:$24 sps:$4 sm:$0xff]  }
 0x3bf   :  { %5658 = vmatmul.mubr.bf16.gmra.mrb[88].mxu0 %v22070_v44 }
 0x3c0   :  { %5667 = vmatprep.mubr.bf16.mxu0 %v19684_v49  ;;  %5069 = vmatpush1.bf16.msra.mxu1 %v17636_v12  ;;  %v17635_v12 = vld [vmem:[#allocation6 + $0x13c4] ss:$24 sps:$4 sm:$0xff]  }
 0x3c1   :  { %5070 = vmatprep.subr.bf16.mxu1 %v17641_v53  ;;  %v17651_v53 = vld [vmem:[#allocation6 + $0x1178] ss:$24 sps:$4 sm:$0xff]  }
 0x3c3   :  { %4956 = vmatmul.mubr.bf16.gmra.mrb[20].mxu1 %v19536_v1 }
 0x3c4   :  { %4965 = vmatprep.mubr.bf16.mxu1 %v19553_v8  ;;  %5071 = vmatpush1.bf16.msra.mxu1 %v17639_v3 }
 0x3c5   :  { %5072 = vmatprep.subr.bf16.mxu1 %v17644_v32  ;;  %v17656_v32 = vld [vmem:[#allocation6 + $0x11ac] ss:$24 sps:$4 sm:$0xff]  }
 0x3c7   :  { %5668 = vmatmul.mubr.bf16.gmra.mrb[92].mxu0 %v19682_v48 }
 0x3c8   :  { %5710 = vmatprep.mubr.bf16.mxu0 %v19727_v11  ;;  %5073 = vmatpush1.bf16.msra.mxu1 %v17642_v30 }
 0x3c9   :  { %5074 = vmatprep.subr.bf16.mxu1 %v17650_v35  ;;  %v17633_v35 = vld [vmem:[#allocation6 + $0x13c0] ss:$24 sps:$4 sm:$0xff]  }
 0x3cb   :  { %4966 = vmatmul.mubr.bf16.gmra.mrb[24].mxu1 %v19551_v10 }
 0x3cc   :  { %4975 = vmatprep.mubr.bf16.mxu1 %v19568_v5  ;;  %5075 = vmatpush1.bf16.msra.mxu1 %v17648_v57  ;;  %v17647_v57 = vld [vmem:[#allocation6 + $0x13f4] ss:$24 sps:$4 sm:$0xff]   ;;  %v17654_v5 = vld [vmem:[#allocation6 + $0x11a8] ss:$24 sps:$4 sm:$0xff]  }
 0x3cd   :  { %5076 = vmatprep.subr.bf16.mxu1 %v17653_v13  ;;  %v17662_v13 = vld [vmem:[#allocation6 + $0x11dc] ss:$24 sps:$4 sm:$0xff]  }
 0x3ce   :  { %v20056_v3 = vpop.f32.mrb[224].mxu1 }
 0x3cf   :  { %22100 = vst [vmem:[#allocation110_spill] sm:$0xff] %v20056_v3  ;;  %v20058_v38 = vpop.f32.mrb[225].mxu1  ;;  %5711 = vmatmul.mubr.bf16.vlgmr.msra.gmra.mrb[48].mxu0 %v19725_v58  ;;  %v17660_v3 = vld [vmem:[#allocation6 + $0x11d8] ss:$24 sps:$4 sm:$0xff]  }
 0x3d0   :  { %22101 = vst [vmem:[#allocation111_spill] sm:$0xff] %v20058_v38  ;;  %v20061_v30 = vpop.f32.mrb[226].mxu1  ;;  %5720 = vmatprep.mubr.bf16.mxu0 %v19737_v55  ;;  %5832 = vmatpush1.bf16.msra.mxu0 %v17627_v31  ;;  %v17645_v38 = vld [vmem:[#allocation6 + $0x13f0] ss:$24 sps:$4 sm:$0xff]  }
 0x3d1   :  { %22102 = vst [vmem:[#allocation112_spill] sm:$0xff] %v20061_v30  ;;  %v20064_v56 = vpop.f32.mrb[227].mxu1  ;;  %5833 = vmatprep.subr.bf16.mxu0 %v17635_v12  ;;  %5077 = vmatpush1.bf16.msra.mxu1 %v17651_v53  ;;  %v17659_v30 = vld [vmem:[#allocation6 + $0x1424] ss:$24 sps:$4 sm:$0xff]  }
 0x3d2   :  { %22103 = vst [vmem:[#allocation113_spill] sm:$0xff] %v20064_v56  ;;  %5078 = vmatprep.subr.bf16.mxu1 %v17656_v32  ;;  %v17665_v56 = vld [vmem:[#allocation6 + $0x120c] ss:$24 sps:$4 sm:$0xff]   ;;  %v17657_v32 = vld [vmem:[#allocation6 + $0x1420] ss:$24 sps:$4 sm:$0xff]  }
 0x3d3   :  { %4976 = vmatmul.mubr.bf16.gmra.mrb[28].mxu1 %v19566_v41 }
 0x3d4   :  { %4985 = vmatprep.mubr.bf16.mxu1 %v19583_v27  ;;  %5834 = vmatpush1.bf16.msra.mxu0 %v17633_v35 }
 0x3d5   :  { %5835 = vmatprep.subr.bf16.mxu0 %v17647_v57  ;;  %5079 = vmatpush1.bf16.msra.mxu1 %v17654_v5  ;;  %v17663_v5 = vld [vmem:[#allocation6 + $0x1208] ss:$24 sps:$4 sm:$0xff]   ;;  %v17671_v57 = vld [vmem:[#allocation6 + $0x1454] ss:$24 sps:$4 sm:$0xff]  }
 0x3d6   :  { %v20068_v31 = vpop.f32.mrb[228].mxu1  ;;  %5080 = vmatprep.subr.bf16.mxu1 %v17662_v13  ;;  %v17669_v13 = vld [vmem:[#allocation6 + $0x1450] ss:$24 sps:$4 sm:$0xff]  }
 0x3d7   :  { %22104 = vst [vmem:[#allocation114_spill] sm:$0xff] %v20068_v31  ;;  %v20070_v12 = vpop.f32.mrb[229].mxu1  ;;  %5721 = vmatmul.mubr.bf16.gmra.mrb[52].mxu0 %v19735_v6  ;;  %v17668_v31 = vld [vmem:[#allocation6 + $0x123c] ss:$24 sps:$4 sm:$0xff]  }
 0x3d8   :  { %22105 = vst [vmem:[#allocation115_spill] sm:$0xff] %v20070_v12  ;;  %v20073_v53 = vpop.f32.mrb[230].mxu1  ;;  %5730 = vmatprep.mubr.bf16.mxu0 %v19747_v4  ;;  %5836 = vmatpush1.bf16.msra.mxu0 %v17645_v38  ;;  %v17683_v12 = vld [vmem:[#allocation6 + $0x1484] ss:$24 sps:$4 sm:$0xff]  }
 0x3d9   :  { %22106 = vst [vmem:[#allocation116_spill] sm:$0xff] %v20073_v53  ;;  %v20076_v35 = vpop.f32.mrb[231].mxu1  ;;  %5837 = vmatprep.subr.bf16.mxu0 %v17659_v30  ;;  %5081 = vmatpush1.bf16.msra.mxu1 %v17660_v3  ;;  %v17666_v53 = vld [vmem:[#allocation6 + $0x1238] ss:$24 sps:$4 sm:$0xff]  }
 0x3da   :  { %22107 = vst [vmem:[#allocation117_spill] sm:$0xff] %v20076_v35  ;;  %5082 = vmatprep.subr.bf16.mxu1 %v17665_v56  ;;  %v17674_v35 = vld [vmem:[#allocation6 + $0x126c] ss:$24 sps:$4 sm:$0xff]   ;;  %v17681_v3 = vld [vmem:[#allocation6 + $0x1480] ss:$24 sps:$4 sm:$0xff]  }
 0x3db   :  { %4986 = vmatmul.mubr.bf16.gmra.mrb[32].mxu1 %v19581_v26 }
 0x3dc   :  { %4995 = vmatprep.mubr.bf16.mxu1 %v19598_v51  ;;  %5838 = vmatpush1.bf16.msra.mxu0 %v17657_v32 }
 0x3dd   :  { %5083 = vmatpush1.bf16.msra.mxu1 %v17663_v5  ;;  %5839 = vmatprep.subr.bf16.mxu0 %v17671_v57  ;;  %v17672_v5 = vld [vmem:[#allocation6 + $0x1268] ss:$24 sps:$4 sm:$0xff]   ;;  %v17695_v57 = vld [vmem:[#allocation6 + $0x14b4] ss:$24 sps:$4 sm:$0xff]  }
 0x3de   :  { %v20080_v38 = vpop.f32.mrb[232].mxu1  ;;  %5084 = vmatprep.subr.bf16.mxu1 %v17668_v31  ;;  %v17693_v31 = vld [vmem:[#allocation6 + $0x14b0] ss:$24 sps:$4 sm:$0xff]  }
 0x3df   :  { %22108 = vst [vmem:[#allocation118_spill] sm:$0xff] %v20080_v38  ;;  %v20082_v30 = vpop.f32.mrb[233].mxu1  ;;  %5731 = vmatmul.mubr.bf16.gmra.mrb[56].mxu0 %v19745_v34  ;;  %v17677_v38 = vld [vmem:[#allocation6 + $0x129c] ss:$24 sps:$4 sm:$0xff]  }
 0x3e0   :  { %22109 = vst [vmem:[#allocation119_spill] sm:$0xff] %v20082_v30  ;;  %v20085_v56 = vpop.f32.mrb[234].mxu1  ;;  %5740 = vmatprep.mubr.bf16.mxu0 %v19757_v61  ;;  %5840 = vmatpush1.bf16.msra.mxu0 %v17669_v13  ;;  %v17698_v30 = vld [vmem:[#allocation6 + $0x14e4] ss:$24 sps:$4 sm:$0xff]  }
 0x3e1   :  { %22110 = vst [vmem:[#allocation120_spill] sm:$0xff] %v20085_v56  ;;  %v20088_v32 = vpop.f32.mrb[235].mxu1  ;;  %5085 = vmatpush1.bf16.msra.mxu1 %v17666_v53  ;;  %5841 = vmatprep.subr.bf16.mxu0 %v17683_v12  ;;  %v17675_v56 = vld [vmem:[#allocation6 + $0x1298] ss:$24 sps:$4 sm:$0xff]  }
 0x3e2   :  { %22111 = vst [vmem:[#allocation121_spill] sm:$0xff] %v20088_v32  ;;  %5086 = vmatprep.subr.bf16.mxu1 %v17674_v35  ;;  %v17680_v32 = vld [vmem:[#allocation6 + $0x12cc] ss:$24 sps:$4 sm:$0xff]   ;;  %v17696_v35 = vld [vmem:[#allocation6 + $0x14e0] ss:$24 sps:$4 sm:$0xff]  }
 0x3e3   :  { %4996 = vmatmul.mubr.bf16.gmra.mrb[36].mxu1 %v19596_v14 }
 0x3e4   :  { %5005 = vmatprep.mubr.bf16.mxu1 %v19613_v24  ;;  %5842 = vmatpush1.bf16.msra.mxu0 %v17681_v3 }
 0x3e5   :  { %5087 = vmatpush1.bf16.msra.mxu1 %v17672_v5  ;;  %5843 = vmatprep.subr.bf16.mxu0 %v17695_v57  ;;  %v17678_v5 = vld [vmem:[#allocation6 + $0x12c8] ss:$24 sps:$4 sm:$0xff]   ;;  %v17701_v57 = vld [vmem:[#allocation6 + $0x4] ss:$24 sps:$4 sm:$0xff]  }
 0x3e6   :  { %v20092_v13 = vpop.f32.mrb[236].mxu1  ;;  %5088 = vmatprep.subr.bf16.mxu1 %v17677_v38  ;;  %v17684_v38 = vld [vmem:[#allocation6 + $0x12f8] ss:$24 sps:$4 sm:$0xff]  }
 0x3e7   :  { %22112 = vst [vmem:[#allocation122_spill] sm:$0xff] %v20092_v13  ;;  %v20094_v53 = vpop.f32.mrb[237].mxu1  ;;  %5741 = vmatmul.mubr.bf16.gmra.mrb[60].mxu0 %v19755_v60  ;;  %v17686_v13 = vld [vmem:[#allocation6 + $0x12fc] ss:$24 sps:$4 sm:$0xff]  }
 0x3e8   :  { %22113 = vst [vmem:[#allocation123_spill] sm:$0xff] %v20094_v53  ;;  %v20097_v12 = vpop.f32.mrb[238].mxu1  ;;  %5750 = vmatprep.mubr.bf16.mxu0 %v19767_v36  ;;  %5844 = vmatpush1.bf16.msra.mxu0 %v17693_v31  ;;  %v17689_v31 = vld [vmem:[#allocation6 + $0x132c] ss:$24 sps:$4 sm:$0xff]  }
 0x3e9   :  { %22114 = vst [vmem:[#allocation124_spill] sm:$0xff] %v20097_v12  ;;  %v20100_v3 = vpop.f32.mrb[239].mxu1  ;;  %5089 = vmatpush1.bf16.msra.mxu1 %v17675_v56  ;;  %5845 = vmatprep.subr.bf16.mxu0 %v17698_v30 }
 0x3ea   :  { %22115 = vst [vmem:[#allocation125_spill] sm:$0xff] %v20100_v3  ;;  %5090 = vmatprep.subr.bf16.mxu1 %v17680_v32  ;;  %v17687_v32 = vld [vmem:[#allocation6 + $0x1328] ss:$24 sps:$4 sm:$0xff]  }
 0x3eb   :  { %5006 = vmatmul.mubr.bf16.gmra.mrb[40].mxu1 %v22060_v46 }
 0x3ec   :  { %5015 = vmatprep.mubr.bf16.mxu1 %v22097_v19  ;;  %5846 = vmatpush1.bf16.msra.mxu0 %v17696_v35  ;;  %v17692_v35 = vld [vmem:[#allocation6 + $0x135c] ss:$24 sps:$4 sm:$0xff]  }
 0x3ed   :  { %5091 = vmatpush1.bf16.msra.mxu1 %v17678_v5  ;;  %7664 = vmatprep.subr.bf16.mxu0 %v17701_v57  ;;  %v17725_v57 = vld [vmem:[#allocation6 + $0x138c] ss:$24 sps:$4 sm:$0xff]  }
 0x3ee   :  { %v20104_v12 = vpop.f32.mrb[240].mxu1  ;;  %5092 = vmatprep.subr.bf16.mxu1 %v17686_v13  ;;  %v17690_v13 = vld [vmem:[#allocation6 + $0x1358] ss:$24 sps:$4 sm:$0xff]  }
 0x3ef   :  { %22116 = vst [vmem:[#allocation126_spill] sm:$0xff] %v20104_v12  ;;  %v20106_v53 = vpop.f32.mrb[241].mxu1  ;;  %5751 = vmatmul.mubr.bf16.gmra.mrb[64].mxu0 %v19765_v16 }
 0x3f0   :  { %22117 = vst [vmem:[#allocation127_spill] sm:$0xff] %v20106_v53  ;;  %v20109_v30 = vpop.f32.mrb[242].mxu1  ;;  %5760 = vmatprep.mubr.bf16.mxu0 %v19777_v45 }
 0x3f1   :  { %22118 = vst [vmem:[#allocation128_spill] sm:$0xff] %v20109_v30  ;;  %v20112_v56 = vpop.f32.mrb[243].mxu1  ;;  %5093 = vmatpush1.bf16.msra.mxu1 %v17684_v38  ;;  %v22122_v30 = vld [vmem:[#allocation80_spill] sm:$0xff]  ;;  %v22124_v38 = vld [vmem:[#allocation83_spill] sm:$0xff] }
 0x3f2   :  { %22119 = vst [vmem:[#allocation129_spill] sm:$0xff] %v20112_v56  ;;  %5094 = vmatprep.subr.bf16.mxu1 %v17689_v31  ;;  %v22130_v56 = vld [vmem:[#allocation85_spill] sm:$0xff] }
 0x3f3   :  { %5016 = vmatmul.mubr.bf16.gmra.mrb[44].mxu1 %v22062_v47 }
 0x3f4   :  { %5025 = vmatprep.mubr.bf16.mxu1 %v22098_v33 }
 0x3f5   :  { %5095 = vmatpush1.bf16.msra.mxu1 %v17687_v32 }
 0x3f6   :  { %v20116_v5 = vpop.f32.mrb[244].mxu1  ;;  %5096 = vmatprep.subr.bf16.mxu1 %v17692_v35 }
 0x3f7   :  { %22120 = vst [vmem:[#allocation130_spill] sm:$0xff] %v20116_v5  ;;  %v20118_v53 = vpop.f32.mrb[245].mxu1  ;;  %5761 = vmatmul.mubr.bf16.gmra.mrb[68].mxu0 %v22122_v30  ;;  %v22128_v5 = vld [vmem:[#allocation82_spill] sm:$0xff] }
 0x3f8   :  { %22121 = vst [vmem:[#allocation131_spill] sm:$0xff] %v20118_v53  ;;  %v20121_v12 = vpop.f32.mrb[246].mxu1  ;;  %5770 = vmatprep.mubr.bf16.mxu0 %v22124_v38 }
 0x3f9   :  { %22123 = vst [vmem:[#allocation132_spill] sm:$0xff] %v20121_v12  ;;  %v20124_v31 = vpop.f32.mrb[247].mxu1  ;;  %5097 = vmatpush1.bf16.msra.mxu1 %v17690_v13 }
 0x3fa   :  { %22125 = vst [vmem:[#allocation133_spill] sm:$0xff] %v20124_v31  ;;  %5219 = vmatprep.subr.bf16.mxu1 %v17725_v57  ;;  %v22134_v31 = vld [vmem:[#allocation84_spill] sm:$0xff] }
 0x3fb   :  { %5026 = vmatmul.mubr.bf16.gmra.mrb[48].mxu1 %v22065_v0 }
 0x3fc   :  { %5035 = vmatprep.mubr.bf16.mxu1 %v22099_v23  ;;  %v17728_v23 = vld [vmem:[#allocation6 + $0x13bc] ss:$24 sps:$4 sm:$0xff]  }
 0x3fe   :  { %v20128_v32 = vpop.f32.mrb[248].mxu1 }
 0x3ff   :  { %22126 = vst [vmem:[#allocation134_spill] sm:$0xff] %v20128_v32  ;;  %v20130_v35 = vpop.f32.mrb[249].mxu1  ;;  %5771 = vmatmul.mubr.bf16.gmra.mrb[72].mxu0 %v22128_v5 }
 0x400   :  { %22127 = vst [vmem:[#allocation135_spill] sm:$0xff] %v20130_v35  ;;  %v20133_v53 = vpop.f32.mrb[250].mxu1  ;;  %5780 = vmatprep.mubr.bf16.mxu0 %v22130_v56  ;;  %v22136_v35 = vld [vmem:[#allocation87_spill] sm:$0xff] }
 0x401   :  { %22129 = vst [vmem:[#allocation136_spill] sm:$0xff] %v20133_v53  ;;  %v20136_v12 = vpop.f32.mrb[251].mxu1 }
 0x402   :  { %22131 = vst [vmem:[#allocation137_spill] sm:$0xff] %v20136_v12 }
 0x403   :  { %5036 = vmatmul.mubr.bf16.gmra.mrb[52].mxu1 %v22068_v52 }
 0x404   :  { %5045 = vmatprep.mubr.bf16.mxu1 %v19673_v29  ;;  %v22140_v29 = vld [vmem:[#allocation86_spill] sm:$0xff] }
 0x406   :  { %v20140_v13 = vpop.f32.mrb[252].mxu1 }
 0x407   :  { %22132 = vst [vmem:[#allocation138_spill] sm:$0xff] %v20140_v13  ;;  %v20142_v57 = vpop.f32.mrb[253].mxu1  ;;  %5781 = vmatmul.mubr.bf16.gmra.mrb[76].mxu0 %v22134_v31 }
 0x408   :  { %22133 = vst [vmem:[#allocation139_spill] sm:$0xff] %v20142_v57  ;;  %v20145_v32 = vpop.f32.mrb[254].mxu1  ;;  %5790 = vmatprep.mubr.bf16.mxu0 %v22136_v35  ;;  %v22142_v57 = vld [vmem:[#allocation89_spill] sm:$0xff] }
 0x409   :  { %22135 = vst [vmem:[#allocation140_spill] sm:$0xff] %v20145_v32  ;;  %v20148_v3 = vpop.f32.mrb[255].mxu1 }
 0x40a   :  { %22137 = vst [vmem:[#allocation141_spill] sm:$0xff] %v20148_v3 }
 0x40b   :  { %5046 = vmatmul.mubr.bf16.gmra.mrb[56].mxu1 %v22070_v44  ;;  %v17723_v44 = vld [vmem:[#allocation6 + $0x1388] ss:$24 sps:$4 sm:$0xff]  }
 0x40c   :  { %5055 = vmatprep.mubr.bf16.mxu1 %v19684_v49  ;;  %v22146_v49 = vld [vmem:[#allocation88_spill] sm:$0xff] }
 0x40e   :  { %v20152_v12 = vpop.f32.mrb[0].mxu1 }
 0x40f   :  { %22138 = vst [vmem:[#allocation142_spill] sm:$0xff] %v20152_v12  ;;  %v20154_v53 = vpop.f32.mrb[1].mxu1  ;;  %5791 = vmatmul.mubr.bf16.gmra.mrb[80].mxu0 %v22140_v29 }
 0x410   :  { %22139 = vst [vmem:[#allocation143_spill] sm:$0xff] %v20154_v53  ;;  %v20157_v13 = vpop.f32.mrb[2].mxu1  ;;  %5800 = vmatprep.mubr.bf16.mxu0 %v22142_v57  ;;  %v22148_v53 = vld [vmem:[#allocation91_spill] sm:$0xff] }
 0x411   :  { %22141 = vst [vmem:[#allocation144_spill] sm:$0xff] %v20157_v13  ;;  %v20160_v52 = vpop.f32.mrb[3].mxu1 }
 0x412   :  { %22143 = vst [vmem:[#allocation145_spill] sm:$0xff] %v20160_v52  ;;  %v17726_v52 = vld [vmem:[#allocation6 + $0x13b8] ss:$24 sps:$4 sm:$0xff]  }
 0x413   :  { %5056 = vmatmul.mubr.bf16.gmra.mrb[60].mxu1 %v19682_v48 }
 0x414   :  { %5098 = vmatprep.mubr.bf16.mxu1 %v19727_v11 }
 0x416   :  { %v20164_v3 = vpop.f32.mrb[4].mxu1 }
 0x417   :  { %22144 = vst [vmem:[#allocation146_spill] sm:$0xff] %v20164_v3  ;;  %v20166_v32 = vpop.f32.mrb[5].mxu1  ;;  %5801 = vmatmul.mubr.bf16.gmra.mrb[84].mxu0 %v22146_v49  ;;  %v17734_v3 = vld [vmem:[#allocation6 + $0x13ec] ss:$24 sps:$4 sm:$0xff]  }
 0x418   :  { %22145 = vst [vmem:[#allocation147_spill] sm:$0xff] %v20166_v32  ;;  %v20169_v12 = vpop.f32.mrb[6].mxu1  ;;  %5810 = vmatprep.mubr.bf16.mxu0 %v22148_v53 }
 0x419   :  { %22147 = vst [vmem:[#allocation148_spill] sm:$0xff] %v20169_v12  ;;  %v20172_v13 = vpop.f32.mrb[7].mxu1 }
 0x41a   :  { %22149 = vst [vmem:[#allocation149_spill] sm:$0xff] %v20172_v13  ;;  %v17732_v13 = vld [vmem:[#allocation6 + $0x13e8] ss:$24 sps:$4 sm:$0xff]  }
 0x41b   :  { %5099 = vmatmul.mubr.bf16.vlgmr.msra.gmra.mrb[16].mxu1 %v19725_v58 }
 0x41c   :  { %5108 = vmatprep.mubr.bf16.mxu1 %v19737_v55  ;;  %5220 = vmatpush1.bf16.msra.mxu1 %v17723_v44  ;;  %v17740_v55 = vld [vmem:[#allocation6 + $0x141c] ss:$24 sps:$4 sm:$0xff]   ;;  %v17738_v44 = vld [vmem:[#allocation6 + $0x1418] ss:$24 sps:$4 sm:$0xff]  }
 0x41d   :  { %5221 = vmatprep.subr.bf16.mxu1 %v17728_v23  ;;  %v17743_v23 = vld [vmem:[#allocation6 + $0x144c] ss:$24 sps:$4 sm:$0xff]  }
 0x41e   :  { %v20176_v48 = vpop.f32.mrb[8].mxu1 }
 0x41f   :  { %22150 = vst [vmem:[#allocation150_spill] sm:$0xff] %v20176_v48  ;;  %v20178_v32 = vpop.f32.mrb[9].mxu1  ;;  %5811 = vmatmul.mubr.bf16.gmra.mrb[88].mxu0 %v19825_v54 }
 0x420   :  { %22151 = vst [vmem:[#allocation151_spill] sm:$0xff] %v20178_v32  ;;  %v20181_v12 = vpop.f32.mrb[10].mxu1  ;;  %5820 = vmatprep.mubr.bf16.mxu0 %v19837_v9  ;;  %5222 = vmatpush1.bf16.msra.mxu1 %v17726_v52 }
 0x421   :  { %22152 = vst [vmem:[#allocation152_spill] sm:$0xff] %v20181_v12  ;;  %v20184_v11 = vpop.f32.mrb[11].mxu1  ;;  %5223 = vmatprep.subr.bf16.mxu1 %v17734_v3  ;;  %v22157_v12 = vmov 0   ;;  %v17741_v3 = vld [vmem:[#allocation6 + $0x1448] ss:$24 sps:$4 sm:$0xff]  }
 0x422   :  { %22153 = vst [vmem:[#allocation153_spill] sm:$0xff] %v20184_v11 }
 0x423   :  { %5109 = vmatmul.mubr.bf16.gmra.mrb[20].mxu1 %v19735_v6  ;;  %v22159_v6 = vld [vmem:[#allocation97_spill] sm:$0xff] }
 0x424   :  { %5118 = vmatprep.mubr.bf16.mxu1 %v19747_v4  ;;  %5224 = vmatpush1.bf16.msra.mxu1 %v17732_v13  ;;  %v17749_v4 = vld [vmem:[#allocation6 + $0x147c] ss:$24 sps:$4 sm:$0xff]  }
 0x425   :  { %5225 = vmatprep.subr.bf16.mxu1 %v17740_v55  ;;  %v17699_v55 = vld [vmem:[#allocation6] ss:$24 sps:$4 sm:$0xff]   ;;  %v17704_v13 = vld [vmem:[#allocation6 + $0x34] ss:$24 sps:$4 sm:$0xff]  }
 0x426   :  { %v20188_v32 = vpop.f32.mrb[12].mxu1 }
 0x427   :  { %22154 = vst [vmem:[#allocation154_spill] sm:$0xff] %v20188_v32  ;;  %v20190_v48 = vpop.f32.mrb[13].mxu1  ;;  %5821 = vmatmul.mubr.bf16.gmra.mrb[92].mxu0 %v19835_v59  ;;  %v17755_v32 = vld [vmem:[#allocation6 + $0x14ac] ss:$24 sps:$4 sm:$0xff]  }
 0x428   :  { %22155 = vst [vmem:[#allocation155_spill] sm:$0xff] %v20190_v48  ;;  %v20193_v52 = vpop.f32.mrb[14].mxu1  ;;  %5863 = vmatprep.mubr.bf16.mxu0 %v22157_v12  ;;  %5226 = vmatpush1.bf16.msra.mxu1 %v17738_v44  ;;  %v17747_v48 = vld [vmem:[#allocation6 + $0x1478] ss:$24 sps:$4 sm:$0xff]   ;;  %v17707_v44 = vld [vmem:[#allocation6 + $0x64] ss:$24 sps:$4 sm:$0xff]  }
 0x429   :  { %22156 = vst [vmem:[#allocation156_spill] sm:$0xff] %v20193_v52  ;;  %v20196_v11 = vpop.f32.mrb[15].mxu1  ;;  %5227 = vmatprep.subr.bf16.mxu1 %v17743_v23  ;;  %v17702_v52 = vld [vmem:[#allocation6 + $0x30] ss:$24 sps:$4 sm:$0xff]  }
 0x42a   :  { %22158 = vst [vmem:[#allocation157_spill] sm:$0xff] %v20196_v11  ;;  %v17753_v23 = vld [vmem:[#allocation6 + $0x14a8] ss:$24 sps:$4 sm:$0xff]   ;;  %v17758_v11 = vld [vmem:[#allocation6 + $0x14dc] ss:$24 sps:$4 sm:$0xff]  }
 0x42b   :  { %5119 = vmatmul.mubr.bf16.gmra.mrb[24].mxu1 %v19745_v34  ;;  %v22160_v34 = vld [vmem:[#allocation98_spill] sm:$0xff] }
 0x42c   :  { %5128 = vmatprep.mubr.bf16.mxu1 %v19757_v61  ;;  %5228 = vmatpush1.bf16.msra.mxu1 %v17741_v3  ;;  %v17705_v3 = vld [vmem:[#allocation6 + $0x60] ss:$24 sps:$4 sm:$0xff]  }
 0x42d   :  { %5229 = vmatprep.subr.bf16.mxu1 %v17749_v4  ;;  %v17710_v4 = vld [vmem:[#allocation6 + $0x94] ss:$24 sps:$4 sm:$0xff]   ;;  %v17756_v61 = vld [vmem:[#allocation6 + $0x14d8] ss:$24 sps:$4 sm:$0xff]  }
 0x42f   :  { %5864 = vmatmul.mubr.bf16.vlgmr.msra.gmra.mrb[48].mxu0 %v22159_v6 }
 0x430   :  { %7665 = vmatpush1.bf16.msra.mxu0 %v17699_v55  ;;  %5873 = vmatprep.mubr.bf16.mxu0 %v22157_v12  ;;  %v17782_v55 = vld [vmem:[#allocation6 + $0xc] ss:$24 sps:$4 sm:$0xff]  }
 0x431   :  { %7666 = vmatprep.subr.bf16.mxu0 %v17704_v13  ;;  %5230 = vmatpush1.bf16.msra.mxu1 %v17747_v48  ;;  %v17708_v48 = vld [vmem:[#allocation6 + $0x90] ss:$24 sps:$4 sm:$0xff]   ;;  %v17716_v13 = vld [vmem:[#allocation6 + $0xf4] ss:$24 sps:$4 sm:$0xff]  }
 0x432   :  { %5231 = vmatprep.subr.bf16.mxu1 %v17755_v32  ;;  %v17713_v32 = vld [vmem:[#allocation6 + $0xc4] ss:$24 sps:$4 sm:$0xff]  }
 0x433   :  { %5129 = vmatmul.mubr.bf16.gmra.mrb[28].mxu1 %v19755_v60 }
 0x434   :  { %5138 = vmatprep.mubr.bf16.mxu1 %v19767_v36  ;;  %7667 = vmatpush1.bf16.msra.mxu0 %v17702_v52  ;;  %v17711_v52 = vld [vmem:[#allocation6 + $0xc0] ss:$24 sps:$4 sm:$0xff]  }
 0x435   :  { %7668 = vmatprep.subr.bf16.mxu0 %v17707_v44  ;;  %5232 = vmatpush1.bf16.msra.mxu1 %v17753_v23  ;;  %v17714_v44 = vld [vmem:[#allocation6 + $0xf0] ss:$24 sps:$4 sm:$0xff]   ;;  %v17719_v23 = vld [vmem:[#allocation6 + $0x124] ss:$24 sps:$4 sm:$0xff]  }
 0x436   :  { %5233 = vmatprep.subr.bf16.mxu1 %v17758_v11  ;;  %v22161_v11 = vld [vmem:[#allocation99_spill] sm:$0xff] }
 0x437   :  { %5874 = vmatmul.mubr.bf16.gmra.mrb[52].mxu0 %v22160_v34 }
 0x438   :  { %7669 = vmatpush1.bf16.msra.mxu0 %v17705_v3  ;;  %5883 = vmatprep.mubr.bf16.mxu0 %v22157_v12  ;;  %v17722_v3 = vld [vmem:[#allocation6 + $0x154] ss:$24 sps:$4 sm:$0xff]  }
 0x439   :  { %7670 = vmatprep.subr.bf16.mxu0 %v17710_v4  ;;  %5234 = vmatpush1.bf16.msra.mxu1 %v17756_v61  ;;  %v17717_v61 = vld [vmem:[#allocation6 + $0x120] ss:$24 sps:$4 sm:$0xff]   ;;  %v22162_v4 = vld [vmem:[#allocation100_spill] sm:$0xff] }
 0x43a   :  { %8276 = vmatprep.subr.bf16.mxu1 %v17782_v55  ;;  %v17720_v55 = vld [vmem:[#allocation6 + $0x150] ss:$24 sps:$4 sm:$0xff]  }
 0x43b   :  { %5139 = vmatmul.mubr.bf16.gmra.mrb[32].mxu1 %v19765_v16 }
 0x43c   :  { %5148 = vmatprep.mubr.bf16.mxu1 %v19777_v45  ;;  %7671 = vmatpush1.bf16.msra.mxu0 %v17708_v48  ;;  %v17731_v48 = vld [vmem:[#allocation6 + $0x184] ss:$24 sps:$4 sm:$0xff]  }
 0x43d   :  { %7672 = vmatprep.subr.bf16.mxu0 %v17713_v32  ;;  %v17729_v32 = vld [vmem:[#allocation6 + $0x180] ss:$24 sps:$4 sm:$0xff]   ;;  %v17845_v45 = vld [vmem:[#allocation6 + $0x27c] ss:$24 sps:$4 sm:$0xff]  }
 0x43f   :  { %5884 = vmatmul.mubr.bf16.gmra.mrb[56].mxu0 %v22161_v11 }
 0x440   :  { %5893 = vmatprep.mubr.bf16.mxu0 %v22157_v12  ;;  %7673 = vmatpush1.bf16.msra.mxu0 %v17711_v52  ;;  %v17737_v52 = vld [vmem:[#allocation6 + $0x1b4] ss:$24 sps:$4 sm:$0xff]  }
 0x441   :  { %7674 = vmatprep.subr.bf16.mxu0 %v17716_v13  ;;  %v22163_v13 = vld [vmem:[#allocation101_spill] sm:$0xff] }
 0x443   :  { %5149 = vmatmul.mubr.bf16.gmra.mrb[36].mxu1 %v22122_v30  ;;  %v17836_v30 = vld [vmem:[#allocation6 + $0x21c] ss:$24 sps:$4 sm:$0xff]  }
 0x444   :  { %5158 = vmatprep.mubr.bf16.mxu1 %v22124_v38  ;;  %7675 = vmatpush1.bf16.msra.mxu0 %v17714_v44  ;;  %v17735_v44 = vld [vmem:[#allocation6 + $0x1b0] ss:$24 sps:$4 sm:$0xff]   ;;  %v17830_v38 = vld [vmem:[#allocation6 + $0x1ec] ss:$24 sps:$4 sm:$0xff]  }
 0x445   :  { %7676 = vmatprep.subr.bf16.mxu0 %v17719_v23  ;;  %v17746_v23 = vld [vmem:[#allocation6 + $0x1e4] ss:$24 sps:$4 sm:$0xff]  }
 0x447   :  { %5894 = vmatmul.mubr.bf16.gmra.mrb[60].mxu0 %v22162_v4 }
 0x448   :  { %5903 = vmatprep.mubr.bf16.mxu0 %v22157_v12  ;;  %7677 = vmatpush1.bf16.msra.mxu0 %v17717_v61  ;;  %v17744_v61 = vld [vmem:[#allocation6 + $0x1e0] ss:$24 sps:$4 sm:$0xff]  }
 0x449   :  { %7678 = vmatprep.subr.bf16.mxu0 %v17722_v3  ;;  %v17752_v3 = vld [vmem:[#allocation6 + $0x214] ss:$24 sps:$4 sm:$0xff]  }
 0x44b   :  { %5159 = vmatmul.mubr.bf16.gmra.mrb[40].mxu1 %v22128_v5  ;;  %v17821_v5 = vld [vmem:[#allocation6 + $0x18c] ss:$24 sps:$4 sm:$0xff]  }
 0x44c   :  { %5168 = vmatprep.mubr.bf16.mxu1 %v22130_v56  ;;  %7679 = vmatpush1.bf16.msra.mxu0 %v17720_v55  ;;  %v22164_v55 = vld [vmem:[#allocation102_spill] sm:$0xff] }
 0x44d   :  { %7680 = vmatprep.subr.bf16.mxu0 %v17731_v48  ;;  %v17750_v48 = vld [vmem:[#allocation6 + $0x210] ss:$24 sps:$4 sm:$0xff]   ;;  %v17761_v56 = vld [vmem:[#allocation6 + $0x244] ss:$24 sps:$4 sm:$0xff]  }
 0x44f   :  { %5904 = vmatmul.mubr.bf16.gmra.mrb[64].mxu0 %v22163_v13 }
 0x450   :  { %5913 = vmatprep.mubr.bf16.mxu0 %v22157_v12  ;;  %7681 = vmatpush1.bf16.msra.mxu0 %v17729_v32  ;;  %v17759_v32 = vld [vmem:[#allocation6 + $0x240] ss:$24 sps:$4 sm:$0xff]  }
 0x451   :  { %7682 = vmatprep.subr.bf16.mxu0 %v17737_v52  ;;  %v17764_v52 = vld [vmem:[#allocation6 + $0x274] ss:$24 sps:$4 sm:$0xff]  }
 0x453   :  { %5169 = vmatmul.mubr.bf16.gmra.mrb[44].mxu1 %v22134_v31  ;;  %v17813_v31 = vld [vmem:[#allocation6 + $0x158] ss:$24 sps:$4 sm:$0xff]  }
 0x454   :  { %5178 = vmatprep.mubr.bf16.mxu1 %v22136_v35  ;;  %7683 = vmatpush1.bf16.msra.mxu0 %v17735_v44  ;;  %v22165_v44 = vld [vmem:[#allocation103_spill] sm:$0xff] }
 0x455   :  { %7684 = vmatprep.subr.bf16.mxu0 %v17746_v23  ;;  %v17762_v23 = vld [vmem:[#allocation6 + $0x270] ss:$24 sps:$4 sm:$0xff]   ;;  %v17767_v35 = vld [vmem:[#allocation6 + $0x2a4] ss:$24 sps:$4 sm:$0xff]  }
 0x457   :  { %5914 = vmatmul.mubr.bf16.gmra.mrb[68].mxu0 %v22164_v55 }
 0x458   :  { %5923 = vmatprep.mubr.bf16.mxu0 %v22157_v12  ;;  %7685 = vmatpush1.bf16.msra.mxu0 %v17744_v61  ;;  %v17765_v61 = vld [vmem:[#allocation6 + $0x2a0] ss:$24 sps:$4 sm:$0xff]  }
 0x459   :  { %7686 = vmatprep.subr.bf16.mxu0 %v17752_v3  ;;  %v17770_v3 = vld [vmem:[#allocation6 + $0x2d4] ss:$24 sps:$4 sm:$0xff]  }
 0x45b   :  { %5179 = vmatmul.mubr.bf16.gmra.mrb[48].mxu1 %v22140_v29  ;;  %v17774_v29 = vld [vmem:[#allocation6 + $0x330] ss:$24 sps:$4 sm:$0xff]  }
 0x45c   :  { %5188 = vmatprep.mubr.bf16.mxu1 %v22142_v57  ;;  %7687 = vmatpush1.bf16.msra.mxu0 %v17750_v48  ;;  %v22166_v48 = vld [vmem:[#allocation104_spill] sm:$0xff] }
 0x45d   :  { %7688 = vmatprep.subr.bf16.mxu0 %v17761_v56  ;;  %v17768_v56 = vld [vmem:[#allocation6 + $0x2d0] ss:$24 sps:$4 sm:$0xff]   ;;  %v17773_v57 = vld [vmem:[#allocation6 + $0x304] ss:$24 sps:$4 sm:$0xff]  }
 0x45f   :  { %5924 = vmatmul.mubr.bf16.gmra.mrb[72].mxu0 %v22165_v44 }
 0x460   :  { %5933 = vmatprep.mubr.bf16.mxu0 %v22157_v12  ;;  %7689 = vmatpush1.bf16.msra.mxu0 %v17759_v32  ;;  %v22167_v32 = vld [vmem:[#allocation105_spill] sm:$0xff] }
 0x461   :  { %7690 = vmatprep.subr.bf16.mxu0 %v17764_v52  ;;  %v17780_v52 = vld [vmem:[#allocation6 + $0x8] ss:$24 sps:$4 sm:$0xff]  }
 0x463   :  { %5189 = vmatmul.mubr.bf16.gmra.mrb[52].mxu1 %v22146_v49  ;;  %v22173_v49 = vld [vmem:[#allocation16_spill] sm:$0xff] }
 0x464   :  { %5198 = vmatprep.mubr.bf16.mxu1 %v22148_v53  ;;  %7691 = vmatpush1.bf16.msra.mxu0 %v17762_v23  ;;  %v17785_v23 = vld [vmem:[#allocation6 + $0x3c] ss:$24 sps:$4 sm:$0xff]  }
 0x465   :  { %7692 = vmatprep.subr.bf16.mxu0 %v17767_v35  ;;  %v22168_v35 = vld [vmem:[#allocation106_spill] sm:$0xff] }
 0x466   :  { %v17806_v53 = vld [vmem:[#allocation6 + $0xfc] ss:$24 sps:$4 sm:$0xff]  }
 0x467   :  { %5934 = vmatmul.mubr.bf16.gmra.mrb[76].mxu0 %v22166_v48 }
 0x468   :  { %5943 = vmatprep.mubr.bf16.mxu0 %v22157_v12  ;;  %7693 = vmatpush1.bf16.msra.mxu0 %v17765_v61  ;;  %v17791_v61 = vld [vmem:[#allocation6 + $0x6c] ss:$24 sps:$4 sm:$0xff]  }
 0x469   :  { %7694 = vmatprep.subr.bf16.mxu0 %v17770_v3  ;;  %v22169_v3 = vld [vmem:[#allocation107_spill] sm:$0xff] }
 0x46b   :  { %5199 = vmatmul.mubr.bf16.gmra.mrb[56].mxu1 %v19825_v54  ;;  %v17798_v54 = vld [vmem:[#allocation6 + $0xc8] ss:$24 sps:$4 sm:$0xff]  }
 0x46c   :  { %5208 = vmatprep.mubr.bf16.mxu1 %v19837_v9  ;;  %7695 = vmatpush1.bf16.msra.mxu0 %v17768_v56  ;;  %v17789_v56 = vld [vmem:[#allocation6 + $0x68] ss:$24 sps:$4 sm:$0xff]   ;;  %v17795_v9 = vld [vmem:[#allocation6 + $0x98] ss:$24 sps:$4 sm:$0xff]  }
 0x46d   :  { %7817 = vmatprep.subr.bf16.mxu0 %v17773_v57  ;;  %v17783_v57 = vld [vmem:[#allocation6 + $0x38] ss:$24 sps:$4 sm:$0xff]  }
 0x46f   :  { %5944 = vmatmul.mubr.bf16.gmra.mrb[80].mxu0 %v22167_v32 }
 0x470   :  { %5953 = vmatprep.mubr.bf16.mxu0 %v22157_v12 }
 0x473   :  { %5209 = vmatmul.mubr.bf16.gmra.mrb[60].mxu1 %v19835_v59  ;;  %v17797_v59 = vld [vmem:[#allocation6 + $0x9c] ss:$24 sps:$4 sm:$0xff]  }
 0x474   :  { %5251 = vmatprep.mubr.bf16.mxu1 %v22157_v12 }
 0x477   :  { %5954 = vmatmul.mubr.bf16.gmra.mrb[84].mxu0 %v22168_v35 }
 0x478   :  { %5963 = vmatprep.mubr.bf16.mxu0 %v22157_v12 }
 0x47b   :  { %5252 = vmatmul.mubr.bf16.vlgmr.msra.gmra.mrb[16].mxu1 %v22159_v6  ;;  %v17800_v6 = vld [vmem:[#allocation6 + $0xcc] ss:$24 sps:$4 sm:$0xff]  }
 0x47c   :  { %5261 = vmatprep.mubr.bf16.mxu1 %v22157_v12  ;;  %8277 = vmatpush1.bf16.msra.mxu1 %v17780_v52  ;;  %v22170_v52 = vld [vmem:[#allocation108_spill] sm:$0xff] }
 0x47d   :  { %8278 = vmatprep.subr.bf16.mxu1 %v17785_v23  ;;  %v22171_v23 = vld [vmem:[#allocation14_spill] sm:$0xff] }
 0x47f   :  { %5964 = vmatmul.mubr.bf16.gmra.mrb[88].mxu0 %v22169_v3 }
 0x480   :  { %5973 = vmatprep.mubr.bf16.mxu0 %v22157_v12  ;;  %8279 = vmatpush1.bf16.msra.mxu1 %v17783_v57  ;;  %v17771_v57 = vld [vmem:[#allocation6 + $0x300] ss:$24 sps:$4 sm:$0xff]  }
 0x481   :  { %8280 = vmatprep.subr.bf16.mxu1 %v17791_v61  ;;  %v17776_v61 = vld [vmem:[#allocation6 + $0x334] ss:$24 sps:$4 sm:$0xff]  }
 0x483   :  { %5262 = vmatmul.mubr.bf16.gmra.mrb[20].mxu1 %v22160_v34  ;;  %v17804_v34 = vld [vmem:[#allocation6 + $0xf8] ss:$24 sps:$4 sm:$0xff]  }
 0x484   :  { %5271 = vmatprep.mubr.bf16.mxu1 %v22157_v12  ;;  %8281 = vmatpush1.bf16.msra.mxu1 %v17789_v56  ;;  %v17812_v56 = vld [vmem:[#allocation6 + $0x12c] ss:$24 sps:$4 sm:$0xff]  }
 0x485   :  { %8282 = vmatprep.subr.bf16.mxu1 %v17797_v59  ;;  %v22172_v59 = vld [vmem:[#allocation13_spill] sm:$0xff] }
 0x487   :  { %5974 = vmatmul.mubr.bf16.gmra.mrb[92].mxu0 %v22170_v52 }
 0x488   :  { %7696 = vmatprep.mubr.bf16.mxu0 %v22171_v23  ;;  %8283 = vmatpush1.bf16.msra.mxu1 %v17795_v9  ;;  %v17779_v9 = vld [vmem:[#allocation6 + $0x364] ss:$24 sps:$4 sm:$0xff]  }
 0x489   :  { %8284 = vmatprep.subr.bf16.mxu1 %v17800_v6  ;;  %v17810_v6 = vld [vmem:[#allocation6 + $0x128] ss:$24 sps:$4 sm:$0xff]  }
 0x48b   :  { %5272 = vmatmul.mubr.bf16.gmra.mrb[24].mxu1 %v22161_v11  ;;  %v17815_v11 = vld [vmem:[#allocation6 + $0x15c] ss:$24 sps:$4 sm:$0xff]  }
 0x48c   :  { %5281 = vmatprep.mubr.bf16.mxu1 %v22157_v12  ;;  %8285 = vmatpush1.bf16.msra.mxu1 %v17798_v54  ;;  %v17777_v54 = vld [vmem:[#allocation6 + $0x360] ss:$24 sps:$4 sm:$0xff]  }
 0x48d   :  { %8286 = vmatprep.subr.bf16.mxu1 %v17806_v53  ;;  %v17788_v53 = vld [vmem:[#allocation6 + $0x394] ss:$24 sps:$4 sm:$0xff]  }
 0x48f   :  { %7697 = vmatmul.mubr.bf16.vlgmr.msra.gmra.mrb[0].mxu0 %v22172_v59 }
 0x490   :  { %7706 = vmatprep.mubr.bf16.mxu0 %v22173_v49  ;;  %7818 = vmatpush1.bf16.msra.mxu0 %v17771_v57  ;;  %v22174_v57 = vld [vmem:[#allocation15_spill] sm:$0xff] }
 0x491   :  { %7819 = vmatprep.subr.bf16.mxu0 %v17776_v61  ;;  %8287 = vmatpush1.bf16.msra.mxu1 %v17804_v34  ;;  %v22175_v61 = vld [vmem:[#allocation18_spill] sm:$0xff]  ;;  %v17786_v34 = vld [vmem:[#allocation6 + $0x390] ss:$24 sps:$4 sm:$0xff]  }
 0x492   :  { %8288 = vmatprep.subr.bf16.mxu1 %v17812_v56  ;;  %v17794_v56 = vld [vmem:[#allocation6 + $0x3c4] ss:$24 sps:$4 sm:$0xff]  }
 0x493   :  { %5282 = vmatmul.mubr.bf16.gmra.mrb[28].mxu1 %v22162_v4  ;;  %v17819_v4 = vld [vmem:[#allocation6 + $0x188] ss:$24 sps:$4 sm:$0xff]  }
 0x494   :  { %7820 = vmatpush1.bf16.msra.mxu0 %v17774_v29  ;;  %5291 = vmatprep.mubr.bf16.mxu1 %v22157_v12  ;;  %v17827_v29 = vld [vmem:[#allocation6 + $0x1bc] ss:$24 sps:$4 sm:$0xff]  }
 0x495   :  { %7821 = vmatprep.subr.bf16.mxu0 %v17779_v9  ;;  %8289 = vmatpush1.bf16.msra.mxu1 %v17810_v6  ;;  %v17792_v9 = vld [vmem:[#allocation6 + $0x3c0] ss:$24 sps:$4 sm:$0xff]  }
 0x496   :  { %8290 = vmatprep.subr.bf16.mxu1 %v17815_v11  ;;  %v17803_v11 = vld [vmem:[#allocation6 + $0x3f4] ss:$24 sps:$4 sm:$0xff]   ;;  %v17825_v6 = vld [vmem:[#allocation6 + $0x1b8] ss:$24 sps:$4 sm:$0xff]  }
 0x497   :  { %7707 = vmatmul.mubr.bf16.gmra.mrb[4].mxu0 %v22174_v57 }
 0x498   :  { %7716 = vmatprep.mubr.bf16.mxu0 %v22175_v61  ;;  %7822 = vmatpush1.bf16.msra.mxu0 %v17777_v54  ;;  %v22176_v54 = vld [vmem:[#allocation17_spill] sm:$0xff] }
 0x499   :  { %7823 = vmatprep.subr.bf16.mxu0 %v17788_v53  ;;  %8291 = vmatpush1.bf16.msra.mxu1 %v17813_v31  ;;  %v22177_v53 = vld [vmem:[#allocation20_spill] sm:$0xff] }
 0x49a   :  { %8292 = vmatprep.subr.bf16.mxu1 %v17821_v5  ;;  %v17801_v31 = vld [vmem:[#allocation6 + $0x3f0] ss:$24 sps:$4 sm:$0xff]   ;;  %v17809_v5 = vld [vmem:[#allocation6 + $0x424] ss:$24 sps:$4 sm:$0xff]  }
 0x49b   :  { %5292 = vmatmul.mubr.bf16.gmra.mrb[32].mxu1 %v22163_v13  ;;  %v17828_v13 = vld [vmem:[#allocation6 + $0x1e8] ss:$24 sps:$4 sm:$0xff]  }
 0x49c   :  { %5301 = vmatprep.mubr.bf16.mxu1 %v22157_v12  ;;  %7824 = vmatpush1.bf16.msra.mxu0 %v17786_v34  ;;  %v17818_v34 = vld [vmem:[#allocation6 + $0x454] ss:$24 sps:$4 sm:$0xff]  }
 0x49d   :  { %7825 = vmatprep.subr.bf16.mxu0 %v17794_v56  ;;  %8293 = vmatpush1.bf16.msra.mxu1 %v17819_v4  ;;  %v17807_v4 = vld [vmem:[#allocation6 + $0x420] ss:$24 sps:$4 sm:$0xff]  }
 0x49e   :  { %8294 = vmatprep.subr.bf16.mxu1 %v17827_v29  ;;  %v17834_v56 = vld [vmem:[#allocation6 + $0x218] ss:$24 sps:$4 sm:$0xff]   ;;  %v17842_v29 = vld [vmem:[#allocation6 + $0x24c] ss:$24 sps:$4 sm:$0xff]  }
 0x49f   :  { %7717 = vmatmul.mubr.bf16.gmra.mrb[8].mxu0 %v22176_v54 }
 0x4a0   :  { %7726 = vmatprep.mubr.bf16.mxu0 %v22177_v53  ;;  %7826 = vmatpush1.bf16.msra.mxu0 %v17792_v9  ;;  %v22178_v9 = vld [vmem:[#allocation19_spill] sm:$0xff] }
 0x4a1   :  { %7827 = vmatprep.subr.bf16.mxu0 %v17803_v11  ;;  %8295 = vmatpush1.bf16.msra.mxu1 %v17825_v6  ;;  %v22179_v11 = vld [vmem:[#allocation22_spill] sm:$0xff]  ;;  %v17816_v6 = vld [vmem:[#allocation6 + $0x450] ss:$24 sps:$4 sm:$0xff]  }
 0x4a2   :  { %8296 = vmatprep.subr.bf16.mxu1 %v17830_v38  ;;  %v17824_v38 = vld [vmem:[#allocation6 + $0x484] ss:$24 sps:$4 sm:$0xff]  }
 0x4a3   :  { %5302 = vmatmul.mubr.bf16.gmra.mrb[36].mxu1 %v22164_v55  ;;  %v17840_v55 = vld [vmem:[#allocation6 + $0x248] ss:$24 sps:$4 sm:$0xff]  }
 0x4a4   :  { %5311 = vmatprep.mubr.bf16.mxu1 %v22157_v12  ;;  %7828 = vmatpush1.bf16.msra.mxu0 %v17801_v31  ;;  %v17843_v31 = vld [vmem:[#allocation6 + $0x278] ss:$24 sps:$4 sm:$0xff]  }
 0x4a5   :  { %7829 = vmatprep.subr.bf16.mxu0 %v17809_v5  ;;  %8297 = vmatpush1.bf16.msra.mxu1 %v17828_v13  ;;  %v17822_v13 = vld [vmem:[#allocation6 + $0x480] ss:$24 sps:$4 sm:$0xff]   ;;  %v17851_v5 = vld [vmem:[#allocation6 + $0x2ac] ss:$24 sps:$4 sm:$0xff]  }
 0x4a6   :  { %8298 = vmatprep.subr.bf16.mxu1 %v17836_v30  ;;  %v17833_v30 = vld [vmem:[#allocation6 + $0x4b4] ss:$24 sps:$4 sm:$0xff]  }
 0x4a7   :  { %7727 = vmatmul.mubr.bf16.gmra.mrb[12].mxu0 %v22178_v9 }
 0x4a8   :  { %7736 = vmatprep.mubr.bf16.mxu0 %v22179_v11  ;;  %7830 = vmatpush1.bf16.msra.mxu0 %v17807_v4  ;;  %v17831_v4 = vld [vmem:[#allocation6 + $0x4b0] ss:$24 sps:$4 sm:$0xff]  }
 0x4a9   :  { %7831 = vmatprep.subr.bf16.mxu0 %v17818_v34  ;;  %8299 = vmatpush1.bf16.msra.mxu1 %v17834_v56  ;;  %v17839_v34 = vld [vmem:[#allocation6 + $0x4e4] ss:$24 sps:$4 sm:$0xff]   ;;  %v17849_v56 = vld [vmem:[#allocation6 + $0x2a8] ss:$24 sps:$4 sm:$0xff]  }
 0x4aa   :  { %8300 = vmatprep.subr.bf16.mxu1 %v17842_v29  ;;  %v17857_v29 = vld [vmem:[#allocation6 + $0x2dc] ss:$24 sps:$4 sm:$0xff]  }
 0x4ab   :  { %5312 = vmatmul.mubr.bf16.gmra.mrb[40].mxu1 %v22165_v44 }
 0x4ac   :  { %5321 = vmatprep.mubr.bf16.mxu1 %v22157_v12  ;;  %7832 = vmatpush1.bf16.msra.mxu0 %v17816_v6  ;;  %v17855_v6 = vld [vmem:[#allocation6 + $0x2d8] ss:$24 sps:$4 sm:$0xff]  }
 0x4ad   :  { %7833 = vmatprep.subr.bf16.mxu0 %v17824_v38  ;;  %8301 = vmatpush1.bf16.msra.mxu1 %v17840_v55  ;;  %v17837_v55 = vld [vmem:[#allocation6 + $0x4e0] ss:$24 sps:$4 sm:$0xff]   ;;  %v17878_v38 = vld [vmem:[#allocation6 + $0x30c] ss:$24 sps:$4 sm:$0xff]  }
 0x4ae   :  { %8302 = vmatprep.subr.bf16.mxu1 %v17845_v45  ;;  %v17848_v45 = vld [vmem:[#allocation6 + $0x514] ss:$24 sps:$4 sm:$0xff]  }
 0x4af   :  { %7737 = vmatmul.mubr.bf16.gmra.mrb[16].mxu0 %v22078_v63 }
 0x4b0   :  { %7746 = vmatprep.mubr.bf16.mxu0 %v22079_v18  ;;  %7834 = vmatpush1.bf16.msra.mxu0 %v17822_v13  ;;  %v17846_v13 = vld [vmem:[#allocation6 + $0x510] ss:$24 sps:$4 sm:$0xff]  }
 0x4b1   :  { %7835 = vmatprep.subr.bf16.mxu0 %v17833_v30  ;;  %8303 = vmatpush1.bf16.msra.mxu1 %v17843_v31  ;;  %v17854_v30 = vld [vmem:[#allocation6 + $0x544] ss:$24 sps:$4 sm:$0xff]   ;;  %v17852_v31 = vld [vmem:[#allocation6 + $0x540] ss:$24 sps:$4 sm:$0xff]  }
 0x4b2   :  { %8304 = vmatprep.subr.bf16.mxu1 %v17851_v5  ;;  %v17860_v5 = vld [vmem:[#allocation6 + $0x574] ss:$24 sps:$4 sm:$0xff]  }
 0x4b3   :  { %5322 = vmatmul.mubr.bf16.gmra.mrb[44].mxu1 %v22166_v48 }
 0x4b4   :  { %5331 = vmatprep.mubr.bf16.mxu1 %v22157_v12  ;;  %7836 = vmatpush1.bf16.msra.mxu0 %v17831_v4  ;;  %v17858_v4 = vld [vmem:[#allocation6 + $0x570] ss:$24 sps:$4 sm:$0xff]  }
 0x4b5   :  { %7837 = vmatprep.subr.bf16.mxu0 %v17839_v34  ;;  %8305 = vmatpush1.bf16.msra.mxu1 %v17849_v56  ;;  %v17863_v34 = vld [vmem:[#allocation6 + $0x5a4] ss:$24 sps:$4 sm:$0xff]   ;;  %v17861_v56 = vld [vmem:[#allocation6 + $0x5a0] ss:$24 sps:$4 sm:$0xff]  }
 0x4b6   :  { %8306 = vmatprep.subr.bf16.mxu1 %v17857_v29  ;;  %v17866_v29 = vld [vmem:[#allocation6 + $0x5d4] ss:$24 sps:$4 sm:$0xff]  }
 0x4b7   :  { %7747 = vmatmul.mubr.bf16.gmra.mrb[20].mxu0 %v22080_v39 }
 0x4b8   :  { %7756 = vmatprep.mubr.bf16.mxu0 %v22081_v17  ;;  %7838 = vmatpush1.bf16.msra.mxu0 %v17837_v55  ;;  %v17864_v55 = vld [vmem:[#allocation6 + $0x5d0] ss:$24 sps:$4 sm:$0xff]  }
 0x4b9   :  { %7839 = vmatprep.subr.bf16.mxu0 %v17848_v45  ;;  %8307 = vmatpush1.bf16.msra.mxu1 %v17855_v6  ;;  %v17869_v45 = vld [vmem:[#allocation6 + $0x604] ss:$24 sps:$4 sm:$0xff]   ;;  %v17876_v6 = vld [vmem:[#allocation6 + $0x308] ss:$24 sps:$4 sm:$0xff]  }
 0x4ba   :  { %8429 = vmatprep.subr.bf16.mxu1 %v17878_v38  ;;  %v17881_v38 = vld [vmem:[#allocation6 + $0x33c] ss:$24 sps:$4 sm:$0xff]  }
 0x4bb   :  { %5332 = vmatmul.mubr.bf16.gmra.mrb[48].mxu1 %v22167_v32 }
 0x4bc   :  { %5341 = vmatprep.mubr.bf16.mxu1 %v22157_v12  ;;  %7840 = vmatpush1.bf16.msra.mxu0 %v17846_v13  ;;  %v17879_v13 = vld [vmem:[#allocation6 + $0x338] ss:$24 sps:$4 sm:$0xff]  }
 0x4bd   :  { %7841 = vmatprep.subr.bf16.mxu0 %v17854_v30  ;;  %v17887_v30 = vld [vmem:[#allocation6 + $0x36c] ss:$24 sps:$4 sm:$0xff]  }
 0x4bf   :  { %7757 = vmatmul.mubr.bf16.gmra.mrb[24].mxu0 %v22082_v43 }
 0x4c0   :  { %7766 = vmatprep.mubr.bf16.mxu0 %v22083_v15  ;;  %7842 = vmatpush1.bf16.msra.mxu0 %v17852_v31  ;;  %v17885_v31 = vld [vmem:[#allocation6 + $0x368] ss:$24 sps:$4 sm:$0xff]  }
 0x4c1   :  { %7843 = vmatprep.subr.bf16.mxu0 %v17860_v5  ;;  %v17893_v5 = vld [vmem:[#allocation6 + $0x39c] ss:$24 sps:$4 sm:$0xff]  }
 0x4c3   :  { %5342 = vmatmul.mubr.bf16.gmra.mrb[52].mxu1 %v22168_v35 }
 0x4c4   :  { %5351 = vmatprep.mubr.bf16.mxu1 %v22157_v12  ;;  %7844 = vmatpush1.bf16.msra.mxu0 %v17858_v4  ;;  %v17891_v4 = vld [vmem:[#allocation6 + $0x398] ss:$24 sps:$4 sm:$0xff]  }
 0x4c5   :  { %7845 = vmatprep.subr.bf16.mxu0 %v17863_v34  ;;  %v17896_v34 = vld [vmem:[#allocation6 + $0x3cc] ss:$24 sps:$4 sm:$0xff]  }
 0x4c7   :  { %7767 = vmatmul.mubr.bf16.gmra.mrb[28].mxu0 %v22084_v28 }
 0x4c8   :  { %7776 = vmatprep.mubr.bf16.mxu0 %v22085_v25  ;;  %7846 = vmatpush1.bf16.msra.mxu0 %v17861_v56  ;;  %v22180_v56 = vld [vmem:[#allocation42_spill] sm:$0xff] }
 0x4c9   :  { %7847 = vmatprep.subr.bf16.mxu0 %v17866_v29  ;;  %v17894_v29 = vld [vmem:[#allocation6 + $0x3c8] ss:$24 sps:$4 sm:$0xff]  }
 0x4cb   :  { %5352 = vmatmul.mubr.bf16.gmra.mrb[56].mxu1 %v22169_v3 }
 0x4cc   :  { %5361 = vmatprep.mubr.bf16.mxu1 %v22157_v12  ;;  %7848 = vmatpush1.bf16.msra.mxu0 %v17864_v55  ;;  %v17902_v55 = vld [vmem:[#allocation6 + $0x3fc] ss:$24 sps:$4 sm:$0xff]  }
 0x4cd   :  { %7970 = vmatprep.subr.bf16.mxu0 %v17869_v45  ;;  %v17867_v45 = vld [vmem:[#allocation6 + $0x600] ss:$24 sps:$4 sm:$0xff]  }
 0x4cf   :  { %7777 = vmatmul.mubr.bf16.gmra.mrb[32].mxu0 %v19387_v37 }
 0x4d0   :  { %7786 = vmatprep.mubr.bf16.mxu0 %v22086_v50 }
 0x4d3   :  { %5362 = vmatmul.mubr.bf16.gmra.mrb[60].mxu1 %v22170_v52  ;;  %v17909_v52 = vld [vmem:[#allocation6 + $0x458] ss:$24 sps:$4 sm:$0xff]  }
 0x4d4   :  { %8308 = vmatprep.mubr.bf16.mxu1 %v22171_v23 }
 0x4d7   :  { %7787 = vmatmul.mubr.bf16.gmra.mrb[36].mxu0 %v22087_v7 }
 0x4d8   :  { %7796 = vmatprep.mubr.bf16.mxu0 %v22088_v20 }
 0x4db   :  { %8309 = vmatmul.mubr.bf16.vlgmr.msra.gmra.mrb[16].mxu1 %v22172_v59 }
 0x4dc   :  { %8318 = vmatprep.mubr.bf16.mxu1 %v22173_v49  ;;  %8430 = vmatpush1.bf16.msra.mxu1 %v17876_v6  ;;  %v17872_v6 = vld [vmem:[#allocation6 + $0x634] ss:$24 sps:$4 sm:$0xff]  }
 0x4dd   :  { %8431 = vmatprep.subr.bf16.mxu1 %v17881_v38  ;;  %v17900_v38 = vld [vmem:[#allocation6 + $0x3f8] ss:$24 sps:$4 sm:$0xff]  }
 0x4df   :  { %7797 = vmatmul.mubr.bf16.gmra.mrb[40].mxu0 %v22090_v40 }
 0x4e0   :  { %7806 = vmatprep.mubr.bf16.mxu0 %v22091_v2  ;;  %8432 = vmatpush1.bf16.msra.mxu1 %v17879_v13  ;;  %v17908_v13 = vld [vmem:[#allocation6 + $0x42c] ss:$24 sps:$4 sm:$0xff]  }
 0x4e1   :  { %8433 = vmatprep.subr.bf16.mxu1 %v17887_v30  ;;  %v22181_v30 = vld [vmem:[#allocation41_spill] sm:$0xff] }
 0x4e3   :  { %8319 = vmatmul.mubr.bf16.gmra.mrb[20].mxu1 %v22174_v57 }
 0x4e4   :  { %8328 = vmatprep.mubr.bf16.mxu1 %v22175_v61  ;;  %8434 = vmatpush1.bf16.msra.mxu1 %v17885_v31  ;;  %v17870_v31 = vld [vmem:[#allocation6 + $0x630] ss:$24 sps:$4 sm:$0xff]  }
 0x4e5   :  { %8435 = vmatprep.subr.bf16.mxu1 %v17893_v5  ;;  %v17875_v5 = vld [vmem:[#allocation6 + $0x664] ss:$24 sps:$4 sm:$0xff]  }
 0x4e7   :  { %7807 = vmatmul.mubr.bf16.gmra.mrb[44].mxu0 %v22092_v42 }
 0x4e8   :  { %7849 = vmatprep.mubr.bf16.mxu0 %v22180_v56  ;;  %8436 = vmatpush1.bf16.msra.mxu1 %v17891_v4  ;;  %v17906_v4 = vld [vmem:[#allocation6 + $0x428] ss:$24 sps:$4 sm:$0xff]  }
 0x4e9   :  { %8437 = vmatprep.subr.bf16.mxu1 %v17896_v34  ;;  %v17911_v34 = vld [vmem:[#allocation6 + $0x45c] ss:$24 sps:$4 sm:$0xff]  }
 0x4eb   :  { %8329 = vmatmul.mubr.bf16.gmra.mrb[24].mxu1 %v22176_v54 }
 0x4ec   :  { %8338 = vmatprep.mubr.bf16.mxu1 %v22177_v53  ;;  %8438 = vmatpush1.bf16.msra.mxu1 %v17894_v29  ;;  %v17873_v29 = vld [vmem:[#allocation6 + $0x660] ss:$24 sps:$4 sm:$0xff]   ;;  %v17917_v53 = vld [vmem:[#allocation6 + $0x48c] ss:$24 sps:$4 sm:$0xff]  }
 0x4ed   :  { %8439 = vmatprep.subr.bf16.mxu1 %v17902_v55  ;;  %v17884_v55 = vld [vmem:[#allocation6 + $0x694] ss:$24 sps:$4 sm:$0xff]  }
 0x4ef   :  { %7850 = vmatmul.mubr.bf16.vlgmr.msra.gmra.mrb[0].mxu0 %v22181_v30 }
 0x4f0   :  { %7859 = vmatprep.mubr.bf16.mxu0 %v22095_v62  ;;  %7971 = vmatpush1.bf16.msra.mxu0 %v17867_v45  ;;  %v17882_v45 = vld [vmem:[#allocation6 + $0x690] ss:$24 sps:$4 sm:$0xff]  }
 0x4f1   :  { %7972 = vmatprep.subr.bf16.mxu0 %v17872_v6  ;;  %8440 = vmatpush1.bf16.msra.mxu1 %v17900_v38  ;;  %v17890_v6 = vld [vmem:[#allocation6 + $0x6c4] ss:$24 sps:$4 sm:$0xff]   ;;  %v17915_v38 = vld [vmem:[#allocation6 + $0x488] ss:$24 sps:$4 sm:$0xff]  }
 0x4f2   :  { %8441 = vmatprep.subr.bf16.mxu1 %v17908_v13  ;;  %v17923_v13 = vld [vmem:[#allocation6 + $0x4bc] ss:$24 sps:$4 sm:$0xff]  }
 0x4f3   :  { %8339 = vmatmul.mubr.bf16.gmra.mrb[28].mxu1 %v22178_v9 }
 0x4f4   :  { %8348 = vmatprep.mubr.bf16.mxu1 %v22179_v11  ;;  %7973 = vmatpush1.bf16.msra.mxu0 %v17870_v31  ;;  %v17888_v31 = vld [vmem:[#allocation6 + $0x6c0] ss:$24 sps:$4 sm:$0xff]  }
 0x4f5   :  { %7974 = vmatprep.subr.bf16.mxu0 %v17875_v5  ;;  %8442 = vmatpush1.bf16.msra.mxu1 %v17906_v4  ;;  %v17899_v5 = vld [vmem:[#allocation6 + $0x6f4] ss:$24 sps:$4 sm:$0xff]   ;;  %v17921_v4 = vld [vmem:[#allocation6 + $0x4b8] ss:$24 sps:$4 sm:$0xff]  }
 0x4f6   :  { %8443 = vmatprep.subr.bf16.mxu1 %v17911_v34  ;;  %v17926_v34 = vld [vmem:[#allocation6 + $0x4ec] ss:$24 sps:$4 sm:$0xff]  }
 0x4f7   :  { %7860 = vmatmul.mubr.bf16.gmra.mrb[4].mxu0 %v19521_v21 }
 0x4f8   :  { %7869 = vmatprep.mubr.bf16.mxu0 %v22096_v22  ;;  %7975 = vmatpush1.bf16.msra.mxu0 %v17873_v29  ;;  %v17924_v29 = vld [vmem:[#allocation6 + $0x4e8] ss:$24 sps:$4 sm:$0xff]  }
 0x4f9   :  { %7976 = vmatprep.subr.bf16.mxu0 %v17884_v55  ;;  %8444 = vmatpush1.bf16.msra.mxu1 %v17909_v52  ;;  %v17897_v52 = vld [vmem:[#allocation6 + $0x6f0] ss:$24 sps:$4 sm:$0xff]   ;;  %v17932_v55 = vld [vmem:[#allocation6 + $0x51c] ss:$24 sps:$4 sm:$0xff]  }
 0x4fa   :  { %8445 = vmatprep.subr.bf16.mxu1 %v17917_v53  ;;  %v17905_v53 = vld [vmem:[#allocation6 + $0x724] ss:$24 sps:$4 sm:$0xff]  }
 0x4fb   :  { %8349 = vmatmul.mubr.bf16.gmra.mrb[32].mxu1 %v22078_v63 }
 0x4fc   :  { %8358 = vmatprep.mubr.bf16.mxu1 %v22079_v18  ;;  %7977 = vmatpush1.bf16.msra.mxu0 %v17882_v45  ;;  %v17903_v45 = vld [vmem:[#allocation6 + $0x720] ss:$24 sps:$4 sm:$0xff]  }
 0x4fd   :  { %7978 = vmatprep.subr.bf16.mxu0 %v17890_v6  ;;  %8446 = vmatpush1.bf16.msra.mxu1 %v17915_v38  ;;  %v17914_v6 = vld [vmem:[#allocation6 + $0x754] ss:$24 sps:$4 sm:$0xff]   ;;  %v17930_v38 = vld [vmem:[#allocation6 + $0x518] ss:$24 sps:$4 sm:$0xff]  }
 0x4fe   :  { %8447 = vmatprep.subr.bf16.mxu1 %v17923_v13  ;;  %v17938_v13 = vld [vmem:[#allocation6 + $0x54c] ss:$24 sps:$4 sm:$0xff]  }
 0x4ff   :  { %7870 = vmatmul.mubr.bf16.gmra.mrb[8].mxu0 %v19536_v1 }
 0x500   :  { %7879 = vmatprep.mubr.bf16.mxu0 %v19553_v8  ;;  %7979 = vmatpush1.bf16.msra.mxu0 %v17888_v31  ;;  %v22182_v31 = vld [vmem:[#allocation50_spill] sm:$0xff] }
 0x501   :  { %7980 = vmatprep.subr.bf16.mxu0 %v17899_v5  ;;  %8448 = vmatpush1.bf16.msra.mxu1 %v17921_v4  ;;  %v17912_v5 = vld [vmem:[#allocation6 + $0x750] ss:$24 sps:$4 sm:$0xff]   ;;  %v17920_v4 = vld [vmem:[#allocation6 + $0x784] ss:$24 sps:$4 sm:$0xff]  }
 0x502   :  { %8449 = vmatprep.subr.bf16.mxu1 %v17926_v34  ;;  %v17936_v34 = vld [vmem:[#allocation6 + $0x548] ss:$24 sps:$4 sm:$0xff]  }
 0x503   :  { %8359 = vmatmul.mubr.bf16.gmra.mrb[36].mxu1 %v22080_v39 }
 0x504   :  { %8368 = vmatprep.mubr.bf16.mxu1 %v22081_v17  ;;  %7981 = vmatpush1.bf16.msra.mxu0 %v17897_v52  ;;  %v17941_v17 = vld [vmem:[#allocation6 + $0x57c] ss:$24 sps:$4 sm:$0xff]   ;;  %v17918_v52 = vld [vmem:[#allocation6 + $0x780] ss:$24 sps:$4 sm:$0xff]  }
 0x505   :  { %7982 = vmatprep.subr.bf16.mxu0 %v17905_v53  ;;  %8450 = vmatpush1.bf16.msra.mxu1 %v17924_v29  ;;  %v17929_v53 = vld [vmem:[#allocation6 + $0x7b4] ss:$24 sps:$4 sm:$0xff]   ;;  %v17939_v29 = vld [vmem:[#allocation6 + $0x578] ss:$24 sps:$4 sm:$0xff]  }
 0x506   :  { %8451 = vmatprep.subr.bf16.mxu1 %v17932_v55  ;;  %v17947_v55 = vld [vmem:[#allocation6 + $0x5ac] ss:$24 sps:$4 sm:$0xff]  }
 0x507   :  { %7880 = vmatmul.mubr.bf16.gmra.mrb[12].mxu0 %v19551_v10 }
 0x508   :  { %7889 = vmatprep.mubr.bf16.mxu0 %v22182_v31  ;;  %7983 = vmatpush1.bf16.msra.mxu0 %v17903_v45  ;;  %v17927_v45 = vld [vmem:[#allocation6 + $0x7b0] ss:$24 sps:$4 sm:$0xff]  }
 0x509   :  { %7984 = vmatprep.subr.bf16.mxu0 %v17914_v6  ;;  %8452 = vmatpush1.bf16.msra.mxu1 %v17930_v38  ;;  %v17935_v6 = vld [vmem:[#allocation6 + $0x7e4] ss:$24 sps:$4 sm:$0xff]   ;;  %v17945_v38 = vld [vmem:[#allocation6 + $0x5a8] ss:$24 sps:$4 sm:$0xff]  }
 0x50a   :  { %8453 = vmatprep.subr.bf16.mxu1 %v17938_v13  ;;  %v17953_v13 = vld [vmem:[#allocation6 + $0x5dc] ss:$24 sps:$4 sm:$0xff]  }
 0x50b   :  { %8369 = vmatmul.mubr.bf16.gmra.mrb[40].mxu1 %v22082_v43 }
 0x50c   :  { %8378 = vmatprep.mubr.bf16.mxu1 %v22083_v15  ;;  %7985 = vmatpush1.bf16.msra.mxu0 %v17912_v5  ;;  %v17933_v5 = vld [vmem:[#allocation6 + $0x7e0] ss:$24 sps:$4 sm:$0xff]  }
 0x50d   :  { %7986 = vmatprep.subr.bf16.mxu0 %v17920_v4  ;;  %8454 = vmatpush1.bf16.msra.mxu1 %v17936_v34  ;;  %v17951_v4 = vld [vmem:[#allocation6 + $0x5d8] ss:$24 sps:$4 sm:$0xff]   ;;  %v17971_v34 = vld [vmem:[#allocation6 + $0x60c] ss:$24 sps:$4 sm:$0xff]  }
 0x50e   :  { %8455 = vmatprep.subr.bf16.mxu1 %v17941_v17  ;;  %v17944_v17 = vld [vmem:[#allocation6 + $0x814] ss:$24 sps:$4 sm:$0xff]  }
 0x50f   :  { %7890 = vmatmul.mubr.bf16.gmra.mrb[16].mxu0 %v19566_v41 }
 0x510   :  { %7899 = vmatprep.mubr.bf16.mxu0 %v19583_v27  ;;  %7987 = vmatpush1.bf16.msra.mxu0 %v17918_v52  ;;  %v17942_v52 = vld [vmem:[#allocation6 + $0x810] ss:$24 sps:$4 sm:$0xff]  }
 0x511   :  { %7988 = vmatprep.subr.bf16.mxu0 %v17929_v53  ;;  %8456 = vmatpush1.bf16.msra.mxu1 %v17939_v29  ;;  %v17950_v53 = vld [vmem:[#allocation6 + $0x844] ss:$24 sps:$4 sm:$0xff]   ;;  %v17948_v29 = vld [vmem:[#allocation6 + $0x840] ss:$24 sps:$4 sm:$0xff]  }
 0x512   :  { %8457 = vmatprep.subr.bf16.mxu1 %v17947_v55  ;;  %v17956_v55 = vld [vmem:[#allocation6 + $0x874] ss:$24 sps:$4 sm:$0xff]  }
 0x513   :  { %8379 = vmatmul.mubr.bf16.gmra.mrb[44].mxu1 %v22084_v28 }
 0x514   :  { %8388 = vmatprep.mubr.bf16.mxu1 %v22085_v25  ;;  %7989 = vmatpush1.bf16.msra.mxu0 %v17927_v45  ;;  %v17954_v45 = vld [vmem:[#allocation6 + $0x870] ss:$24 sps:$4 sm:$0xff]  }
 0x515   :  { %7990 = vmatprep.subr.bf16.mxu0 %v17935_v6  ;;  %8458 = vmatpush1.bf16.msra.mxu1 %v17945_v38  ;;  %v17959_v6 = vld [vmem:[#allocation6 + $0x8a4] ss:$24 sps:$4 sm:$0xff]   ;;  %v17957_v38 = vld [vmem:[#allocation6 + $0x8a0] ss:$24 sps:$4 sm:$0xff]  }
 0x516   :  { %8459 = vmatprep.subr.bf16.mxu1 %v17953_v13  ;;  %v17962_v13 = vld [vmem:[#allocation6 + $0x8d4] ss:$24 sps:$4 sm:$0xff]  }
 0x517   :  { %7900 = vmatmul.mubr.bf16.gmra.mrb[20].mxu0 %v19581_v26 }
 0x518   :  { %7909 = vmatprep.mubr.bf16.mxu0 %v19598_v51  ;;  %7991 = vmatpush1.bf16.msra.mxu0 %v17933_v5  ;;  %v17960_v5 = vld [vmem:[#allocation6 + $0x8d0] ss:$24 sps:$4 sm:$0xff]  }
 0x519   :  { %7992 = vmatprep.subr.bf16.mxu0 %v17944_v17  ;;  %8460 = vmatpush1.bf16.msra.mxu1 %v17951_v4  ;;  %v17965_v17 = vld [vmem:[#allocation6 + $0x904] ss:$24 sps:$4 sm:$0xff]  }
 0x51a   :  { %8582 = vmatprep.subr.bf16.mxu1 %v17971_v34  ;;  %v22183_v4 = vld [vmem:[#allocation62_spill] sm:$0xff]  ;;  %v17969_v34 = vld [vmem:[#allocation6 + $0x608] ss:$24 sps:$4 sm:$0xff]  }
 0x51b   :  { %8389 = vmatmul.mubr.bf16.gmra.mrb[48].mxu1 %v19387_v37 }
 0x51c   :  { %8398 = vmatprep.mubr.bf16.mxu1 %v22086_v50  ;;  %7993 = vmatpush1.bf16.msra.mxu0 %v17942_v52  ;;  %v17974_v52 = vld [vmem:[#allocation6 + $0x63c] ss:$24 sps:$4 sm:$0xff]  }
 0x51d   :  { %7994 = vmatprep.subr.bf16.mxu0 %v17950_v53  ;;  %v17972_v53 = vld [vmem:[#allocation6 + $0x638] ss:$24 sps:$4 sm:$0xff]  }
 0x51f   :  { %7910 = vmatmul.mubr.bf16.gmra.mrb[24].mxu0 %v19596_v14 }
 0x520   :  { %7919 = vmatprep.mubr.bf16.mxu0 %v19613_v24  ;;  %7995 = vmatpush1.bf16.msra.mxu0 %v17948_v29  ;;  %v17977_v29 = vld [vmem:[#allocation6 + $0x66c] ss:$24 sps:$4 sm:$0xff]  }
 0x521   :  { %7996 = vmatprep.subr.bf16.mxu0 %v17956_v55  ;;  %v22184_v55 = vld [vmem:[#allocation61_spill] sm:$0xff] }
 0x523   :  { %8399 = vmatmul.mubr.bf16.gmra.mrb[52].mxu1 %v22087_v7 }
 0x524   :  { %8408 = vmatprep.mubr.bf16.mxu1 %v22088_v20  ;;  %7997 = vmatpush1.bf16.msra.mxu0 %v17954_v45  ;;  %v22185_v45 = vld [vmem:[#allocation64_spill] sm:$0xff] }
 0x525   :  { %7998 = vmatprep.subr.bf16.mxu0 %v17959_v6  ;;  %v17975_v6 = vld [vmem:[#allocation6 + $0x668] ss:$24 sps:$4 sm:$0xff]  }
 0x527   :  { %7920 = vmatmul.mubr.bf16.gmra.mrb[28].mxu0 %v22060_v46 }
 0x528   :  { %7929 = vmatprep.mubr.bf16.mxu0 %v22097_v19  ;;  %7999 = vmatpush1.bf16.msra.mxu0 %v17957_v38  ;;  %v17983_v38 = vld [vmem:[#allocation6 + $0x69c] ss:$24 sps:$4 sm:$0xff]  }
 0x529   :  { %8000 = vmatprep.subr.bf16.mxu0 %v17962_v13  ;;  %v17981_v13 = vld [vmem:[#allocation6 + $0x698] ss:$24 sps:$4 sm:$0xff]  }
 0x52b   :  { %8409 = vmatmul.mubr.bf16.gmra.mrb[56].mxu1 %v22090_v40 }
 0x52c   :  { %8418 = vmatprep.mubr.bf16.mxu1 %v22091_v2  ;;  %8001 = vmatpush1.bf16.msra.mxu0 %v17960_v5  ;;  %v17986_v5 = vld [vmem:[#allocation6 + $0x6cc] ss:$24 sps:$4 sm:$0xff]  }
 0x52d   :  { %8123 = vmatprep.subr.bf16.mxu0 %v17965_v17  ;;  %v22186_v17 = vld [vmem:[#allocation63_spill] sm:$0xff] }
 0x52f   :  { %7930 = vmatmul.mubr.bf16.gmra.mrb[32].mxu0 %v22062_v47 }
 0x530   :  { %7939 = vmatprep.mubr.bf16.mxu0 %v22098_v33 }
 0x533   :  { %8419 = vmatmul.mubr.bf16.gmra.mrb[60].mxu1 %v22092_v42 }
 0x534   :  { %8461 = vmatprep.mubr.bf16.mxu1 %v22180_v56  ;;  %v18001_v56 = vld [vmem:[#allocation6 + $0x78c] ss:$24 sps:$4 sm:$0xff]  }
 0x537   :  { %7940 = vmatmul.mubr.bf16.gmra.mrb[36].mxu0 %v22065_v0 }
 0x538   :  { %7949 = vmatprep.mubr.bf16.mxu0 %v22183_v4 }
 0x53b   :  { %8462 = vmatmul.mubr.bf16.vlgmr.msra.gmra.mrb[16].mxu1 %v22181_v30  ;;  %v17966_v30 = vld [vmem:[#allocation6 + $0x930] ss:$24 sps:$4 sm:$0xff]  }
 0x53c   :  { %8471 = vmatprep.mubr.bf16.mxu1 %v22095_v62  ;;  %8583 = vmatpush1.bf16.msra.mxu1 %v17969_v34  ;;  %v22187_v34 = vld [vmem:[#allocation70_spill] sm:$0xff] }
 0x53d   :  { %8584 = vmatprep.subr.bf16.mxu1 %v17974_v52  ;;  %v17984_v52 = vld [vmem:[#allocation6 + $0x6c8] ss:$24 sps:$4 sm:$0xff]   ;;  %v17989_v62 = vld [vmem:[#allocation6 + $0x6fc] ss:$24 sps:$4 sm:$0xff]  }
 0x53f   :  { %7950 = vmatmul.mubr.bf16.gmra.mrb[40].mxu0 %v22184_v55 }
 0x540   :  { %7959 = vmatprep.mubr.bf16.mxu0 %v22185_v45  ;;  %8585 = vmatpush1.bf16.msra.mxu1 %v17972_v53  ;;  %v17963_v53 = vld [vmem:[#allocation6 + $0x900] ss:$24 sps:$4 sm:$0xff]  }
 0x541   :  { %8586 = vmatprep.subr.bf16.mxu1 %v17977_v29  ;;  %v17968_v29 = vld [vmem:[#allocation6 + $0x934] ss:$24 sps:$4 sm:$0xff]  }
 0x543   :  { %8472 = vmatmul.mubr.bf16.gmra.mrb[20].mxu1 %v19521_v21  ;;  %v22189_v21 = vld [vmem:[#allocation72_spill] sm:$0xff] }
 0x544   :  { %8481 = vmatprep.mubr.bf16.mxu1 %v22096_v22  ;;  %8587 = vmatpush1.bf16.msra.mxu1 %v17975_v6  ;;  %v17987_v22 = vld [vmem:[#allocation6 + $0x6f8] ss:$24 sps:$4 sm:$0xff]   ;;  %v17995_v6 = vld [vmem:[#allocation6 + $0x72c] ss:$24 sps:$4 sm:$0xff]  }
 0x545   :  { %8588 = vmatprep.subr.bf16.mxu1 %v17983_v38  ;;  %v22188_v38 = vld [vmem:[#allocation69_spill] sm:$0xff] }
 0x547   :  { %7960 = vmatmul.mubr.bf16.gmra.mrb[44].mxu0 %v22186_v17 }
 0x548   :  { %8002 = vmatprep.mubr.bf16.mxu0 %v22187_v34  ;;  %8589 = vmatpush1.bf16.msra.mxu1 %v17981_v13  ;;  %v17980_v13 = vld [vmem:[#allocation6 + $0x964] ss:$24 sps:$4 sm:$0xff]  }
 0x549   :  { %8590 = vmatprep.subr.bf16.mxu1 %v17986_v5  ;;  %v17993_v5 = vld [vmem:[#allocation6 + $0x728] ss:$24 sps:$4 sm:$0xff]  }
 0x54b   :  { %8482 = vmatmul.mubr.bf16.gmra.mrb[24].mxu1 %v19536_v1  ;;  %v17998_v1 = vld [vmem:[#allocation6 + $0x75c] ss:$24 sps:$4 sm:$0xff]  }
 0x54c   :  { %8491 = vmatprep.mubr.bf16.mxu1 %v19553_v8  ;;  %8591 = vmatpush1.bf16.msra.mxu1 %v17984_v52  ;;  %v17978_v52 = vld [vmem:[#allocation6 + $0x960] ss:$24 sps:$4 sm:$0xff]  }
 0x54d   :  { %8592 = vmatprep.subr.bf16.mxu1 %v17989_v62  ;;  %v17992_v62 = vld [vmem:[#allocation6 + $0x994] ss:$24 sps:$4 sm:$0xff]   ;;  %v17996_v8 = vld [vmem:[#allocation6 + $0x758] ss:$24 sps:$4 sm:$0xff]  }
 0x54f   :  { %8003 = vmatmul.mubr.bf16.vlgmr.msra.gmra.mrb[0].mxu0 %v22188_v38 }
 0x550   :  { %8012 = vmatprep.mubr.bf16.mxu0 %v22189_v21  ;;  %8124 = vmatpush1.bf16.msra.mxu0 %v17963_v53  ;;  %v22190_v53 = vld [vmem:[#allocation74_spill] sm:$0xff] }
 0x551   :  { %8125 = vmatprep.subr.bf16.mxu0 %v17968_v29  ;;  %8593 = vmatpush1.bf16.msra.mxu1 %v17987_v22  ;;  %v17990_v22 = vld [vmem:[#allocation6 + $0x990] ss:$24 sps:$4 sm:$0xff]  }
 0x552   :  { %8594 = vmatprep.subr.bf16.mxu1 %v17995_v6  ;;  %v17999_v29 = vld [vmem:[#allocation6 + $0x788] ss:$24 sps:$4 sm:$0xff]   ;;  %v18004_v6 = vld [vmem:[#allocation6 + $0x9c4] ss:$24 sps:$4 sm:$0xff]  }
 0x553   :  { %8492 = vmatmul.mubr.bf16.gmra.mrb[28].mxu1 %v19551_v10 }
 0x554   :  { %8501 = vmatprep.mubr.bf16.mxu1 %v22182_v31  ;;  %8126 = vmatpush1.bf16.msra.mxu0 %v17966_v30  ;;  %v18007_v31 = vld [vmem:[#allocation6 + $0x7bc] ss:$24 sps:$4 sm:$0xff]   ;;  %v18002_v30 = vld [vmem:[#allocation6 + $0x9c0] ss:$24 sps:$4 sm:$0xff]  }
 0x555   :  { %8127 = vmatprep.subr.bf16.mxu0 %v17980_v13  ;;  %8595 = vmatpush1.bf16.msra.mxu1 %v17993_v5  ;;  %v18016_v13 = vld [vmem:[#allocation6 + $0x9f4] ss:$24 sps:$4 sm:$0xff]  }
 0x556   :  { %8596 = vmatprep.subr.bf16.mxu1 %v17998_v1  ;;  %v18005_v1 = vld [vmem:[#allocation6 + $0x7b8] ss:$24 sps:$4 sm:$0xff]   ;;  %v18010_v5 = vld [vmem:[#allocation6 + $0x7ec] ss:$24 sps:$4 sm:$0xff]  }
 0x557   :  { %8013 = vmatmul.mubr.bf16.gmra.mrb[4].mxu0 %v19725_v58 }
 0x558   :  { %8022 = vmatprep.mubr.bf16.mxu0 %v22190_v53  ;;  %8128 = vmatpush1.bf16.msra.mxu0 %v17978_v52  ;;  %v22191_v52 = vld [vmem:[#allocation73_spill] sm:$0xff] }
 0x559   :  { %8129 = vmatprep.subr.bf16.mxu0 %v17992_v62  ;;  %8597 = vmatpush1.bf16.msra.mxu1 %v17996_v8  ;;  %v22192_v62 = vld [vmem:[#allocation76_spill] sm:$0xff] }
 0x55a   :  { %8598 = vmatprep.subr.bf16.mxu1 %v18001_v56  ;;  %v18014_v8 = vld [vmem:[#allocation6 + $0x9f0] ss:$24 sps:$4 sm:$0xff]  }
 0x55b   :  { %8502 = vmatmul.mubr.bf16.gmra.mrb[32].mxu1 %v19566_v41  ;;  %v18008_v56 = vld [vmem:[#allocation6 + $0x7e8] ss:$24 sps:$4 sm:$0xff]   ;;  %v18028_v41 = vld [vmem:[#allocation6 + $0xa24] ss:$24 sps:$4 sm:$0xff]  }
 0x55c   :  { %8511 = vmatprep.mubr.bf16.mxu1 %v19583_v27  ;;  %8130 = vmatpush1.bf16.msra.mxu0 %v17990_v22  ;;  %v18013_v27 = vld [vmem:[#allocation6 + $0x81c] ss:$24 sps:$4 sm:$0xff]   ;;  %v18026_v22 = vld [vmem:[#allocation6 + $0xa20] ss:$24 sps:$4 sm:$0xff]  }
 0x55d   :  { %8599 = vmatpush1.bf16.msra.mxu1 %v17999_v29  ;;  %8131 = vmatprep.subr.bf16.mxu0 %v18004_v6  ;;  %v18034_v29 = vld [vmem:[#allocation6 + $0xa54] ss:$24 sps:$4 sm:$0xff]  }
 0x55e   :  { %8600 = vmatprep.subr.bf16.mxu1 %v18007_v31  ;;  %v18011_v31 = vld [vmem:[#allocation6 + $0x818] ss:$24 sps:$4 sm:$0xff]   ;;  %v18019_v6 = vld [vmem:[#allocation6 + $0x84c] ss:$24 sps:$4 sm:$0xff]  }
 0x55f   :  { %8023 = vmatmul.mubr.bf16.gmra.mrb[8].mxu0 %v22191_v52 }
 0x560   :  { %8032 = vmatprep.mubr.bf16.mxu0 %v22192_v62  ;;  %8132 = vmatpush1.bf16.msra.mxu0 %v18002_v30  ;;  %v22193_v30 = vld [vmem:[#allocation75_spill] sm:$0xff] }
 0x561   :  { %8601 = vmatpush1.bf16.msra.mxu1 %v18005_v1  ;;  %8133 = vmatprep.subr.bf16.mxu0 %v18016_v13  ;;  %v22194_v1 = vld [vmem:[#allocation78_spill] sm:$0xff]  ;;  %v18032_v13 = vld [vmem:[#allocation6 + $0xa50] ss:$24 sps:$4 sm:$0xff]  }
 0x562   :  { %8602 = vmatprep.subr.bf16.mxu1 %v18010_v5  ;;  %v18017_v5 = vld [vmem:[#allocation6 + $0x848] ss:$24 sps:$4 sm:$0xff]  }
 0x563   :  { %8512 = vmatmul.mubr.bf16.gmra.mrb[36].mxu1 %v19581_v26  ;;  %v18037_v26 = vld [vmem:[#allocation6 + $0x14] ss:$24 sps:$4 sm:$0xff]  }
 0x564   :  { %8521 = vmatprep.mubr.bf16.mxu1 %v19598_v51  ;;  %8134 = vmatpush1.bf16.msra.mxu0 %v18014_v8  ;;  %v18022_v51 = vld [vmem:[#allocation6 + $0x87c] ss:$24 sps:$4 sm:$0xff]   ;;  %v18023_v8 = vld [vmem:[#allocation6 + $0x8a8] ss:$24 sps:$4 sm:$0xff]  }
 0x565   :  { %8603 = vmatpush1.bf16.msra.mxu1 %v18008_v56  ;;  %8135 = vmatprep.subr.bf16.mxu0 %v18028_v41  ;;  %v18020_v41 = vld [vmem:[#allocation6 + $0x878] ss:$24 sps:$4 sm:$0xff]   ;;  %v18031_v56 = vld [vmem:[#allocation6 + $0x8dc] ss:$24 sps:$4 sm:$0xff]  }
 0x566   :  { %8604 = vmatprep.subr.bf16.mxu1 %v18013_v27  ;;  %v18025_v27 = vld [vmem:[#allocation6 + $0x8ac] ss:$24 sps:$4 sm:$0xff]  }
 0x567   :  { %8033 = vmatmul.mubr.bf16.gmra.mrb[12].mxu0 %v22193_v30 }
 0x568   :  { %8042 = vmatprep.mubr.bf16.mxu0 %v22194_v1  ;;  %8136 = vmatpush1.bf16.msra.mxu0 %v18026_v22  ;;  %v18029_v22 = vld [vmem:[#allocation6 + $0x8d8] ss:$24 sps:$4 sm:$0xff]  }
 0x569   :  { %8605 = vmatpush1.bf16.msra.mxu1 %v18011_v31  ;;  %8137 = vmatprep.subr.bf16.mxu0 %v18034_v29  ;;  %v18061_v31 = vld [vmem:[#allocation6 + $0x90c] ss:$24 sps:$4 sm:$0xff]  }
 0x56a   :  { %8606 = vmatprep.subr.bf16.mxu1 %v18019_v6  ;;  %v22197_v29 = vld [vmem:[#allocation83_spill] sm:$0xff]  ;;  %v22198_v6 = vld [vmem:[#allocation82_spill] sm:$0xff] }
 0x56b   :  { %8522 = vmatmul.mubr.bf16.gmra.mrb[40].mxu1 %v19596_v14 }
 0x56c   :  { %8531 = vmatprep.mubr.bf16.mxu1 %v19613_v24  ;;  %8138 = vmatpush1.bf16.msra.mxu0 %v18032_v13  ;;  %v22199_v13 = vld [vmem:[#allocation85_spill] sm:$0xff] }
 0x56d   :  { %8607 = vmatpush1.bf16.msra.mxu1 %v18017_v5  ;;  %8888 = vmatprep.subr.bf16.mxu0 %v18037_v26  ;;  %v22195_v26 = vld [vmem:[#allocation81_spill] sm:$0xff]  ;;  %v22200_v5 = vld [vmem:[#allocation84_spill] sm:$0xff] }
 0x56e   :  { %8608 = vmatprep.subr.bf16.mxu1 %v18022_v51  ;;  %v22196_v51 = vld [vmem:[#allocation80_spill] sm:$0xff] }
 0x56f   :  { %8043 = vmatmul.mubr.bf16.gmra.mrb[16].mxu0 %v19755_v60 }
 0x570   :  { %8052 = vmatprep.mubr.bf16.mxu0 %v19767_v36 }
 0x571   :  { %8609 = vmatpush1.bf16.msra.mxu1 %v18020_v41  ;;  %v22201_v41 = vld [vmem:[#allocation87_spill] sm:$0xff] }
 0x572   :  { %8610 = vmatprep.subr.bf16.mxu1 %v18025_v27  ;;  %v22202_v27 = vld [vmem:[#allocation86_spill] sm:$0xff] }
 0x573   :  { %8532 = vmatmul.mubr.bf16.gmra.mrb[44].mxu1 %v22060_v46 }
 0x574   :  { %8541 = vmatprep.mubr.bf16.mxu1 %v22097_v19 }
 0x575   :  { %8611 = vmatpush1.bf16.msra.mxu1 %v18023_v8  ;;  %v22203_v8 = vld [vmem:[#allocation89_spill] sm:$0xff] }
 0x576   :  { %8612 = vmatprep.subr.bf16.mxu1 %v18031_v56  ;;  %v18059_v56 = vld [vmem:[#allocation6 + $0x908] ss:$24 sps:$4 sm:$0xff]  }
 0x577   :  { %8053 = vmatmul.mubr.bf16.gmra.mrb[20].mxu0 %v19765_v16 }
 0x578   :  { %8062 = vmatprep.mubr.bf16.mxu0 %v22195_v26 }
 0x579   :  { %8613 = vmatpush1.bf16.msra.mxu1 %v18029_v22  ;;  %v18064_v22 = vld [vmem:[#allocation6 + $0x93c] ss:$24 sps:$4 sm:$0xff]  }
 0x57a   :  { %8735 = vmatprep.subr.bf16.mxu1 %v18061_v31  ;;  %v18062_v31 = vld [vmem:[#allocation6 + $0x938] ss:$24 sps:$4 sm:$0xff]  }
 0x57b   :  { %8542 = vmatmul.mubr.bf16.gmra.mrb[48].mxu1 %v22062_v47 }
 0x57c   :  { %8551 = vmatprep.mubr.bf16.mxu1 %v22098_v33  ;;  %v22208_v33 = vld [vmem:[#allocation97_spill] sm:$0xff] }
 0x57f   :  { %8063 = vmatmul.mubr.bf16.gmra.mrb[24].mxu0 %v22196_v51 }
 0x580   :  { %8072 = vmatprep.mubr.bf16.mxu0 %v22197_v29 }
 0x583   :  { %8552 = vmatmul.mubr.bf16.gmra.mrb[52].mxu1 %v22065_v0  ;;  %v18085_v0 = vld [vmem:[#allocation6 + $0x9fc] ss:$24 sps:$4 sm:$0xff]  }
 0x584   :  { %8561 = vmatprep.mubr.bf16.mxu1 %v22183_v4  ;;  %v22205_v4 = vld [vmem:[#allocation91_spill] sm:$0xff] }
 0x587   :  { %8073 = vmatmul.mubr.bf16.gmra.mrb[28].mxu0 %v22198_v6 }
 0x588   :  { %8082 = vmatprep.mubr.bf16.mxu0 %v22199_v13 }
 0x58b   :  { %8562 = vmatmul.mubr.bf16.gmra.mrb[56].mxu1 %v22184_v55  ;;  %v22204_v55 = vld [vmem:[#allocation88_spill] sm:$0xff] }
 0x58c   :  { %8571 = vmatprep.mubr.bf16.mxu1 %v22185_v45  ;;  %v18070_v45 = vld [vmem:[#allocation6 + $0x96c] ss:$24 sps:$4 sm:$0xff]  }
 0x58f   :  { %8083 = vmatmul.mubr.bf16.gmra.mrb[32].mxu0 %v22200_v5 }
 0x590   :  { %8092 = vmatprep.mubr.bf16.mxu0 %v22201_v41 }
 0x593   :  { %8572 = vmatmul.mubr.bf16.gmra.mrb[60].mxu1 %v22186_v17  ;;  %v18076_v17 = vld [vmem:[#allocation6 + $0x99c] ss:$24 sps:$4 sm:$0xff]  }
 0x594   :  { %8614 = vmatprep.mubr.bf16.mxu1 %v22187_v34  ;;  %v18068_v34 = vld [vmem:[#allocation6 + $0x968] ss:$24 sps:$4 sm:$0xff]  }
 0x597   :  { %8093 = vmatmul.mubr.bf16.gmra.mrb[36].mxu0 %v22202_v27 }
 0x598   :  { %8102 = vmatprep.mubr.bf16.mxu0 %v22203_v8 }
 0x59b   :  { %8615 = vmatmul.mubr.bf16.vlgmr.msra.gmra.mrb[16].mxu1 %v22188_v38  ;;  %v18074_v38 = vld [vmem:[#allocation6 + $0x998] ss:$24 sps:$4 sm:$0xff]  }
 0x59c   :  { %8624 = vmatprep.mubr.bf16.mxu1 %v22189_v21  ;;  %8736 = vmatpush1.bf16.msra.mxu1 %v18059_v56  ;;  %v18079_v21 = vld [vmem:[#allocation6 + $0x9cc] ss:$24 sps:$4 sm:$0xff]   ;;  %v22206_v56 = vld [vmem:[#allocation90_spill] sm:$0xff] }
 0x59d   :  { %8737 = vmatprep.subr.bf16.mxu1 %v18064_v22  ;;  %v18077_v22 = vld [vmem:[#allocation6 + $0x9c8] ss:$24 sps:$4 sm:$0xff]  }
 0x59f   :  { %8103 = vmatmul.mubr.bf16.gmra.mrb[40].mxu0 %v22204_v55 }
 0x5a0   :  { %8112 = vmatprep.mubr.bf16.mxu0 %v22205_v4  ;;  %8738 = vmatpush1.bf16.msra.mxu1 %v18062_v31  ;;  %v18040_v31 = vld [vmem:[#allocation6 + $0x44] ss:$24 sps:$4 sm:$0xff]  }
 0x5a1   :  { %8739 = vmatprep.subr.bf16.mxu1 %v18070_v45  ;;  %v18035_v45 = vld [vmem:[#allocation6 + $0x10] ss:$24 sps:$4 sm:$0xff]  }
 0x5a3   :  { %8625 = vmatmul.mubr.bf16.gmra.mrb[20].mxu1 %v19725_v58  ;;  %v18038_v58 = vld [vmem:[#allocation6 + $0x40] ss:$24 sps:$4 sm:$0xff]  }
 0x5a4   :  { %8634 = vmatprep.mubr.bf16.mxu1 %v22190_v53  ;;  %8740 = vmatpush1.bf16.msra.mxu1 %v18068_v34  ;;  %v18083_v53 = vld [vmem:[#allocation6 + $0x9f8] ss:$24 sps:$4 sm:$0xff]   ;;  %v18091_v34 = vld [vmem:[#allocation6 + $0xa2c] ss:$24 sps:$4 sm:$0xff]  }
 0x5a5   :  { %8741 = vmatprep.subr.bf16.mxu1 %v18076_v17  ;;  %v22207_v17 = vld [vmem:[#allocation96_spill] sm:$0xff] }
 0x5a7   :  { %8113 = vmatmul.mubr.bf16.gmra.mrb[44].mxu0 %v22206_v56 }
 0x5a8   :  { %8155 = vmatprep.mubr.bf16.mxu0 %v22157_v12  ;;  %8742 = vmatpush1.bf16.msra.mxu1 %v18074_v38  ;;  %v18043_v38 = vld [vmem:[#allocation6 + $0x74] ss:$24 sps:$4 sm:$0xff]  }
 0x5a9   :  { %8743 = vmatprep.subr.bf16.mxu1 %v18079_v21  ;;  %v18089_v21 = vld [vmem:[#allocation6 + $0xa28] ss:$24 sps:$4 sm:$0xff]  }
 0x5ab   :  { %8635 = vmatmul.mubr.bf16.gmra.mrb[24].mxu1 %v22191_v52  ;;  %v18094_v52 = vld [vmem:[#allocation6 + $0xa5c] ss:$24 sps:$4 sm:$0xff]  }
 0x5ac   :  { %8644 = vmatprep.mubr.bf16.mxu1 %v22192_v62  ;;  %8744 = vmatpush1.bf16.msra.mxu1 %v18077_v22  ;;  %v18041_v22 = vld [vmem:[#allocation6 + $0x70] ss:$24 sps:$4 sm:$0xff]  }
 0x5ad   :  { %8745 = vmatprep.subr.bf16.mxu1 %v18085_v0  ;;  %v18046_v0 = vld [vmem:[#allocation6 + $0xa4] ss:$24 sps:$4 sm:$0xff]   ;;  %v18092_v62 = vld [vmem:[#allocation6 + $0xa58] ss:$24 sps:$4 sm:$0xff]  }
 0x5af   :  { %8156 = vmatmul.mubr.bf16.vlgmr.msra.gmra.mrb[0].mxu0 %v22207_v17 }
 0x5b0   :  { %8889 = vmatpush1.bf16.msra.mxu0 %v18035_v45  ;;  %8165 = vmatprep.mubr.bf16.mxu0 %v22157_v12  ;;  %v18118_v45 = vld [vmem:[#allocation6 + $0x150c] ss:$24 sps:$4 sm:$0xff]  }
 0x5b1   :  { %8890 = vmatprep.subr.bf16.mxu0 %v18040_v31  ;;  %8746 = vmatpush1.bf16.msra.mxu1 %v18083_v53  ;;  %v18044_v53 = vld [vmem:[#allocation6 + $0xa0] ss:$24 sps:$4 sm:$0xff]   ;;  %v18049_v31 = vld [vmem:[#allocation6 + $0xd4] ss:$24 sps:$4 sm:$0xff]  }
 0x5b2   :  { %8747 = vmatprep.subr.bf16.mxu1 %v18091_v34  ;;  %v18052_v34 = vld [vmem:[#allocation6 + $0x104] ss:$24 sps:$4 sm:$0xff]  }
 0x5b3   :  { %8645 = vmatmul.mubr.bf16.gmra.mrb[28].mxu1 %v22193_v30 }
 0x5b4   :  { %8654 = vmatprep.mubr.bf16.mxu1 %v22194_v1  ;;  %8891 = vmatpush1.bf16.msra.mxu0 %v18038_v58  ;;  %v18047_v58 = vld [vmem:[#allocation6 + $0xd0] ss:$24 sps:$4 sm:$0xff]  }
 0x5b5   :  { %8892 = vmatprep.subr.bf16.mxu0 %v18043_v38  ;;  %8748 = vmatpush1.bf16.msra.mxu1 %v18089_v21  ;;  %v18050_v38 = vld [vmem:[#allocation6 + $0x100] ss:$24 sps:$4 sm:$0xff]   ;;  %v18055_v21 = vld [vmem:[#allocation6 + $0x134] ss:$24 sps:$4 sm:$0xff]  }
 0x5b6   :  { %8749 = vmatprep.subr.bf16.mxu1 %v18094_v52  ;;  %v22209_v52 = vld [vmem:[#allocation98_spill] sm:$0xff] }
 0x5b7   :  { %8166 = vmatmul.mubr.bf16.gmra.mrb[4].mxu0 %v22208_v33 }
 0x5b8   :  { %8893 = vmatpush1.bf16.msra.mxu0 %v18041_v22  ;;  %8175 = vmatprep.mubr.bf16.mxu0 %v22157_v12  ;;  %v18058_v22 = vld [vmem:[#allocation6 + $0x164] ss:$24 sps:$4 sm:$0xff]  }
 0x5b9   :  { %8894 = vmatprep.subr.bf16.mxu0 %v18046_v0  ;;  %8750 = vmatpush1.bf16.msra.mxu1 %v18092_v62  ;;  %v18053_v62 = vld [vmem:[#allocation6 + $0x130] ss:$24 sps:$4 sm:$0xff]   ;;  %v22210_v0 = vld [vmem:[#allocation99_spill] sm:$0xff] }
 0x5ba   :  { %12129 = vmatprep.subr.bf16.mxu1 %v18118_v45  ;;  %v18056_v45 = vld [vmem:[#allocation6 + $0x160] ss:$24 sps:$4 sm:$0xff]  }
 0x5bb   :  { %8655 = vmatmul.mubr.bf16.gmra.mrb[32].mxu1 %v19755_v60 }
 0x5bc   :  { %8664 = vmatprep.mubr.bf16.mxu1 %v19767_v36  ;;  %8895 = vmatpush1.bf16.msra.mxu0 %v18044_v53  ;;  %v18067_v53 = vld [vmem:[#allocation6 + $0x194] ss:$24 sps:$4 sm:$0xff]  }
 0x5bd   :  { %8896 = vmatprep.subr.bf16.mxu0 %v18049_v31  ;;  %v18065_v31 = vld [vmem:[#allocation6 + $0x190] ss:$24 sps:$4 sm:$0xff]  }
 0x5bf   :  { %8176 = vmatmul.mubr.bf16.gmra.mrb[8].mxu0 %v22209_v52 }
 0x5c0   :  { %8185 = vmatprep.mubr.bf16.mxu0 %v22157_v12  ;;  %8897 = vmatpush1.bf16.msra.mxu0 %v18047_v58  ;;  %v18073_v58 = vld [vmem:[#allocation6 + $0x1c4] ss:$24 sps:$4 sm:$0xff]  }
 0x5c1   :  { %8898 = vmatprep.subr.bf16.mxu0 %v18052_v34  ;;  %v22211_v34 = vld [vmem:[#allocation100_spill] sm:$0xff] }
 0x5c3   :  { %8665 = vmatmul.mubr.bf16.gmra.mrb[36].mxu1 %v19765_v16 }
 0x5c4   :  { %8674 = vmatprep.mubr.bf16.mxu1 %v22195_v26  ;;  %8899 = vmatpush1.bf16.msra.mxu0 %v18050_v38  ;;  %v18071_v38 = vld [vmem:[#allocation6 + $0x1c0] ss:$24 sps:$4 sm:$0xff]  }
 0x5c5   :  { %8900 = vmatprep.subr.bf16.mxu0 %v18055_v21  ;;  %v18082_v21 = vld [vmem:[#allocation6 + $0x1f4] ss:$24 sps:$4 sm:$0xff]  }
 0x5c7   :  { %8186 = vmatmul.mubr.bf16.gmra.mrb[12].mxu0 %v22210_v0 }
 0x5c8   :  { %8195 = vmatprep.mubr.bf16.mxu0 %v22157_v12  ;;  %8901 = vmatpush1.bf16.msra.mxu0 %v18053_v62  ;;  %v18080_v62 = vld [vmem:[#allocation6 + $0x1f0] ss:$24 sps:$4 sm:$0xff]  }
 0x5c9   :  { %8902 = vmatprep.subr.bf16.mxu0 %v18058_v22  ;;  %v18088_v22 = vld [vmem:[#allocation6 + $0x224] ss:$24 sps:$4 sm:$0xff]  }
 0x5cb   :  { %8675 = vmatmul.mubr.bf16.gmra.mrb[40].mxu1 %v22196_v51 }
 0x5cc   :  { %8684 = vmatprep.mubr.bf16.mxu1 %v22197_v29  ;;  %8903 = vmatpush1.bf16.msra.mxu0 %v18056_v45  ;;  %v22212_v45 = vld [vmem:[#allocation101_spill] sm:$0xff] }
 0x5cd   :  { %8904 = vmatprep.subr.bf16.mxu0 %v18067_v53  ;;  %v18086_v53 = vld [vmem:[#allocation6 + $0x220] ss:$24 sps:$4 sm:$0xff]   ;;  %v18097_v29 = vld [vmem:[#allocation6 + $0x254] ss:$24 sps:$4 sm:$0xff]  }
 0x5cf   :  { %8196 = vmatmul.mubr.bf16.gmra.mrb[16].mxu0 %v22211_v34 }
 0x5d0   :  { %8205 = vmatprep.mubr.bf16.mxu0 %v22157_v12  ;;  %8905 = vmatpush1.bf16.msra.mxu0 %v18065_v31  ;;  %v18095_v31 = vld [vmem:[#allocation6 + $0x250] ss:$24 sps:$4 sm:$0xff]  }
 0x5d1   :  { %8906 = vmatprep.subr.bf16.mxu0 %v18073_v58  ;;  %v18100_v58 = vld [vmem:[#allocation6 + $0x284] ss:$24 sps:$4 sm:$0xff]  }
 0x5d3   :  { %8685 = vmatmul.mubr.bf16.gmra.mrb[44].mxu1 %v22198_v6 }
 0x5d4   :  { %8694 = vmatprep.mubr.bf16.mxu1 %v22199_v13  ;;  %8907 = vmatpush1.bf16.msra.mxu0 %v18071_v38  ;;  %v22213_v38 = vld [vmem:[#allocation102_spill] sm:$0xff] }
 0x5d5   :  { %8908 = vmatprep.subr.bf16.mxu0 %v18082_v21  ;;  %v18098_v21 = vld [vmem:[#allocation6 + $0x280] ss:$24 sps:$4 sm:$0xff]   ;;  %v18103_v13 = vld [vmem:[#allocation6 + $0x2b4] ss:$24 sps:$4 sm:$0xff]  }
 0x5d7   :  { %8206 = vmatmul.mubr.bf16.gmra.mrb[20].mxu0 %v22212_v45 }
 0x5d8   :  { %8215 = vmatprep.mubr.bf16.mxu0 %v22157_v12  ;;  %8909 = vmatpush1.bf16.msra.mxu0 %v18080_v62  ;;  %v18101_v62 = vld [vmem:[#allocation6 + $0x2b0] ss:$24 sps:$4 sm:$0xff]  }
 0x5d9   :  { %8910 = vmatprep.subr.bf16.mxu0 %v18088_v22  ;;  %v18106_v22 = vld [vmem:[#allocation6 + $0x2e4] ss:$24 sps:$4 sm:$0xff]  }
 0x5db   :  { %8695 = vmatmul.mubr.bf16.gmra.mrb[48].mxu1 %v22200_v5 }
 0x5dc   :  { %8704 = vmatprep.mubr.bf16.mxu1 %v22201_v41  ;;  %8911 = vmatpush1.bf16.msra.mxu0 %v18086_v53  ;;  %v18109_v53 = vld [vmem:[#allocation6 + $0x314] ss:$24 sps:$4 sm:$0xff]  }
 0x5dd   :  { %8912 = vmatprep.subr.bf16.mxu0 %v18097_v29  ;;  %v18104_v29 = vld [vmem:[#allocation6 + $0x2e0] ss:$24 sps:$4 sm:$0xff]  }
 0x5df   :  { %8216 = vmatmul.mubr.bf16.gmra.mrb[24].mxu0 %v22213_v38 }
 0x5e0   :  { %8225 = vmatprep.mubr.bf16.mxu0 %v22157_v12  ;;  %8913 = vmatpush1.bf16.msra.mxu0 %v18095_v31  ;;  %v18121_v31 = vld [vmem:[#allocation6 + $0x153c] ss:$24 sps:$4 sm:$0xff]  }
 0x5e1   :  { %8914 = vmatprep.subr.bf16.mxu0 %v18100_v58  ;;  %v18119_v58 = vld [vmem:[#allocation6 + $0x1538] ss:$24 sps:$4 sm:$0xff]  }
 0x5e3   :  { %8705 = vmatmul.mubr.bf16.gmra.mrb[52].mxu1 %v22202_v27 }
 0x5e4   :  { %8714 = vmatprep.mubr.bf16.mxu1 %v22203_v8  ;;  %8915 = vmatpush1.bf16.msra.mxu0 %v18098_v21  ;;  %v18127_v21 = vld [vmem:[#allocation6 + $0x156c] ss:$24 sps:$4 sm:$0xff]  }
 0x5e5   :  { %8916 = vmatprep.subr.bf16.mxu0 %v18103_v13  ;;  %v18116_v13 = vld [vmem:[#allocation6 + $0x1508] ss:$24 sps:$4 sm:$0xff]  }
 0x5e7   :  { %8226 = vmatmul.mubr.bf16.gmra.mrb[28].mxu0 %v22165_v44 }
 0x5e8   :  { %8235 = vmatprep.mubr.bf16.mxu0 %v22157_v12  ;;  %8917 = vmatpush1.bf16.msra.mxu0 %v18101_v62  ;;  %v18125_v62 = vld [vmem:[#allocation6 + $0x1568] ss:$24 sps:$4 sm:$0xff]  }
 0x5e9   :  { %8918 = vmatprep.subr.bf16.mxu0 %v18106_v22  ;;  %v18133_v22 = vld [vmem:[#allocation6 + $0x159c] ss:$24 sps:$4 sm:$0xff]  }
 0x5eb   :  { %8715 = vmatmul.mubr.bf16.gmra.mrb[56].mxu1 %v22204_v55 }
 0x5ec   :  { %8724 = vmatprep.mubr.bf16.mxu1 %v22205_v4  ;;  %8919 = vmatpush1.bf16.msra.mxu0 %v18104_v29  ;;  %v18131_v29 = vld [vmem:[#allocation6 + $0x1598] ss:$24 sps:$4 sm:$0xff]  }
 0x5ed   :  { %9041 = vmatprep.subr.bf16.mxu0 %v18109_v53  ;;  %v18136_v53 = vld [vmem:[#allocation6 + $0x15cc] ss:$24 sps:$4 sm:$0xff]  }
 0x5ef   :  { %8236 = vmatmul.mubr.bf16.gmra.mrb[32].mxu0 %v22166_v48 }
 0x5f0   :  { %8245 = vmatprep.mubr.bf16.mxu0 %v22157_v12 }
 0x5f3   :  { %8725 = vmatmul.mubr.bf16.gmra.mrb[60].mxu1 %v22206_v56 }
 0x5f4   :  { %8767 = vmatprep.mubr.bf16.mxu1 %v22157_v12 }
 0x5f7   :  { %8246 = vmatmul.mubr.bf16.gmra.mrb[36].mxu0 %v22167_v32 }
 0x5f8   :  { %8255 = vmatprep.mubr.bf16.mxu0 %v22157_v12 }
 0x5fb   :  { %8768 = vmatmul.mubr.bf16.vlgmr.msra.gmra.mrb[16].mxu1 %v22207_v17 }
 0x5fc   :  { %8777 = vmatprep.mubr.bf16.mxu1 %v22157_v12  ;;  %12130 = vmatpush1.bf16.msra.mxu1 %v18116_v13  ;;  %v18134_v13 = vld [vmem:[#allocation6 + $0x15c8] ss:$24 sps:$4 sm:$0xff]  }
 0x5fd   :  { %12131 = vmatprep.subr.bf16.mxu1 %v18121_v31  ;;  %v18142_v31 = vld [vmem:[#allocation6 + $0x15fc] ss:$24 sps:$4 sm:$0xff]  }
 0x5ff   :  { %8256 = vmatmul.mubr.bf16.gmra.mrb[40].mxu0 %v22168_v35 }
 0x600   :  { %8265 = vmatprep.mubr.bf16.mxu0 %v22157_v12  ;;  %12132 = vmatpush1.bf16.msra.mxu1 %v18119_v58  ;;  %v18107_v58 = vld [vmem:[#allocation6 + $0x310] ss:$24 sps:$4 sm:$0xff]  }
 0x601   :  { %12133 = vmatprep.subr.bf16.mxu1 %v18127_v21  ;;  %v18112_v21 = vld [vmem:[#allocation6 + $0x344] ss:$24 sps:$4 sm:$0xff]  }
 0x603   :  { %8778 = vmatmul.mubr.bf16.gmra.mrb[20].mxu1 %v22208_v33  ;;  %v18140_v33 = vld [vmem:[#allocation6 + $0x15f8] ss:$24 sps:$4 sm:$0xff]  }
 0x604   :  { %8787 = vmatprep.mubr.bf16.mxu1 %v22157_v12  ;;  %12134 = vmatpush1.bf16.msra.mxu1 %v18125_v62  ;;  %v18148_v62 = vld [vmem:[#allocation6 + $0x162c] ss:$24 sps:$4 sm:$0xff]  }
 0x605   :  { %12135 = vmatprep.subr.bf16.mxu1 %v18133_v22  ;;  %v18115_v22 = vld [vmem:[#allocation6 + $0x374] ss:$24 sps:$4 sm:$0xff]  }
 0x607   :  { %8266 = vmatmul.mubr.bf16.gmra.mrb[44].mxu0 %v22169_v3 }
 0x608   :  { %8920 = vmatprep.mubr.bf16.mxu0 %v22171_v23  ;;  %12136 = vmatpush1.bf16.msra.mxu1 %v18131_v29  ;;  %v18110_v23 = vld [vmem:[#allocation6 + $0x340] ss:$24 sps:$4 sm:$0xff]  }
 0x609   :  { %12137 = vmatprep.subr.bf16.mxu1 %v18136_v53  ;;  %v18146_v29 = vld [vmem:[#allocation6 + $0x1628] ss:$24 sps:$4 sm:$0xff]   ;;  %v18151_v53 = vld [vmem:[#allocation6 + $0x165c] ss:$24 sps:$4 sm:$0xff]  }
 0x60b   :  { %8788 = vmatmul.mubr.bf16.gmra.mrb[24].mxu1 %v22209_v52 }
 0x60c   :  { %8797 = vmatprep.mubr.bf16.mxu1 %v22157_v12  ;;  %12138 = vmatpush1.bf16.msra.mxu1 %v18134_v13  ;;  %v18113_v13 = vld [vmem:[#allocation6 + $0x370] ss:$24 sps:$4 sm:$0xff]  }
 0x60d   :  { %12139 = vmatprep.subr.bf16.mxu1 %v18142_v31  ;;  %v18124_v31 = vld [vmem:[#allocation6 + $0x3a4] ss:$24 sps:$4 sm:$0xff]  }
 0x60f   :  { %8921 = vmatmul.mubr.bf16.vlgmr.msra.gmra.mrb[48].mxu0 %v22172_v59  ;;  %v18149_v59 = vld [vmem:[#allocation6 + $0x1658] ss:$24 sps:$4 sm:$0xff]  }
 0x610   :  { %8930 = vmatprep.mubr.bf16.mxu0 %v22173_v49  ;;  %9042 = vmatpush1.bf16.msra.mxu0 %v18107_v58  ;;  %v18157_v49 = vld [vmem:[#allocation6 + $0x168c] ss:$24 sps:$4 sm:$0xff]  }
 0x611   :  { %9043 = vmatprep.subr.bf16.mxu0 %v18112_v21  ;;  %12140 = vmatpush1.bf16.msra.mxu1 %v18140_v33  ;;  %v18122_v33 = vld [vmem:[#allocation6 + $0x3a0] ss:$24 sps:$4 sm:$0xff]   ;;  %v18130_v58 = vld [vmem:[#allocation6 + $0x3d4] ss:$24 sps:$4 sm:$0xff]  }
 0x612   :  { %12141 = vmatprep.subr.bf16.mxu1 %v18148_v62  ;;  %v18155_v21 = vld [vmem:[#allocation6 + $0x1688] ss:$24 sps:$4 sm:$0xff]   ;;  %v18163_v62 = vld [vmem:[#allocation6 + $0x16bc] ss:$24 sps:$4 sm:$0xff]  }
 0x613   :  { %8798 = vmatmul.mubr.bf16.gmra.mrb[28].mxu1 %v22210_v0 }
 0x614   :  { %9044 = vmatpush1.bf16.msra.mxu0 %v18110_v23  ;;  %8807 = vmatprep.mubr.bf16.mxu1 %v22157_v12  ;;  %v18128_v23 = vld [vmem:[#allocation6 + $0x3d0] ss:$24 sps:$4 sm:$0xff]  }
 0x615   :  { %9045 = vmatprep.subr.bf16.mxu0 %v18115_v22  ;;  %12142 = vmatpush1.bf16.msra.mxu1 %v18146_v29  ;;  %v18139_v22 = vld [vmem:[#allocation6 + $0x404] ss:$24 sps:$4 sm:$0xff]  }
 0x616   :  { %12143 = vmatprep.subr.bf16.mxu1 %v18151_v53  ;;  %v18166_v29 = vld [vmem:[#allocation6 + $0x16ec] ss:$24 sps:$4 sm:$0xff]  }
 0x617   :  { %8931 = vmatmul.mubr.bf16.gmra.mrb[52].mxu0 %v22174_v57  ;;  %v18161_v57 = vld [vmem:[#allocation6 + $0x16b8] ss:$24 sps:$4 sm:$0xff]   ;;  %v22214_v53 = vld [vmem:[#allocation20_spill] sm:$0xff] }
 0x618   :  { %8940 = vmatprep.mubr.bf16.mxu0 %v22175_v61  ;;  %9046 = vmatpush1.bf16.msra.mxu0 %v18113_v13  ;;  %v18137_v13 = vld [vmem:[#allocation6 + $0x400] ss:$24 sps:$4 sm:$0xff]  }
 0x619   :  { %9047 = vmatprep.subr.bf16.mxu0 %v18124_v31  ;;  %12144 = vmatpush1.bf16.msra.mxu1 %v18149_v59  ;;  %v18145_v31 = vld [vmem:[#allocation6 + $0x434] ss:$24 sps:$4 sm:$0xff]   ;;  %v18164_v59 = vld [vmem:[#allocation6 + $0x16e8] ss:$24 sps:$4 sm:$0xff]  }
 0x61a   :  { %12145 = vmatprep.subr.bf16.mxu1 %v18157_v49  ;;  %v18172_v49 = vld [vmem:[#allocation6 + $0x171c] ss:$24 sps:$4 sm:$0xff]  }
 0x61b   :  { %8808 = vmatmul.mubr.bf16.gmra.mrb[32].mxu1 %v22211_v34 }
 0x61c   :  { %8817 = vmatprep.mubr.bf16.mxu1 %v22157_v12  ;;  %9048 = vmatpush1.bf16.msra.mxu0 %v18122_v33  ;;  %v18143_v33 = vld [vmem:[#allocation6 + $0x430] ss:$24 sps:$4 sm:$0xff]  }
 0x61d   :  { %9049 = vmatprep.subr.bf16.mxu0 %v18130_v58  ;;  %12146 = vmatpush1.bf16.msra.mxu1 %v18155_v21  ;;  %v18154_v58 = vld [vmem:[#allocation6 + $0x464] ss:$24 sps:$4 sm:$0xff]   ;;  %v18170_v21 = vld [vmem:[#allocation6 + $0x1718] ss:$24 sps:$4 sm:$0xff]  }
 0x61e   :  { %12147 = vmatprep.subr.bf16.mxu1 %v18163_v62  ;;  %v18178_v62 = vld [vmem:[#allocation6 + $0x174c] ss:$24 sps:$4 sm:$0xff]  }
 0x61f   :  { %8941 = vmatmul.mubr.bf16.gmra.mrb[56].mxu0 %v22176_v54 }
 0x620   :  { %8950 = vmatprep.mubr.bf16.mxu0 %v22214_v53  ;;  %9050 = vmatpush1.bf16.msra.mxu0 %v18128_v23  ;;  %v18152_v23 = vld [vmem:[#allocation6 + $0x460] ss:$24 sps:$4 sm:$0xff]  }
 0x621   :  { %9051 = vmatprep.subr.bf16.mxu0 %v18139_v22  ;;  %12148 = vmatpush1.bf16.msra.mxu1 %v18161_v57  ;;  %v18160_v22 = vld [vmem:[#allocation6 + $0x494] ss:$24 sps:$4 sm:$0xff]   ;;  %v18176_v57 = vld [vmem:[#allocation6 + $0x1748] ss:$24 sps:$4 sm:$0xff]  }
 0x622   :  { %12149 = vmatprep.subr.bf16.mxu1 %v18166_v29  ;;  %v18181_v29 = vld [vmem:[#allocation6 + $0x177c] ss:$24 sps:$4 sm:$0xff]  }
 0x623   :  { %8818 = vmatmul.mubr.bf16.gmra.mrb[36].mxu1 %v22212_v45 }
 0x624   :  { %8827 = vmatprep.mubr.bf16.mxu1 %v22157_v12  ;;  %9052 = vmatpush1.bf16.msra.mxu0 %v18137_v13  ;;  %v18158_v13 = vld [vmem:[#allocation6 + $0x490] ss:$24 sps:$4 sm:$0xff]  }
 0x625   :  { %9053 = vmatprep.subr.bf16.mxu0 %v18145_v31  ;;  %12150 = vmatpush1.bf16.msra.mxu1 %v18164_v59  ;;  %v18169_v31 = vld [vmem:[#allocation6 + $0x4c4] ss:$24 sps:$4 sm:$0xff]   ;;  %v18179_v59 = vld [vmem:[#allocation6 + $0x1778] ss:$24 sps:$4 sm:$0xff]  }
 0x626   :  { %12151 = vmatprep.subr.bf16.mxu1 %v18172_v49  ;;  %v18187_v49 = vld [vmem:[#allocation6 + $0x17ac] ss:$24 sps:$4 sm:$0xff]  }
 0x627   :  { %8951 = vmatmul.mubr.bf16.gmra.mrb[60].mxu0 %v22178_v9 }
 0x628   :  { %8960 = vmatprep.mubr.bf16.mxu0 %v22179_v11  ;;  %9054 = vmatpush1.bf16.msra.mxu0 %v18143_v33  ;;  %v18167_v33 = vld [vmem:[#allocation6 + $0x4c0] ss:$24 sps:$4 sm:$0xff]  }
 0x629   :  { %9055 = vmatprep.subr.bf16.mxu0 %v18154_v58  ;;  %12152 = vmatpush1.bf16.msra.mxu1 %v18170_v21  ;;  %v18175_v58 = vld [vmem:[#allocation6 + $0x4f4] ss:$24 sps:$4 sm:$0xff]   ;;  %v18185_v21 = vld [vmem:[#allocation6 + $0x17a8] ss:$24 sps:$4 sm:$0xff]  }
 0x62a   :  { %12153 = vmatprep.subr.bf16.mxu1 %v18178_v62  ;;  %v18193_v62 = vld [vmem:[#allocation6 + $0x17dc] ss:$24 sps:$4 sm:$0xff]  }
 0x62b   :  { %8828 = vmatmul.mubr.bf16.gmra.mrb[40].mxu1 %v22213_v38 }
 0x62c   :  { %8837 = vmatprep.mubr.bf16.mxu1 %v22157_v12  ;;  %9056 = vmatpush1.bf16.msra.mxu0 %v18152_v23  ;;  %v18173_v23 = vld [vmem:[#allocation6 + $0x4f0] ss:$24 sps:$4 sm:$0xff]  }
 0x62d   :  { %9057 = vmatprep.subr.bf16.mxu0 %v18160_v22  ;;  %12154 = vmatpush1.bf16.msra.mxu1 %v18176_v57  ;;  %v18184_v22 = vld [vmem:[#allocation6 + $0x524] ss:$24 sps:$4 sm:$0xff]   ;;  %v18191_v57 = vld [vmem:[#allocation6 + $0x17d8] ss:$24 sps:$4 sm:$0xff]  }
 0x62e   :  { %12155 = vmatprep.subr.bf16.mxu1 %v18181_v29  ;;  %v18214_v29 = vld [vmem:[#allocation6 + $0x180c] ss:$24 sps:$4 sm:$0xff]  }
 0x62f   :  { %8961 = vmatmul.mubr.bf16.gmra.mrb[64].mxu0 %v22078_v63 }
 0x630   :  { %8970 = vmatprep.mubr.bf16.mxu0 %v22079_v18  ;;  %9058 = vmatpush1.bf16.msra.mxu0 %v18158_v13  ;;  %v22215_v13 = vld [vmem:[#allocation26_spill] sm:$0xff] }
 0x631   :  { %9059 = vmatprep.subr.bf16.mxu0 %v18169_v31  ;;  %12156 = vmatpush1.bf16.msra.mxu1 %v18179_v59  ;;  %v18182_v31 = vld [vmem:[#allocation6 + $0x520] ss:$24 sps:$4 sm:$0xff]   ;;  %v18190_v59 = vld [vmem:[#allocation6 + $0x554] ss:$24 sps:$4 sm:$0xff]  }
 0x632   :  { %12157 = vmatprep.subr.bf16.mxu1 %v18187_v49  ;;  %v18188_v49 = vld [vmem:[#allocation6 + $0x550] ss:$24 sps:$4 sm:$0xff]  }
 0x633   :  { %8838 = vmatmul.mubr.bf16.gmra.mrb[44].mxu1 %v22165_v44 }
 0x634   :  { %8847 = vmatprep.mubr.bf16.mxu1 %v22157_v12  ;;  %9060 = vmatpush1.bf16.msra.mxu0 %v18167_v33  ;;  %v18196_v33 = vld [vmem:[#allocation6 + $0x584] ss:$24 sps:$4 sm:$0xff]  }
 0x635   :  { %9061 = vmatprep.subr.bf16.mxu0 %v18175_v58  ;;  %12158 = vmatpush1.bf16.msra.mxu1 %v18185_v21  ;;  %v18194_v58 = vld [vmem:[#allocation6 + $0x580] ss:$24 sps:$4 sm:$0xff]   ;;  %v18199_v21 = vld [vmem:[#allocation6 + $0x5b4] ss:$24 sps:$4 sm:$0xff]  }
 0x636   :  { %12159 = vmatprep.subr.bf16.mxu1 %v18193_v62  ;;  %v18197_v62 = vld [vmem:[#allocation6 + $0x5b0] ss:$24 sps:$4 sm:$0xff]  }
 0x637   :  { %8971 = vmatmul.mubr.bf16.gmra.mrb[68].mxu0 %v22080_v39 }
 0x638   :  { %8980 = vmatprep.mubr.bf16.mxu0 %v22215_v13  ;;  %9062 = vmatpush1.bf16.msra.mxu0 %v18173_v23  ;;  %v18202_v23 = vld [vmem:[#allocation6 + $0x5e4] ss:$24 sps:$4 sm:$0xff]  }
 0x639   :  { %9063 = vmatprep.subr.bf16.mxu0 %v18184_v22  ;;  %12160 = vmatpush1.bf16.msra.mxu1 %v18191_v57  ;;  %v18200_v22 = vld [vmem:[#allocation6 + $0x5e0] ss:$24 sps:$4 sm:$0xff]   ;;  %v18205_v57 = vld [vmem:[#allocation6 + $0x614] ss:$24 sps:$4 sm:$0xff]  }
 0x63a   :  { %12282 = vmatprep.subr.bf16.mxu1 %v18214_v29  ;;  %v18212_v29 = vld [vmem:[#allocation6 + $0x1808] ss:$24 sps:$4 sm:$0xff]  }
 0x63b   :  { %8848 = vmatmul.mubr.bf16.gmra.mrb[48].mxu1 %v22166_v48 }
 0x63c   :  { %8857 = vmatprep.mubr.bf16.mxu1 %v22157_v12  ;;  %9064 = vmatpush1.bf16.msra.mxu0 %v18182_v31  ;;  %v18217_v31 = vld [vmem:[#allocation6 + $0x183c] ss:$24 sps:$4 sm:$0xff]  }
 0x63d   :  { %9065 = vmatprep.subr.bf16.mxu0 %v18190_v59  ;;  %v18215_v59 = vld [vmem:[#allocation6 + $0x1838] ss:$24 sps:$4 sm:$0xff]  }
 0x63f   :  { %8981 = vmatmul.mubr.bf16.gmra.mrb[72].mxu0 %v22082_v43 }
 0x640   :  { %8990 = vmatprep.mubr.bf16.mxu0 %v22083_v15  ;;  %9066 = vmatpush1.bf16.msra.mxu0 %v18188_v49  ;;  %v18223_v49 = vld [vmem:[#allocation6 + $0x186c] ss:$24 sps:$4 sm:$0xff]  }
 0x641   :  { %9067 = vmatprep.subr.bf16.mxu0 %v18196_v33  ;;  %v18221_v33 = vld [vmem:[#allocation6 + $0x1868] ss:$24 sps:$4 sm:$0xff]  }
 0x643   :  { %8858 = vmatmul.mubr.bf16.gmra.mrb[52].mxu1 %v22167_v32 }
 0x644   :  { %8867 = vmatprep.mubr.bf16.mxu1 %v22157_v12  ;;  %9068 = vmatpush1.bf16.msra.mxu0 %v18194_v58  ;;  %v18229_v58 = vld [vmem:[#allocation6 + $0x189c] ss:$24 sps:$4 sm:$0xff]  }
 0x645   :  { %9069 = vmatprep.subr.bf16.mxu0 %v18199_v21  ;;  %v18227_v21 = vld [vmem:[#allocation6 + $0x1898] ss:$24 sps:$4 sm:$0xff]  }
 0x647   :  { %8991 = vmatmul.mubr.bf16.gmra.mrb[76].mxu0 %v22084_v28 }
 0x648   :  { %9000 = vmatprep.mubr.bf16.mxu0 %v22085_v25  ;;  %9070 = vmatpush1.bf16.msra.mxu0 %v18197_v62  ;;  %v18232_v62 = vld [vmem:[#allocation6 + $0x18cc] ss:$24 sps:$4 sm:$0xff]  }
 0x649   :  { %9071 = vmatprep.subr.bf16.mxu0 %v18202_v23  ;;  %v22216_v23 = vld [vmem:[#allocation42_spill] sm:$0xff] }
 0x64b   :  { %8868 = vmatmul.mubr.bf16.gmra.mrb[56].mxu1 %v22168_v35 }
 0x64c   :  { %8877 = vmatprep.mubr.bf16.mxu1 %v22157_v12  ;;  %9072 = vmatpush1.bf16.msra.mxu0 %v18200_v22  ;;  %v18230_v22 = vld [vmem:[#allocation6 + $0x18c8] ss:$24 sps:$4 sm:$0xff]  }
 0x64d   :  { %9194 = vmatprep.subr.bf16.mxu0 %v18205_v57  ;;  %v18238_v57 = vld [vmem:[#allocation6 + $0x18fc] ss:$24 sps:$4 sm:$0xff]  }
 0x64f   :  { %9001 = vmatmul.mubr.bf16.gmra.mrb[80].mxu0 %v19387_v37 }
 0x650   :  { %9010 = vmatprep.mubr.bf16.mxu0 %v22086_v50 }
 0x653   :  { %8878 = vmatmul.mubr.bf16.gmra.mrb[60].mxu1 %v22169_v3 }
 0x654   :  { %12161 = vmatprep.mubr.bf16.mxu1 %v22175_v61 }
 0x657   :  { %9011 = vmatmul.mubr.bf16.gmra.mrb[84].mxu0 %v22087_v7 }
 0x658   :  { %9020 = vmatprep.mubr.bf16.mxu0 %v22088_v20 }
 0x65b   :  { %12162 = vmatmul.mubr.bf16.vlgmr.msra.gmra.mrb[16].mxu1 %v22176_v54 }
 0x65c   :  { %12171 = vmatprep.mubr.bf16.mxu1 %v22214_v53  ;;  %12283 = vmatpush1.bf16.msra.mxu1 %v18212_v29  ;;  %v18203_v29 = vld [vmem:[#allocation6 + $0x610] ss:$24 sps:$4 sm:$0xff]  }
 0x65d   :  { %12284 = vmatprep.subr.bf16.mxu1 %v18217_v31  ;;  %v18208_v31 = vld [vmem:[#allocation6 + $0x644] ss:$24 sps:$4 sm:$0xff]  }
 0x65f   :  { %9021 = vmatmul.mubr.bf16.gmra.mrb[88].mxu0 %v22090_v40 }
 0x660   :  { %9030 = vmatprep.mubr.bf16.mxu0 %v22091_v2  ;;  %12285 = vmatpush1.bf16.msra.mxu1 %v18215_v59  ;;  %v18236_v59 = vld [vmem:[#allocation6 + $0x18f8] ss:$24 sps:$4 sm:$0xff]  }
 0x661   :  { %12286 = vmatprep.subr.bf16.mxu1 %v18223_v49  ;;  %v18244_v49 = vld [vmem:[#allocation6 + $0x192c] ss:$24 sps:$4 sm:$0xff]  }
 0x663   :  { %12172 = vmatmul.mubr.bf16.gmra.mrb[20].mxu1 %v22178_v9 }
 0x664   :  { %12181 = vmatprep.mubr.bf16.mxu1 %v22179_v11  ;;  %12287 = vmatpush1.bf16.msra.mxu1 %v18221_v33  ;;  %v22217_v33 = vld [vmem:[#allocation41_spill] sm:$0xff] }
 0x665   :  { %12288 = vmatprep.subr.bf16.mxu1 %v18229_v58  ;;  %v22218_v58 = vld [vmem:[#allocation44_spill] sm:$0xff] }
 0x667   :  { %9031 = vmatmul.mubr.bf16.gmra.mrb[92].mxu0 %v22092_v42 }
 0x668   :  { %9073 = vmatprep.mubr.bf16.mxu0 %v22216_v23  ;;  %12289 = vmatpush1.bf16.msra.mxu1 %v18227_v21  ;;  %v18206_v23 = vld [vmem:[#allocation6 + $0x640] ss:$24 sps:$4 sm:$0xff]   ;;  %v18211_v21 = vld [vmem:[#allocation6 + $0x674] ss:$24 sps:$4 sm:$0xff]  }
 0x669   :  { %12290 = vmatprep.subr.bf16.mxu1 %v18232_v62  ;;  %v18242_v62 = vld [vmem:[#allocation6 + $0x1928] ss:$24 sps:$4 sm:$0xff]  }
 0x66b   :  { %12182 = vmatmul.mubr.bf16.gmra.mrb[24].mxu1 %v22078_v63  ;;  %v18247_v63 = vld [vmem:[#allocation6 + $0x195c] ss:$24 sps:$4 sm:$0xff]  }
 0x66c   :  { %12191 = vmatprep.mubr.bf16.mxu1 %v22079_v18  ;;  %12291 = vmatpush1.bf16.msra.mxu1 %v18230_v22  ;;  %v18209_v22 = vld [vmem:[#allocation6 + $0x670] ss:$24 sps:$4 sm:$0xff]  }
 0x66d   :  { %12292 = vmatprep.subr.bf16.mxu1 %v18238_v57  ;;  %v18220_v57 = vld [vmem:[#allocation6 + $0x6a4] ss:$24 sps:$4 sm:$0xff]  }
 0x66f   :  { %9074 = vmatmul.mubr.bf16.vlgmr.msra.gmra.mrb[48].mxu0 %v22217_v33  ;;  %v18245_v33 = vld [vmem:[#allocation6 + $0x1958] ss:$24 sps:$4 sm:$0xff]  }
 0x670   :  { %9083 = vmatprep.mubr.bf16.mxu0 %v22218_v58  ;;  %9195 = vmatpush1.bf16.msra.mxu0 %v18203_v29  ;;  %v18253_v58 = vld [vmem:[#allocation6 + $0x198c] ss:$24 sps:$4 sm:$0xff]  }
 0x671   :  { %9196 = vmatprep.subr.bf16.mxu0 %v18208_v31  ;;  %12293 = vmatpush1.bf16.msra.mxu1 %v18236_v59  ;;  %v22219_v29 = vld [vmem:[#allocation43_spill] sm:$0xff]  ;;  %v22220_v31 = vld [vmem:[#allocation46_spill] sm:$0xff] }
 0x672   :  { %12294 = vmatprep.subr.bf16.mxu1 %v18244_v49  ;;  %v18218_v59 = vld [vmem:[#allocation6 + $0x6a0] ss:$24 sps:$4 sm:$0xff]   ;;  %v18226_v49 = vld [vmem:[#allocation6 + $0x6d4] ss:$24 sps:$4 sm:$0xff]  }
 0x673   :  { %12192 = vmatmul.mubr.bf16.gmra.mrb[28].mxu1 %v22080_v39  ;;  %v18251_v39 = vld [vmem:[#allocation6 + $0x1988] ss:$24 sps:$4 sm:$0xff]  }
 0x674   :  { %12201 = vmatprep.mubr.bf16.mxu1 %v22215_v13  ;;  %9197 = vmatpush1.bf16.msra.mxu0 %v18206_v23  ;;  %v18259_v13 = vld [vmem:[#allocation6 + $0x19bc] ss:$24 sps:$4 sm:$0xff]   ;;  %v18224_v23 = vld [vmem:[#allocation6 + $0x6d0] ss:$24 sps:$4 sm:$0xff]  }
 0x675   :  { %9198 = vmatprep.subr.bf16.mxu0 %v18211_v21  ;;  %12295 = vmatpush1.bf16.msra.mxu1 %v18242_v62  ;;  %v18257_v21 = vld [vmem:[#allocation6 + $0x19b8] ss:$24 sps:$4 sm:$0xff]   ;;  %v18262_v62 = vld [vmem:[#allocation6 + $0x19ec] ss:$24 sps:$4 sm:$0xff]  }
 0x676   :  { %12296 = vmatprep.subr.bf16.mxu1 %v18247_v63  ;;  %v18235_v63 = vld [vmem:[#allocation6 + $0x704] ss:$24 sps:$4 sm:$0xff]  }
 0x677   :  { %9084 = vmatmul.mubr.bf16.gmra.mrb[52].mxu0 %v22219_v29  ;;  %v18260_v29 = vld [vmem:[#allocation6 + $0x19e8] ss:$24 sps:$4 sm:$0xff]  }
 0x678   :  { %9093 = vmatprep.mubr.bf16.mxu0 %v22220_v31  ;;  %9199 = vmatpush1.bf16.msra.mxu0 %v18209_v22  ;;  %v22221_v22 = vld [vmem:[#allocation45_spill] sm:$0xff] }
 0x679   :  { %9200 = vmatprep.subr.bf16.mxu0 %v18220_v57  ;;  %12297 = vmatpush1.bf16.msra.mxu1 %v18245_v33  ;;  %v22222_v57 = vld [vmem:[#allocation48_spill] sm:$0xff]  ;;  %v18233_v33 = vld [vmem:[#allocation6 + $0x700] ss:$24 sps:$4 sm:$0xff]  }
 0x67a   :  { %12298 = vmatprep.subr.bf16.mxu1 %v18253_v58  ;;  %v18241_v58 = vld [vmem:[#allocation6 + $0x734] ss:$24 sps:$4 sm:$0xff]  }
 0x67b   :  { %12202 = vmatmul.mubr.bf16.gmra.mrb[32].mxu1 %v22082_v43 }
 0x67c   :  { %12211 = vmatprep.mubr.bf16.mxu1 %v22083_v15  ;;  %9201 = vmatpush1.bf16.msra.mxu0 %v18218_v59  ;;  %v18268_v15 = vld [vmem:[#allocation6 + $0x1a1c] ss:$24 sps:$4 sm:$0xff]   ;;  %v18266_v59 = vld [vmem:[#allocation6 + $0x1a18] ss:$24 sps:$4 sm:$0xff]  }
 0x67d   :  { %9202 = vmatprep.subr.bf16.mxu0 %v18226_v49  ;;  %12299 = vmatpush1.bf16.msra.mxu1 %v18251_v39  ;;  %v18239_v39 = vld [vmem:[#allocation6 + $0x730] ss:$24 sps:$4 sm:$0xff]   ;;  %v18274_v49 = vld [vmem:[#allocation6 + $0x1a4c] ss:$24 sps:$4 sm:$0xff]  }
 0x67e   :  { %12300 = vmatprep.subr.bf16.mxu1 %v18259_v13  ;;  %v18250_v13 = vld [vmem:[#allocation6 + $0x764] ss:$24 sps:$4 sm:$0xff]  }
 0x67f   :  { %9094 = vmatmul.mubr.bf16.gmra.mrb[56].mxu0 %v22221_v22 }
 0x680   :  { %9103 = vmatprep.mubr.bf16.mxu0 %v22222_v57  ;;  %9203 = vmatpush1.bf16.msra.mxu0 %v18224_v23  ;;  %v22223_v23 = vld [vmem:[#allocation50_spill] sm:$0xff] }
 0x681   :  { %9204 = vmatprep.subr.bf16.mxu0 %v18235_v63  ;;  %12301 = vmatpush1.bf16.msra.mxu1 %v18257_v21  ;;  %v18248_v63 = vld [vmem:[#allocation6 + $0x760] ss:$24 sps:$4 sm:$0xff]   ;;  %v18256_v21 = vld [vmem:[#allocation6 + $0x794] ss:$24 sps:$4 sm:$0xff]  }
 0x682   :  { %12302 = vmatprep.subr.bf16.mxu1 %v18262_v62  ;;  %v18272_v62 = vld [vmem:[#allocation6 + $0x1a48] ss:$24 sps:$4 sm:$0xff]  }
 0x683   :  { %12212 = vmatmul.mubr.bf16.gmra.mrb[36].mxu1 %v22084_v28 }
 0x684   :  { %12221 = vmatprep.mubr.bf16.mxu1 %v22085_v25  ;;  %9205 = vmatpush1.bf16.msra.mxu0 %v18233_v33  ;;  %v18277_v25 = vld [vmem:[#allocation6 + $0x1a7c] ss:$24 sps:$4 sm:$0xff]   ;;  %v18254_v33 = vld [vmem:[#allocation6 + $0x790] ss:$24 sps:$4 sm:$0xff]  }
 0x685   :  { %9206 = vmatprep.subr.bf16.mxu0 %v18241_v58  ;;  %12303 = vmatpush1.bf16.msra.mxu1 %v18260_v29  ;;  %v18275_v58 = vld [vmem:[#allocation6 + $0x1a78] ss:$24 sps:$4 sm:$0xff]   ;;  %v18283_v29 = vld [vmem:[#allocation6 + $0x1aac] ss:$24 sps:$4 sm:$0xff]  }
 0x686   :  { %12304 = vmatprep.subr.bf16.mxu1 %v18268_v15  ;;  %v18265_v15 = vld [vmem:[#allocation6 + $0x7c4] ss:$24 sps:$4 sm:$0xff]  }
 0x687   :  { %9104 = vmatmul.mubr.bf16.gmra.mrb[60].mxu0 %v19551_v10 }
 0x688   :  { %9113 = vmatprep.mubr.bf16.mxu0 %v22223_v23  ;;  %9207 = vmatpush1.bf16.msra.mxu0 %v18239_v39  ;;  %v22224_v39 = vld [vmem:[#allocation49_spill] sm:$0xff] }
 0x689   :  { %9208 = vmatprep.subr.bf16.mxu0 %v18250_v13  ;;  %12305 = vmatpush1.bf16.msra.mxu1 %v18266_v59  ;;  %v22225_v13 = vld [vmem:[#allocation52_spill] sm:$0xff]  ;;  %v18263_v59 = vld [vmem:[#allocation6 + $0x7c0] ss:$24 sps:$4 sm:$0xff]  }
 0x68a   :  { %12306 = vmatprep.subr.bf16.mxu1 %v18274_v49  ;;  %v18271_v49 = vld [vmem:[#allocation6 + $0x7f4] ss:$24 sps:$4 sm:$0xff]  }
 0x68b   :  { %12222 = vmatmul.mubr.bf16.gmra.mrb[40].mxu1 %v19387_v37  ;;  %v18281_v37 = vld [vmem:[#allocation6 + $0x1aa8] ss:$24 sps:$4 sm:$0xff]  }
 0x68c   :  { %12231 = vmatprep.mubr.bf16.mxu1 %v22086_v50  ;;  %9209 = vmatpush1.bf16.msra.mxu0 %v18248_v63  ;;  %v18289_v50 = vld [vmem:[#allocation6 + $0x1adc] ss:$24 sps:$4 sm:$0xff]   ;;  %v18269_v63 = vld [vmem:[#allocation6 + $0x7f0] ss:$24 sps:$4 sm:$0xff]  }
 0x68d   :  { %9210 = vmatprep.subr.bf16.mxu0 %v18256_v21  ;;  %12307 = vmatpush1.bf16.msra.mxu1 %v18272_v62  ;;  %v18287_v21 = vld [vmem:[#allocation6 + $0x1ad8] ss:$24 sps:$4 sm:$0xff]   ;;  %v18307_v62 = vld [vmem:[#allocation6 + $0x1b0c] ss:$24 sps:$4 sm:$0xff]  }
 0x68e   :  { %12308 = vmatprep.subr.bf16.mxu1 %v18277_v25  ;;  %v18280_v25 = vld [vmem:[#allocation6 + $0x824] ss:$24 sps:$4 sm:$0xff]  }
 0x68f   :  { %9114 = vmatmul.mubr.bf16.gmra.mrb[64].mxu0 %v22224_v39 }
 0x690   :  { %9123 = vmatprep.mubr.bf16.mxu0 %v22225_v13  ;;  %9211 = vmatpush1.bf16.msra.mxu0 %v18254_v33  ;;  %v22226_v33 = vld [vmem:[#allocation51_spill] sm:$0xff] }
 0x691   :  { %9212 = vmatprep.subr.bf16.mxu0 %v18265_v15  ;;  %12309 = vmatpush1.bf16.msra.mxu1 %v18275_v58  ;;  %v22227_v15 = vld [vmem:[#allocation54_spill] sm:$0xff] }
 0x692   :  { %12310 = vmatprep.subr.bf16.mxu1 %v18283_v29  ;;  %v18278_v58 = vld [vmem:[#allocation6 + $0x820] ss:$24 sps:$4 sm:$0xff]   ;;  %v18286_v29 = vld [vmem:[#allocation6 + $0x854] ss:$24 sps:$4 sm:$0xff]  }
 0x693   :  { %12232 = vmatmul.mubr.bf16.gmra.mrb[44].mxu1 %v22087_v7 }
 0x694   :  { %12241 = vmatprep.mubr.bf16.mxu1 %v22088_v20  ;;  %9213 = vmatpush1.bf16.msra.mxu0 %v18263_v59  ;;  %v18284_v59 = vld [vmem:[#allocation6 + $0x850] ss:$24 sps:$4 sm:$0xff]  }
 0x695   :  { %9214 = vmatprep.subr.bf16.mxu0 %v18271_v49  ;;  %12311 = vmatpush1.bf16.msra.mxu1 %v18281_v37  ;;  %v18292_v37 = vld [vmem:[#allocation6 + $0x884] ss:$24 sps:$4 sm:$0xff]   ;;  %v18295_v49 = vld [vmem:[#allocation6 + $0x8b4] ss:$24 sps:$4 sm:$0xff]  }
 0x696   :  { %12312 = vmatprep.subr.bf16.mxu1 %v18289_v50  ;;  %v18290_v50 = vld [vmem:[#allocation6 + $0x880] ss:$24 sps:$4 sm:$0xff]  }
 0x697   :  { %9124 = vmatmul.mubr.bf16.gmra.mrb[68].mxu0 %v22226_v33 }
 0x698   :  { %9133 = vmatprep.mubr.bf16.mxu0 %v22227_v15  ;;  %9215 = vmatpush1.bf16.msra.mxu0 %v18269_v63  ;;  %v22228_v63 = vld [vmem:[#allocation38_spill] sm:$0xff] }
 0x699   :  { %9216 = vmatprep.subr.bf16.mxu0 %v18280_v25  ;;  %12313 = vmatpush1.bf16.msra.mxu1 %v18287_v21  ;;  %v18293_v25 = vld [vmem:[#allocation6 + $0x8b0] ss:$24 sps:$4 sm:$0xff]   ;;  %v18298_v21 = vld [vmem:[#allocation6 + $0x8e4] ss:$24 sps:$4 sm:$0xff]  }
 0x69a   :  { %12435 = vmatprep.subr.bf16.mxu1 %v18307_v62  ;;  %v18296_v62 = vld [vmem:[#allocation6 + $0x8e0] ss:$24 sps:$4 sm:$0xff]  }
 0x69b   :  { %12242 = vmatmul.mubr.bf16.gmra.mrb[48].mxu1 %v22090_v40 }
 0x69c   :  { %12251 = vmatprep.mubr.bf16.mxu1 %v22091_v2  ;;  %9217 = vmatpush1.bf16.msra.mxu0 %v18278_v58  ;;  %v18301_v58 = vld [vmem:[#allocation6 + $0x914] ss:$24 sps:$4 sm:$0xff]  }
 0x69d   :  { %9218 = vmatprep.subr.bf16.mxu0 %v18286_v29  ;;  %v22229_v29 = vld [vmem:[#allocation37_spill] sm:$0xff] }
 0x69e   :  { %v18325_v2 = vld [vmem:[#allocation6 + $0x1bfc] ss:$24 sps:$4 sm:$0xff]  }
 0x69f   :  { %9134 = vmatmul.mubr.bf16.gmra.mrb[72].mxu0 %v19596_v14 }
 0x6a0   :  { %9143 = vmatprep.mubr.bf16.mxu0 %v19613_v24  ;;  %9219 = vmatpush1.bf16.msra.mxu0 %v18284_v59  ;;  %v22230_v59 = vld [vmem:[#allocation40_spill] sm:$0xff] }
 0x6a1   :  { %9220 = vmatprep.subr.bf16.mxu0 %v18292_v37  ;;  %v22231_v37 = vld [vmem:[#allocation60_spill] sm:$0xff] }
 0x6a3   :  { %12252 = vmatmul.mubr.bf16.gmra.mrb[52].mxu1 %v22092_v42  ;;  %v18320_v42 = vld [vmem:[#allocation6 + $0x1bc8] ss:$24 sps:$4 sm:$0xff]  }
 0x6a4   :  { %12261 = vmatprep.mubr.bf16.mxu1 %v22228_v63  ;;  %9221 = vmatpush1.bf16.msra.mxu0 %v18290_v50  ;;  %v22232_v50 = vld [vmem:[#allocation39_spill] sm:$0xff] }
 0x6a5   :  { %9222 = vmatprep.subr.bf16.mxu0 %v18295_v49  ;;  %v22233_v49 = vld [vmem:[#allocation59_spill] sm:$0xff] }
 0x6a6   :  { %v18310_v63 = vld [vmem:[#allocation6 + $0x1b3c] ss:$24 sps:$4 sm:$0xff]  }
 0x6a7   :  { %9144 = vmatmul.mubr.bf16.gmra.mrb[76].mxu0 %v22060_v46 }
 0x6a8   :  { %9153 = vmatprep.mubr.bf16.mxu0 %v22097_v19  ;;  %9223 = vmatpush1.bf16.msra.mxu0 %v18293_v25  ;;  %v22234_v25 = vld [vmem:[#allocation62_spill] sm:$0xff] }
 0x6a9   :  { %9224 = vmatprep.subr.bf16.mxu0 %v18298_v21  ;;  %v18305_v21 = vld [vmem:[#allocation6 + $0x1b08] ss:$24 sps:$4 sm:$0xff]  }
 0x6ab   :  { %12262 = vmatmul.mubr.bf16.gmra.mrb[56].mxu1 %v22229_v29  ;;  %v22236_v29 = vld [vmem:[#allocation64_spill] sm:$0xff] }
 0x6ac   :  { %12271 = vmatprep.mubr.bf16.mxu1 %v22230_v59  ;;  %9225 = vmatpush1.bf16.msra.mxu0 %v18296_v62  ;;  %v18308_v62 = vld [vmem:[#allocation6 + $0x1b38] ss:$24 sps:$4 sm:$0xff]  }
 0x6ad   :  { %9347 = vmatprep.subr.bf16.mxu0 %v18301_v58  ;;  %v18313_v58 = vld [vmem:[#allocation6 + $0x1b6c] ss:$24 sps:$4 sm:$0xff]  }
 0x6ae   :  { %v22235_v59 = vld [vmem:[#allocation61_spill] sm:$0xff] }
 0x6af   :  { %9154 = vmatmul.mubr.bf16.gmra.mrb[80].mxu0 %v22062_v47 }
 0x6b0   :  { %9163 = vmatprep.mubr.bf16.mxu0 %v22231_v37 }
 0x6b3   :  { %12272 = vmatmul.mubr.bf16.gmra.mrb[60].mxu1 %v22232_v50  ;;  %v18319_v50 = vld [vmem:[#allocation6 + $0x1b9c] ss:$24 sps:$4 sm:$0xff]  }
 0x6b4   :  { %12314 = vmatprep.mubr.bf16.mxu1 %v22220_v31  ;;  %v18311_v31 = vld [vmem:[#allocation6 + $0x1b68] ss:$24 sps:$4 sm:$0xff]  }
 0x6b7   :  { %9164 = vmatmul.mubr.bf16.gmra.mrb[84].mxu0 %v22233_v49 }
 0x6b8   :  { %9173 = vmatprep.mubr.bf16.mxu0 %v22234_v25 }
 0x6bb   :  { %12315 = vmatmul.mubr.bf16.vlgmr.msra.gmra.mrb[16].mxu1 %v22221_v22  ;;  %v18317_v22 = vld [vmem:[#allocation6 + $0x1b98] ss:$24 sps:$4 sm:$0xff]  }
 0x6bc   :  { %12324 = vmatprep.mubr.bf16.mxu1 %v22222_v57  ;;  %12436 = vmatpush1.bf16.msra.mxu1 %v18305_v21  ;;  %v18322_v57 = vld [vmem:[#allocation6 + $0x1bcc] ss:$24 sps:$4 sm:$0xff]  }
 0x6bd   :  { %12437 = vmatprep.subr.bf16.mxu1 %v18310_v63  ;;  %v22237_v21 = vld [vmem:[#allocation63_spill] sm:$0xff]  ;;  %v22238_v63 = vld [vmem:[#allocation70_spill] sm:$0xff] }
 0x6bf   :  { %9174 = vmatmul.mubr.bf16.gmra.mrb[88].mxu0 %v22235_v59 }
 0x6c0   :  { %9183 = vmatprep.mubr.bf16.mxu0 %v22236_v29  ;;  %12438 = vmatpush1.bf16.msra.mxu1 %v18308_v62  ;;  %v18299_v62 = vld [vmem:[#allocation6 + $0x910] ss:$24 sps:$4 sm:$0xff]  }
 0x6c1   :  { %12439 = vmatprep.subr.bf16.mxu1 %v18313_v58  ;;  %v18304_v58 = vld [vmem:[#allocation6 + $0x944] ss:$24 sps:$4 sm:$0xff]  }
 0x6c3   :  { %12325 = vmatmul.mubr.bf16.gmra.mrb[20].mxu1 %v19551_v10  ;;  %v22240_v10 = vld [vmem:[#allocation72_spill] sm:$0xff] }
 0x6c4   :  { %12334 = vmatprep.mubr.bf16.mxu1 %v22223_v23  ;;  %12440 = vmatpush1.bf16.msra.mxu1 %v18311_v31  ;;  %v18323_v23 = vld [vmem:[#allocation6 + $0x1bf8] ss:$24 sps:$4 sm:$0xff]   ;;  %v18331_v31 = vld [vmem:[#allocation6 + $0x1c2c] ss:$24 sps:$4 sm:$0xff]  }
 0x6c5   :  { %12441 = vmatprep.subr.bf16.mxu1 %v18319_v50  ;;  %v22239_v50 = vld [vmem:[#allocation69_spill] sm:$0xff] }
 0x6c7   :  { %9184 = vmatmul.mubr.bf16.gmra.mrb[92].mxu0 %v22237_v21 }
 0x6c8   :  { %9226 = vmatprep.mubr.bf16.mxu0 %v22238_v63  ;;  %12442 = vmatpush1.bf16.msra.mxu1 %v18317_v22  ;;  %v18302_v63 = vld [vmem:[#allocation6 + $0x940] ss:$24 sps:$4 sm:$0xff]   ;;  %v18316_v22 = vld [vmem:[#allocation6 + $0x974] ss:$24 sps:$4 sm:$0xff]  }
 0x6c9   :  { %12443 = vmatprep.subr.bf16.mxu1 %v18322_v57  ;;  %v18329_v57 = vld [vmem:[#allocation6 + $0x1c28] ss:$24 sps:$4 sm:$0xff]  }
 0x6cb   :  { %12335 = vmatmul.mubr.bf16.gmra.mrb[24].mxu1 %v22224_v39  ;;  %v18334_v39 = vld [vmem:[#allocation6 + $0x1c5c] ss:$24 sps:$4 sm:$0xff]  }
 0x6cc   :  { %12344 = vmatprep.mubr.bf16.mxu1 %v22225_v13  ;;  %12444 = vmatpush1.bf16.msra.mxu1 %v18320_v42  ;;  %v18314_v42 = vld [vmem:[#allocation6 + $0x970] ss:$24 sps:$4 sm:$0xff]  }
 0x6cd   :  { %12445 = vmatprep.subr.bf16.mxu1 %v18325_v2  ;;  %v18328_v2 = vld [vmem:[#allocation6 + $0x9a4] ss:$24 sps:$4 sm:$0xff]  }
 0x6cf   :  { %9227 = vmatmul.mubr.bf16.vlgmr.msra.gmra.mrb[48].mxu0 %v22239_v50  ;;  %v18332_v50 = vld [vmem:[#allocation6 + $0x1c58] ss:$24 sps:$4 sm:$0xff]  }
 0x6d0   :  { %9236 = vmatprep.mubr.bf16.mxu0 %v22240_v10  ;;  %9348 = vmatpush1.bf16.msra.mxu0 %v18299_v62  ;;  %v18337_v10 = vld [vmem:[#allocation6 + $0x1c8c] ss:$24 sps:$4 sm:$0xff]  }
 0x6d1   :  { %9349 = vmatprep.subr.bf16.mxu0 %v18304_v58  ;;  %12446 = vmatpush1.bf16.msra.mxu1 %v18323_v23  ;;  %v22241_v62 = vld [vmem:[#allocation71_spill] sm:$0xff]  ;;  %v22242_v58 = vld [vmem:[#allocation74_spill] sm:$0xff] }
 0x6d2   :  { %12447 = vmatprep.subr.bf16.mxu1 %v18331_v31  ;;  %v18326_v23 = vld [vmem:[#allocation6 + $0x9a0] ss:$24 sps:$4 sm:$0xff]  }
 0x6d3   :  { %12345 = vmatmul.mubr.bf16.gmra.mrb[28].mxu1 %v22226_v33  ;;  %v18335_v31 = vld [vmem:[#allocation6 + $0x1c88] ss:$24 sps:$4 sm:$0xff]   ;;  %v18340_v33 = vld [vmem:[#allocation6 + $0x9d4] ss:$24 sps:$4 sm:$0xff]  }
 0x6d4   :  { %12354 = vmatprep.mubr.bf16.mxu1 %v22227_v15  ;;  %9350 = vmatpush1.bf16.msra.mxu0 %v18302_v63  ;;  %v18343_v15 = vld [vmem:[#allocation6 + $0x1cbc] ss:$24 sps:$4 sm:$0xff]   ;;  %v18338_v63 = vld [vmem:[#allocation6 + $0x9d0] ss:$24 sps:$4 sm:$0xff]  }
 0x6d5   :  { %9351 = vmatprep.subr.bf16.mxu0 %v18316_v22  ;;  %12448 = vmatpush1.bf16.msra.mxu1 %v18329_v57  ;;  %v18352_v22 = vld [vmem:[#allocation6 + $0xa04] ss:$24 sps:$4 sm:$0xff]  }
 0x6d6   :  { %12449 = vmatprep.subr.bf16.mxu1 %v18334_v39  ;;  %v18341_v39 = vld [vmem:[#allocation6 + $0x1cb8] ss:$24 sps:$4 sm:$0xff]   ;;  %v18346_v57 = vld [vmem:[#allocation6 + $0x1cec] ss:$24 sps:$4 sm:$0xff]  }
 0x6d7   :  { %9237 = vmatmul.mubr.bf16.gmra.mrb[52].mxu0 %v22241_v62  ;;  %v18364_v62 = vld [vmem:[#allocation6 + $0xa34] ss:$24 sps:$4 sm:$0xff]  }
 0x6d8   :  { %9246 = vmatprep.mubr.bf16.mxu0 %v22242_v58  ;;  %9352 = vmatpush1.bf16.msra.mxu0 %v18314_v42  ;;  %v22243_v42 = vld [vmem:[#allocation73_spill] sm:$0xff] }
 0x6d9   :  { %9353 = vmatprep.subr.bf16.mxu0 %v18328_v2  ;;  %12450 = vmatpush1.bf16.msra.mxu1 %v18332_v50  ;;  %v22244_v2 = vld [vmem:[#allocation76_spill] sm:$0xff]  ;;  %v18350_v50 = vld [vmem:[#allocation6 + $0xa00] ss:$24 sps:$4 sm:$0xff]  }
 0x6da   :  { %12451 = vmatprep.subr.bf16.mxu1 %v18337_v10  ;;  %v18344_v10 = vld [vmem:[#allocation6 + $0x1ce8] ss:$24 sps:$4 sm:$0xff]  }
 0x6db   :  { %12355 = vmatmul.mubr.bf16.gmra.mrb[32].mxu1 %v19596_v14 }
 0x6dc   :  { %12364 = vmatprep.mubr.bf16.mxu1 %v19613_v24  ;;  %9354 = vmatpush1.bf16.msra.mxu0 %v18326_v23  ;;  %v18349_v24 = vld [vmem:[#allocation6 + $0x1d1c] ss:$24 sps:$4 sm:$0xff]  }
 0x6dd   :  { %12452 = vmatpush1.bf16.msra.mxu1 %v18335_v31  ;;  %9355 = vmatprep.subr.bf16.mxu0 %v18340_v33  ;;  %v18362_v33 = vld [vmem:[#allocation6 + $0xa30] ss:$24 sps:$4 sm:$0xff]   ;;  %v18370_v23 = vld [vmem:[#allocation6 + $0xa64] ss:$24 sps:$4 sm:$0xff]  }
 0x6de   :  { %12453 = vmatprep.subr.bf16.mxu1 %v18343_v15  ;;  %v18347_v15 = vld [vmem:[#allocation6 + $0x1d18] ss:$24 sps:$4 sm:$0xff]   ;;  %v18355_v31 = vld [vmem:[#allocation6 + $0x1d4c] ss:$24 sps:$4 sm:$0xff]  }
 0x6df   :  { %9247 = vmatmul.mubr.bf16.gmra.mrb[56].mxu0 %v22243_v42 }
 0x6e0   :  { %9256 = vmatprep.mubr.bf16.mxu0 %v22244_v2  ;;  %9356 = vmatpush1.bf16.msra.mxu0 %v18338_v63  ;;  %v18368_v63 = vld [vmem:[#allocation6 + $0xa60] ss:$24 sps:$4 sm:$0xff]  }
 0x6e1   :  { %12454 = vmatpush1.bf16.msra.mxu1 %v18341_v39  ;;  %9357 = vmatprep.subr.bf16.mxu0 %v18352_v22  ;;  %v18353_v39 = vld [vmem:[#allocation6 + $0x1d48] ss:$24 sps:$4 sm:$0xff]   ;;  %v18373_v22 = vld [vmem:[#allocation6 + $0x1504] ss:$24 sps:$4 sm:$0xff]  }
 0x6e2   :  { %12455 = vmatprep.subr.bf16.mxu1 %v18346_v57  ;;  %v18358_v57 = vld [vmem:[#allocation6 + $0x1d7c] ss:$24 sps:$4 sm:$0xff]  }
 0x6e3   :  { %12365 = vmatmul.mubr.bf16.gmra.mrb[36].mxu1 %v22060_v46 }
 0x6e4   :  { %12374 = vmatprep.mubr.bf16.mxu1 %v22097_v19  ;;  %9358 = vmatpush1.bf16.msra.mxu0 %v18350_v50  ;;  %v18361_v50 = vld [vmem:[#allocation6 + $0x1dac] ss:$24 sps:$4 sm:$0xff]  }
 0x6e5   :  { %12456 = vmatpush1.bf16.msra.mxu1 %v18344_v10  ;;  %9359 = vmatprep.subr.bf16.mxu0 %v18364_v62  ;;  %v18359_v10 = vld [vmem:[#allocation6 + $0x1da8] ss:$24 sps:$4 sm:$0xff]   ;;  %v18367_v62 = vld [vmem:[#allocation6 + $0x1ddc] ss:$24 sps:$4 sm:$0xff]  }
 0x6e6   :  { %12457 = vmatprep.subr.bf16.mxu1 %v18349_v24  ;;  %v18356_v24 = vld [vmem:[#allocation6 + $0x1d78] ss:$24 sps:$4 sm:$0xff]  }
 0x6e7   :  { %9257 = vmatmul.mubr.bf16.gmra.mrb[60].mxu0 %v22193_v30 }
 0x6e8   :  { %9266 = vmatprep.mubr.bf16.mxu0 %v22194_v1  ;;  %9360 = vmatpush1.bf16.msra.mxu0 %v18362_v33  ;;  %v18365_v33 = vld [vmem:[#allocation6 + $0x1dd8] ss:$24 sps:$4 sm:$0xff]  }
 0x6e9   :  { %12458 = vmatpush1.bf16.msra.mxu1 %v18347_v15  ;;  %9361 = vmatprep.subr.bf16.mxu0 %v18370_v23  ;;  %v18397_v15 = vld [vmem:[#allocation6 + $0x1e0c] ss:$24 sps:$4 sm:$0xff]  }
 0x6ea   :  { %12459 = vmatprep.subr.bf16.mxu1 %v18355_v31  ;;  %v22245_v23 = vld [vmem:[#allocation83_spill] sm:$0xff]  ;;  %v22246_v31 = vld [vmem:[#allocation66_spill] sm:$0xff] }
 0x6eb   :  { %12375 = vmatmul.mubr.bf16.gmra.mrb[40].mxu1 %v22062_v47 }
 0x6ec   :  { %12384 = vmatprep.mubr.bf16.mxu1 %v22231_v37  ;;  %9362 = vmatpush1.bf16.msra.mxu0 %v18368_v63  ;;  %v22247_v63 = vld [vmem:[#allocation85_spill] sm:$0xff] }
 0x6ed   :  { %12460 = vmatpush1.bf16.msra.mxu1 %v18353_v39  ;;  %11517 = vmatprep.subr.bf16.mxu0 %v18373_v22  ;;  %v22248_v39 = vld [vmem:[#allocation65_spill] sm:$0xff]  ;;  %v22249_v22 = vld [vmem:[#allocation68_spill] sm:$0xff] }
 0x6ee   :  { %12461 = vmatprep.subr.bf16.mxu1 %v18358_v57  ;;  %v22250_v57 = vld [vmem:[#allocation67_spill] sm:$0xff] }
 0x6ef   :  { %9267 = vmatmul.mubr.bf16.gmra.mrb[64].mxu0 %v19755_v60 }
 0x6f0   :  { %9276 = vmatprep.mubr.bf16.mxu0 %v19767_v36 }
 0x6f1   :  { %12462 = vmatpush1.bf16.msra.mxu1 %v18356_v24  ;;  %v18395_v24 = vld [vmem:[#allocation6 + $0x1e08] ss:$24 sps:$4 sm:$0xff]  }
 0x6f2   :  { %12463 = vmatprep.subr.bf16.mxu1 %v18361_v50  ;;  %v18403_v50 = vld [vmem:[#allocation6 + $0x1e3c] ss:$24 sps:$4 sm:$0xff]  }
 0x6f3   :  { %12385 = vmatmul.mubr.bf16.gmra.mrb[44].mxu1 %v22233_v49 }
 0x6f4   :  { %12394 = vmatprep.mubr.bf16.mxu1 %v22234_v25 }
 0x6f5   :  { %12464 = vmatpush1.bf16.msra.mxu1 %v18359_v10  ;;  %v18401_v10 = vld [vmem:[#allocation6 + $0x1e38] ss:$24 sps:$4 sm:$0xff]  }
 0x6f6   :  { %12465 = vmatprep.subr.bf16.mxu1 %v18367_v62  ;;  %v18406_v62 = vld [vmem:[#allocation6 + $0x1e6c] ss:$24 sps:$4 sm:$0xff]  }
 0x6f7   :  { %9277 = vmatmul.mubr.bf16.gmra.mrb[68].mxu0 %v19765_v16 }
 0x6f8   :  { %9286 = vmatprep.mubr.bf16.mxu0 %v22195_v26 }
 0x6f9   :  { %12466 = vmatpush1.bf16.msra.mxu1 %v18365_v33  ;;  %v18404_v33 = vld [vmem:[#allocation6 + $0x1e68] ss:$24 sps:$4 sm:$0xff]  }
 0x6fa   :  { %12588 = vmatprep.subr.bf16.mxu1 %v18397_v15  ;;  %v18412_v15 = vld [vmem:[#allocation6 + $0x1e9c] ss:$24 sps:$4 sm:$0xff]  }
 0x6fb   :  { %12395 = vmatmul.mubr.bf16.gmra.mrb[48].mxu1 %v22235_v59 }
 0x6fc   :  { %12404 = vmatprep.mubr.bf16.mxu1 %v22236_v29 }
 0x6ff   :  { %9287 = vmatmul.mubr.bf16.gmra.mrb[72].mxu0 %v22196_v51 }
 0x700   :  { %9296 = vmatprep.mubr.bf16.mxu0 %v22245_v23 }
 0x703   :  { %12405 = vmatmul.mubr.bf16.gmra.mrb[52].mxu1 %v22237_v21 }
 0x704   :  { %12414 = vmatprep.mubr.bf16.mxu1 %v22246_v31 }
 0x707   :  { %9297 = vmatmul.mubr.bf16.gmra.mrb[76].mxu0 %v22198_v6 }
 0x708   :  { %9306 = vmatprep.mubr.bf16.mxu0 %v22247_v63 }
 0x70b   :  { %12415 = vmatmul.mubr.bf16.gmra.mrb[56].mxu1 %v22248_v39 }
 0x70c   :  { %12424 = vmatprep.mubr.bf16.mxu1 %v22249_v22 }
 0x70f   :  { %9307 = vmatmul.mubr.bf16.gmra.mrb[80].mxu0 %v22200_v5 }
 0x710   :  { %9316 = vmatprep.mubr.bf16.mxu0 %v22201_v41 }
 0x713   :  { %12425 = vmatmul.mubr.bf16.gmra.mrb[60].mxu1 %v22250_v57 }
 0x714   :  { %12467 = vmatprep.mubr.bf16.mxu1 %v22242_v58 }
 0x717   :  { %9317 = vmatmul.mubr.bf16.gmra.mrb[84].mxu0 %v22202_v27 }
 0x718   :  { %9326 = vmatprep.mubr.bf16.mxu0 %v22203_v8 }
 0x71b   :  { %12468 = vmatmul.mubr.bf16.vlgmr.msra.gmra.mrb[16].mxu1 %v22243_v42  ;;  %v18410_v42 = vld [vmem:[#allocation6 + $0x1e98] ss:$24 sps:$4 sm:$0xff]  }
 0x71c   :  { %12477 = vmatprep.mubr.bf16.mxu1 %v22244_v2  ;;  %12589 = vmatpush1.bf16.msra.mxu1 %v18395_v24  ;;  %v18418_v2 = vld [vmem:[#allocation6 + $0x1ecc] ss:$24 sps:$4 sm:$0xff]   ;;  %v18416_v24 = vld [vmem:[#allocation6 + $0x1ec8] ss:$24 sps:$4 sm:$0xff]  }
 0x71d   :  { %12590 = vmatprep.subr.bf16.mxu1 %v18403_v50  ;;  %v18421_v50 = vld [vmem:[#allocation6 + $0x1efc] ss:$24 sps:$4 sm:$0xff]  }
 0x71f   :  { %9327 = vmatmul.mubr.bf16.gmra.mrb[88].mxu0 %v22204_v55 }
 0x720   :  { %9336 = vmatprep.mubr.bf16.mxu0 %v22205_v4  ;;  %12591 = vmatpush1.bf16.msra.mxu1 %v18401_v10  ;;  %v18371_v10 = vld [vmem:[#allocation6 + $0x1500] ss:$24 sps:$4 sm:$0xff]  }
 0x721   :  { %12592 = vmatprep.subr.bf16.mxu1 %v18406_v62  ;;  %v18376_v62 = vld [vmem:[#allocation6 + $0x1534] ss:$24 sps:$4 sm:$0xff]  }
 0x723   :  { %12478 = vmatmul.mubr.bf16.gmra.mrb[20].mxu1 %v22193_v30 }
 0x724   :  { %12487 = vmatprep.mubr.bf16.mxu1 %v22194_v1  ;;  %12593 = vmatpush1.bf16.msra.mxu1 %v18404_v33  ;;  %v18419_v1 = vld [vmem:[#allocation6 + $0x1ef8] ss:$24 sps:$4 sm:$0xff]   ;;  %v18427_v33 = vld [vmem:[#allocation6 + $0x1f2c] ss:$24 sps:$4 sm:$0xff]  }
 0x725   :  { %12594 = vmatprep.subr.bf16.mxu1 %v18412_v15  ;;  %v18374_v15 = vld [vmem:[#allocation6 + $0x1530] ss:$24 sps:$4 sm:$0xff]  }
 0x727   :  { %9337 = vmatmul.mubr.bf16.gmra.mrb[92].mxu0 %v22206_v56 }
 0x728   :  { %9379 = vmatprep.mubr.bf16.mxu0 %v22157_v12  ;;  %12595 = vmatpush1.bf16.msra.mxu1 %v18410_v42  ;;  %v18379_v42 = vld [vmem:[#allocation6 + $0x1564] ss:$24 sps:$4 sm:$0xff]  }
 0x729   :  { %12596 = vmatprep.subr.bf16.mxu1 %v18418_v2  ;;  %v18425_v2 = vld [vmem:[#allocation6 + $0x1f28] ss:$24 sps:$4 sm:$0xff]  }
 0x72b   :  { %12488 = vmatmul.mubr.bf16.gmra.mrb[24].mxu1 %v19755_v60  ;;  %v18433_v60 = vld [vmem:[#allocation6 + $0x1f5c] ss:$24 sps:$4 sm:$0xff]  }
 0x72c   :  { %12497 = vmatprep.mubr.bf16.mxu1 %v19767_v36  ;;  %12597 = vmatpush1.bf16.msra.mxu1 %v18416_v24  ;;  %v18377_v24 = vld [vmem:[#allocation6 + $0x1560] ss:$24 sps:$4 sm:$0xff]   ;;  %v22251_v36 = vld [vmem:[#allocation97_spill] sm:$0xff] }
 0x72d   :  { %12598 = vmatprep.subr.bf16.mxu1 %v18421_v50  ;;  %v18382_v50 = vld [vmem:[#allocation6 + $0x1594] ss:$24 sps:$4 sm:$0xff]  }
 0x72f   :  { %9380 = vmatmul.mubr.bf16.vlgmr.msra.gmra.mrb[48].mxu0 %v22207_v17  ;;  %v18431_v17 = vld [vmem:[#allocation6 + $0x1f58] ss:$24 sps:$4 sm:$0xff]  }
 0x730   :  { %11518 = vmatpush1.bf16.msra.mxu0 %v18371_v10  ;;  %9389 = vmatprep.mubr.bf16.mxu0 %v22157_v12  ;;  %v18454_v10 = vld [vmem:[#allocation6 + $0x1b14] ss:$24 sps:$4 sm:$0xff]  }
 0x731   :  { %11519 = vmatprep.subr.bf16.mxu0 %v18376_v62  ;;  %12599 = vmatpush1.bf16.msra.mxu1 %v18419_v1  ;;  %v18380_v1 = vld [vmem:[#allocation6 + $0x1590] ss:$24 sps:$4 sm:$0xff]   ;;  %v18385_v62 = vld [vmem:[#allocation6 + $0x15c4] ss:$24 sps:$4 sm:$0xff]  }
 0x732   :  { %12600 = vmatprep.subr.bf16.mxu1 %v18427_v33  ;;  %v18383_v33 = vld [vmem:[#allocation6 + $0x15c0] ss:$24 sps:$4 sm:$0xff]  }
 0x733   :  { %12498 = vmatmul.mubr.bf16.gmra.mrb[28].mxu1 %v19765_v16 }
 0x734   :  { %12507 = vmatprep.mubr.bf16.mxu1 %v22195_v26  ;;  %11520 = vmatpush1.bf16.msra.mxu0 %v18374_v15  ;;  %v18388_v15 = vld [vmem:[#allocation6 + $0x15f4] ss:$24 sps:$4 sm:$0xff]  }
 0x735   :  { %11521 = vmatprep.subr.bf16.mxu0 %v18379_v42  ;;  %12601 = vmatpush1.bf16.msra.mxu1 %v18425_v2  ;;  %v18389_v42 = vld [vmem:[#allocation6 + $0x1620] ss:$24 sps:$4 sm:$0xff]   ;;  %v18394_v2 = vld [vmem:[#allocation6 + $0x1654] ss:$24 sps:$4 sm:$0xff]  }
 0x736   :  { %12602 = vmatprep.subr.bf16.mxu1 %v18433_v60  ;;  %v18386_v60 = vld [vmem:[#allocation6 + $0x15f0] ss:$24 sps:$4 sm:$0xff]  }
 0x737   :  { %9390 = vmatmul.mubr.bf16.gmra.mrb[52].mxu0 %v22251_v36  ;;  %v18391_v36 = vld [vmem:[#allocation6 + $0x1624] ss:$24 sps:$4 sm:$0xff]  }
 0x738   :  { %11522 = vmatpush1.bf16.msra.mxu0 %v18377_v24  ;;  %9399 = vmatprep.mubr.bf16.mxu0 %v22157_v12  ;;  %v18392_v24 = vld [vmem:[#allocation6 + $0x1650] ss:$24 sps:$4 sm:$0xff]  }
 0x739   :  { %11523 = vmatprep.subr.bf16.mxu0 %v18382_v50  ;;  %12603 = vmatpush1.bf16.msra.mxu1 %v18431_v17  ;;  %v18400_v50 = vld [vmem:[#allocation6 + $0x1684] ss:$24 sps:$4 sm:$0xff]   ;;  %v18398_v17 = vld [vmem:[#allocation6 + $0x1680] ss:$24 sps:$4 sm:$0xff]  }
 0x73a   :  { %15432 = vmatprep.subr.bf16.mxu1 %v18454_v10  ;;  %v18409_v10 = vld [vmem:[#allocation6 + $0x16b4] ss:$24 sps:$4 sm:$0xff]  }
 0x73b   :  { %12508 = vmatmul.mubr.bf16.gmra.mrb[32].mxu1 %v22196_v51 }
 0x73c   :  { %12517 = vmatprep.mubr.bf16.mxu1 %v22245_v23  ;;  %11524 = vmatpush1.bf16.msra.mxu0 %v18380_v1  ;;  %v18407_v1 = vld [vmem:[#allocation6 + $0x16b0] ss:$24 sps:$4 sm:$0xff]  }
 0x73d   :  { %11525 = vmatprep.subr.bf16.mxu0 %v18385_v62  ;;  %v18415_v62 = vld [vmem:[#allocation6 + $0x16e4] ss:$24 sps:$4 sm:$0xff]  }
 0x73f   :  { %9400 = vmatmul.mubr.bf16.gmra.mrb[56].mxu0 %v22209_v52 }
 0x740   :  { %9409 = vmatprep.mubr.bf16.mxu0 %v22157_v12  ;;  %11526 = vmatpush1.bf16.msra.mxu0 %v18383_v33  ;;  %v18413_v33 = vld [vmem:[#allocation6 + $0x16e0] ss:$24 sps:$4 sm:$0xff]  }
 0x741   :  { %11527 = vmatprep.subr.bf16.mxu0 %v18388_v15  ;;  %v18424_v15 = vld [vmem:[#allocation6 + $0x1714] ss:$24 sps:$4 sm:$0xff]  }
 0x743   :  { %12518 = vmatmul.mubr.bf16.gmra.mrb[36].mxu1 %v22198_v6 }
 0x744   :  { %12527 = vmatprep.mubr.bf16.mxu1 %v22247_v63  ;;  %11528 = vmatpush1.bf16.msra.mxu0 %v18386_v60  ;;  %v18422_v60 = vld [vmem:[#allocation6 + $0x1710] ss:$24 sps:$4 sm:$0xff]  }
 0x745   :  { %11529 = vmatprep.subr.bf16.mxu0 %v18391_v36  ;;  %v18430_v36 = vld [vmem:[#allocation6 + $0x1744] ss:$24 sps:$4 sm:$0xff]  }
 0x747   :  { %9410 = vmatmul.mubr.bf16.gmra.mrb[60].mxu0 %v22210_v0 }
 0x748   :  { %9419 = vmatprep.mubr.bf16.mxu0 %v22157_v12  ;;  %11530 = vmatpush1.bf16.msra.mxu0 %v18389_v42  ;;  %v18428_v42 = vld [vmem:[#allocation6 + $0x1740] ss:$24 sps:$4 sm:$0xff]  }
 0x749   :  { %11531 = vmatprep.subr.bf16.mxu0 %v18394_v2  ;;  %v18436_v2 = vld [vmem:[#allocation6 + $0x1774] ss:$24 sps:$4 sm:$0xff]  }
 0x74b   :  { %12528 = vmatmul.mubr.bf16.gmra.mrb[40].mxu1 %v22200_v5 }
 0x74c   :  { %12537 = vmatprep.mubr.bf16.mxu1 %v22201_v41  ;;  %11532 = vmatpush1.bf16.msra.mxu0 %v18392_v24  ;;  %v18434_v24 = vld [vmem:[#allocation6 + $0x1770] ss:$24 sps:$4 sm:$0xff]  }
 0x74d   :  { %11533 = vmatprep.subr.bf16.mxu0 %v18400_v50  ;;  %v18439_v50 = vld [vmem:[#allocation6 + $0x17a4] ss:$24 sps:$4 sm:$0xff]  }
 0x74f   :  { %9420 = vmatmul.mubr.bf16.gmra.mrb[64].mxu0 %v22211_v34 }
 0x750   :  { %9429 = vmatprep.mubr.bf16.mxu0 %v22157_v12  ;;  %11534 = vmatpush1.bf16.msra.mxu0 %v18398_v17  ;;  %v22252_v17 = vld [vmem:[#allocation93_spill] sm:$0xff] }
 0x751   :  { %11535 = vmatprep.subr.bf16.mxu0 %v18409_v10  ;;  %v18437_v10 = vld [vmem:[#allocation6 + $0x17a0] ss:$24 sps:$4 sm:$0xff]  }
 0x753   :  { %12538 = vmatmul.mubr.bf16.gmra.mrb[44].mxu1 %v22202_v27 }
 0x754   :  { %12547 = vmatprep.mubr.bf16.mxu1 %v22203_v8  ;;  %11536 = vmatpush1.bf16.msra.mxu0 %v18407_v1  ;;  %v18442_v1 = vld [vmem:[#allocation6 + $0x17d4] ss:$24 sps:$4 sm:$0xff]  }
 0x755   :  { %11537 = vmatprep.subr.bf16.mxu0 %v18415_v62  ;;  %v18440_v62 = vld [vmem:[#allocation6 + $0x17d0] ss:$24 sps:$4 sm:$0xff]  }
 0x757   :  { %9430 = vmatmul.mubr.bf16.gmra.mrb[68].mxu0 %v22212_v45 }
 0x758   :  { %9439 = vmatprep.mubr.bf16.mxu0 %v22157_v12  ;;  %11538 = vmatpush1.bf16.msra.mxu0 %v18413_v33  ;;  %v18445_v33 = vld [vmem:[#allocation6 + $0x1804] ss:$24 sps:$4 sm:$0xff]  }
 0x759   :  { %11539 = vmatprep.subr.bf16.mxu0 %v18424_v15  ;;  %v22253_v15 = vld [vmem:[#allocation92_spill] sm:$0xff] }
 0x75b   :  { %12548 = vmatmul.mubr.bf16.gmra.mrb[48].mxu1 %v22204_v55 }
 0x75c   :  { %12557 = vmatprep.mubr.bf16.mxu1 %v22205_v4  ;;  %11540 = vmatpush1.bf16.msra.mxu0 %v18422_v60  ;;  %v22254_v60 = vld [vmem:[#allocation95_spill] sm:$0xff] }
 0x75d   :  { %11541 = vmatprep.subr.bf16.mxu0 %v18430_v36  ;;  %v22255_v36 = vld [vmem:[#allocation94_spill] sm:$0xff] }
 0x75f   :  { %9440 = vmatmul.mubr.bf16.gmra.mrb[72].mxu0 %v22213_v38 }
 0x760   :  { %9449 = vmatprep.mubr.bf16.mxu0 %v22157_v12  ;;  %11542 = vmatpush1.bf16.msra.mxu0 %v18428_v42  ;;  %v18452_v42 = vld [vmem:[#allocation6 + $0x1b10] ss:$24 sps:$4 sm:$0xff]  }
 0x761   :  { %11543 = vmatprep.subr.bf16.mxu0 %v18436_v2  ;;  %v18457_v2 = vld [vmem:[#allocation6 + $0x1b44] ss:$24 sps:$4 sm:$0xff]  }
 0x763   :  { %12558 = vmatmul.mubr.bf16.gmra.mrb[52].mxu1 %v22206_v56 }
 0x764   :  { %12567 = vmatprep.mubr.bf16.mxu1 %v22252_v17  ;;  %11544 = vmatpush1.bf16.msra.mxu0 %v18434_v24  ;;  %v18455_v24 = vld [vmem:[#allocation6 + $0x1b40] ss:$24 sps:$4 sm:$0xff]  }
 0x765   :  { %11545 = vmatprep.subr.bf16.mxu0 %v18439_v50  ;;  %v18463_v50 = vld [vmem:[#allocation6 + $0x1b74] ss:$24 sps:$4 sm:$0xff]  }
 0x767   :  { %9450 = vmatmul.mubr.bf16.gmra.mrb[76].mxu0 %v22165_v44 }
 0x768   :  { %9459 = vmatprep.mubr.bf16.mxu0 %v22157_v12  ;;  %11546 = vmatpush1.bf16.msra.mxu0 %v18437_v10  ;;  %v18461_v10 = vld [vmem:[#allocation6 + $0x1b70] ss:$24 sps:$4 sm:$0xff]  }
 0x769   :  { %11547 = vmatprep.subr.bf16.mxu0 %v18442_v1  ;;  %v18469_v1 = vld [vmem:[#allocation6 + $0x1ba4] ss:$24 sps:$4 sm:$0xff]  }
 0x76b   :  { %12568 = vmatmul.mubr.bf16.gmra.mrb[56].mxu1 %v22253_v15 }
 0x76c   :  { %12577 = vmatprep.mubr.bf16.mxu1 %v22254_v60  ;;  %11548 = vmatpush1.bf16.msra.mxu0 %v18440_v62  ;;  %v18467_v62 = vld [vmem:[#allocation6 + $0x1ba0] ss:$24 sps:$4 sm:$0xff]  }
 0x76d   :  { %11670 = vmatprep.subr.bf16.mxu0 %v18445_v33  ;;  %v18472_v33 = vld [vmem:[#allocation6 + $0x1bd4] ss:$24 sps:$4 sm:$0xff]  }
 0x76f   :  { %9460 = vmatmul.mubr.bf16.gmra.mrb[80].mxu0 %v22166_v48 }
 0x770   :  { %9469 = vmatprep.mubr.bf16.mxu0 %v22157_v12 }
 0x773   :  { %12578 = vmatmul.mubr.bf16.gmra.mrb[60].mxu1 %v22255_v36 }
 0x774   :  { %12620 = vmatprep.mubr.bf16.mxu1 %v22157_v12 }
 0x777   :  { %9470 = vmatmul.mubr.bf16.gmra.mrb[84].mxu0 %v22167_v32 }
 0x778   :  { %9479 = vmatprep.mubr.bf16.mxu0 %v22157_v12 }
 0x77b   :  { %12621 = vmatmul.mubr.bf16.vlgmr.msra.gmra.mrb[16].mxu1 %v22209_v52 }
 0x77c   :  { %12630 = vmatprep.mubr.bf16.mxu1 %v22157_v12  ;;  %15448 = vmatpush1.bf16.msra.mxu1 %v18452_v42  ;;  %v18470_v42 = vld [vmem:[#allocation6 + $0x1bd0] ss:$24 sps:$4 sm:$0xff]  }
 0x77d   :  { %15433 = vmatprep.subr.bf16.mxu1 %v18457_v2  ;;  %v18478_v2 = vld [vmem:[#allocation6 + $0x1c04] ss:$24 sps:$4 sm:$0xff]  }
 0x77f   :  { %9480 = vmatmul.mubr.bf16.gmra.mrb[88].mxu0 %v22168_v35 }
 0x780   :  { %9489 = vmatprep.mubr.bf16.mxu0 %v22157_v12  ;;  %15449 = vmatpush1.bf16.msra.mxu1 %v18455_v24  ;;  %v18443_v24 = vld [vmem:[#allocation6 + $0x1800] ss:$24 sps:$4 sm:$0xff]  }
 0x781   :  { %15434 = vmatprep.subr.bf16.mxu1 %v18463_v50  ;;  %v18448_v50 = vld [vmem:[#allocation6 + $0x1834] ss:$24 sps:$4 sm:$0xff]  }
 0x783   :  { %12631 = vmatmul.mubr.bf16.gmra.mrb[20].mxu1 %v22210_v0  ;;  %v18476_v0 = vld [vmem:[#allocation6 + $0x1c00] ss:$24 sps:$4 sm:$0xff]  }
 0x784   :  { %12640 = vmatprep.mubr.bf16.mxu1 %v22157_v12  ;;  %15450 = vmatpush1.bf16.msra.mxu1 %v18461_v10  ;;  %v18484_v10 = vld [vmem:[#allocation6 + $0x1c34] ss:$24 sps:$4 sm:$0xff]  }
 0x785   :  { %15435 = vmatprep.subr.bf16.mxu1 %v18469_v1  ;;  %v18446_v1 = vld [vmem:[#allocation6 + $0x1830] ss:$24 sps:$4 sm:$0xff]  }
 0x787   :  { %9490 = vmatmul.mubr.bf16.gmra.mrb[92].mxu0 %v22169_v3 }
 0x788   :  { %11549 = vmatprep.mubr.bf16.mxu0 %v22175_v61  ;;  %15451 = vmatpush1.bf16.msra.mxu1 %v18467_v62  ;;  %v18451_v62 = vld [vmem:[#allocation6 + $0x1864] ss:$24 sps:$4 sm:$0xff]  }
 0x789   :  { %15436 = vmatprep.subr.bf16.mxu1 %v18472_v33  ;;  %v18482_v33 = vld [vmem:[#allocation6 + $0x1c30] ss:$24 sps:$4 sm:$0xff]   ;;  %v18487_v61 = vld [vmem:[#allocation6 + $0x1c64] ss:$24 sps:$4 sm:$0xff]  }
 0x78b   :  { %12641 = vmatmul.mubr.bf16.gmra.mrb[24].mxu1 %v22211_v34 }
 0x78c   :  { %12650 = vmatprep.mubr.bf16.mxu1 %v22157_v12  ;;  %15452 = vmatpush1.bf16.msra.mxu1 %v18470_v42  ;;  %v18449_v42 = vld [vmem:[#allocation6 + $0x1860] ss:$24 sps:$4 sm:$0xff]  }
 0x78d   :  { %15437 = vmatprep.subr.bf16.mxu1 %v18478_v2  ;;  %v18460_v2 = vld [vmem:[#allocation6 + $0x1894] ss:$24 sps:$4 sm:$0xff]  }
 0x78f   :  { %11550 = vmatmul.mubr.bf16.vlgmr.msra.gmra.mrb[0].mxu0 %v22176_v54  ;;  %v18485_v54 = vld [vmem:[#allocation6 + $0x1c60] ss:$24 sps:$4 sm:$0xff]  }
 0x790   :  { %11559 = vmatprep.mubr.bf16.mxu0 %v22214_v53  ;;  %11671 = vmatpush1.bf16.msra.mxu0 %v18443_v24  ;;  %v18493_v53 = vld [vmem:[#allocation6 + $0x1c94] ss:$24 sps:$4 sm:$0xff]   ;;  %v18466_v24 = vld [vmem:[#allocation6 + $0x18c4] ss:$24 sps:$4 sm:$0xff]  }
 0x791   :  { %11672 = vmatprep.subr.bf16.mxu0 %v18448_v50  ;;  %15453 = vmatpush1.bf16.msra.mxu1 %v18476_v0  ;;  %v18458_v0 = vld [vmem:[#allocation6 + $0x1890] ss:$24 sps:$4 sm:$0xff]  }
 0x792   :  { %15438 = vmatprep.subr.bf16.mxu1 %v18484_v10  ;;  %v18491_v50 = vld [vmem:[#allocation6 + $0x1c90] ss:$24 sps:$4 sm:$0xff]   ;;  %v18499_v10 = vld [vmem:[#allocation6 + $0x1cc4] ss:$24 sps:$4 sm:$0xff]  }
 0x793   :  { %12651 = vmatmul.mubr.bf16.gmra.mrb[28].mxu1 %v22212_v45 }
 0x794   :  { %11673 = vmatpush1.bf16.msra.mxu0 %v18446_v1  ;;  %12660 = vmatprep.mubr.bf16.mxu1 %v22157_v12  ;;  %v18464_v1 = vld [vmem:[#allocation6 + $0x18c0] ss:$24 sps:$4 sm:$0xff]  }
 0x795   :  { %11674 = vmatprep.subr.bf16.mxu0 %v18451_v62  ;;  %15454 = vmatpush1.bf16.msra.mxu1 %v18482_v33  ;;  %v18497_v62 = vld [vmem:[#allocation6 + $0x1cc0] ss:$24 sps:$4 sm:$0xff]   ;;  %v18502_v33 = vld [vmem:[#allocation6 + $0x1cf4] ss:$24 sps:$4 sm:$0xff]  }
 0x796   :  { %15439 = vmatprep.subr.bf16.mxu1 %v18487_v61  ;;  %v18475_v61 = vld [vmem:[#allocation6 + $0x18f4] ss:$24 sps:$4 sm:$0xff]  }
 0x797   :  { %11560 = vmatmul.mubr.bf16.gmra.mrb[4].mxu0 %v22178_v9 }
 0x798   :  { %11569 = vmatprep.mubr.bf16.mxu0 %v22179_v11  ;;  %11675 = vmatpush1.bf16.msra.mxu0 %v18449_v42  ;;  %v22256_v42 = vld [vmem:[#allocation21_spill] sm:$0xff]  ;;  %v18517_v11 = vld [vmem:[#allocation6 + $0x1d84] ss:$24 sps:$4 sm:$0xff]  }
 0x799   :  { %11676 = vmatprep.subr.bf16.mxu0 %v18460_v2  ;;  %15455 = vmatpush1.bf16.msra.mxu1 %v18485_v54  ;;  %v18473_v54 = vld [vmem:[#allocation6 + $0x18f0] ss:$24 sps:$4 sm:$0xff]  }
 0x79a   :  { %15440 = vmatprep.subr.bf16.mxu1 %v18493_v53  ;;  %v18481_v53 = vld [vmem:[#allocation6 + $0x1924] ss:$24 sps:$4 sm:$0xff]   ;;  %v18500_v2 = vld [vmem:[#allocation6 + $0x1cf0] ss:$24 sps:$4 sm:$0xff]  }
 0x79b   :  { %12661 = vmatmul.mubr.bf16.gmra.mrb[32].mxu1 %v22213_v38 }
 0x79c   :  { %11677 = vmatpush1.bf16.msra.mxu0 %v18458_v0  ;;  %12670 = vmatprep.mubr.bf16.mxu1 %v22157_v12  ;;  %v18508_v0 = vld [vmem:[#allocation6 + $0x1d24] ss:$24 sps:$4 sm:$0xff]  }
 0x79d   :  { %11678 = vmatprep.subr.bf16.mxu0 %v18466_v24  ;;  %15456 = vmatpush1.bf16.msra.mxu1 %v18491_v50  ;;  %v18479_v24 = vld [vmem:[#allocation6 + $0x1920] ss:$24 sps:$4 sm:$0xff]   ;;  %v18490_v50 = vld [vmem:[#allocation6 + $0x1954] ss:$24 sps:$4 sm:$0xff]  }
 0x79e   :  { %15441 = vmatprep.subr.bf16.mxu1 %v18499_v10  ;;  %v18506_v10 = vld [vmem:[#allocation6 + $0x1d20] ss:$24 sps:$4 sm:$0xff]  }
 0x79f   :  { %11570 = vmatmul.mubr.bf16.gmra.mrb[8].mxu0 %v22256_v42  ;;  %v18512_v42 = vld [vmem:[#allocation6 + $0x1d50] ss:$24 sps:$4 sm:$0xff]  }
 0x7a0   :  { %11579 = vmatprep.mubr.bf16.mxu0 %v22079_v18  ;;  %11679 = vmatpush1.bf16.msra.mxu0 %v18464_v1  ;;  %v18514_v18 = vld [vmem:[#allocation6 + $0x1d54] ss:$24 sps:$4 sm:$0xff]   ;;  %v22257_v1 = vld [vmem:[#allocation23_spill] sm:$0xff] }
 0x7a1   :  { %11680 = vmatprep.subr.bf16.mxu0 %v18475_v61  ;;  %15457 = vmatpush1.bf16.msra.mxu1 %v18497_v62  ;;  %v22258_v61 = vld [vmem:[#allocation26_spill] sm:$0xff]  ;;  %v18488_v62 = vld [vmem:[#allocation6 + $0x1950] ss:$24 sps:$4 sm:$0xff]  }
 0x7a2   :  { %15442 = vmatprep.subr.bf16.mxu1 %v18502_v33  ;;  %v18496_v33 = vld [vmem:[#allocation6 + $0x1984] ss:$24 sps:$4 sm:$0xff]  }
 0x7a3   :  { %12671 = vmatmul.mubr.bf16.gmra.mrb[36].mxu1 %v22165_v44 }
 0x7a4   :  { %12680 = vmatprep.mubr.bf16.mxu1 %v22157_v12  ;;  %11681 = vmatpush1.bf16.msra.mxu0 %v18473_v54  ;;  %v18494_v54 = vld [vmem:[#allocation6 + $0x1980] ss:$24 sps:$4 sm:$0xff]  }
 0x7a5   :  { %11682 = vmatprep.subr.bf16.mxu0 %v18481_v53  ;;  %15458 = vmatpush1.bf16.msra.mxu1 %v18500_v2  ;;  %v18505_v53 = vld [vmem:[#allocation6 + $0x19b4] ss:$24 sps:$4 sm:$0xff]   ;;  %v18515_v2 = vld [vmem:[#allocation6 + $0x1d80] ss:$24 sps:$4 sm:$0xff]  }
 0x7a6   :  { %15443 = vmatprep.subr.bf16.mxu1 %v18508_v0  ;;  %v18523_v0 = vld [vmem:[#allocation6 + $0x1db4] ss:$24 sps:$4 sm:$0xff]  }
 0x7a7   :  { %11580 = vmatmul.mubr.bf16.gmra.mrb[12].mxu0 %v22257_v1 }
 0x7a8   :  { %11589 = vmatprep.mubr.bf16.mxu0 %v22258_v61  ;;  %11683 = vmatpush1.bf16.msra.mxu0 %v18479_v24  ;;  %v22259_v24 = vld [vmem:[#allocation28_spill] sm:$0xff] }
 0x7a9   :  { %11684 = vmatprep.subr.bf16.mxu0 %v18490_v50  ;;  %15459 = vmatpush1.bf16.msra.mxu1 %v18506_v10  ;;  %v18503_v50 = vld [vmem:[#allocation6 + $0x19b0] ss:$24 sps:$4 sm:$0xff]   ;;  %v18529_v61 = vld [vmem:[#allocation6 + $0x1de4] ss:$24 sps:$4 sm:$0xff]  }
 0x7aa   :  { %15444 = vmatprep.subr.bf16.mxu1 %v18514_v18  ;;  %v18511_v18 = vld [vmem:[#allocation6 + $0x19e4] ss:$24 sps:$4 sm:$0xff]   ;;  %v18521_v10 = vld [vmem:[#allocation6 + $0x1db0] ss:$24 sps:$4 sm:$0xff]  }
 0x7ab   :  { %12681 = vmatmul.mubr.bf16.gmra.mrb[40].mxu1 %v22166_v48 }
 0x7ac   :  { %12690 = vmatprep.mubr.bf16.mxu1 %v22157_v12  ;;  %11685 = vmatpush1.bf16.msra.mxu0 %v18488_v62  ;;  %v18527_v62 = vld [vmem:[#allocation6 + $0x1de0] ss:$24 sps:$4 sm:$0xff]  }
 0x7ad   :  { %11686 = vmatprep.subr.bf16.mxu0 %v18496_v33  ;;  %15460 = vmatpush1.bf16.msra.mxu1 %v18512_v42  ;;  %v18509_v42 = vld [vmem:[#allocation6 + $0x19e0] ss:$24 sps:$4 sm:$0xff]  }
 0x7ae   :  { %15445 = vmatprep.subr.bf16.mxu1 %v18517_v11  ;;  %v18520_v11 = vld [vmem:[#allocation6 + $0x1a14] ss:$24 sps:$4 sm:$0xff]  }
 0x7af   :  { %11590 = vmatmul.mubr.bf16.gmra.mrb[16].mxu0 %v22082_v43  ;;  %v22260_v33 = vld [vmem:[#allocation30_spill] sm:$0xff] }
 0x7b0   :  { %11599 = vmatprep.mubr.bf16.mxu0 %v22259_v24  ;;  %11687 = vmatpush1.bf16.msra.mxu0 %v18494_v54  ;;  %v18518_v54 = vld [vmem:[#allocation6 + $0x1a10] ss:$24 sps:$4 sm:$0xff]  }
 0x7b1   :  { %11688 = vmatprep.subr.bf16.mxu0 %v18505_v53  ;;  %15461 = vmatpush1.bf16.msra.mxu1 %v18515_v2  ;;  %v18526_v53 = vld [vmem:[#allocation6 + $0x1a44] ss:$24 sps:$4 sm:$0xff]   ;;  %v18524_v2 = vld [vmem:[#allocation6 + $0x1a40] ss:$24 sps:$4 sm:$0xff]  }
 0x7b2   :  { %15446 = vmatprep.subr.bf16.mxu1 %v18523_v0  ;;  %v18532_v0 = vld [vmem:[#allocation6 + $0x1a74] ss:$24 sps:$4 sm:$0xff]  }
 0x7b3   :  { %12691 = vmatmul.mubr.bf16.gmra.mrb[44].mxu1 %v22167_v32 }
 0x7b4   :  { %12700 = vmatprep.mubr.bf16.mxu1 %v22157_v12  ;;  %11689 = vmatpush1.bf16.msra.mxu0 %v18503_v50  ;;  %v22261_v50 = vld [vmem:[#allocation29_spill] sm:$0xff] }
 0x7b5   :  { %11690 = vmatprep.subr.bf16.mxu0 %v18511_v18  ;;  %15462 = vmatpush1.bf16.msra.mxu1 %v18521_v10  ;;  %v18530_v18 = vld [vmem:[#allocation6 + $0x1a70] ss:$24 sps:$4 sm:$0xff]   ;;  %v18535_v10 = vld [vmem:[#allocation6 + $0x1aa4] ss:$24 sps:$4 sm:$0xff]  }
 0x7b6   :  { %15447 = vmatprep.subr.bf16.mxu1 %v18529_v61  ;;  %v22262_v61 = vld [vmem:[#allocation32_spill] sm:$0xff] }
 0x7b7   :  { %11600 = vmatmul.mubr.bf16.gmra.mrb[20].mxu0 %v22084_v28 }
 0x7b8   :  { %11609 = vmatprep.mubr.bf16.mxu0 %v22260_v33  ;;  %11691 = vmatpush1.bf16.msra.mxu0 %v18509_v42  ;;  %v18533_v42 = vld [vmem:[#allocation6 + $0x1aa0] ss:$24 sps:$4 sm:$0xff]  }
 0x7b9   :  { %11692 = vmatprep.subr.bf16.mxu0 %v18520_v11  ;;  %15463 = vmatpush1.bf16.msra.mxu1 %v18527_v62  ;;  %v18538_v11 = vld [vmem:[#allocation6 + $0x1ad4] ss:$24 sps:$4 sm:$0xff]   ;;  %v18536_v62 = vld [vmem:[#allocation6 + $0x1ad0] ss:$24 sps:$4 sm:$0xff]  }
 0x7bb   :  { %12701 = vmatmul.mubr.bf16.gmra.mrb[48].mxu1 %v22168_v35 }
 0x7bc   :  { %12710 = vmatprep.mubr.bf16.mxu1 %v22157_v12  ;;  %11693 = vmatpush1.bf16.msra.mxu0 %v18518_v54  ;;  %v18541_v54 = vld [vmem:[#allocation6 + $0x1b04] ss:$24 sps:$4 sm:$0xff]  }
 0x7bd   :  { %11694 = vmatprep.subr.bf16.mxu0 %v18526_v53  ;;  %v22263_v53 = vld [vmem:[#allocation108_spill] sm:$0xff] }
 0x7bf   :  { %11610 = vmatmul.mubr.bf16.gmra.mrb[24].mxu0 %v22261_v50 }
 0x7c0   :  { %11619 = vmatprep.mubr.bf16.mxu0 %v22262_v61  ;;  %11695 = vmatpush1.bf16.msra.mxu0 %v18524_v2  ;;  %v22264_v2 = vld [vmem:[#allocation36_spill] sm:$0xff]  ;;  %v18599_v61 = vld [vmem:[#allocation6 + $0x1ec0] ss:$24 sps:$4 sm:$0xff]  }
 0x7c1   :  { %11696 = vmatprep.subr.bf16.mxu0 %v18532_v0  ;;  %v22265_v0 = vld [vmem:[#allocation109_spill] sm:$0xff] }
 0x7c3   :  { %12711 = vmatmul.mubr.bf16.gmra.mrb[52].mxu1 %v22169_v3 }
 0x7c4   :  { %12720 = vmatprep.mubr.bf16.mxu1 %v22157_v12  ;;  %11697 = vmatpush1.bf16.msra.mxu0 %v18530_v18  ;;  %v22266_v18 = vld [vmem:[#allocation35_spill] sm:$0xff] }
 0x7c5   :  { %11698 = vmatprep.subr.bf16.mxu0 %v18535_v10  ;;  %v22267_v10 = vld [vmem:[#allocation38_spill] sm:$0xff] }
 0x7c7   :  { %11620 = vmatmul.mubr.bf16.gmra.mrb[28].mxu0 %v22087_v7  ;;  %v22275_v7 = vld [vmem:[#allocation50_spill] sm:$0xff] }
 0x7c8   :  { %11629 = vmatprep.mubr.bf16.mxu0 %v22088_v20  ;;  %11699 = vmatpush1.bf16.msra.mxu0 %v18533_v42  ;;  %v22268_v42 = vld [vmem:[#allocation37_spill] sm:$0xff]  ;;  %v22274_v20 = vld [vmem:[#allocation47_spill] sm:$0xff] }
 0x7c9   :  { %11700 = vmatprep.subr.bf16.mxu0 %v18538_v11  ;;  %v22269_v11 = vld [vmem:[#allocation40_spill] sm:$0xff] }
 0x7cb   :  { %12721 = vmatmul.mubr.bf16.gmra.mrb[56].mxu1 %v22263_v53 }
 0x7cc   :  { %12730 = vmatprep.mubr.bf16.mxu1 %v22157_v12  ;;  %11701 = vmatpush1.bf16.msra.mxu0 %v18536_v62  ;;  %v22270_v62 = vld [vmem:[#allocation39_spill] sm:$0xff] }
 0x7cd   :  { %11823 = vmatprep.subr.bf16.mxu0 %v18541_v54  ;;  %v22271_v54 = vld [vmem:[#allocation46_spill] sm:$0xff] }
 0x7cf   :  { %11630 = vmatmul.mubr.bf16.gmra.mrb[32].mxu0 %v22090_v40  ;;  %v22273_v40 = vld [vmem:[#allocation48_spill] sm:$0xff] }
 0x7d0   :  { %11639 = vmatprep.mubr.bf16.mxu0 %v22264_v2  ;;  %v22272_v2 = vld [vmem:[#allocation45_spill] sm:$0xff] }
 0x7d3   :  { %12731 = vmatmul.mubr.bf16.gmra.mrb[60].mxu1 %v22265_v0 }
 0x7d4   :  { %13129 = vmatprep.mubr.bf16.mxu1 %v22245_v23 }
 0x7d7   :  { %11640 = vmatmul.mubr.bf16.gmra.mrb[36].mxu0 %v22266_v18  ;;  %v18544_v18 = vld [vmem:[#allocation6 + $0x1b34] ss:$24 sps:$4 sm:$0xff]  }
 0x7d8   :  { %11649 = vmatprep.mubr.bf16.mxu0 %v22267_v10  ;;  %v18539_v10 = vld [vmem:[#allocation6 + $0x1b00] ss:$24 sps:$4 sm:$0xff]  }
 0x7db   :  { %13130 = vmatmul.mubr.bf16.vlgmr.msra.gmra.mrb[64].mxu1 %v22198_v6 }
 0x7dc   :  { %13139 = vmatprep.mubr.bf16.mxu1 %v22247_v63 }
 0x7df   :  { %11650 = vmatmul.mubr.bf16.gmra.mrb[40].mxu0 %v22268_v42  ;;  %v18547_v42 = vld [vmem:[#allocation6 + $0x1b64] ss:$24 sps:$4 sm:$0xff]  }
 0x7e0   :  { %11659 = vmatprep.mubr.bf16.mxu0 %v22269_v11  ;;  %v18542_v11 = vld [vmem:[#allocation6 + $0x1b30] ss:$24 sps:$4 sm:$0xff]  }
 0x7e3   :  { %13140 = vmatmul.mubr.bf16.gmra.mrb[68].mxu1 %v22200_v5 }
 0x7e4   :  { %13149 = vmatprep.mubr.bf16.mxu1 %v22201_v41 }
 0x7e7   :  { %11660 = vmatmul.mubr.bf16.gmra.mrb[44].mxu0 %v22270_v62  ;;  %v18550_v62 = vld [vmem:[#allocation6 + $0x1b94] ss:$24 sps:$4 sm:$0xff]  }
 0x7e8   :  { %11702 = vmatprep.mubr.bf16.mxu0 %v22271_v54  ;;  %v18545_v54 = vld [vmem:[#allocation6 + $0x1b60] ss:$24 sps:$4 sm:$0xff]  }
 0x7eb   :  { %13150 = vmatmul.mubr.bf16.gmra.mrb[72].mxu1 %v22202_v27 }
 0x7ec   :  { %13159 = vmatprep.mubr.bf16.mxu1 %v22203_v8 }
 0x7ef   :  { %11703 = vmatmul.mubr.bf16.vlgmr.msra.gmra.mrb[0].mxu0 %v22272_v2  ;;  %v18548_v2 = vld [vmem:[#allocation6 + $0x1b90] ss:$24 sps:$4 sm:$0xff]  }
 0x7f0   :  { %11712 = vmatprep.mubr.bf16.mxu0 %v22273_v40  ;;  %11824 = vmatpush1.bf16.msra.mxu0 %v18539_v10  ;;  %v18553_v40 = vld [vmem:[#allocation6 + $0x1bc4] ss:$24 sps:$4 sm:$0xff]   ;;  %v18556_v10 = vld [vmem:[#allocation6 + $0x1bf4] ss:$24 sps:$4 sm:$0xff]  }
 0x7f1   :  { %11825 = vmatprep.subr.bf16.mxu0 %v18544_v18  ;;  %v18551_v18 = vld [vmem:[#allocation6 + $0x1bc0] ss:$24 sps:$4 sm:$0xff]  }
 0x7f3   :  { %13160 = vmatmul.mubr.bf16.gmra.mrb[76].mxu1 %v22204_v55 }
 0x7f4   :  { %13169 = vmatprep.mubr.bf16.mxu1 %v22205_v4  ;;  %11826 = vmatpush1.bf16.msra.mxu0 %v18542_v11  ;;  %v22276_v11 = vld [vmem:[#allocation49_spill] sm:$0xff] }
 0x7f5   :  { %11827 = vmatprep.subr.bf16.mxu0 %v18547_v42  ;;  %v18554_v42 = vld [vmem:[#allocation6 + $0x1bf0] ss:$24 sps:$4 sm:$0xff]  }
 0x7f7   :  { %11713 = vmatmul.mubr.bf16.gmra.mrb[4].mxu0 %v22274_v20 }
 0x7f8   :  { %11722 = vmatprep.mubr.bf16.mxu0 %v22275_v7  ;;  %11828 = vmatpush1.bf16.msra.mxu0 %v18545_v54  ;;  %v18559_v7 = vld [vmem:[#allocation6 + $0x1c24] ss:$24 sps:$4 sm:$0xff]   ;;  %v18562_v54 = vld [vmem:[#allocation6 + $0x1c54] ss:$24 sps:$4 sm:$0xff]  }
 0x7f9   :  { %11829 = vmatprep.subr.bf16.mxu0 %v18550_v62  ;;  %v18557_v62 = vld [vmem:[#allocation6 + $0x1c20] ss:$24 sps:$4 sm:$0xff]  }
 0x7fb   :  { %13170 = vmatmul.mubr.bf16.gmra.mrb[80].mxu1 %v22206_v56 }
 0x7fc   :  { %13179 = vmatprep.mubr.bf16.mxu1 %v22252_v17  ;;  %11830 = vmatpush1.bf16.msra.mxu0 %v18548_v2  ;;  %v22277_v2 = vld [vmem:[#allocation51_spill] sm:$0xff] }
 0x7fd   :  { %11831 = vmatprep.subr.bf16.mxu0 %v18553_v40  ;;  %v22278_v40 = vld [vmem:[#allocation54_spill] sm:$0xff] }
 0x7ff   :  { %11723 = vmatmul.mubr.bf16.gmra.mrb[8].mxu0 %v22276_v11  ;;  %v18560_v11 = vld [vmem:[#allocation6 + $0x1c50] ss:$24 sps:$4 sm:$0xff]  }
 0x800   :  { %11732 = vmatprep.mubr.bf16.mxu0 %v22225_v13  ;;  %11832 = vmatpush1.bf16.msra.mxu0 %v18551_v18  ;;  %v18565_v13 = vld [vmem:[#allocation6 + $0x1c84] ss:$24 sps:$4 sm:$0xff]   ;;  %v18563_v18 = vld [vmem:[#allocation6 + $0x1c80] ss:$24 sps:$4 sm:$0xff]  }
 0x801   :  { %11833 = vmatprep.subr.bf16.mxu0 %v18556_v10  ;;  %v18568_v10 = vld [vmem:[#allocation6 + $0x1cb4] ss:$24 sps:$4 sm:$0xff]  }
 0x803   :  { %13180 = vmatmul.mubr.bf16.gmra.mrb[84].mxu1 %v22253_v15 }
 0x804   :  { %13189 = vmatprep.mubr.bf16.mxu1 %v22254_v60  ;;  %11834 = vmatpush1.bf16.msra.mxu0 %v18554_v42  ;;  %v22279_v42 = vld [vmem:[#allocation56_spill] sm:$0xff] }
 0x805   :  { %11835 = vmatprep.subr.bf16.mxu0 %v18559_v7  ;;  %v18566_v7 = vld [vmem:[#allocation6 + $0x1cb0] ss:$24 sps:$4 sm:$0xff]  }
 0x807   :  { %11733 = vmatmul.mubr.bf16.gmra.mrb[12].mxu0 %v22277_v2  ;;  %v18571_v2 = vld [vmem:[#allocation6 + $0x1ce4] ss:$24 sps:$4 sm:$0xff]  }
 0x808   :  { %11742 = vmatprep.mubr.bf16.mxu0 %v22278_v40  ;;  %11836 = vmatpush1.bf16.msra.mxu0 %v18557_v62  ;;  %v18569_v40 = vld [vmem:[#allocation6 + $0x1ce0] ss:$24 sps:$4 sm:$0xff]   ;;  %v18574_v62 = vld [vmem:[#allocation6 + $0x1d14] ss:$24 sps:$4 sm:$0xff]  }
 0x809   :  { %11837 = vmatprep.subr.bf16.mxu0 %v18562_v54  ;;  %v18575_v54 = vld [vmem:[#allocation6 + $0x1d40] ss:$24 sps:$4 sm:$0xff]  }
 0x80b   :  { %13190 = vmatmul.mubr.bf16.gmra.mrb[88].mxu1 %v22255_v36 }
 0x80c   :  { %11838 = vmatpush1.bf16.msra.mxu0 %v18560_v11  ;;  %v18572_v11 = vld [vmem:[#allocation6 + $0x1d10] ss:$24 sps:$4 sm:$0xff]  }
 0x80d   :  { %11839 = vmatprep.subr.bf16.mxu0 %v18565_v13  ;;  %v18577_v13 = vld [vmem:[#allocation6 + $0x1d44] ss:$24 sps:$4 sm:$0xff]  }
 0x80f   :  { %11743 = vmatmul.mubr.bf16.gmra.mrb[16].mxu0 %v19596_v14 }
 0x810   :  { %11752 = vmatprep.mubr.bf16.mxu0 %v22279_v42  ;;  %11840 = vmatpush1.bf16.msra.mxu0 %v18563_v18  ;;  %v18580_v42 = vld [vmem:[#allocation6 + $0x1d74] ss:$24 sps:$4 sm:$0xff]   ;;  %v18578_v18 = vld [vmem:[#allocation6 + $0x1d70] ss:$24 sps:$4 sm:$0xff]  }
 0x811   :  { %11841 = vmatprep.subr.bf16.mxu0 %v18568_v10  ;;  %v18581_v10 = vld [vmem:[#allocation6 + $0x1da0] ss:$24 sps:$4 sm:$0xff]  }
 0x814   :  { %11842 = vmatpush1.bf16.msra.mxu0 %v18566_v7  ;;  %v18586_v7 = vld [vmem:[#allocation6 + $0x1dd4] ss:$24 sps:$4 sm:$0xff]  }
 0x815   :  { %11843 = vmatprep.subr.bf16.mxu0 %v18571_v2  ;;  %v18583_v2 = vld [vmem:[#allocation6 + $0x1da4] ss:$24 sps:$4 sm:$0xff]  }
 0x817   :  { %11753 = vmatmul.mubr.bf16.gmra.mrb[20].mxu0 %v22060_v46 }
 0x818   :  { %11762 = vmatprep.mubr.bf16.mxu0 %v22097_v19  ;;  %11844 = vmatpush1.bf16.msra.mxu0 %v18569_v40  ;;  %v18584_v40 = vld [vmem:[#allocation6 + $0x1dd0] ss:$24 sps:$4 sm:$0xff]   ;;  %v18601_v19 = vld [vmem:[#allocation6 + $0x1ec4] ss:$24 sps:$4 sm:$0xff]  }
 0x819   :  { %11845 = vmatprep.subr.bf16.mxu0 %v18574_v62  ;;  %v18589_v62 = vld [vmem:[#allocation6 + $0x1e04] ss:$24 sps:$4 sm:$0xff]  }
 0x81c   :  { %11846 = vmatpush1.bf16.msra.mxu0 %v18572_v11  ;;  %v18587_v11 = vld [vmem:[#allocation6 + $0x1e00] ss:$24 sps:$4 sm:$0xff]  }
 0x81d   :  { %11847 = vmatprep.subr.bf16.mxu0 %v18577_v13  ;;  %v18592_v13 = vld [vmem:[#allocation6 + $0x1e34] ss:$24 sps:$4 sm:$0xff]  }
 0x81f   :  { %11763 = vmatmul.mubr.bf16.gmra.mrb[24].mxu0 %v22062_v47 }
 0x820   :  { %11772 = vmatprep.mubr.bf16.mxu0 %v22231_v37  ;;  %11848 = vmatpush1.bf16.msra.mxu0 %v18575_v54 }
 0x821   :  { %11849 = vmatprep.subr.bf16.mxu0 %v18580_v42  ;;  %v13497_v42 = vld [vmem:[#allocation7] sm:$0x3f] }
 0x824   :  { %11850 = vmatpush1.bf16.msra.mxu0 %v18578_v18  ;;  %v22280_v18 = vld [vmem:[#allocation12_spill] sm:$0xff] }
 0x825   :  { %11851 = vmatprep.subr.bf16.mxu0 %v18583_v2  ;;  %v22281_v2 = vsub.s32 2, %v22280_v18 }
 0x827   :  { %11773 = vmatmul.mubr.bf16.gmra.mrb[28].mxu0 %v22233_v49  ;;  %v18596_v49 = vld [vmem:[#allocation6 + $0x1e90] ss:$24 sps:$4 sm:$0xff]  }
 0x828   :  { %11782 = vmatprep.mubr.bf16.mxu0 %v22234_v25  ;;  %11852 = vmatpush1.bf16.msra.mxu0 %v18581_v10  ;;  %v20713_v10 = vrot.slane %v13497_v42, %v22281_v2  ;;  %v18598_v25 = vld [vmem:[#allocation6 + $0x1e94] ss:$24 sps:$4 sm:$0xff]  }
 0x829   :  { %11853 = vmatprep.subr.bf16.mxu0 %v18586_v7  ;;  %v22282_v7 = vld [vmem:[#allocation73_spill] sm:$0xff] }
 0x82c   :  { %11854 = vmatpush1.bf16.msra.mxu0 %v18584_v40 }
 0x82d   :  { %11976 = vmatprep.subr.bf16.mxu0 %v18589_v62  ;;  %v22283_v62 = vsub.s32 3, %v22280_v18  ;;  %v13838_v18 = vld [vmem:[%s21691_s5 + $0xa8] sm:$0xff] }
 0x82f   :  { %11783 = vmatmul.mubr.bf16.gmra.mrb[32].mxu0 %v22235_v59  ;;  %v18593_v59 = vld [vmem:[#allocation6 + $0x1e60] ss:$24 sps:$4 sm:$0xff]  }
 0x830   :  { %11792 = vmatprep.mubr.bf16.mxu0 %v22236_v29 }
 0x837   :  { %11793 = vmatmul.mubr.bf16.gmra.mrb[36].mxu0 %v22237_v21  ;;  %v18595_v21 = vld [vmem:[#allocation6 + $0x1e64] ss:$24 sps:$4 sm:$0xff]  }
 0x838   :  { %11802 = vmatprep.mubr.bf16.mxu0 %v22246_v31 }
 0x83f   :  { %11803 = vmatmul.mubr.bf16.gmra.mrb[40].mxu0 %v22248_v39  ;;  %v20718_v39 = vrot.slane %v13497_v42, %v22283_v62 }
 0x840   :  { %11812 = vmatprep.mubr.bf16.mxu0 %v22249_v22  ;;  %v22284_v22 = vld [vmem:[#allocation76_spill] sm:$0xff] }
 0x847   :  { %11813 = vmatmul.mubr.bf16.gmra.mrb[44].mxu0 %v22250_v57 }
 0x848   :  { %11855 = vmatprep.mubr.bf16.mxu0 %v22242_v58  ;;  %v18590_v58 = vld [vmem:[#allocation6 + $0x1e30] ss:$24 sps:$4 sm:$0xff]  }
 0x84e   :  { %v12622_v54 = vpop.f32.mrb[16].mxu1 }
 0x84f   :  { %11856 = vmatmul.mubr.bf16.vlgmr.msra.gmra.mrb[0].mxu0 %v22282_v7  ;;  %v12624_v40 = vpop.f32.mrb[17].mxu1  ;;  %v13531_v29 = vadd.f32 %v20713_v10, %v12622_v54 }
 0x850   :  { %11865 = vmatprep.mubr.bf16.mxu0 %v22284_v22  ;;  %11977 = vmatpush1.bf16.msra.mxu0 %v18587_v11  ;;  %v12626_v57 = vpop.f32.mrb[18].mxu1  ;;  %v13532_v2 = vadd.f32 %v20718_v39, %v12624_v40  ;;  %v13819_v11 = vld [vmem:[%s21691_s5 + $0x10] sm:$0xff] }
 0x851   :  { %v12628_v31 = vpop.f32.mrb[19].mxu1  ;;  %11978 = vmatprep.subr.bf16.mxu0 %v18592_v13  ;;  %v13537_v7 = vadd.f32 %v20713_v10, %v12626_v57  ;;  %v13675_v22 = vmax.f32 %v13531_v29, 0.0 }
 0x852   :  { %v13538_v42 = vadd.f32 %v20718_v39, %v12628_v31  ;;  %v13676_v40 = vmax.f32 %v13532_v2, 0.0  ;;  %v22285_v31 = vld [vmem:[#allocation78_spill] sm:$0xff] }
 0x853   :  { %v13832_v2 = vld [vmem:[%s21691_s5 + $0x78] sm:$0xff] }
 0x854   :  { %11979 = vmatpush1.bf16.msra.mxu0 %v18590_v58  ;;  %v13820_v58 = vld [vmem:[%s21691_s5 + $0x18] sm:$0xff]  ;;  %v13682_v46 = vmax.f32 %v13538_v42, 0.0 }
 0x855   :  { %11980 = vmatprep.subr.bf16.mxu0 %v18595_v21  ;;  %v13831_v21 = vld [vmem:[%s21691_s5 + $0x70] sm:$0xff]  ;;  %v13964_v20 = vmul.f32 %v13820_v58, %v13676_v40  ;;  %v22287_v58 = vld [vmem:[#allocation79_spill] sm:$0xff] }
 0x856   :  { %v12632_v62 = vpop.f32.mrb[20].mxu1 }
 0x857   :  { %v13543_v13 = vadd.f32 %v20713_v10, %v12632_v62  ;;  %11866 = vmatmul.mubr.bf16.gmra.mrb[4].mxu0 %v22193_v30  ;;  %v12634_v54 = vpop.f32.mrb[21].mxu1  ;;  %v13681_v62 = vmax.f32 %v13537_v7, 0.0 }
 0x858   :  { %v13544_v29 = vadd.f32 %v20718_v39, %v12634_v54  ;;  %11875 = vmatprep.mubr.bf16.mxu0 %v22285_v31  ;;  %v12636_v57 = vpop.f32.mrb[22].mxu1  ;;  %11981 = vmatpush1.bf16.msra.mxu0 %v18593_v59  ;;  %v13825_v54 = vld [vmem:[%s21691_s5 + $0x40] sm:$0xff] }
 0x859   :  { %v13687_v37 = vmax.f32 %v13543_v13, 0.0  ;;  %v13549_v30 = vadd.f32 %v20713_v10, %v12636_v57  ;;  %v12638_v47 = vpop.f32.mrb[23].mxu1  ;;  %11982 = vmatprep.subr.bf16.mxu0 %v18598_v25  ;;  %v13837_v59 = vld [vmem:[%s21691_s5 + $0xa0] sm:$0xff]  ;;  %v13963_v13 = vmul.f32 %v13819_v11, %v13675_v22  ;;  %v13826_v57 = vld [vmem:[%s21691_s5 + $0x48] sm:$0xff]  ;;  %v13969_v50 = vmul.f32 %v13825_v54, %v13681_v62 }
 0x85a   :  { %v13688_v31 = vmax.f32 %v13544_v29, 0.0  ;;  %v13550_v7 = vadd.f32 %v20718_v39, %v12638_v47  ;;  %v18604_v47 = vld [vmem:[#allocation6 + $0x1ef4] ss:$24 sps:$4 sm:$0xff]   ;;  %v13970_v22 = vmul.f32 %v13826_v57, %v13682_v46 }
 0x85b   :  { %v13975_v14 = vmul.f32 %v13831_v21, %v13687_v37  ;;  %v13693_v25 = vmax.f32 %v13549_v30, 0.0  ;;  %v22286_v21 = vld [vmem:[#allocation77_spill] sm:$0xff] }
 0x85c   :  { %v13976_v42 = vmul.f32 %v13832_v2, %v13688_v31  ;;  %v13694_v29 = vmax.f32 %v13550_v7, 0.0  ;;  %11983 = vmatpush1.bf16.msra.mxu0 %v18596_v49  ;;  %v13843_v49 = vld [vmem:[%s21691_s5 + $0xd0] sm:$0xff]  ;;  %v13850_v2 = vld [vmem:[%s21691_s5 + $0x108] sm:$0xff] }
 0x85d   :  { %v14107_v33 = vadd.f32 %v13975_v14, %v13963_v13  ;;  %v13981_v28 = vmul.f32 %v13837_v59, %v13693_v25  ;;  %11984 = vmatprep.subr.bf16.mxu0 %v18601_v19  ;;  %v18605_v7 = vld [vmem:[#allocation6 + $0x1f20] ss:$24 sps:$4 sm:$0xff]   ;;  %v18610_v25 = vld [vmem:[#allocation6 + $0x1f54] ss:$24 sps:$4 sm:$0xff]  }
 0x85e   :  { %v14108_v11 = vadd.f32 %v13976_v42, %v13964_v20  ;;  %v13982_v24 = vmul.f32 %v13838_v18, %v13694_v29  ;;  %v12642_v43 = vpop.f32.mrb[24].mxu1  ;;  %v18602_v20 = vld [vmem:[#allocation6 + $0x1ef0] ss:$24 sps:$4 sm:$0xff]  }
 0x85f   :  { %v14113_v37 = vadd.f32 %v13981_v28, %v13969_v50  ;;  %v13555_v30 = vadd.f32 %v20713_v10, %v12642_v43  ;;  %11876 = vmatmul.mubr.bf16.gmra.mrb[8].mxu0 %v22286_v21  ;;  %v12644_v1 = vpop.f32.mrb[25].mxu1  ;;  %v13844_v43 = vld [vmem:[%s21691_s5 + $0xd8] sm:$0xff] }
 0x860   :  { %v14114_v40 = vadd.f32 %v13982_v24, %v13970_v22  ;;  %v13556_v14 = vadd.f32 %v20718_v39, %v12644_v1  ;;  %11885 = vmatprep.mubr.bf16.mxu0 %v22287_v58  ;;  %v12646_v19 = vpop.f32.mrb[26].mxu1  ;;  %11985 = vmatpush1.bf16.msra.mxu0 %v18599_v61  ;;  %v18607_v24 = vld [vmem:[#allocation6 + $0x1f24] ss:$24 sps:$4 sm:$0xff]  }
 0x861   :  { %v13699_v46 = vmax.f32 %v13555_v30, 0.0  ;;  %v13561_v28 = vadd.f32 %v20713_v10, %v12646_v19  ;;  %v12648_v50 = vpop.f32.mrb[27].mxu1  ;;  %11986 = vmatprep.subr.bf16.mxu0 %v18604_v47  ;;  %v13849_v1 = vld [vmem:[%s21691_s5 + $0x100] sm:$0xff]  ;;  %v13855_v19 = vld [vmem:[%s21691_s5 + $0x130] sm:$0xff] }
 0x862   :  { %v13700_v18 = vmax.f32 %v13556_v14, 0.0  ;;  %v13562_v31 = vadd.f32 %v20718_v39, %v12648_v50 }
 0x863   :  { %v13987_v62 = vmul.f32 %v13843_v49, %v13699_v46  ;;  %v13705_v61 = vmax.f32 %v13561_v28, 0.0 }
 0x864   :  { %v13988_v54 = vmul.f32 %v13844_v43, %v13700_v18  ;;  %v13706_v59 = vmax.f32 %v13562_v31, 0.0  ;;  %11987 = vmatpush1.bf16.msra.mxu0 %v18602_v20 }
 0x865   :  { %v14119_v13 = vadd.f32 %v14107_v33, %v13987_v62  ;;  %v13993_v57 = vmul.f32 %v13849_v1, %v13705_v61  ;;  %11988 = vmatprep.subr.bf16.mxu0 %v18607_v24  ;;  %v13861_v24 = vld [vmem:[%s21691_s5 + $0x160] sm:$0xff]  ;;  %v13862_v62 = vld [vmem:[%s21691_s5 + $0x168] sm:$0xff] }
 0x866   :  { %v14120_v42 = vadd.f32 %v14108_v11, %v13988_v54  ;;  %v13994_v29 = vmul.f32 %v13850_v2, %v13706_v59  ;;  %v12652_v47 = vpop.f32.mrb[28].mxu1  ;;  %v18608_v11 = vld [vmem:[#allocation6 + $0x1f50] ss:$24 sps:$4 sm:$0xff]  }
 0x867   :  { %v14125_v22 = vadd.f32 %v14113_v37, %v13993_v57  ;;  %v13567_v30 = vadd.f32 %v20713_v10, %v12652_v47  ;;  %11886 = vmatmul.mubr.bf16.gmra.mrb[12].mxu0 %v19765_v16  ;;  %v12654_v49 = vpop.f32.mrb[29].mxu1  ;;  %v13856_v37 = vld [vmem:[%s21691_s5 + $0x138] sm:$0xff] }
 0x868   :  { %v14126_v14 = vadd.f32 %v14114_v40, %v13994_v29  ;;  %v13568_v20 = vadd.f32 %v20718_v39, %v12654_v49  ;;  %11895 = vmatprep.mubr.bf16.mxu0 %v22195_v26  ;;  %v12656_v33 = vpop.f32.mrb[30].mxu1  ;;  %11989 = vmatpush1.bf16.msra.mxu0 %v18605_v7  ;;  %v18613_v40 = vld [vmem:[#allocation6 + $0x1514] ss:$24 sps:$4 sm:$0xff]  }
 0x869   :  { %v13711_v46 = vmax.f32 %v13567_v30, 0.0  ;;  %v13573_v43 = vadd.f32 %v20713_v10, %v12656_v33  ;;  %v12658_v28 = vpop.f32.mrb[31].mxu1  ;;  %11990 = vmatprep.subr.bf16.mxu0 %v18610_v25 }
 0x86a   :  { %v13712_v50 = vmax.f32 %v13568_v20, 0.0  ;;  %v13574_v18 = vadd.f32 %v20718_v39, %v12658_v28 }
 0x86b   :  { %v13999_v1 = vmul.f32 %v13855_v19, %v13711_v46  ;;  %v13717_v31 = vmax.f32 %v13573_v43, 0.0  ;;  %v13867_v19 = vld [vmem:[%s21691_s5 + $0x190] sm:$0xff] }
 0x86c   :  { %v14000_v61 = vmul.f32 %v13856_v37, %v13712_v50  ;;  %v13718_v2 = vmax.f32 %v13574_v18, 0.0  ;;  %11991 = vmatpush1.bf16.msra.mxu0 %v18608_v11 }
 0x86d   :  { %v14131_v54 = vadd.f32 %v14119_v13, %v13999_v1  ;;  %v14005_v59 = vmul.f32 %v13861_v24, %v13717_v31  ;;  %12741 = vmatprep.subr.bf16.mxu0 %v18613_v40 }
 0x86e   :  { %v14132_v7 = vadd.f32 %v14120_v42, %v14000_v61  ;;  %v14006_v57 = vmul.f32 %v13862_v62, %v13718_v2  ;;  %v12662_v25 = vpop.f32.mrb[32].mxu1  ;;  %v13868_v42 = vld [vmem:[%s21691_s5 + $0x198] sm:$0xff] }
 0x86f   :  { %v14137_v29 = vadd.f32 %v14125_v22, %v14005_v59  ;;  %v13579_v47 = vadd.f32 %v20713_v10, %v12662_v25  ;;  %11896 = vmatmul.mubr.bf16.gmra.mrb[16].mxu0 %v22196_v51  ;;  %v12664_v30 = vpop.f32.mrb[33].mxu1  ;;  %v13879_v25 = vld [vmem:[%s21691_s5 + $0x1f0] sm:$0xff] }
 0x870   :  { %v14138_v49 = vadd.f32 %v14126_v14, %v14006_v57  ;;  %v13580_v20 = vadd.f32 %v20718_v39, %v12664_v30  ;;  %11905 = vmatprep.mubr.bf16.mxu0 %v22245_v23  ;;  %v12666_v13 = vpop.f32.mrb[34].mxu1  ;;  %v13873_v14 = vld [vmem:[%s21691_s5 + $0x1c0] sm:$0xff]  ;;  %v13874_v23 = vld [vmem:[%s21691_s5 + $0x1c8] sm:$0xff] }
 0x871   :  { %v13723_v33 = vmax.f32 %v13579_v47, 0.0  ;;  %v13585_v22 = vadd.f32 %v20713_v10, %v12666_v13  ;;  %v12668_v11 = vpop.f32.mrb[35].mxu1 }
 0x872   :  { %v13724_v46 = vmax.f32 %v13580_v20, 0.0  ;;  %v13586_v37 = vadd.f32 %v20718_v39, %v12668_v11 }
 0x873   :  { %v14011_v43 = vmul.f32 %v13867_v19, %v13723_v33  ;;  %v13729_v28 = vmax.f32 %v13585_v22, 0.0 }
 0x874   :  { %v14012_v40 = vmul.f32 %v13868_v42, %v13724_v46  ;;  %v13730_v50 = vmax.f32 %v13586_v37, 0.0 }
 0x875   :  { %v14143_v24 = vadd.f32 %v14131_v54, %v14011_v43  ;;  %v14017_v18 = vmul.f32 %v13873_v14, %v13729_v28 }
 0x876   :  { %v14144_v1 = vadd.f32 %v14132_v7, %v14012_v40  ;;  %v14018_v31 = vmul.f32 %v13874_v23, %v13730_v50  ;;  %v12672_v62 = vpop.f32.mrb[36].mxu1  ;;  %v13880_v7 = vld [vmem:[%s21691_s5 + $0x1f8] sm:$0xff] }
 0x877   :  { %v14149_v61 = vadd.f32 %v14137_v29, %v14017_v18  ;;  %v13591_v2 = vadd.f32 %v20713_v10, %v12672_v62  ;;  %11906 = vmatmul.mubr.bf16.gmra.mrb[20].mxu0 %v22198_v6  ;;  %v12674_v59 = vpop.f32.mrb[37].mxu1  ;;  %v13891_v18 = vld [vmem:[%s21691_s5 + $0x250] sm:$0xff] }
 0x878   :  { %v14150_v57 = vadd.f32 %v14138_v49, %v14018_v31  ;;  %v13592_v47 = vadd.f32 %v20718_v39, %v12674_v59  ;;  %11915 = vmatprep.mubr.bf16.mxu0 %v22247_v63  ;;  %v12676_v54 = vpop.f32.mrb[38].mxu1  ;;  %v13885_v49 = vld [vmem:[%s21691_s5 + $0x220] sm:$0xff]  ;;  %v13886_v63 = vld [vmem:[%s21691_s5 + $0x228] sm:$0xff] }
 0x879   :  { %v13735_v30 = vmax.f32 %v13591_v2, 0.0  ;;  %v13597_v29 = vadd.f32 %v20713_v10, %v12676_v54  ;;  %v12678_v19 = vpop.f32.mrb[39].mxu1  ;;  %v13897_v59 = vld [vmem:[%s21691_s5 + $0x280] sm:$0xff] }
 0x87a   :  { %v13736_v6 = vmax.f32 %v13592_v47, 0.0  ;;  %v13598_v20 = vadd.f32 %v20718_v39, %v12678_v19 }
 0x87b   :  { %v14023_v13 = vmul.f32 %v13879_v25, %v13735_v30  ;;  %v13741_v33 = vmax.f32 %v13597_v29, 0.0 }
 0x87c   :  { %v14024_v42 = vmul.f32 %v13880_v7, %v13736_v6  ;;  %v13742_v22 = vmax.f32 %v13598_v20, 0.0 }
 0x87d   :  { %v14155_v11 = vadd.f32 %v14143_v24, %v14023_v13  ;;  %v14029_v46 = vmul.f32 %v13885_v49, %v13741_v33 }
 0x87e   :  { %v14156_v14 = vadd.f32 %v14144_v1, %v14024_v42  ;;  %v14030_v37 = vmul.f32 %v13886_v63, %v13742_v22  ;;  %v12682_v43 = vpop.f32.mrb[40].mxu1  ;;  %v13892_v1 = vld [vmem:[%s21691_s5 + $0x258] sm:$0xff]  ;;  %v13903_v42 = vld [vmem:[%s21691_s5 + $0x2b0] sm:$0xff] }
 0x87f   :  { %v14161_v28 = vadd.f32 %v14149_v61, %v14029_v46  ;;  %v13603_v23 = vadd.f32 %v20713_v10, %v12682_v43  ;;  %11916 = vmatmul.mubr.bf16.gmra.mrb[24].mxu0 %v22200_v5  ;;  %v12684_v40 = vpop.f32.mrb[41].mxu1 }
 0x880   :  { %v14162_v50 = vadd.f32 %v14150_v57, %v14030_v37  ;;  %v13604_v31 = vadd.f32 %v20718_v39, %v12684_v40  ;;  %11925 = vmatprep.mubr.bf16.mxu0 %v22201_v41  ;;  %v12686_v24 = vpop.f32.mrb[42].mxu1  ;;  %v13898_v41 = vld [vmem:[%s21691_s5 + $0x288] sm:$0xff] }
 0x881   :  { %v13747_v62 = vmax.f32 %v13603_v23, 0.0  ;;  %v13609_v61 = vadd.f32 %v20713_v10, %v12686_v24  ;;  %v12688_v2 = vpop.f32.mrb[43].mxu1 }
 0x882   :  { %v13748_v5 = vmax.f32 %v13604_v31, 0.0  ;;  %v13610_v57 = vadd.f32 %v20718_v39, %v12688_v2 }
 0x883   :  { %v14035_v25 = vmul.f32 %v13891_v18, %v13747_v62  ;;  %v13753_v47 = vmax.f32 %v13609_v61, 0.0 }
 0x884   :  { %v14036_v54 = vmul.f32 %v13892_v1, %v13748_v5  ;;  %v13754_v30 = vmax.f32 %v13610_v57, 0.0 }
 0x885   :  { %v14167_v7 = vadd.f32 %v14155_v11, %v14035_v25  ;;  %v14041_v29 = vmul.f32 %v13897_v59, %v13753_v47  ;;  %v13915_v47 = vld [vmem:[%s21691_s5 + $0x310] sm:$0xff] }
 0x886   :  { %v14168_v19 = vadd.f32 %v14156_v14, %v14036_v54  ;;  %v14042_v6 = vmul.f32 %v13898_v41, %v13754_v30  ;;  %v12692_v49 = vpop.f32.mrb[44].mxu1  ;;  %v13904_v14 = vld [vmem:[%s21691_s5 + $0x2b8] sm:$0xff] }
 0x887   :  { %v14173_v20 = vadd.f32 %v14161_v28, %v14041_v29  ;;  %v13615_v13 = vadd.f32 %v20713_v10, %v12692_v49  ;;  %11926 = vmatmul.mubr.bf16.gmra.mrb[28].mxu0 %v22202_v27  ;;  %v12694_v33 = vpop.f32.mrb[45].mxu1  ;;  %v13909_v28 = vld [vmem:[%s21691_s5 + $0x2e0] sm:$0xff] }
 0x888   :  { %v14174_v63 = vadd.f32 %v14162_v50, %v14042_v6  ;;  %v13616_v22 = vadd.f32 %v20718_v39, %v12694_v33  ;;  %11935 = vmatprep.mubr.bf16.mxu0 %v22203_v8  ;;  %v12696_v11 = vpop.f32.mrb[46].mxu1  ;;  %v13910_v8 = vld [vmem:[%s21691_s5 + $0x2e8] sm:$0xff]  ;;  %v13921_v6 = vld [vmem:[%s21691_s5 + $0x340] sm:$0xff] }
 0x889   :  { %v13759_v46 = vmax.f32 %v13615_v13, 0.0  ;;  %v13621_v37 = vadd.f32 %v20713_v10, %v12696_v11  ;;  %v12698_v43 = vpop.f32.mrb[47].mxu1 }
 0x88a   :  { %v13760_v27 = vmax.f32 %v13616_v22, 0.0  ;;  %v13622_v23 = vadd.f32 %v20718_v39, %v12698_v43 }
 0x88b   :  { %v14047_v40 = vmul.f32 %v13903_v42, %v13759_v46  ;;  %v13765_v50 = vmax.f32 %v13621_v37, 0.0 }
 0x88c   :  { %v14048_v18 = vmul.f32 %v13904_v14, %v13760_v27  ;;  %v13766_v31 = vmax.f32 %v13622_v23, 0.0  ;;  %v13927_v23 = vld [vmem:[%s21691_s5 + $0x370] sm:$0xff] }
 0x88d   :  { %v14179_v24 = vadd.f32 %v14167_v7, %v14047_v40  ;;  %v14053_v62 = vmul.f32 %v13909_v28, %v13765_v50  ;;  %v13916_v7 = vld [vmem:[%s21691_s5 + $0x318] sm:$0xff] }
 0x88e   :  { %v14180_v1 = vadd.f32 %v14168_v19, %v14048_v18  ;;  %v14054_v61 = vmul.f32 %v13910_v8, %v13766_v31  ;;  %v12702_v2 = vpop.f32.mrb[48].mxu1  ;;  %v13928_v18 = vld [vmem:[%s21691_s5 + $0x378] sm:$0xff] }
 0x88f   :  { %v14185_v5 = vadd.f32 %v14173_v20, %v14053_v62  ;;  %v13627_v59 = vadd.f32 %v20713_v10, %v12702_v2  ;;  %11936 = vmatmul.mubr.bf16.gmra.mrb[32].mxu0 %v22204_v55  ;;  %v12704_v57 = vpop.f32.mrb[49].mxu1  ;;  %v13933_v62 = vld [vmem:[%s21691_s5 + $0x3a0] sm:$0xff] }
 0x890   :  { %v14186_v25 = vadd.f32 %v14174_v63, %v14054_v61  ;;  %v13628_v41 = vadd.f32 %v20718_v39, %v12704_v57  ;;  %11945 = vmatprep.mubr.bf16.mxu0 %v22205_v4  ;;  %v12706_v54 = vpop.f32.mrb[50].mxu1  ;;  %v13922_v4 = vld [vmem:[%s21691_s5 + $0x348] sm:$0xff] }
 0x891   :  { %v13771_v30 = vmax.f32 %v13627_v59, 0.0  ;;  %v13633_v29 = vadd.f32 %v20713_v10, %v12706_v54  ;;  %v12708_v19 = vpop.f32.mrb[51].mxu1 }
 0x892   :  { %v13772_v55 = vmax.f32 %v13628_v41, 0.0  ;;  %v13634_v49 = vadd.f32 %v20718_v39, %v12708_v19 }
 0x893   :  { %v14059_v20 = vmul.f32 %v13915_v47, %v13771_v30  ;;  %v13777_v13 = vmax.f32 %v13633_v29, 0.0 }
 0x894   :  { %v14060_v33 = vmul.f32 %v13916_v7, %v13772_v55  ;;  %v13778_v63 = vmax.f32 %v13634_v49, 0.0  ;;  %v13939_v55 = vld [vmem:[%s21691_s5 + $0x3d0] sm:$0xff] }
 0x895   :  { %v14191_v42 = vadd.f32 %v14179_v24, %v14059_v20  ;;  %v14065_v22 = vmul.f32 %v13921_v6, %v13777_v13  ;;  %v13940_v13 = vld [vmem:[%s21691_s5 + $0x3d8] sm:$0xff] }
 0x896   :  { %v14192_v11 = vadd.f32 %v14180_v1, %v14060_v33  ;;  %v14066_v46 = vmul.f32 %v13922_v4, %v13778_v63  ;;  %v12712_v14 = vpop.f32.mrb[52].mxu1  ;;  %v13945_v63 = vld [vmem:[%s21691_s5 + $0x400] sm:$0xff] }
 0x897   :  { %v14197_v37 = vadd.f32 %v14185_v5, %v14065_v22  ;;  %v13639_v43 = vadd.f32 %v20713_v10, %v12712_v14  ;;  %11946 = vmatmul.mubr.bf16.gmra.mrb[36].mxu0 %v22206_v56  ;;  %v12714_v27 = vpop.f32.mrb[53].mxu1 }
 0x898   :  { %v14198_v28 = vadd.f32 %v14186_v25, %v14066_v46  ;;  %v13640_v40 = vadd.f32 %v20718_v39, %v12714_v27  ;;  %11955 = vmatprep.mubr.bf16.mxu0 %v22252_v17  ;;  %v12716_v50 = vpop.f32.mrb[54].mxu1  ;;  %v13934_v17 = vld [vmem:[%s21691_s5 + $0x3a8] sm:$0xff] }
 0x899   :  { %v13783_v8 = vmax.f32 %v13639_v43, 0.0  ;;  %v13645_v31 = vadd.f32 %v20713_v10, %v12716_v50  ;;  %v12718_v24 = vpop.f32.mrb[55].mxu1 }
 0x89a   :  { %v13784_v56 = vmax.f32 %v13640_v40, 0.0  ;;  %v13646_v1 = vadd.f32 %v20718_v39, %v12718_v24 }
 0x89b   :  { %v14071_v61 = vmul.f32 %v13927_v23, %v13783_v8  ;;  %v13789_v2 = vmax.f32 %v13645_v31, 0.0  ;;  %v13951_v31 = vld [vmem:[%s21691_s5 + $0x430] sm:$0xff] }
 0x89c   :  { %v14072_v5 = vmul.f32 %v13928_v18, %v13784_v56  ;;  %v13790_v59 = vmax.f32 %v13646_v1, 0.0  ;;  %v13952_v1 = vld [vmem:[%s21691_s5 + $0x438] sm:$0xff] }
 0x89d   :  { %v14203_v57 = vadd.f32 %v14191_v42, %v14071_v61  ;;  %v14077_v25 = vmul.f32 %v13933_v62, %v13789_v2 }
 0x89e   :  { %v14204_v47 = vadd.f32 %v14192_v11, %v14072_v5  ;;  %v14078_v41 = vmul.f32 %v13934_v17, %v13790_v59  ;;  %v12722_v54 = vpop.f32.mrb[56].mxu1  ;;  %v13957_v17 = vld [vmem:[%s21691_s5 + $0x460] sm:$0xff] }
 0x89f   :  { %v14209_v30 = vadd.f32 %v14197_v37, %v14077_v25  ;;  %v13651_v7 = vadd.f32 %v20713_v10, %v12722_v54  ;;  %11956 = vmatmul.mubr.bf16.gmra.mrb[40].mxu0 %v22253_v15  ;;  %v12724_v29 = vpop.f32.mrb[57].mxu1  ;;  %v13958_v25 = vld [vmem:[%s21691_s5 + $0x468] sm:$0xff]  ;;  %v18611_v54 = vld [vmem:[#allocation6 + $0x1510] ss:$24 sps:$4 sm:$0xff]  }
 0x8a0   :  { %v14210_v19 = vadd.f32 %v14198_v28, %v14078_v41  ;;  %v13652_v6 = vadd.f32 %v20718_v39, %v12724_v29  ;;  %11965 = vmatprep.mubr.bf16.mxu0 %v22254_v60  ;;  %v12726_v49 = vpop.f32.mrb[58].mxu1  ;;  %v13946_v60 = vld [vmem:[%s21691_s5 + $0x408] sm:$0xff] }
 0x8a1   :  { %v13795_v20 = vmax.f32 %v13651_v7, 0.0  ;;  %v13657_v4 = vadd.f32 %v20713_v10, %v12726_v49  ;;  %v12728_v33 = vpop.f32.mrb[59].mxu1  ;;  %v18616_v7 = vld [vmem:[#allocation6 + $0x1544] ss:$24 sps:$4 sm:$0xff]  }
 0x8a2   :  { %v13796_v15 = vmax.f32 %v13652_v6, 0.0  ;;  %v13658_v42 = vadd.f32 %v20718_v39, %v12728_v33  ;;  %v18619_v33 = vld [vmem:[#allocation6 + $0x1574] ss:$24 sps:$4 sm:$0xff]  }
 0x8a3   :  { %v14083_v22 = vmul.f32 %v13939_v55, %v13795_v20  ;;  %v13801_v11 = vmax.f32 %v13657_v4, 0.0 }
 0x8a4   :  { %v14084_v46 = vmul.f32 %v13940_v13, %v13796_v15  ;;  %v13802_v14 = vmax.f32 %v13658_v42, 0.0  ;;  %v18614_v13 = vld [vmem:[#allocation6 + $0x1540] ss:$24 sps:$4 sm:$0xff]   ;;  %v18617_v15 = vld [vmem:[#allocation6 + $0x1570] ss:$24 sps:$4 sm:$0xff]  }
 0x8a5   :  { %v14215_v37 = vadd.f32 %v14203_v57, %v14083_v22  ;;  %v14089_v43 = vmul.f32 %v13945_v63, %v13801_v11  ;;  %v18622_v63 = vld [vmem:[#allocation6 + $0x15a4] ss:$24 sps:$4 sm:$0xff]  }
 0x8a6   :  { %v14216_v27 = vadd.f32 %v14204_v47, %v14084_v46  ;;  %v14090_v28 = vmul.f32 %v13946_v60, %v13802_v14  ;;  %v12732_v23 = vpop.f32.mrb[60].mxu1  ;;  %v22288_v22 = vld [vmem:[#allocation99_spill] sm:$0xff] }
 0x8a7   :  { %v14221_v40 = vadd.f32 %v14209_v30, %v14089_v43  ;;  %v13663_v50 = vadd.f32 %v20713_v10, %v12732_v23  ;;  %11966 = vmatmul.mubr.bf16.gmra.mrb[44].mxu0 %v22255_v36  ;;  %v12734_v8 = vpop.f32.mrb[61].mxu1  ;;  %v18620_v46 = vld [vmem:[#allocation6 + $0x15a0] ss:$24 sps:$4 sm:$0xff]   ;;  %v18623_v43 = vld [vmem:[#allocation6 + $0x15d0] ss:$24 sps:$4 sm:$0xff]  }
 0x8a8   :  { %v14222_v18 = vadd.f32 %v14210_v19, %v14090_v28  ;;  %v13664_v24 = vadd.f32 %v20718_v39, %v12734_v8  ;;  %v12736_v56 = vpop.f32.mrb[62].mxu1  ;;  %12008 = vmatprep.mubr.bf16.mxu0 %v22157_v12 }
 0x8a9   :  { %v13807_v62 = vmax.f32 %v13663_v50, 0.0  ;;  %v13669_v61 = vadd.f32 %v20713_v10, %v12736_v56  ;;  %v12738_v2 = vpop.f32.mrb[63].mxu1  ;;  %v18626_v50 = vld [vmem:[#allocation6 + $0x1600] ss:$24 sps:$4 sm:$0xff]  }
 0x8aa   :  { %v13808_v36 = vmax.f32 %v13664_v24, 0.0  ;;  %v13670_v5 = vadd.f32 %v20718_v39, %v12738_v2  ;;  %v18634_v24 = vld [vmem:[#allocation6 + $0x1664] ss:$24 sps:$4 sm:$0xff]  }
 0x8ab   :  { %v14095_v59 = vmul.f32 %v13951_v31, %v13807_v62  ;;  %v13813_v57 = vmax.f32 %v13669_v61, 0.0  ;;  %v18629_v31 = vld [vmem:[#allocation6 + $0x1630] ss:$24 sps:$4 sm:$0xff]   ;;  %v18632_v61 = vld [vmem:[#allocation6 + $0x1660] ss:$24 sps:$4 sm:$0xff]  }
 0x8ac   :  { %v14096_v47 = vmul.f32 %v13952_v1, %v13808_v36  ;;  %v13814_v41 = vmax.f32 %v13670_v5, 0.0  ;;  %v18637_v36 = vld [vmem:[#allocation6 + $0x1694] ss:$24 sps:$4 sm:$0xff]   ;;  %v18640_v5 = vld [vmem:[#allocation6 + $0x16c4] ss:$24 sps:$4 sm:$0xff]  }
 0x8ad   :  { %v20935_v30 = vadd.f32 %v14215_v37, %v14095_v59  ;;  %v14101_v10 = vmul.f32 %v13957_v17, %v13813_v57  ;;  %v18625_v37 = vld [vmem:[#allocation6 + $0x15d4] ss:$24 sps:$4 sm:$0xff]   ;;  %v18635_v17 = vld [vmem:[#allocation6 + $0x1690] ss:$24 sps:$4 sm:$0xff]  }
 0x8ae   :  { %v20937_v29 = vadd.f32 %v14216_v27, %v14096_v47  ;;  %v14102_v19 = vmul.f32 %v13958_v25, %v13814_v41  ;;  %v20939_v55 = vpop.f32.mrb[64].mxu1  ;;  %v18628_v27 = vld [vmem:[#allocation6 + $0x1604] ss:$24 sps:$4 sm:$0xff]   ;;  %v18638_v47 = vld [vmem:[#allocation6 + $0x16c0] ss:$24 sps:$4 sm:$0xff]  }
 0x8af   :  { %v20941_v6 = vadd.f32 %v14221_v40, %v14101_v10  ;;  %12009 = vmatmul.mubr.bf16.vlgmr.msra.gmra.mrb[0].mxu0 %v22209_v52  ;;  %v20944_v39 = vpop.f32.mrb[65].mxu1  ;;  %v18641_v10 = vld [vmem:[#allocation6 + $0x16f0] ss:$24 sps:$4 sm:$0xff]  }
 0x8b0   :  { %v20946_v49 = vadd.f32 %v14222_v18, %v14102_v19  ;;  %12742 = vmatpush1.bf16.msra.mxu0 %v18611_v54  ;;  %v20948_v20 = vpop.f32.mrb[66].mxu1  ;;  %12018 = vmatprep.mubr.bf16.mxu0 %v22157_v12  ;;  %v18631_v18 = vld [vmem:[#allocation6 + $0x1634] ss:$24 sps:$4 sm:$0xff]  }
 0x8b1   :  { %v20951_v4 = vpop.f32.mrb[67].mxu1  ;;  %12743 = vmatprep.subr.bf16.mxu0 %v18616_v7  ;;  %v18643_v54 = vld [vmem:[#allocation6 + $0x16f4] ss:$24 sps:$4 sm:$0xff]   ;;  %v18646_v7 = vld [vmem:[#allocation6 + $0x1724] ss:$24 sps:$4 sm:$0xff]  }
 0x8b4   :  { %12744 = vmatpush1.bf16.msra.mxu0 %v18614_v13 }
 0x8b5   :  { %12745 = vmatprep.subr.bf16.mxu0 %v18619_v33 }
 0x8b6   :  { %v20953_v42 = vpop.f32.mrb[68].mxu1 }
 0x8b7   :  { %12019 = vmatmul.mubr.bf16.gmra.mrb[4].mxu0 %v22288_v22  ;;  %v20956_v11 = vpop.f32.mrb[69].mxu1 }
 0x8b8   :  { %v20958_v60 = vpop.f32.mrb[70].mxu1  ;;  %12746 = vmatpush1.bf16.msra.mxu0 %v18617_v15  ;;  %12028 = vmatprep.mubr.bf16.mxu0 %v22157_v12  ;;  %v18644_v15 = vld [vmem:[#allocation6 + $0x1720] ss:$24 sps:$4 sm:$0xff]  }
 0x8b9   :  { %v20961_v14 = vpop.f32.mrb[71].mxu1  ;;  %12747 = vmatprep.subr.bf16.mxu0 %v18622_v63 }
 0x8ba   :  { %22289 = vst [vmem:[#allocation103_spill] sm:$0xff] %v20961_v14 }
 0x8bc   :  { %12748 = vmatpush1.bf16.msra.mxu0 %v18620_v46  ;;  %v18649_v46 = vld [vmem:[#allocation6 + $0x1754] ss:$24 sps:$4 sm:$0xff]  }
 0x8bd   :  { %12749 = vmatprep.subr.bf16.mxu0 %v18625_v37  ;;  %v18647_v37 = vld [vmem:[#allocation6 + $0x1750] ss:$24 sps:$4 sm:$0xff]  }
 0x8be   :  { %v20963_v28 = vpop.f32.mrb[72].mxu1 }
 0x8bf   :  { %22290 = vst [vmem:[#allocation104_spill] sm:$0xff] %v20963_v28  ;;  %12029 = vmatmul.mubr.bf16.gmra.mrb[8].mxu0 %v22211_v34  ;;  %v20966_v23 = vpop.f32.mrb[73].mxu1  ;;  %v18804_v28 = vld [vmem:[#allocation6 + $0x1cc0] ss:$24 sps:$4 sm:$0xff]  }
 0x8c0   :  { %22291 = vst [vmem:[#allocation105_spill] sm:$0xff] %v20966_v23  ;;  %v20968_v40 = vpop.f32.mrb[74].mxu1  ;;  %12038 = vmatprep.mubr.bf16.mxu0 %v22157_v12  ;;  %12750 = vmatpush1.bf16.msra.mxu0 %v18623_v43  ;;  %v18652_v43 = vld [vmem:[#allocation6 + $0x1784] ss:$24 sps:$4 sm:$0xff]  }
 0x8c1   :  { %22292 = vst [vmem:[#allocation106_spill] sm:$0xff] %v20968_v40  ;;  %v20971_v8 = vpop.f32.mrb[75].mxu1  ;;  %12751 = vmatprep.subr.bf16.mxu0 %v18628_v27 }
 0x8c2   :  { %22293 = vst [vmem:[#allocation107_spill] sm:$0xff] %v20971_v8 }
 0x8c4   :  { %12752 = vmatpush1.bf16.msra.mxu0 %v18626_v50 }
 0x8c5   :  { %12753 = vmatprep.subr.bf16.mxu0 %v18631_v18 }
 0x8c6   :  { %v20973_v56 = vpop.f32.mrb[76].mxu1 }
 0x8c7   :  { %22294 = vst [vmem:[#allocation14_spill] sm:$0xff] %v20973_v56  ;;  %12039 = vmatmul.mubr.bf16.gmra.mrb[12].mxu0 %v22212_v45  ;;  %v20976_v62 = vpop.f32.mrb[77].mxu1 }
 0x8c8   :  { %22295 = vst [vmem:[#allocation13_spill] sm:$0xff] %v20976_v62  ;;  %v20978_v1 = vpop.f32.mrb[78].mxu1  ;;  %12048 = vmatprep.mubr.bf16.mxu0 %v22157_v12  ;;  %12754 = vmatpush1.bf16.msra.mxu0 %v18629_v31  ;;  %v18650_v31 = vld [vmem:[#allocation6 + $0x1780] ss:$24 sps:$4 sm:$0xff]  }
 0x8c9   :  { %22296 = vst [vmem:[#allocation16_spill] sm:$0xff] %v20978_v1  ;;  %v20981_v2 = vpop.f32.mrb[79].mxu1  ;;  %12755 = vmatprep.subr.bf16.mxu0 %v18634_v24 }
 0x8ca   :  { %22297 = vst [vmem:[#allocation15_spill] sm:$0xff] %v20981_v2 }
 0x8cc   :  { %12756 = vmatpush1.bf16.msra.mxu0 %v18632_v61  ;;  %v18655_v61 = vld [vmem:[#allocation6 + $0x17b4] ss:$24 sps:$4 sm:$0xff]  }
 0x8cd   :  { %12757 = vmatprep.subr.bf16.mxu0 %v18637_v36  ;;  %v18653_v36 = vld [vmem:[#allocation6 + $0x17b0] ss:$24 sps:$4 sm:$0xff]  }
 0x8ce   :  { %v20983_v59 = vpop.f32.mrb[80].mxu1 }
 0x8cf   :  { %22298 = vst [vmem:[#allocation19_spill] sm:$0xff] %v20983_v59  ;;  %12049 = vmatmul.mubr.bf16.gmra.mrb[16].mxu0 %v22213_v38  ;;  %v20986_v57 = vpop.f32.mrb[81].mxu1 }
 0x8d0   :  { %22299 = vst [vmem:[#allocation81_spill] sm:$0xff] %v20986_v57  ;;  %v20988_v25 = vpop.f32.mrb[82].mxu1  ;;  %12058 = vmatprep.mubr.bf16.mxu0 %v22157_v12  ;;  %12758 = vmatpush1.bf16.msra.mxu0 %v18635_v17  ;;  %v18658_v17 = vld [vmem:[#allocation6 + $0x17e4] ss:$24 sps:$4 sm:$0xff]  }
 0x8d1   :  { %22300 = vst [vmem:[#allocation80_spill] sm:$0xff] %v20988_v25  ;;  %v20991_v41 = vpop.f32.mrb[83].mxu1  ;;  %12759 = vmatprep.subr.bf16.mxu0 %v18640_v5  ;;  %v18656_v5 = vld [vmem:[#allocation6 + $0x17e0] ss:$24 sps:$4 sm:$0xff]  }
 0x8d2   :  { %22301 = vst [vmem:[#allocation82_spill] sm:$0xff] %v20991_v41  ;;  %v18802_v41 = vld [vmem:[#allocation6 + $0x1c90] ss:$24 sps:$4 sm:$0xff]  }
 0x8d4   :  { %12760 = vmatpush1.bf16.msra.mxu0 %v18638_v47  ;;  %v18661_v47 = vld [vmem:[#allocation6 + $0x1814] ss:$24 sps:$4 sm:$0xff]  }
 0x8d5   :  { %12761 = vmatprep.subr.bf16.mxu0 %v18643_v54  ;;  %v22310_v54 = vld [vmem:[#allocation18_spill] sm:$0xff] }
 0x8d6   :  { %v20993_v19 = vpop.f32.mrb[84].mxu1 }
 0x8d7   :  { %22302 = vst [vmem:[#allocation84_spill] sm:$0xff] %v20993_v19  ;;  %12059 = vmatmul.mubr.bf16.gmra.mrb[20].mxu0 %v22165_v44  ;;  %v20996_v13 = vpop.f32.mrb[85].mxu1 }
 0x8d8   :  { %22303 = vst [vmem:[#allocation87_spill] sm:$0xff] %v20996_v13  ;;  %v20998_v33 = vpop.f32.mrb[86].mxu1  ;;  %12068 = vmatprep.mubr.bf16.mxu0 %v22157_v12  ;;  %12762 = vmatpush1.bf16.msra.mxu0 %v18641_v10  ;;  %v18659_v10 = vld [vmem:[#allocation6 + $0x1810] ss:$24 sps:$4 sm:$0xff]  }
 0x8d9   :  { %22304 = vst [vmem:[#allocation86_spill] sm:$0xff] %v20998_v33  ;;  %v21001_v63 = vpop.f32.mrb[87].mxu1  ;;  %12763 = vmatprep.subr.bf16.mxu0 %v18646_v7  ;;  %v18664_v7 = vld [vmem:[#allocation6 + $0x1844] ss:$24 sps:$4 sm:$0xff]  }
 0x8da   :  { %22305 = vst [vmem:[#allocation89_spill] sm:$0xff] %v21001_v63  ;;  %v18799_v63 = vld [vmem:[#allocation6 + $0x1c64] ss:$24 sps:$4 sm:$0xff]  }
 0x8db   :  { %v22352_v13 = vld [vmem:[#allocation116_spill] sm:$0xff] }
 0x8dc   :  { %12764 = vmatpush1.bf16.msra.mxu0 %v18644_v15  ;;  %v22311_v15 = vld [vmem:[#allocation17_spill] sm:$0xff] }
 0x8dd   :  { %12765 = vmatprep.subr.bf16.mxu0 %v18649_v46  ;;  %v22312_v46 = vld [vmem:[#allocation20_spill] sm:$0xff] }
 0x8de   :  { %v21003_v27 = vpop.f32.mrb[88].mxu1 }
 0x8df   :  { %22306 = vst [vmem:[#allocation88_spill] sm:$0xff] %v21003_v27  ;;  %12069 = vmatmul.mubr.bf16.gmra.mrb[24].mxu0 %v22166_v48  ;;  %v21006_v50 = vpop.f32.mrb[89].mxu1  ;;  %v18798_v27 = vld [vmem:[#allocation6 + $0x1c30] ss:$24 sps:$4 sm:$0xff]  }
 0x8e0   :  { %22307 = vst [vmem:[#allocation91_spill] sm:$0xff] %v21006_v50  ;;  %v21008_v18 = vpop.f32.mrb[90].mxu1  ;;  %12078 = vmatprep.mubr.bf16.mxu0 %v22157_v12  ;;  %12766 = vmatpush1.bf16.msra.mxu0 %v18647_v37  ;;  %v18662_v37 = vld [vmem:[#allocation6 + $0x1840] ss:$24 sps:$4 sm:$0xff]  }
 0x8e1   :  { %22308 = vst [vmem:[#allocation90_spill] sm:$0xff] %v21008_v18  ;;  %v21011_v24 = vpop.f32.mrb[91].mxu1  ;;  %12767 = vmatprep.subr.bf16.mxu0 %v18652_v43  ;;  %v18667_v43 = vld [vmem:[#allocation6 + $0x1874] ss:$24 sps:$4 sm:$0xff]  }
 0x8e2   :  { %22309 = vst [vmem:[#allocation96_spill] sm:$0xff] %v21011_v24  ;;  %v22349_v50 = vld [vmem:[#allocation54_spill] sm:$0xff] }
 0x8e4   :  { %12768 = vmatpush1.bf16.msra.mxu0 %v18650_v31  ;;  %v18665_v31 = vld [vmem:[#allocation6 + $0x1870] ss:$24 sps:$4 sm:$0xff]  }
 0x8e5   :  { %12769 = vmatprep.subr.bf16.mxu0 %v18655_v61  ;;  %v18670_v61 = vld [vmem:[#allocation6 + $0x18a4] ss:$24 sps:$4 sm:$0xff]  }
 0x8e7   :  { %12079 = vmatmul.mubr.bf16.gmra.mrb[28].mxu0 %v22167_v32 }
 0x8e8   :  { %12088 = vmatprep.mubr.bf16.mxu0 %v22157_v12  ;;  %12770 = vmatpush1.bf16.msra.mxu0 %v18653_v36  ;;  %v22313_v36 = vld [vmem:[#allocation22_spill] sm:$0xff] }
 0x8e9   :  { %12771 = vmatprep.subr.bf16.mxu0 %v18658_v17  ;;  %v18668_v17 = vld [vmem:[#allocation6 + $0x18a0] ss:$24 sps:$4 sm:$0xff]  }
 0x8ec   :  { %12772 = vmatpush1.bf16.msra.mxu0 %v18656_v5  ;;  %v18673_v5 = vld [vmem:[#allocation6 + $0x18d4] ss:$24 sps:$4 sm:$0xff]  }
 0x8ed   :  { %12894 = vmatprep.subr.bf16.mxu0 %v18661_v47  ;;  %v18671_v47 = vld [vmem:[#allocation6 + $0x18d0] ss:$24 sps:$4 sm:$0xff]  }
 0x8ef   :  { %12089 = vmatmul.mubr.bf16.gmra.mrb[32].mxu0 %v22168_v35 }
 0x8f0   :  { %12098 = vmatprep.mubr.bf16.mxu0 %v22157_v12 }
 0x8f7   :  { %12099 = vmatmul.mubr.bf16.gmra.mrb[36].mxu0 %v22169_v3 }
 0x8f8   :  { %12108 = vmatprep.mubr.bf16.mxu0 %v22157_v12 }
 0x8ff   :  { %12109 = vmatmul.mubr.bf16.gmra.mrb[40].mxu0 %v22263_v53 }
 0x900   :  { %12118 = vmatprep.mubr.bf16.mxu0 %v22157_v12 }
 0x907   :  { %12119 = vmatmul.mubr.bf16.gmra.mrb[44].mxu0 %v22265_v0 }
 0x908   :  { %12773 = vmatprep.mubr.bf16.mxu0 %v22310_v54  ;;  %v18676_v54 = vld [vmem:[#allocation6 + $0x1904] ss:$24 sps:$4 sm:$0xff]  }
 0x90f   :  { %12774 = vmatmul.mubr.bf16.vlgmr.msra.gmra.mrb[48].mxu0 %v22311_v15  ;;  %v18674_v15 = vld [vmem:[#allocation6 + $0x1900] ss:$24 sps:$4 sm:$0xff]  }
 0x910   :  { %12783 = vmatprep.mubr.bf16.mxu0 %v22312_v46  ;;  %12895 = vmatpush1.bf16.msra.mxu0 %v18659_v10  ;;  %v22314_v10 = vld [vmem:[#allocation21_spill] sm:$0xff] }
 0x911   :  { %12896 = vmatprep.subr.bf16.mxu0 %v18664_v7  ;;  %v22315_v7 = vld [vmem:[#allocation24_spill] sm:$0xff] }
 0x912   :  { %v18679_v46 = vld [vmem:[#allocation6 + $0x1934] ss:$24 sps:$4 sm:$0xff]  }
 0x914   :  { %12897 = vmatpush1.bf16.msra.mxu0 %v18662_v37  ;;  %v18682_v37 = vld [vmem:[#allocation6 + $0x1964] ss:$24 sps:$4 sm:$0xff]  }
 0x915   :  { %12898 = vmatprep.subr.bf16.mxu0 %v18667_v43  ;;  %v22316_v43 = vld [vmem:[#allocation23_spill] sm:$0xff] }
 0x917   :  { %12784 = vmatmul.mubr.bf16.gmra.mrb[52].mxu0 %v22178_v9  ;;  %v18677_v9 = vld [vmem:[#allocation6 + $0x1930] ss:$24 sps:$4 sm:$0xff]  }
 0x918   :  { %12793 = vmatprep.mubr.bf16.mxu0 %v22313_v36  ;;  %12899 = vmatpush1.bf16.msra.mxu0 %v18665_v31  ;;  %v22317_v31 = vld [vmem:[#allocation26_spill] sm:$0xff] }
 0x919   :  { %12900 = vmatprep.subr.bf16.mxu0 %v18670_v61  ;;  %v18680_v61 = vld [vmem:[#allocation6 + $0x1960] ss:$24 sps:$4 sm:$0xff]   ;;  %v18685_v36 = vld [vmem:[#allocation6 + $0x1994] ss:$24 sps:$4 sm:$0xff]  }
 0x91c   :  { %12901 = vmatpush1.bf16.msra.mxu0 %v18668_v17  ;;  %v18683_v17 = vld [vmem:[#allocation6 + $0x1990] ss:$24 sps:$4 sm:$0xff]  }
 0x91d   :  { %12902 = vmatprep.subr.bf16.mxu0 %v18673_v5  ;;  %v18688_v5 = vld [vmem:[#allocation6 + $0x19c4] ss:$24 sps:$4 sm:$0xff]  }
 0x91f   :  { %12794 = vmatmul.mubr.bf16.gmra.mrb[56].mxu0 %v22314_v10  ;;  %v18686_v10 = vld [vmem:[#allocation6 + $0x19c0] ss:$24 sps:$4 sm:$0xff]  }
 0x920   :  { %12803 = vmatprep.mubr.bf16.mxu0 %v22315_v7  ;;  %12903 = vmatpush1.bf16.msra.mxu0 %v18671_v47  ;;  %v22318_v47 = vld [vmem:[#allocation25_spill] sm:$0xff] }
 0x921   :  { %12904 = vmatprep.subr.bf16.mxu0 %v18676_v54  ;;  %v22319_v54 = vld [vmem:[#allocation28_spill] sm:$0xff] }
 0x922   :  { %v18691_v7 = vld [vmem:[#allocation6 + $0x19f4] ss:$24 sps:$4 sm:$0xff]  }
 0x924   :  { %12905 = vmatpush1.bf16.msra.mxu0 %v18674_v15  ;;  %v18689_v15 = vld [vmem:[#allocation6 + $0x19f0] ss:$24 sps:$4 sm:$0xff]  }
 0x925   :  { %12906 = vmatprep.subr.bf16.mxu0 %v18679_v46  ;;  %v18694_v46 = vld [vmem:[#allocation6 + $0x1a24] ss:$24 sps:$4 sm:$0xff]  }
 0x927   :  { %12804 = vmatmul.mubr.bf16.gmra.mrb[60].mxu0 %v22316_v43  ;;  %v18692_v43 = vld [vmem:[#allocation6 + $0x1a20] ss:$24 sps:$4 sm:$0xff]  }
 0x928   :  { %12813 = vmatprep.mubr.bf16.mxu0 %v22317_v31  ;;  %12907 = vmatpush1.bf16.msra.mxu0 %v18677_v9  ;;  %v22320_v9 = vld [vmem:[#allocation27_spill] sm:$0xff]  ;;  %v18697_v31 = vld [vmem:[#allocation6 + $0x1a54] ss:$24 sps:$4 sm:$0xff]  }
 0x929   :  { %12908 = vmatprep.subr.bf16.mxu0 %v18682_v37  ;;  %v22321_v37 = vld [vmem:[#allocation30_spill] sm:$0xff] }
 0x92c   :  { %12909 = vmatpush1.bf16.msra.mxu0 %v18680_v61  ;;  %v18695_v61 = vld [vmem:[#allocation6 + $0x1a50] ss:$24 sps:$4 sm:$0xff]  }
 0x92d   :  { %12910 = vmatprep.subr.bf16.mxu0 %v18685_v36  ;;  %v18700_v36 = vld [vmem:[#allocation6 + $0x1a84] ss:$24 sps:$4 sm:$0xff]  }
 0x92f   :  { %12814 = vmatmul.mubr.bf16.gmra.mrb[64].mxu0 %v22318_v47  ;;  %v18698_v47 = vld [vmem:[#allocation6 + $0x1a80] ss:$24 sps:$4 sm:$0xff]  }
 0x930   :  { %12823 = vmatprep.mubr.bf16.mxu0 %v22319_v54  ;;  %12911 = vmatpush1.bf16.msra.mxu0 %v18683_v17  ;;  %v22322_v17 = vld [vmem:[#allocation29_spill] sm:$0xff] }
 0x931   :  { %12912 = vmatprep.subr.bf16.mxu0 %v18688_v5  ;;  %v22323_v5 = vld [vmem:[#allocation32_spill] sm:$0xff] }
 0x932   :  { %v18703_v54 = vld [vmem:[#allocation6 + $0x1ab4] ss:$24 sps:$4 sm:$0xff]  }
 0x934   :  { %12913 = vmatpush1.bf16.msra.mxu0 %v18686_v10  ;;  %v18701_v10 = vld [vmem:[#allocation6 + $0x1ab0] ss:$24 sps:$4 sm:$0xff]  }
 0x935   :  { %12914 = vmatprep.subr.bf16.mxu0 %v18691_v7  ;;  %v18706_v7 = vld [vmem:[#allocation6 + $0x1ae4] ss:$24 sps:$4 sm:$0xff]  }
 0x937   :  { %12824 = vmatmul.mubr.bf16.gmra.mrb[68].mxu0 %v22320_v9  ;;  %v18704_v9 = vld [vmem:[#allocation6 + $0x1ae0] ss:$24 sps:$4 sm:$0xff]  }
 0x938   :  { %12833 = vmatprep.mubr.bf16.mxu0 %v22321_v37  ;;  %12915 = vmatpush1.bf16.msra.mxu0 %v18689_v15  ;;  %v22324_v15 = vld [vmem:[#allocation31_spill] sm:$0xff]  ;;  %v18784_v37 = vld [vmem:[#allocation6 + $0x1b14] ss:$24 sps:$4 sm:$0xff]  }
 0x939   :  { %12916 = vmatprep.subr.bf16.mxu0 %v18694_v46  ;;  %v22325_v46 = vld [vmem:[#allocation34_spill] sm:$0xff] }
 0x93c   :  { %12917 = vmatpush1.bf16.msra.mxu0 %v18692_v43  ;;  %v22326_v43 = vld [vmem:[#allocation33_spill] sm:$0xff] }
 0x93d   :  { %12918 = vmatprep.subr.bf16.mxu0 %v18697_v31  ;;  %v22327_v31 = vld [vmem:[#allocation36_spill] sm:$0xff] }
 0x93f   :  { %12834 = vmatmul.mubr.bf16.gmra.mrb[72].mxu0 %v22322_v17  ;;  %v22330_v17 = vld [vmem:[#allocation37_spill] sm:$0xff] }
 0x940   :  { %12843 = vmatprep.mubr.bf16.mxu0 %v22323_v5  ;;  %12919 = vmatpush1.bf16.msra.mxu0 %v18695_v61  ;;  %v22328_v61 = vld [vmem:[#allocation35_spill] sm:$0xff]  ;;  %v22331_v5 = vld [vmem:[#allocation40_spill] sm:$0xff] }
 0x941   :  { %12920 = vmatprep.subr.bf16.mxu0 %v18700_v36  ;;  %v22329_v36 = vld [vmem:[#allocation38_spill] sm:$0xff] }
 0x944   :  { %12921 = vmatpush1.bf16.msra.mxu0 %v18698_v47  ;;  %v22332_v47 = vld [vmem:[#allocation39_spill] sm:$0xff] }
 0x945   :  { %12922 = vmatprep.subr.bf16.mxu0 %v18703_v54  ;;  %v22333_v54 = vld [vmem:[#allocation46_spill] sm:$0xff] }
 0x947   :  { %12844 = vmatmul.mubr.bf16.gmra.mrb[76].mxu0 %v22324_v15  ;;  %v18785_v15 = vld [vmem:[#allocation6 + $0x1b10] ss:$24 sps:$4 sm:$0xff]  }
 0x948   :  { %12853 = vmatprep.mubr.bf16.mxu0 %v22325_v46  ;;  %12923 = vmatpush1.bf16.msra.mxu0 %v18701_v10  ;;  %v22334_v10 = vld [vmem:[#allocation45_spill] sm:$0xff]  ;;  %v18786_v46 = vld [vmem:[#allocation6 + $0x1b44] ss:$24 sps:$4 sm:$0xff]  }
 0x949   :  { %12924 = vmatprep.subr.bf16.mxu0 %v18706_v7  ;;  %v22335_v7 = vld [vmem:[#allocation48_spill] sm:$0xff] }
 0x94c   :  { %12925 = vmatpush1.bf16.msra.mxu0 %v18704_v9  ;;  %v18787_v9 = vld [vmem:[#allocation6 + $0x1b40] ss:$24 sps:$4 sm:$0xff]  }
 0x94d   :  { %13047 = vmatprep.subr.bf16.mxu0 %v18784_v37  ;;  %v18788_v37 = vld [vmem:[#allocation6 + $0x1b74] ss:$24 sps:$4 sm:$0xff]  }
 0x94f   :  { %12854 = vmatmul.mubr.bf16.gmra.mrb[80].mxu0 %v22326_v43  ;;  %v22336_v43 = vld [vmem:[#allocation47_spill] sm:$0xff] }
 0x950   :  { %12863 = vmatprep.mubr.bf16.mxu0 %v22327_v31  ;;  %v22337_v31 = vld [vmem:[#allocation50_spill] sm:$0xff] }
 0x957   :  { %12864 = vmatmul.mubr.bf16.gmra.mrb[84].mxu0 %v22328_v61  ;;  %v18789_v61 = vld [vmem:[#allocation6 + $0x1b70] ss:$24 sps:$4 sm:$0xff]  }
 0x958   :  { %12873 = vmatprep.mubr.bf16.mxu0 %v22329_v36  ;;  %v18790_v36 = vld [vmem:[#allocation6 + $0x1ba4] ss:$24 sps:$4 sm:$0xff]  }
 0x95f   :  { %12874 = vmatmul.mubr.bf16.gmra.mrb[88].mxu0 %v22330_v17  ;;  %v18791_v17 = vld [vmem:[#allocation6 + $0x1ba0] ss:$24 sps:$4 sm:$0xff]  }
 0x960   :  { %12883 = vmatprep.mubr.bf16.mxu0 %v22331_v5  ;;  %v18792_v5 = vld [vmem:[#allocation6 + $0x1bd4] ss:$24 sps:$4 sm:$0xff]  }
 0x967   :  { %12884 = vmatmul.mubr.bf16.gmra.mrb[92].mxu0 %v22332_v47  ;;  %v22338_v47 = vld [vmem:[#allocation49_spill] sm:$0xff] }
 0x968   :  { %12926 = vmatprep.mubr.bf16.mxu0 %v22333_v54  ;;  %v22339_v54 = vld [vmem:[#allocation52_spill] sm:$0xff] }
 0x96f   :  { %12927 = vmatmul.mubr.bf16.vlgmr.msra.gmra.mrb[48].mxu0 %v22334_v10  ;;  %v18793_v10 = vld [vmem:[#allocation6 + $0x1bd0] ss:$24 sps:$4 sm:$0xff]  }
 0x970   :  { %12936 = vmatprep.mubr.bf16.mxu0 %v22335_v7  ;;  %13048 = vmatpush1.bf16.msra.mxu0 %v18785_v15  ;;  %v18794_v7 = vld [vmem:[#allocation6 + $0x1c04] ss:$24 sps:$4 sm:$0xff]  }
 0x971   :  { %13049 = vmatprep.subr.bf16.mxu0 %v18786_v46  ;;  %v22340_v46 = vld [vmem:[#allocation110_spill] sm:$0xff] }
 0x974   :  { %13050 = vmatpush1.bf16.msra.mxu0 %v18787_v9 }
 0x975   :  { %13051 = vmatprep.subr.bf16.mxu0 %v18788_v37 }
 0x977   :  { %12937 = vmatmul.mubr.bf16.gmra.mrb[52].mxu0 %v22336_v43  ;;  %v22341_v43 = vld [vmem:[#allocation111_spill] sm:$0xff] }
 0x978   :  { %12946 = vmatprep.mubr.bf16.mxu0 %v22337_v31  ;;  %13052 = vmatpush1.bf16.msra.mxu0 %v18789_v61 }
 0x979   :  { %13053 = vmatprep.subr.bf16.mxu0 %v18790_v36  ;;  %v18795_v36 = vld [vmem:[#allocation6 + $0x1c00] ss:$24 sps:$4 sm:$0xff]  }
 0x97c   :  { %13054 = vmatpush1.bf16.msra.mxu0 %v18791_v17  ;;  %v21055_v17 = vld [vmem:[#allocation7] sm:$0x3f] }
 0x97d   :  { %13055 = vmatprep.subr.bf16.mxu0 %v18792_v5  ;;  %22342 = vst [vmem:[#allocation98_spill] sm:$0xff] %v21055_v17  ;;  %v22343_v5 = vld [vmem:[#allocation12_spill] sm:$0xff] }
 0x97e   :  { %v22344_v24 = vsub.s32 0, %v22343_v5 }
 0x97f   :  { %12947 = vmatmul.mubr.bf16.gmra.mrb[56].mxu0 %v22338_v47 }
 0x980   :  { %12956 = vmatprep.mubr.bf16.mxu0 %v22339_v54  ;;  %13056 = vmatpush1.bf16.msra.mxu0 %v18793_v10  ;;  %v21060_v47 = vrot.slane %v21055_v17, %v22344_v24  ;;  %v22345_v54 = vld [vmem:[#allocation112_spill] sm:$0xff] }
 0x981   :  { %13057 = vmatprep.subr.bf16.mxu0 %v18794_v7  ;;  %v18797_v7 = vld [vmem:[#allocation6 + $0x1c34] ss:$24 sps:$4 sm:$0xff]  }
 0x982   :  { %v12010_v15 = vpop.f32.mrb[0].mxu0 }
 0x983   :  { %v15464_v9 = vadd.f32 %v12010_v15, %v22340_v46  ;;  %v12012_v37 = vpop.f32.mrb[1].mxu0  ;;  %v22346_v15 = vsub.s32 1, %v22343_v5  ;;  %v22350_v5 = vld [vmem:[#allocation114_spill] sm:$0xff] }
 0x984   :  { %v15465_v31 = vadd.f32 %v12012_v37, %v22341_v43  ;;  %v12014_v61 = vpop.f32.mrb[2].mxu0  ;;  %13058 = vmatpush1.bf16.msra.mxu0 %v18795_v36  ;;  %v22347_v37 = vld [vmem:[#allocation113_spill] sm:$0xff]  ;;  %v22348_v36 = vld [vmem:[#allocation51_spill] sm:$0xff] }
 0x985   :  { %v15466_v10 = vadd.f32 %v12014_v61, %v22345_v54  ;;  %v12016_v18 = vpop.f32.mrb[3].mxu0  ;;  %13059 = vmatprep.subr.bf16.mxu0 %v18797_v7  ;;  %v21066_v46 = vrot.slane %v21055_v17, %v22346_v15  ;;  %v13529_v24 = vadd.f32 %v15464_v9, %v21060_v47 }
 0x986   :  { %v15467_v43 = vadd.f32 %v12016_v18, %v22347_v37  ;;  %v22351_v37 = vld [vmem:[#allocation115_spill] sm:$0xff] }
 0x987   :  { %12957 = vmatmul.mubr.bf16.gmra.mrb[60].mxu0 %v22348_v36  ;;  %v13530_v61 = vadd.f32 %v15465_v31, %v21066_v46  ;;  %v13535_v7 = vadd.f32 %v15466_v10, %v21060_v47  ;;  %v18801_v31 = vld [vmem:[#allocation6 + $0x1c94] ss:$24 sps:$4 sm:$0xff]  }
 0x988   :  { %12966 = vmatprep.mubr.bf16.mxu0 %v22349_v50  ;;  %13060 = vmatpush1.bf16.msra.mxu0 %v18798_v27  ;;  %v13536_v18 = vadd.f32 %v15467_v43, %v21066_v46  ;;  %v18800_v50 = vld [vmem:[#allocation6 + $0x1c60] ss:$24 sps:$4 sm:$0xff]   ;;  %v13673_v27 = vmax.f32 %v13529_v24, 0.0 }
 0x989   :  { %13061 = vmatprep.subr.bf16.mxu0 %v18799_v63  ;;  %v13674_v10 = vmax.f32 %v13530_v61, 0.0 }
 0x98a   :  { %v12020_v54 = vpop.f32.mrb[4].mxu0 }
 0x98b   :  { %v15468_v15 = vadd.f32 %v12020_v54, %v22350_v5  ;;  %v12022_v17 = vpop.f32.mrb[5].mxu0  ;;  %v13817_v5 = vld [vmem:[%s21691_s5] sm:$0xff]  ;;  %v22353_v54 = vld [vmem:[#allocation117_spill] sm:$0xff] }
 0x98c   :  { %v15469_v36 = vadd.f32 %v12022_v17, %v22351_v37  ;;  %v12024_v33 = vpop.f32.mrb[6].mxu0  ;;  %13062 = vmatpush1.bf16.msra.mxu0 %v18800_v50  ;;  %v13829_v17 = vld [vmem:[%s21691_s5 + $0x60] sm:$0xff]  ;;  %v13830_v37 = vld [vmem:[%s21691_s5 + $0x68] sm:$0xff]  ;;  %v22354_v50 = vld [vmem:[#allocation53_spill] sm:$0xff]  ;;  %v13961_v25 = vmul.f32 %v13817_v5, %v13673_v27 }
 0x98d   :  { %v13541_v9 = vadd.f32 %v15468_v15, %v21060_v47  ;;  %v15470_v63 = vadd.f32 %v12024_v33, %v22352_v13  ;;  %v12026_v19 = vpop.f32.mrb[7].mxu0  ;;  %13063 = vmatprep.subr.bf16.mxu0 %v18801_v31  ;;  %v13818_v13 = vld [vmem:[%s21691_s5 + $0x8] sm:$0xff]  ;;  %v13679_v33 = vmax.f32 %v13535_v7, 0.0  ;;  %v13680_v31 = vmax.f32 %v13536_v18, 0.0  ;;  %v13836_v18 = vld [vmem:[%s21691_s5 + $0x98] sm:$0xff] }
 0x98e   :  { %v13542_v43 = vadd.f32 %v15469_v36, %v21066_v46  ;;  %v15471_v24 = vadd.f32 %v12026_v19, %v22353_v54  ;;  %v13823_v36 = vld [vmem:[%s21691_s5 + $0x30] sm:$0xff]  ;;  %v13962_v59 = vmul.f32 %v13818_v13, %v13674_v10  ;;  %v22356_v27 = vld [vmem:[#allocation118_spill] sm:$0xff] }
 0x98f   :  { %v13685_v15 = vmax.f32 %v13541_v9, 0.0  ;;  %v13547_v61 = vadd.f32 %v15470_v63, %v21060_v47  ;;  %12967 = vmatmul.mubr.bf16.gmra.mrb[64].mxu0 %v22354_v50  ;;  %v13835_v54 = vld [vmem:[%s21691_s5 + $0x90] sm:$0xff]  ;;  %v13824_v63 = vld [vmem:[%s21691_s5 + $0x38] sm:$0xff] }
 0x990   :  { %v13686_v19 = vmax.f32 %v13542_v43, 0.0  ;;  %v13548_v7 = vadd.f32 %v15471_v24, %v21066_v46  ;;  %v22355_v9 = vld [vmem:[#allocation56_spill] sm:$0xff]  ;;  %13064 = vmatpush1.bf16.msra.mxu0 %v18802_v41  ;;  %v13968_v8 = vmul.f32 %v13824_v63, %v13680_v31 }
 0x991   :  { %12976 = vmatprep.mubr.bf16.mxu0 %v22355_v9  ;;  %v13973_v50 = vmul.f32 %v13829_v17, %v13685_v15  ;;  %v13691_v57 = vmax.f32 %v13547_v61, 0.0  ;;  %v18803_v43 = vld [vmem:[#allocation6 + $0x1cc4] ss:$24 sps:$4 sm:$0xff]   ;;  %v13967_v9 = vmul.f32 %v13823_v36, %v13679_v33  ;;  %v18805_v33 = vld [vmem:[#allocation6 + $0x1cf4] ss:$24 sps:$4 sm:$0xff]  }
 0x992   :  { %13065 = vmatprep.subr.bf16.mxu0 %v18803_v43  ;;  %v13974_v2 = vmul.f32 %v13830_v37, %v13686_v19  ;;  %v13692_v24 = vmax.f32 %v13548_v7, 0.0  ;;  %v12030_v1 = vpop.f32.mrb[8].mxu0  ;;  %v22357_v15 = vld [vmem:[#allocation119_spill] sm:$0xff]  ;;  %v22358_v13 = vld [vmem:[#allocation120_spill] sm:$0xff]  ;;  %v22361_v7 = vld [vmem:[#allocation58_spill] sm:$0xff] }
 0x993   :  { %v14105_v62 = vadd.f32 %v13973_v50, %v13961_v25  ;;  %v13979_v41 = vmul.f32 %v13835_v54, %v13691_v57  ;;  %v15472_v5 = vadd.f32 %v12030_v1, %v22356_v27  ;;  %v12032_v56 = vpop.f32.mrb[9].mxu0  ;;  %v13841_v1 = vld [vmem:[%s21691_s5 + $0xc0] sm:$0xff]  ;;  %v18806_v63 = vld [vmem:[#allocation6 + $0x1cf0] ss:$24 sps:$4 sm:$0xff]  }
 0x994   :  { %v14106_v40 = vadd.f32 %v13974_v2, %v13962_v59  ;;  %v13980_v17 = vmul.f32 %v13836_v18, %v13692_v24  ;;  %v15473_v61 = vadd.f32 %v12032_v56, %v22357_v15  ;;  %v12034_v23 = vpop.f32.mrb[10].mxu0  ;;  %13066 = vmatpush1.bf16.msra.mxu0 %v18804_v28  ;;  %v22359_v59 = vld [vmem:[#allocation121_spill] sm:$0xff]  ;;  %v13842_v28 = vld [vmem:[%s21691_s5 + $0xc8] sm:$0xff]  ;;  %v22362_v15 = vld [vmem:[#allocation122_spill] sm:$0xff] }
 0x995   :  { %v14111_v14 = vadd.f32 %v13979_v41, %v13967_v9  ;;  %v13553_v10 = vadd.f32 %v15472_v5, %v21060_v47  ;;  %v15474_v37 = vadd.f32 %v12034_v23, %v22358_v13  ;;  %v12036_v19 = vpop.f32.mrb[11].mxu0  ;;  %13067 = vmatprep.subr.bf16.mxu0 %v18805_v33  ;;  %v22360_v23 = vld [vmem:[#allocation55_spill] sm:$0xff]  ;;  %v13848_v43 = vld [vmem:[%s21691_s5 + $0xf8] sm:$0xff] }
 0x996   :  { %v14112_v57 = vadd.f32 %v13980_v17, %v13968_v8  ;;  %v13554_v2 = vadd.f32 %v15473_v61, %v21066_v46  ;;  %v15475_v56 = vadd.f32 %v12036_v19, %v22359_v59  ;;  %v13847_v8 = vld [vmem:[%s21691_s5 + $0xf0] sm:$0xff]  ;;  %v18807_v24 = vld [vmem:[#allocation6 + $0x1d24] ss:$24 sps:$4 sm:$0xff]  }
 0x997   :  { %v13697_v25 = vmax.f32 %v13553_v10, 0.0  ;;  %v13559_v36 = vadd.f32 %v15474_v37, %v21060_v47  ;;  %12977 = vmatmul.mubr.bf16.gmra.mrb[68].mxu0 %v22360_v23  ;;  %v22363_v19 = vld [vmem:[#allocation123_spill] sm:$0xff]  ;;  %v18809_v23 = vld [vmem:[#allocation6 + $0x1d54] ss:$24 sps:$4 sm:$0xff]  }
 0x998   :  { %v13698_v31 = vmax.f32 %v13554_v2, 0.0  ;;  %v13560_v54 = vadd.f32 %v15475_v56, %v21066_v46  ;;  %12986 = vmatprep.mubr.bf16.mxu0 %v22361_v7  ;;  %13068 = vmatpush1.bf16.msra.mxu0 %v18806_v63  ;;  %v18808_v2 = vld [vmem:[#allocation6 + $0x1d20] ss:$24 sps:$4 sm:$0xff]  }
 0x999   :  { %v13985_v50 = vmul.f32 %v13841_v1, %v13697_v25  ;;  %v13703_v18 = vmax.f32 %v13559_v36, 0.0  ;;  %13069 = vmatprep.subr.bf16.mxu0 %v18807_v24  ;;  %v22364_v25 = vld [vmem:[#allocation124_spill] sm:$0xff] }
 0x99a   :  { %v13986_v9 = vmul.f32 %v13842_v28, %v13698_v31  ;;  %v13704_v41 = vmax.f32 %v13560_v54, 0.0  ;;  %v12040_v27 = vpop.f32.mrb[12].mxu0  ;;  %v13853_v31 = vld [vmem:[%s21691_s5 + $0x120] sm:$0xff]  ;;  %v22367_v24 = vld [vmem:[#allocation60_spill] sm:$0xff] }
 0x99b   :  { %v14117_v5 = vadd.f32 %v14105_v62, %v13985_v50  ;;  %v13991_v17 = vmul.f32 %v13847_v8, %v13703_v18  ;;  %v15476_v61 = vadd.f32 %v12040_v27, %v22362_v15  ;;  %v12042_v10 = vpop.f32.mrb[13].mxu0  ;;  %v22365_v8 = vld [vmem:[#allocation125_spill] sm:$0xff]  ;;  %v18811_v15 = vld [vmem:[#allocation6 + $0x1d84] ss:$24 sps:$4 sm:$0xff]  }
 0x99c   :  { %v14118_v13 = vadd.f32 %v14106_v40, %v13986_v9  ;;  %v13992_v37 = vmul.f32 %v13848_v43, %v13704_v41  ;;  %v15477_v33 = vadd.f32 %v12042_v10, %v22363_v19  ;;  %v12044_v1 = vpop.f32.mrb[14].mxu0  ;;  %13070 = vmatpush1.bf16.msra.mxu0 %v18808_v2  ;;  %v22366_v50 = vld [vmem:[#allocation57_spill] sm:$0xff] }
 0x99d   :  { %v14123_v59 = vadd.f32 %v14111_v14, %v13991_v17  ;;  %v13565_v56 = vadd.f32 %v15476_v61, %v21060_v47  ;;  %v15478_v36 = vadd.f32 %v12044_v1, %v22364_v25  ;;  %v12046_v28 = vpop.f32.mrb[15].mxu0  ;;  %13071 = vmatprep.subr.bf16.mxu0 %v18809_v23  ;;  %v13854_v14 = vld [vmem:[%s21691_s5 + $0x128] sm:$0xff]  ;;  %v18810_v9 = vld [vmem:[#allocation6 + $0x1d50] ss:$24 sps:$4 sm:$0xff]   ;;  %v22368_v1 = vld [vmem:[#allocation126_spill] sm:$0xff] }
 0x99e   :  { %v14124_v62 = vadd.f32 %v14112_v57, %v13992_v37  ;;  %v13566_v40 = vadd.f32 %v15477_v33, %v21066_v46  ;;  %v15479_v54 = vadd.f32 %v12046_v28, %v22365_v8  ;;  %v13859_v57 = vld [vmem:[%s21691_s5 + $0x150] sm:$0xff]  ;;  %v13860_v17 = vld [vmem:[%s21691_s5 + $0x158] sm:$0xff]  ;;  %v22369_v28 = vld [vmem:[#allocation127_spill] sm:$0xff] }
 0x99f   :  { %v13709_v7 = vmax.f32 %v13565_v56, 0.0  ;;  %v13571_v63 = vadd.f32 %v15478_v36, %v21060_v47  ;;  %12987 = vmatmul.mubr.bf16.gmra.mrb[72].mxu0 %v22366_v50  ;;  %v18813_v50 = vld [vmem:[#allocation6 + $0x1db4] ss:$24 sps:$4 sm:$0xff]  }
 0x9a0   :  { %v13710_v18 = vmax.f32 %v13566_v40, 0.0  ;;  %v13572_v43 = vadd.f32 %v15479_v54, %v21066_v46  ;;  %12996 = vmatprep.mubr.bf16.mxu0 %v22367_v24  ;;  %13072 = vmatpush1.bf16.msra.mxu0 %v18810_v9  ;;  %v18812_v40 = vld [vmem:[#allocation6 + $0x1d80] ss:$24 sps:$4 sm:$0xff]  }
 0x9a1   :  { %v13997_v41 = vmul.f32 %v13853_v31, %v13709_v7  ;;  %v13715_v27 = vmax.f32 %v13571_v63, 0.0  ;;  %13073 = vmatprep.subr.bf16.mxu0 %v18811_v15  ;;  %v22370_v7 = vld [vmem:[#allocation128_spill] sm:$0xff]  ;;  %v22373_v15 = vld [vmem:[#allocation62_spill] sm:$0xff] }
 0x9a2   :  { %v13998_v61 = vmul.f32 %v13854_v14, %v13710_v18  ;;  %v13716_v10 = vmax.f32 %v13572_v43, 0.0  ;;  %v12050_v37 = vpop.f32.mrb[16].mxu0  ;;  %v13865_v18 = vld [vmem:[%s21691_s5 + $0x180] sm:$0xff] }
 0x9a3   :  { %v14129_v19 = vadd.f32 %v14117_v5, %v13997_v41  ;;  %v14003_v33 = vmul.f32 %v13859_v57, %v13715_v27  ;;  %v15480_v2 = vadd.f32 %v12050_v37, %v22368_v1  ;;  %v12052_v56 = vpop.f32.mrb[17].mxu0  ;;  %v22371_v57 = vld [vmem:[#allocation129_spill] sm:$0xff]  ;;  %v22372_v41 = vld [vmem:[#allocation59_spill] sm:$0xff] }
 0x9a4   :  { %v14130_v25 = vadd.f32 %v14118_v13, %v13998_v61  ;;  %v14004_v36 = vmul.f32 %v13860_v17, %v13716_v10  ;;  %v15481_v23 = vadd.f32 %v12052_v56, %v22369_v28  ;;  %v12054_v31 = vpop.f32.mrb[18].mxu0  ;;  %13074 = vmatpush1.bf16.msra.mxu0 %v18812_v40  ;;  %v18814_v61 = vld [vmem:[#allocation6 + $0x1db0] ss:$24 sps:$4 sm:$0xff]   ;;  %v18815_v1 = vld [vmem:[#allocation6 + $0x1de4] ss:$24 sps:$4 sm:$0xff]  }
 0x9a5   :  { %v14135_v8 = vadd.f32 %v14123_v59, %v14003_v33  ;;  %v13577_v54 = vadd.f32 %v15480_v2, %v21060_v47  ;;  %v15482_v63 = vadd.f32 %v12054_v31, %v22370_v7  ;;  %v12056_v14 = vpop.f32.mrb[19].mxu0  ;;  %13075 = vmatprep.subr.bf16.mxu0 %v18813_v50  ;;  %v13866_v59 = vld [vmem:[%s21691_s5 + $0x188] sm:$0xff]  ;;  %v13872_v33 = vld [vmem:[%s21691_s5 + $0x1b8] sm:$0xff] }
 0x9a6   :  { %v14136_v5 = vadd.f32 %v14124_v62, %v14004_v36  ;;  %v13578_v13 = vadd.f32 %v15481_v23, %v21066_v46  ;;  %v15483_v43 = vadd.f32 %v12056_v14, %v22371_v57  ;;  %v13871_v62 = vld [vmem:[%s21691_s5 + $0x1b0] sm:$0xff]  ;;  %v22374_v40 = vld [vmem:[#allocation130_spill] sm:$0xff]  ;;  %v22375_v50 = vld [vmem:[#allocation131_spill] sm:$0xff] }
 0x9a7   :  { %v13721_v24 = vmax.f32 %v13577_v54, 0.0  ;;  %v13583_v9 = vadd.f32 %v15482_v63, %v21060_v47  ;;  %12997 = vmatmul.mubr.bf16.gmra.mrb[76].mxu0 %v22372_v41  ;;  %v18709_v2 = vld [vmem:[#allocation6 + $0x1e14] ss:$24 sps:$4 sm:$0xff]   ;;  %v18816_v57 = vld [vmem:[#allocation6 + $0x1de0] ss:$24 sps:$4 sm:$0xff]  }
 0x9a8   :  { %v13722_v27 = vmax.f32 %v13578_v13, 0.0  ;;  %v13584_v17 = vadd.f32 %v15483_v43, %v21066_v46  ;;  %13006 = vmatprep.mubr.bf16.mxu0 %v22373_v15  ;;  %13076 = vmatpush1.bf16.msra.mxu0 %v18814_v61 }
 0x9a9   :  { %v14009_v10 = vmul.f32 %v13865_v18, %v13721_v24  ;;  %v13727_v37 = vmax.f32 %v13583_v9, 0.0  ;;  %13077 = vmatprep.subr.bf16.mxu0 %v18815_v1  ;;  %v22376_v9 = vld [vmem:[#allocation132_spill] sm:$0xff] }
 0x9aa   :  { %v14010_v56 = vmul.f32 %v13866_v59, %v13722_v27  ;;  %v13728_v36 = vmax.f32 %v13584_v17, 0.0  ;;  %v12060_v28 = vpop.f32.mrb[20].mxu0  ;;  %v22379_v1 = vld [vmem:[#allocation64_spill] sm:$0xff] }
 0x9ab   :  { %v14141_v23 = vadd.f32 %v14129_v19, %v14009_v10  ;;  %v14015_v31 = vmul.f32 %v13871_v62, %v13727_v37  ;;  %v15484_v54 = vadd.f32 %v12060_v28, %v22374_v40  ;;  %v12062_v7 = vpop.f32.mrb[21].mxu0  ;;  %v13877_v19 = vld [vmem:[%s21691_s5 + $0x1e0] sm:$0xff]  ;;  %v22377_v62 = vld [vmem:[#allocation133_spill] sm:$0xff] }
 0x9ac   :  { %v14142_v63 = vadd.f32 %v14130_v25, %v14010_v56  ;;  %v14016_v14 = vmul.f32 %v13872_v33, %v13728_v36  ;;  %v15485_v18 = vadd.f32 %v12062_v7, %v22375_v50  ;;  %v12064_v13 = vpop.f32.mrb[22].mxu0  ;;  %13078 = vmatpush1.bf16.msra.mxu0 %v18816_v57  ;;  %v22378_v10 = vld [vmem:[#allocation61_spill] sm:$0xff] }
 0x9ad   :  { %v14147_v43 = vadd.f32 %v14135_v8, %v14015_v31  ;;  %v13589_v24 = vadd.f32 %v15484_v54, %v21060_v47  ;;  %v15486_v41 = vadd.f32 %v12064_v13, %v22376_v9  ;;  %v12066_v59 = vpop.f32.mrb[23].mxu0  ;;  %13200 = vmatprep.subr.bf16.mxu0 %v18709_v2  ;;  %v13878_v8 = vld [vmem:[%s21691_s5 + $0x1e8] sm:$0xff]  ;;  %v13884_v36 = vld [vmem:[%s21691_s5 + $0x218] sm:$0xff] }
 0x9ae   :  { %v14148_v27 = vadd.f32 %v14136_v5, %v14016_v14  ;;  %v13590_v25 = vadd.f32 %v15485_v18, %v21066_v46  ;;  %v15487_v17 = vadd.f32 %v12066_v59, %v22377_v62  ;;  %v13883_v5 = vld [vmem:[%s21691_s5 + $0x210] sm:$0xff]  ;;  %v22380_v14 = vld [vmem:[#allocation134_spill] sm:$0xff] }
 0x9af   :  { %v13733_v15 = vmax.f32 %v13589_v24, 0.0  ;;  %v13595_v61 = vadd.f32 %v15486_v41, %v21060_v47  ;;  %13007 = vmatmul.mubr.bf16.gmra.mrb[80].mxu0 %v22378_v10  ;;  %v22381_v24 = vld [vmem:[#allocation135_spill] sm:$0xff] }
 0x9b0   :  { %v13734_v37 = vmax.f32 %v13590_v25, 0.0  ;;  %v13596_v33 = vadd.f32 %v15487_v17, %v21066_v46  ;;  %13016 = vmatprep.mubr.bf16.mxu0 %v22379_v1  ;;  %v22382_v25 = vld [vmem:[#allocation136_spill] sm:$0xff] }
 0x9b1   :  { %v14021_v2 = vmul.f32 %v13877_v19, %v13733_v15  ;;  %v13739_v56 = vmax.f32 %v13595_v61, 0.0  ;;  %v22383_v61 = vld [vmem:[#allocation137_spill] sm:$0xff] }
 0x9b2   :  { %v14022_v28 = vmul.f32 %v13878_v8, %v13734_v37  ;;  %v13740_v31 = vmax.f32 %v13596_v33, 0.0  ;;  %v12070_v40 = vpop.f32.mrb[24].mxu0  ;;  %v13890_v37 = vld [vmem:[%s21691_s5 + $0x248] sm:$0xff] }
 0x9b3   :  { %v14153_v54 = vadd.f32 %v14141_v23, %v14021_v2  ;;  %v14027_v7 = vmul.f32 %v13883_v5, %v13739_v56  ;;  %v15488_v50 = vadd.f32 %v12070_v40, %v22380_v14  ;;  %v12072_v18 = vpop.f32.mrb[25].mxu0  ;;  %v13889_v23 = vld [vmem:[%s21691_s5 + $0x240] sm:$0xff] }
 0x9b4   :  { %v14154_v13 = vadd.f32 %v14142_v63, %v14022_v28  ;;  %v14028_v57 = vmul.f32 %v13884_v36, %v13740_v31  ;;  %v15489_v9 = vadd.f32 %v12072_v18, %v22381_v24  ;;  %v12074_v41 = vpop.f32.mrb[26].mxu0  ;;  %v22384_v5 = vld [vmem:[#allocation63_spill] sm:$0xff]  ;;  %v22385_v2 = vld [vmem:[#allocation66_spill] sm:$0xff] }
 0x9b5   :  { %v14159_v59 = vadd.f32 %v14147_v43, %v14027_v7  ;;  %v13601_v19 = vadd.f32 %v15488_v50, %v21060_v47  ;;  %v15490_v62 = vadd.f32 %v12074_v41, %v22382_v25  ;;  %v12076_v17 = vpop.f32.mrb[27].mxu0  ;;  %v13896_v28 = vld [vmem:[%s21691_s5 + $0x278] sm:$0xff] }
 0x9b6   :  { %v14160_v15 = vadd.f32 %v14148_v27, %v14028_v57  ;;  %v13602_v8 = vadd.f32 %v15489_v9, %v21066_v46  ;;  %v15491_v10 = vadd.f32 %v12076_v17, %v22383_v61  ;;  %v13895_v27 = vld [vmem:[%s21691_s5 + $0x270] sm:$0xff]  ;;  %v22386_v18 = vld [vmem:[#allocation138_spill] sm:$0xff] }
 0x9b7   :  { %v13745_v63 = vmax.f32 %v13601_v19, 0.0  ;;  %v13607_v43 = vadd.f32 %v15490_v62, %v21060_v47  ;;  %13017 = vmatmul.mubr.bf16.gmra.mrb[84].mxu0 %v22384_v5  ;;  %v22387_v19 = vld [vmem:[#allocation139_spill] sm:$0xff] }
 0x9b8   :  { %v13746_v33 = vmax.f32 %v13602_v8, 0.0  ;;  %v13608_v1 = vadd.f32 %v15491_v10, %v21066_v46  ;;  %13026 = vmatprep.mubr.bf16.mxu0 %v22385_v2  ;;  %v22388_v8 = vld [vmem:[#allocation140_spill] sm:$0xff] }
 0x9b9   :  { %v14033_v56 = vmul.f32 %v13889_v23, %v13745_v63  ;;  %v13751_v36 = vmax.f32 %v13607_v43, 0.0  ;;  %v22389_v43 = vld [vmem:[#allocation141_spill] sm:$0xff] }
 0x9ba   :  { %v14034_v31 = vmul.f32 %v13890_v37, %v13746_v33  ;;  %v13752_v40 = vmax.f32 %v13608_v1, 0.0  ;;  %v12080_v7 = vpop.f32.mrb[28].mxu0  ;;  %v13902_v33 = vld [vmem:[%s21691_s5 + $0x2a8] sm:$0xff] }
 0x9bb   :  { %v14165_v14 = vadd.f32 %v14153_v54, %v14033_v56  ;;  %v14039_v50 = vmul.f32 %v13895_v27, %v13751_v36  ;;  %v15492_v57 = vadd.f32 %v12080_v7, %v22386_v18  ;;  %v12082_v24 = vpop.f32.mrb[29].mxu0  ;;  %v13901_v54 = vld [vmem:[%s21691_s5 + $0x2a0] sm:$0xff]  ;;  %v22390_v27 = vld [vmem:[#allocation65_spill] sm:$0xff]  ;;  %v22391_v56 = vld [vmem:[#allocation68_spill] sm:$0xff] }
 0x9bc   :  { %v14166_v9 = vadd.f32 %v14154_v13, %v14034_v31  ;;  %v14040_v41 = vmul.f32 %v13896_v28, %v13752_v40  ;;  %v15493_v25 = vadd.f32 %v12082_v24, %v22387_v19  ;;  %v12084_v62 = vpop.f32.mrb[30].mxu0  ;;  %v13908_v31 = vld [vmem:[%s21691_s5 + $0x2d8] sm:$0xff] }
 0x9bd   :  { %v14171_v17 = vadd.f32 %v14159_v59, %v14039_v50  ;;  %v13613_v23 = vadd.f32 %v15492_v57, %v21060_v47  ;;  %v15494_v61 = vadd.f32 %v12084_v62, %v22388_v8  ;;  %v12086_v10 = vpop.f32.mrb[31].mxu0  ;;  %v22392_v24 = vld [vmem:[#allocation142_spill] sm:$0xff] }
 0x9be   :  { %v14172_v63 = vadd.f32 %v14160_v15, %v14040_v41  ;;  %v13614_v37 = vadd.f32 %v15493_v25, %v21066_v46  ;;  %v15495_v5 = vadd.f32 %v12086_v10, %v22389_v43  ;;  %v13907_v15 = vld [vmem:[%s21691_s5 + $0x2d0] sm:$0xff] }
 0x9bf   :  { %v13757_v13 = vmax.f32 %v13613_v23, 0.0  ;;  %v13619_v59 = vadd.f32 %v15494_v61, %v21060_v47  ;;  %13027 = vmatmul.mubr.bf16.gmra.mrb[88].mxu0 %v22390_v27  ;;  %v22393_v23 = vld [vmem:[#allocation143_spill] sm:$0xff] }
 0x9c0   :  { %v13758_v1 = vmax.f32 %v13614_v37, 0.0  ;;  %v13620_v2 = vadd.f32 %v15495_v5, %v21066_v46  ;;  %13036 = vmatprep.mubr.bf16.mxu0 %v22391_v56  ;;  %v22394_v37 = vld [vmem:[#allocation144_spill] sm:$0xff] }
 0x9c1   :  { %v14045_v36 = vmul.f32 %v13901_v54, %v13757_v13  ;;  %v13763_v28 = vmax.f32 %v13619_v59, 0.0  ;;  %v22395_v59 = vld [vmem:[#allocation145_spill] sm:$0xff] }
 0x9c2   :  { %v14046_v40 = vmul.f32 %v13902_v33, %v13758_v1  ;;  %v13764_v7 = vmax.f32 %v13620_v2, 0.0  ;;  %v12090_v50 = vpop.f32.mrb[32].mxu0  ;;  %v13914_v1 = vld [vmem:[%s21691_s5 + $0x308] sm:$0xff] }
 0x9c3   :  { %v14177_v18 = vadd.f32 %v14165_v14, %v14045_v36  ;;  %v14051_v57 = vmul.f32 %v13907_v15, %v13763_v28  ;;  %v15496_v41 = vadd.f32 %v12090_v50, %v22392_v24  ;;  %v12092_v19 = vpop.f32.mrb[33].mxu0  ;;  %v13913_v14 = vld [vmem:[%s21691_s5 + $0x300] sm:$0xff] }
 0x9c4   :  { %v14178_v25 = vadd.f32 %v14166_v9, %v14046_v40  ;;  %v14052_v62 = vmul.f32 %v13908_v31, %v13764_v7  ;;  %v15497_v8 = vadd.f32 %v12092_v19, %v22393_v23  ;;  %v12094_v61 = vpop.f32.mrb[34].mxu0  ;;  %v22396_v15 = vld [vmem:[#allocation67_spill] sm:$0xff]  ;;  %v22397_v36 = vld [vmem:[#allocation74_spill] sm:$0xff] }
 0x9c5   :  { %v14183_v10 = vadd.f32 %v14171_v17, %v14051_v57  ;;  %v13625_v54 = vadd.f32 %v15496_v41, %v21060_v47  ;;  %v15498_v43 = vadd.f32 %v12094_v61, %v22394_v37  ;;  %v12096_v5 = vpop.f32.mrb[35].mxu0  ;;  %v13920_v40 = vld [vmem:[%s21691_s5 + $0x338] sm:$0xff] }
 0x9c6   :  { %v14184_v13 = vadd.f32 %v14172_v63, %v14052_v62  ;;  %v13626_v33 = vadd.f32 %v15497_v8, %v21066_v46  ;;  %v15499_v27 = vadd.f32 %v12096_v5, %v22395_v59  ;;  %v13919_v63 = vld [vmem:[%s21691_s5 + $0x330] sm:$0xff]  ;;  %v22398_v19 = vld [vmem:[#allocation146_spill] sm:$0xff] }
 0x9c7   :  { %v13769_v9 = vmax.f32 %v13625_v54, 0.0  ;;  %v13631_v17 = vadd.f32 %v15498_v43, %v21060_v47  ;;  %13037 = vmatmul.mubr.bf16.gmra.mrb[92].mxu0 %v22396_v15  ;;  %v22399_v54 = vld [vmem:[#allocation147_spill] sm:$0xff]  ;;  %v18707_v5 = vld [vmem:[#allocation6 + $0x1e10] ss:$24 sps:$4 sm:$0xff]  }
 0x9c8   :  { %v13770_v2 = vmax.f32 %v13626_v33, 0.0  ;;  %v13632_v56 = vadd.f32 %v15499_v27, %v21066_v46  ;;  %13079 = vmatprep.mubr.bf16.mxu0 %v22397_v36  ;;  %v22400_v59 = vld [vmem:[#allocation148_spill] sm:$0xff]  ;;  %v22402_v36 = vld [vmem:[#allocation73_spill] sm:$0xff] }
 0x9c9   :  { %v14057_v28 = vmul.f32 %v13913_v14, %v13769_v9  ;;  %v13775_v31 = vmax.f32 %v13631_v17, 0.0 }
 0x9ca   :  { %v14058_v7 = vmul.f32 %v13914_v1, %v13770_v2  ;;  %v13776_v50 = vmax.f32 %v13632_v56, 0.0  ;;  %v12100_v57 = vpop.f32.mrb[36].mxu0  ;;  %v18712_v1 = vld [vmem:[#allocation6 + $0x1e44] ss:$24 sps:$4 sm:$0xff]  }
 0x9cb   :  { %v14189_v24 = vadd.f32 %v14177_v18, %v14057_v28  ;;  %v14063_v41 = vmul.f32 %v13919_v63, %v13775_v31  ;;  %v15500_v62 = vadd.f32 %v12100_v57, %v22398_v19  ;;  %v12102_v23 = vpop.f32.mrb[37].mxu0  ;;  %v13925_v18 = vld [vmem:[%s21691_s5 + $0x360] sm:$0xff]  ;;  %v18715_v19 = vld [vmem:[#allocation6 + $0x1e74] ss:$24 sps:$4 sm:$0xff]  }
 0x9cc   :  { %v14190_v8 = vadd.f32 %v14178_v25, %v14058_v7  ;;  %v14064_v61 = vmul.f32 %v13920_v40, %v13776_v50  ;;  %v15501_v37 = vadd.f32 %v12102_v23, %v22399_v54  ;;  %v12104_v43 = vpop.f32.mrb[38].mxu0  ;;  %v22401_v25 = vld [vmem:[#allocation149_spill] sm:$0xff]  ;;  %v22403_v40 = vld [vmem:[#allocation76_spill] sm:$0xff]  ;;  %v18710_v7 = vld [vmem:[#allocation6 + $0x1e40] ss:$24 sps:$4 sm:$0xff]  }
 0x9cd   :  { %v14195_v14 = vadd.f32 %v14183_v10, %v14063_v41  ;;  %v13637_v33 = vadd.f32 %v15500_v62, %v21060_v47  ;;  %v15502_v27 = vadd.f32 %v12104_v43, %v22400_v59  ;;  %v12106_v9 = vpop.f32.mrb[39].mxu0  ;;  %v13926_v10 = vld [vmem:[%s21691_s5 + $0x368] sm:$0xff]  ;;  %v13932_v41 = vld [vmem:[%s21691_s5 + $0x398] sm:$0xff] }
 0x9ce   :  { %v14196_v17 = vadd.f32 %v14184_v13, %v14064_v61  ;;  %v13638_v15 = vadd.f32 %v15501_v37, %v21066_v46  ;;  %v15503_v2 = vadd.f32 %v12106_v9, %v22401_v25  ;;  %v13931_v13 = vld [vmem:[%s21691_s5 + $0x390] sm:$0xff]  ;;  %v22404_v43 = vld [vmem:[#allocation150_spill] sm:$0xff] }
 0x9cf   :  { %v13781_v63 = vmax.f32 %v13637_v33, 0.0  ;;  %v13643_v56 = vadd.f32 %v15502_v27, %v21060_v47  ;;  %13080 = vmatmul.mubr.bf16.vlgmr.msra.gmra.mrb[48].mxu0 %v22402_v36  ;;  %v18713_v25 = vld [vmem:[#allocation6 + $0x1e70] ss:$24 sps:$4 sm:$0xff]   ;;  %v18718_v36 = vld [vmem:[#allocation6 + $0x1ea4] ss:$24 sps:$4 sm:$0xff]  }
 0x9d0   :  { %v13782_v28 = vmax.f32 %v13638_v15, 0.0  ;;  %v13644_v31 = vadd.f32 %v15503_v2, %v21066_v46  ;;  %13089 = vmatprep.mubr.bf16.mxu0 %v22403_v40  ;;  %13201 = vmatpush1.bf16.msra.mxu0 %v18707_v5  ;;  %v22405_v5 = vld [vmem:[#allocation151_spill] sm:$0xff] }
 0x9d1   :  { %v14069_v50 = vmul.f32 %v13925_v18, %v13781_v63  ;;  %v13787_v57 = vmax.f32 %v13643_v56, 0.0  ;;  %13202 = vmatprep.subr.bf16.mxu0 %v18712_v1  ;;  %v22406_v1 = vld [vmem:[#allocation152_spill] sm:$0xff] }
 0x9d2   :  { %v14070_v62 = vmul.f32 %v13926_v10, %v13782_v28  ;;  %v13788_v23 = vmax.f32 %v13644_v31, 0.0  ;;  %v12110_v61 = vpop.f32.mrb[40].mxu0  ;;  %v13937_v28 = vld [vmem:[%s21691_s5 + $0x3c0] sm:$0xff] }
 0x9d3   :  { %v14201_v54 = vadd.f32 %v14189_v24, %v14069_v50  ;;  %v14075_v37 = vmul.f32 %v13931_v13, %v13787_v57  ;;  %v15504_v33 = vadd.f32 %v12110_v61, %v22404_v43  ;;  %v12112_v59 = vpop.f32.mrb[41].mxu0  ;;  %v22407_v13 = vld [vmem:[#allocation153_spill] sm:$0xff]  ;;  %v22408_v50 = vld [vmem:[#allocation75_spill] sm:$0xff] }
 0x9d4   :  { %v14202_v27 = vadd.f32 %v14190_v8, %v14070_v62  ;;  %v14076_v9 = vmul.f32 %v13932_v41, %v13788_v23  ;;  %v15505_v15 = vadd.f32 %v12112_v59, %v22405_v5  ;;  %v12114_v18 = vpop.f32.mrb[42].mxu0  ;;  %13203 = vmatpush1.bf16.msra.mxu0 %v18710_v7  ;;  %v18716_v62 = vld [vmem:[#allocation6 + $0x1ea0] ss:$24 sps:$4 sm:$0xff]   ;;  %v18721_v43 = vld [vmem:[#allocation6 + $0x1ed4] ss:$24 sps:$4 sm:$0xff]  }
 0x9d5   :  { %v14207_v2 = vadd.f32 %v14195_v14, %v14075_v37  ;;  %v13649_v63 = vadd.f32 %v15504_v33, %v21060_v47  ;;  %v15506_v56 = vadd.f32 %v12114_v18, %v22406_v1  ;;  %v12116_v10 = vpop.f32.mrb[43].mxu0  ;;  %13204 = vmatprep.subr.bf16.mxu0 %v18715_v19  ;;  %v13938_v14 = vld [vmem:[%s21691_s5 + $0x3c8] sm:$0xff]  ;;  %v22409_v19 = vld [vmem:[#allocation78_spill] sm:$0xff] }
 0x9d6   :  { %v14208_v24 = vadd.f32 %v14196_v17, %v14076_v9  ;;  %v13650_v8 = vadd.f32 %v15505_v15, %v21066_v46  ;;  %v15507_v31 = vadd.f32 %v12116_v10, %v22407_v13  ;;  %v13943_v17 = vld [vmem:[%s21691_s5 + $0x3f0] sm:$0xff]  ;;  %v13944_v37 = vld [vmem:[%s21691_s5 + $0x3f8] sm:$0xff] }
 0x9d7   :  { %v13793_v40 = vmax.f32 %v13649_v63, 0.0  ;;  %v13655_v7 = vadd.f32 %v15506_v56, %v21060_v47  ;;  %13090 = vmatmul.mubr.bf16.gmra.mrb[52].mxu0 %v22408_v50  ;;  %v22410_v18 = vld [vmem:[#allocation154_spill] sm:$0xff]  ;;  %v18719_v13 = vld [vmem:[#allocation6 + $0x1ed0] ss:$24 sps:$4 sm:$0xff]  }
 0x9d8   :  { %v13794_v57 = vmax.f32 %v13650_v8, 0.0  ;;  %v13656_v41 = vadd.f32 %v15507_v31, %v21066_v46  ;;  %13099 = vmatprep.mubr.bf16.mxu0 %v22409_v19  ;;  %13205 = vmatpush1.bf16.msra.mxu0 %v18713_v25  ;;  %v22411_v25 = vld [vmem:[#allocation155_spill] sm:$0xff] }
 0x9d9   :  { %v14081_v23 = vmul.f32 %v13937_v28, %v13793_v40  ;;  %v13799_v61 = vmax.f32 %v13655_v7, 0.0  ;;  %13206 = vmatprep.subr.bf16.mxu0 %v18718_v36  ;;  %v22412_v36 = vld [vmem:[#allocation156_spill] sm:$0xff] }
 0x9da   :  { %v14082_v33 = vmul.f32 %v13938_v14, %v13794_v57  ;;  %v13800_v59 = vmax.f32 %v13656_v41, 0.0  ;;  %v12120_v9 = vpop.f32.mrb[44].mxu0  ;;  %v18724_v50 = vld [vmem:[#allocation6 + $0x1f04] ss:$24 sps:$4 sm:$0xff]  }
 0x9db   :  { %v14213_v5 = vadd.f32 %v14201_v54, %v14081_v23  ;;  %v14087_v15 = vmul.f32 %v13943_v17, %v13799_v61  ;;  %v15508_v63 = vadd.f32 %v12120_v9, %v22410_v18  ;;  %v12122_v1 = vpop.f32.mrb[45].mxu0  ;;  %v13949_v57 = vld [vmem:[%s21691_s5 + $0x420] sm:$0xff]  ;;  %v22413_v17 = vld [vmem:[#allocation157_spill] sm:$0xff] }
 0x9dc   :  { %v14214_v56 = vadd.f32 %v14202_v27, %v14082_v33  ;;  %v14088_v10 = vmul.f32 %v13944_v37, %v13800_v59  ;;  %v15509_v8 = vadd.f32 %v12122_v1, %v22411_v25  ;;  %v12124_v28 = vpop.f32.mrb[46].mxu0  ;;  %13207 = vmatpush1.bf16.msra.mxu0 %v18716_v62  ;;  %v18722_v37 = vld [vmem:[#allocation6 + $0x1f00] ss:$24 sps:$4 sm:$0xff]   ;;  %v13956_v59 = vld [vmem:[%s21691_s5 + $0x458] sm:$0xff] }
 0x9dd   :  { %v14219_v31 = vadd.f32 %v14207_v2, %v14087_v15  ;;  %v13661_v40 = vadd.f32 %v15508_v63, %v21060_v47  ;;  %v15510_v7 = vadd.f32 %v12124_v28, %v22412_v36  ;;  %v12126_v14 = vpop.f32.mrb[47].mxu0  ;;  %13208 = vmatprep.subr.bf16.mxu0 %v18721_v43  ;;  %v13950_v2 = vld [vmem:[%s21691_s5 + $0x428] sm:$0xff] }
 0x9de   :  { %v14220_v54 = vadd.f32 %v14208_v24, %v14088_v10  ;;  %v13662_v27 = vadd.f32 %v15509_v8, %v21066_v46  ;;  %v15511_v41 = vadd.f32 %v12126_v14, %v22413_v17  ;;  %v13955_v24 = vld [vmem:[%s21691_s5 + $0x450] sm:$0xff] }
 0x9df   :  { %v13805_v19 = vmax.f32 %v13661_v40, 0.0  ;;  %v13667_v62 = vadd.f32 %v15510_v7, %v21060_v47  ;;  %13100 = vmatmul.mubr.bf16.gmra.mrb[56].mxu0 %v22286_v21  ;;  %v18727_v47 = vld [vmem:[#allocation6 + $0x1f34] ss:$24 sps:$4 sm:$0xff]   ;;  %v18728_v40 = vld [vmem:[#allocation6 + $0x1f60] ss:$24 sps:$4 sm:$0xff]  }
 0x9e0   :  { %v13806_v23 = vmax.f32 %v13662_v27, 0.0  ;;  %v13668_v61 = vadd.f32 %v15511_v41, %v21066_v46  ;;  %13109 = vmatprep.mubr.bf16.mxu0 %v22287_v58  ;;  %13209 = vmatpush1.bf16.msra.mxu0 %v18719_v13  ;;  %v18725_v46 = vld [vmem:[#allocation6 + $0x1f30] ss:$24 sps:$4 sm:$0xff]   ;;  %v18730_v58 = vld [vmem:[#allocation6 + $0x1f64] ss:$24 sps:$4 sm:$0xff]  }
 0x9e1   :  { %v14093_v43 = vmul.f32 %v13949_v57, %v13805_v19  ;;  %v13811_v33 = vmax.f32 %v13667_v62, 0.0  ;;  %13210 = vmatprep.subr.bf16.mxu0 %v18724_v50  ;;  %v22418_v7 = vld [vmem:[#allocation107_spill] sm:$0xff]  ;;  %v22419_v50 = vld [vmem:[#allocation14_spill] sm:$0xff]  ;;  %v22420_v27 = vld [vmem:[#allocation13_spill] sm:$0xff] }
 0x9e2   :  { %v14094_v21 = vmul.f32 %v13950_v2, %v13806_v23  ;;  %v13812_v9 = vmax.f32 %v13668_v61, 0.0  ;;  %v22421_v19 = vld [vmem:[#allocation16_spill] sm:$0xff]  ;;  %v22422_v23 = vld [vmem:[#allocation15_spill] sm:$0xff] }
 0x9e3   :  { %v14225_v15 = vadd.f32 %v14213_v5, %v14093_v43  ;;  %v14099_v18 = vmul.f32 %v13955_v24, %v13811_v33 }
 0x9e4   :  { %v14226_v63 = vadd.f32 %v14214_v56, %v14094_v21  ;;  %v14100_v1 = vmul.f32 %v13956_v59, %v13812_v9  ;;  %13211 = vmatpush1.bf16.msra.mxu0 %v18722_v37  ;;  %v22423_v37 = vld [vmem:[#allocation19_spill] sm:$0xff]  ;;  %v22424_v59 = vld [vmem:[#allocation81_spill] sm:$0xff]  ;;  %v22425_v9 = vld [vmem:[#allocation80_spill] sm:$0xff] }
 0x9e5   :  { %v14231_v10 = vadd.f32 %v14219_v31, %v14099_v18  ;;  %13212 = vmatprep.subr.bf16.mxu0 %v18727_v47 }
 0x9e6   :  { %v14237_v25 = vadd.f32 %v14226_v63, %v14225_v15  ;;  %v14232_v8 = vadd.f32 %v14220_v54, %v14100_v1  ;;  %v22426_v63 = vld [vmem:[#allocation82_spill] sm:$0xff] }
 0x9e7   :  { %13110 = vmatmul.mubr.bf16.gmra.mrb[60].mxu0 %v19765_v16 }
 0x9e8   :  { %v14239_v28 = vadd.f32 %v14237_v25, %v20935_v30  ;;  %v14238_v13 = vadd.f32 %v14232_v8, %v14231_v10  ;;  %13119 = vmatprep.mubr.bf16.mxu0 %v22195_v26  ;;  %13213 = vmatpush1.bf16.msra.mxu0 %v18725_v46  ;;  %v22414_v30 = vld [vmem:[#allocation103_spill] sm:$0xff]  ;;  %v22427_v10 = vld [vmem:[#allocation84_spill] sm:$0xff] }
 0x9e9   :  { %13214 = vmatprep.subr.bf16.mxu0 %v18730_v58  ;;  %v22428_v8 = vld [vmem:[#allocation87_spill] sm:$0xff] }
 0x9ea   :  { %v14240_v5 = vadd.f32 %v14238_v13, %v20941_v6  ;;  %v21334_v56 = vadd.f32 %v14239_v28, %v20937_v29  ;;  %v22415_v6 = vld [vmem:[#allocation104_spill] sm:$0xff] }
 0x9ec   :  { %13215 = vmatpush1.bf16.msra.mxu0 %v18728_v40  ;;  %v21337_v31 = vadd.f32 %v14240_v5, %v20946_v49  ;;  %v22429_v40 = vld [vmem:[#allocation86_spill] sm:$0xff] }
 0x9ef   :  { %13120 = vmatmul.mubr.bf16.gmra.mrb[64].mxu0 %v22196_v51 }
 0x9f0   :  { %13232 = vmatprep.mubr.bf16.mxu0 %v22157_v12 }
 0x9f7   :  { %13233 = vmatmul.mubr.bf16.vlgmr.msra.gmra.mrb[48].mxu0 %v22209_v52 }
 0x9f8   :  { %13242 = vmatprep.mubr.bf16.mxu0 %v22157_v12 }
 0x9ff   :  { %13243 = vmatmul.mubr.bf16.gmra.mrb[52].mxu0 %v22288_v22  ;;  %v22417_v22 = vld [vmem:[#allocation106_spill] sm:$0xff] }
 0xa00   :  { %13252 = vmatprep.mubr.bf16.mxu0 %v22157_v12 }
 0xa07   :  { %13253 = vmatmul.mubr.bf16.gmra.mrb[56].mxu0 %v22211_v34 }
 0xa08   :  { %13262 = vmatprep.mubr.bf16.mxu0 %v22157_v12 }
 0xa0f   :  { %13263 = vmatmul.mubr.bf16.gmra.mrb[60].mxu0 %v22212_v45 }
 0xa10   :  { %13272 = vmatprep.mubr.bf16.mxu0 %v22157_v12 }
 0xa17   :  { %13273 = vmatmul.mubr.bf16.gmra.mrb[64].mxu0 %v22213_v38 }
 0xa18   :  { %13282 = vmatprep.mubr.bf16.mxu0 %v22157_v12 }
 0xa1f   :  { %13283 = vmatmul.mubr.bf16.gmra.mrb[96].mxu0 %v22165_v44 }
 0xa20   :  { %13292 = vmatprep.mubr.bf16.mxu0 %v22157_v12 }
 0xa27   :  { %13293 = vmatmul.mubr.bf16.gmra.mrb[100].mxu0 %v22166_v48 }
 0xa28   :  { %13302 = vmatprep.mubr.bf16.mxu0 %v22157_v12 }
 0xa2f   :  { %13303 = vmatmul.mubr.bf16.gmra.mrb[104].mxu0 %v22167_v32 }
 0xa30   :  { %13312 = vmatprep.mubr.bf16.mxu0 %v22157_v12 }
 0xa37   :  { %13313 = vmatmul.mubr.bf16.gmra.mrb[108].mxu0 %v22168_v35 }
 0xa38   :  { %13322 = vmatprep.mubr.bf16.mxu0 %v22157_v12 }
 0xa3f   :  { %13323 = vmatmul.mubr.bf16.gmra.mrb[112].mxu0 %v22169_v3 }
 0xa40   :  { %13332 = vmatprep.mubr.bf16.mxu0 %v22157_v12 }
 0xa47   :  { %13333 = vmatmul.mubr.bf16.gmra.mrb[116].mxu0 %v22263_v53 }
 0xa48   :  { %13342 = vmatprep.mubr.bf16.mxu0 %v22157_v12 }
 0xa4f   :  { %13343 = vmatmul.mubr.bf16.gmra.mrb[120].mxu0 %v22265_v0 }
 0xa6a   :  { %v12978_v16 = vpop.f32.mrb[68].mxu0 }
 0xa6b   :  { %v21365_v44 = vadd.f32 %v20939_v55, %v12978_v16  ;;  %v12980_v48 = vpop.f32.mrb[69].mxu0 }
 0xa6c   :  { %v21368_v32 = vadd.f32 %v20944_v39, %v12980_v48  ;;  %v12982_v35 = vpop.f32.mrb[70].mxu0  ;;  %v22430_v48 = vld [vmem:[#allocation89_spill] sm:$0xff] }
 0xa6d   :  { %v21371_v26 = vadd.f32 %v20948_v20, %v12982_v35  ;;  %v12984_v3 = vpop.f32.mrb[71].mxu0  ;;  %v22416_v20 = vld [vmem:[#allocation105_spill] sm:$0xff] }
 0xa6e   :  { %v21374_v51 = vadd.f32 %v20951_v4, %v12984_v3 }
 0xa72   :  { %v12988_v52 = vpop.f32.mrb[72].mxu0 }
 0xa73   :  { %v21377_v12 = vadd.f32 %v20953_v42, %v12988_v52  ;;  %v12990_v34 = vpop.f32.mrb[73].mxu0  ;;  %v22431_v52 = vld [vmem:[#allocation88_spill] sm:$0xff] }
 0xa74   :  { %v21380_v45 = vadd.f32 %v20956_v11, %v12990_v34  ;;  %v12992_v38 = vpop.f32.mrb[74].mxu0 }
 0xa75   :  { %v21383_v53 = vadd.f32 %v20958_v60, %v12992_v38  ;;  %v12994_v0 = vpop.f32.mrb[75].mxu0 }
 0xa76   :  { %v21386_v29 = vadd.f32 %v22414_v30, %v12994_v0  ;;  %v22432_v0 = vld [vmem:[#allocation91_spill] sm:$0xff] }
 0xa7a   :  { %v12998_v55 = vpop.f32.mrb[76].mxu0 }
 0xa7b   :  { %v21389_v39 = vadd.f32 %v22415_v6, %v12998_v55  ;;  %v13000_v49 = vpop.f32.mrb[77].mxu0  ;;  %v22433_v6 = vld [vmem:[#allocation90_spill] sm:$0xff] }
 0xa7c   :  { %v21392_v4 = vadd.f32 %v22416_v20, %v13000_v49  ;;  %v13002_v42 = vpop.f32.mrb[78].mxu0 }
 0xa7d   :  { %v21395_v11 = vadd.f32 %v22417_v22, %v13002_v42  ;;  %v13004_v36 = vpop.f32.mrb[79].mxu0  ;;  %v22434_v42 = vld [vmem:[#allocation96_spill] sm:$0xff] }
 0xa7e   :  { %v21398_v60 = vadd.f32 %v22418_v7, %v13004_v36  ;;  %v22435_v7 = vld [vmem:[#allocation12_spill] sm:$0xff] }
 0xa82   :  { %v13008_v14 = vpop.f32.mrb[80].mxu0 }
 0xa83   :  { %v21401_v54 = vadd.f32 %v22419_v50, %v13008_v14  ;;  %v13010_v57 = vpop.f32.mrb[81].mxu0  ;;  %v22436_v14 = vsub.s32 4, %v22435_v7  ;;  %v22437_v50 = vld [vmem:[#allocation98_spill] sm:$0xff] }
 0xa84   :  { %v21404_v17 = vadd.f32 %v22420_v27, %v13010_v57  ;;  %v13012_v41 = vpop.f32.mrb[82].mxu0 }
 0xa85   :  { %v21407_v2 = vadd.f32 %v22421_v19, %v13012_v41  ;;  %v13014_v62 = vpop.f32.mrb[83].mxu0  ;;  %v21451_v57 = vrot.slane %v22437_v50, %v22436_v14  ;;  %v22438_v41 = vsub.s32 5, %v22435_v7  ;;  %v13828_v7 = vld [vmem:[%s21691_s5 + $0x58] sm:$0xff] }
 0xa86   :  { %v21410_v24 = vadd.f32 %v22422_v23, %v13014_v62 }
 0xa87   :  { %v21456_v19 = vrot.slane %v22437_v50, %v22438_v41 }
 0xa8a   :  { %v13018_v61 = vpop.f32.mrb[84].mxu0 }
 0xa8b   :  { %v21413_v43 = vadd.f32 %v22423_v37, %v13018_v61  ;;  %v13020_v33 = vpop.f32.mrb[85].mxu0 }
 0xa8c   :  { %v21416_v47 = vadd.f32 %v22424_v59, %v13020_v33  ;;  %v13022_v21 = vpop.f32.mrb[86].mxu0 }
 0xa8d   :  { %v21419_v15 = vadd.f32 %v22425_v9, %v13022_v21  ;;  %v13024_v18 = vpop.f32.mrb[87].mxu0 }
 0xa8e   :  { %v21422_v1 = vadd.f32 %v22426_v63, %v13024_v18 }
 0xa92   :  { %v13028_v46 = vpop.f32.mrb[88].mxu0 }
 0xa93   :  { %v21425_v58 = vadd.f32 %v22427_v10, %v13028_v46  ;;  %v13030_v25 = vpop.f32.mrb[89].mxu0  ;;  %v13821_v46 = vld [vmem:[%s21691_s5 + $0x20] sm:$0xff] }
 0xa94   :  { %v21428_v28 = vadd.f32 %v22428_v8, %v13030_v25  ;;  %v13032_v13 = vpop.f32.mrb[90].mxu0  ;;  %v13833_v25 = vld [vmem:[%s21691_s5 + $0x80] sm:$0xff] }
 0xa95   :  { %v21431_v5 = vadd.f32 %v22429_v40, %v13032_v13  ;;  %v13034_v16 = vpop.f32.mrb[91].mxu0  ;;  %v13822_v40 = vld [vmem:[%s21691_s5 + $0x28] sm:$0xff] }
 0xa96   :  { %v21434_v35 = vadd.f32 %v22430_v48, %v13034_v16 }
 0xa9a   :  { %v13038_v3 = vpop.f32.mrb[92].mxu0 }
 0xa9b   :  { %v21437_v34 = vadd.f32 %v22431_v52, %v13038_v3  ;;  %v13040_v38 = vpop.f32.mrb[93].mxu0  ;;  %v13834_v3 = vld [vmem:[%s21691_s5 + $0x88] sm:$0xff] }
 0xa9c   :  { %v21440_v30 = vadd.f32 %v22432_v0, %v13040_v38  ;;  %v13042_v55 = vpop.f32.mrb[94].mxu0  ;;  %v13827_v0 = vld [vmem:[%s21691_s5 + $0x50] sm:$0xff] }
 0xa9d   :  { %v21443_v49 = vadd.f32 %v22433_v6, %v13042_v55  ;;  %v13044_v20 = vpop.f32.mrb[95].mxu0 }
 0xa9e   :  { %v21446_v22 = vadd.f32 %v22434_v42, %v13044_v20  ;;  %v13839_v20 = vld [vmem:[%s21691_s5 + $0xb0] sm:$0xff] }
 0xaca   :  { %v13234_v36 = vpop.f32.mrb[48].mxu0 }
 0xacb   :  { %v13236_v27 = vpop.f32.mrb[49].mxu0  ;;  %v13533_v61 = vadd.f32 %v21451_v57, %v13234_v36 }
 0xacc   :  { %v13238_v62 = vpop.f32.mrb[50].mxu0  ;;  %v13534_v37 = vadd.f32 %v21456_v19, %v13236_v27  ;;  %v13840_v27 = vld [vmem:[%s21691_s5 + $0xb8] sm:$0xff] }
 0xacd   :  { %v13240_v23 = vpop.f32.mrb[51].mxu0  ;;  %v13539_v33 = vadd.f32 %v21451_v57, %v13238_v62  ;;  %v13677_v9 = vmax.f32 %v13533_v61, 0.0 }
 0xace   :  { %v13540_v59 = vadd.f32 %v21456_v19, %v13240_v23  ;;  %v13678_v10 = vmax.f32 %v13534_v37, 0.0 }
 0xacf   :  { %v13683_v16 = vmax.f32 %v13539_v33, 0.0  ;;  %v13965_v36 = vmul.f32 %v13821_v46, %v13677_v9 }
 0xad0   :  { %v13684_v55 = vmax.f32 %v13540_v59, 0.0  ;;  %v13966_v41 = vmul.f32 %v13822_v40, %v13678_v10 }
 0xad1   :  { %v13971_v61 = vmul.f32 %v13827_v0, %v13683_v16  ;;  %v13846_v16 = vld [vmem:[%s21691_s5 + $0xe8] sm:$0xff]  ;;  %v13851_v0 = vld [vmem:[%s21691_s5 + $0x110] sm:$0xff] }
 0xad2   :  { %v13244_v21 = vpop.f32.mrb[52].mxu0  ;;  %v13972_v59 = vmul.f32 %v13828_v7, %v13684_v55 }
 0xad3   :  { %v13545_v18 = vadd.f32 %v21451_v57, %v13244_v21  ;;  %v13246_v63 = vpop.f32.mrb[53].mxu0 }
 0xad4   :  { %v13546_v8 = vadd.f32 %v21456_v19, %v13246_v63  ;;  %v13248_v13 = vpop.f32.mrb[54].mxu0 }
 0xad5   :  { %v13689_v48 = vmax.f32 %v13545_v18, 0.0  ;;  %v13551_v52 = vadd.f32 %v21451_v57, %v13248_v13  ;;  %v13250_v38 = vpop.f32.mrb[55].mxu0  ;;  %v13845_v13 = vld [vmem:[%s21691_s5 + $0xe0] sm:$0xff] }
 0xad6   :  { %v13690_v6 = vmax.f32 %v13546_v8, 0.0  ;;  %v13552_v42 = vadd.f32 %v21456_v19, %v13250_v38 }
 0xad7   :  { %v13977_v14 = vmul.f32 %v13833_v25, %v13689_v48  ;;  %v13695_v50 = vmax.f32 %v13551_v52, 0.0 }
 0xad8   :  { %v13978_v62 = vmul.f32 %v13834_v3, %v13690_v6  ;;  %v13696_v23 = vmax.f32 %v13552_v42, 0.0  ;;  %v13852_v42 = vld [vmem:[%s21691_s5 + $0x118] sm:$0xff] }
 0xad9   :  { %v14109_v37 = vadd.f32 %v13977_v14, %v13965_v36  ;;  %v13983_v33 = vmul.f32 %v13839_v20, %v13695_v50 }
 0xada   :  { %v14110_v21 = vadd.f32 %v13978_v62, %v13966_v41  ;;  %v13984_v18 = vmul.f32 %v13840_v27, %v13696_v23  ;;  %v13254_v9 = vpop.f32.mrb[56].mxu0 }
 0xadb   :  { %v14115_v63 = vadd.f32 %v13983_v33, %v13971_v61  ;;  %v13557_v46 = vadd.f32 %v21451_v57, %v13254_v9  ;;  %v13256_v8 = vpop.f32.mrb[57].mxu0 }
 0xadc   :  { %v14116_v25 = vadd.f32 %v13984_v18, %v13972_v59  ;;  %v13558_v10 = vadd.f32 %v21456_v19, %v13256_v8  ;;  %v13258_v40 = vpop.f32.mrb[58].mxu0  ;;  %v13857_v18 = vld [vmem:[%s21691_s5 + $0x140] sm:$0xff] }
 0xadd   :  { %v13701_v48 = vmax.f32 %v13557_v46, 0.0  ;;  %v13563_v3 = vadd.f32 %v21451_v57, %v13258_v40  ;;  %v13260_v52 = vpop.f32.mrb[59].mxu0 }
 0xade   :  { %v13702_v38 = vmax.f32 %v13558_v10, 0.0  ;;  %v13564_v55 = vadd.f32 %v21456_v19, %v13260_v52 }
 0xadf   :  { %v13989_v6 = vmul.f32 %v13845_v13, %v13701_v48  ;;  %v13707_v20 = vmax.f32 %v13563_v3, 0.0 }
 0xae0   :  { %v13990_v36 = vmul.f32 %v13846_v16, %v13702_v38  ;;  %v13708_v7 = vmax.f32 %v13564_v55, 0.0  ;;  %v13864_v16 = vld [vmem:[%s21691_s5 + $0x178] sm:$0xff] }
 0xae1   :  { %v14121_v14 = vadd.f32 %v14109_v37, %v13989_v6  ;;  %v13995_v50 = vmul.f32 %v13851_v0, %v13707_v20  ;;  %v13858_v37 = vld [vmem:[%s21691_s5 + $0x148] sm:$0xff] }
 0xae2   :  { %v14122_v27 = vadd.f32 %v14110_v21, %v13990_v36  ;;  %v13996_v41 = vmul.f32 %v13852_v42, %v13708_v7  ;;  %v13264_v62 = vpop.f32.mrb[60].mxu0 }
 0xae3   :  { %v14127_v23 = vadd.f32 %v14115_v63, %v13995_v50  ;;  %v13569_v61 = vadd.f32 %v21451_v57, %v13264_v62  ;;  %v13266_v33 = vpop.f32.mrb[61].mxu0 }
 0xae4   :  { %v14128_v59 = vadd.f32 %v14116_v25, %v13996_v41  ;;  %v13570_v9 = vadd.f32 %v21456_v19, %v13266_v33  ;;  %v13268_v46 = vpop.f32.mrb[62].mxu0  ;;  %v13863_v25 = vld [vmem:[%s21691_s5 + $0x170] sm:$0xff]  ;;  %v13869_v41 = vld [vmem:[%s21691_s5 + $0x1a0] sm:$0xff] }
 0xae5   :  { %v13713_v8 = vmax.f32 %v13569_v61, 0.0  ;;  %v13575_v21 = vadd.f32 %v21451_v57, %v13268_v46  ;;  %v13270_v13 = vpop.f32.mrb[63].mxu0 }
 0xae6   :  { %v13714_v63 = vmax.f32 %v13570_v9, 0.0  ;;  %v13576_v10 = vadd.f32 %v21456_v19, %v13270_v13 }
 0xae7   :  { %v14001_v40 = vmul.f32 %v13857_v18, %v13713_v8  ;;  %v13719_v48 = vmax.f32 %v13575_v21, 0.0 }
 0xae8   :  { %v14002_v3 = vmul.f32 %v13858_v37, %v13714_v63  ;;  %v13720_v52 = vmax.f32 %v13576_v10, 0.0  ;;  %v13876_v37 = vld [vmem:[%s21691_s5 + $0x1d8] sm:$0xff] }
 0xae9   :  { %v14133_v38 = vadd.f32 %v14121_v14, %v14001_v40  ;;  %v14007_v0 = vmul.f32 %v13863_v25, %v13719_v48  ;;  %v13870_v14 = vld [vmem:[%s21691_s5 + $0x1a8] sm:$0xff] }
 0xaea   :  { %v14134_v55 = vadd.f32 %v14122_v27, %v14002_v3  ;;  %v14008_v6 = vmul.f32 %v13864_v16, %v13720_v52  ;;  %v13274_v20 = vpop.f32.mrb[64].mxu0 }
 0xaeb   :  { %v14139_v42 = vadd.f32 %v14127_v23, %v14007_v0  ;;  %v13581_v36 = vadd.f32 %v21451_v57, %v13274_v20  ;;  %v13276_v7 = vpop.f32.mrb[65].mxu0 }
 0xaec   :  { %v14140_v50 = vadd.f32 %v14128_v59, %v14008_v6  ;;  %v13582_v62 = vadd.f32 %v21456_v19, %v13276_v7  ;;  %v13278_v61 = vpop.f32.mrb[66].mxu0  ;;  %v13875_v59 = vld [vmem:[%s21691_s5 + $0x1d0] sm:$0xff] }
 0xaed   :  { %v13725_v33 = vmax.f32 %v13581_v36, 0.0  ;;  %v13587_v27 = vadd.f32 %v21451_v57, %v13278_v61  ;;  %v13280_v18 = vpop.f32.mrb[67].mxu0 }
 0xaee   :  { %v13726_v23 = vmax.f32 %v13582_v62, 0.0  ;;  %v13588_v9 = vadd.f32 %v21456_v19, %v13280_v18 }
 0xaef   :  { %v14013_v46 = vmul.f32 %v13869_v41, %v13725_v33  ;;  %v13731_v8 = vmax.f32 %v13587_v27, 0.0 }
 0xaf0   :  { %v14014_v21 = vmul.f32 %v13870_v14, %v13726_v23  ;;  %v13732_v13 = vmax.f32 %v13588_v9, 0.0 }
 0xaf1   :  { %v14145_v63 = vadd.f32 %v14133_v38, %v14013_v46  ;;  %v14019_v25 = vmul.f32 %v13875_v59, %v13731_v8  ;;  %v13881_v38 = vld [vmem:[%s21691_s5 + $0x200] sm:$0xff] }
 0xaf2   :  { %v14146_v10 = vadd.f32 %v14134_v55, %v14014_v21  ;;  %v14020_v40 = vmul.f32 %v13876_v37, %v13732_v13  ;;  %v13284_v48 = vpop.f32.mrb[96].mxu0 }
 0xaf3   :  { %v14151_v16 = vadd.f32 %v14139_v42, %v14019_v25  ;;  %v15513_v3 = vadd.f32 %v21365_v44, %v13284_v48  ;;  %v13286_v52 = vpop.f32.mrb[97].mxu0  ;;  %v13882_v44 = vld [vmem:[%s21691_s5 + $0x208] sm:$0xff] }
 0xaf4   :  { %v14152_v0 = vadd.f32 %v14140_v50, %v14020_v40  ;;  %v15515_v6 = vadd.f32 %v21368_v32, %v13286_v52  ;;  %v13288_v20 = vpop.f32.mrb[98].mxu0 }
 0xaf5   :  { %v13593_v36 = vadd.f32 %v15513_v3, %v21451_v57  ;;  %v15517_v7 = vadd.f32 %v21371_v26, %v13288_v20  ;;  %v13290_v41 = vpop.f32.mrb[99].mxu0  ;;  %v13887_v26 = vld [vmem:[%s21691_s5 + $0x230] sm:$0xff] }
 0xaf6   :  { %v13594_v55 = vadd.f32 %v15515_v6, %v21456_v19  ;;  %v15519_v42 = vadd.f32 %v21374_v51, %v13290_v41  ;;  %v13888_v51 = vld [vmem:[%s21691_s5 + $0x238] sm:$0xff] }
 0xaf7   :  { %v13737_v62 = vmax.f32 %v13593_v36, 0.0  ;;  %v13599_v32 = vadd.f32 %v15517_v7, %v21451_v57 }
 0xaf8   :  { %v13738_v50 = vmax.f32 %v13594_v55, 0.0  ;;  %v13600_v61 = vadd.f32 %v15519_v42, %v21456_v19 }
 0xaf9   :  { %v14025_v33 = vmul.f32 %v13881_v38, %v13737_v62  ;;  %v13743_v14 = vmax.f32 %v13599_v32, 0.0 }
 0xafa   :  { %v14026_v27 = vmul.f32 %v13882_v44, %v13738_v50  ;;  %v13744_v18 = vmax.f32 %v13600_v61, 0.0  ;;  %v13294_v23 = vpop.f32.mrb[100].mxu0 }
 0xafb   :  { %v14157_v59 = vadd.f32 %v14145_v63, %v14025_v33  ;;  %v14031_v9 = vmul.f32 %v13887_v26, %v13743_v14  ;;  %v15521_v46 = vadd.f32 %v21377_v12, %v13294_v23  ;;  %v13296_v8 = vpop.f32.mrb[101].mxu0  ;;  %v13893_v63 = vld [vmem:[%s21691_s5 + $0x260] sm:$0xff] }
 0xafc   :  { %v14158_v37 = vadd.f32 %v14146_v10, %v14026_v27  ;;  %v14032_v21 = vmul.f32 %v13888_v51, %v13744_v18  ;;  %v15523_v13 = vadd.f32 %v21380_v45, %v13296_v8  ;;  %v13298_v25 = vpop.f32.mrb[102].mxu0  ;;  %v13894_v45 = vld [vmem:[%s21691_s5 + $0x268] sm:$0xff] }
 0xafd   :  { %v14163_v40 = vadd.f32 %v14151_v16, %v14031_v9  ;;  %v13605_v48 = vadd.f32 %v15521_v46, %v21451_v57  ;;  %v15525_v3 = vadd.f32 %v21383_v53, %v13298_v25  ;;  %v13300_v52 = vpop.f32.mrb[103].mxu0  ;;  %v13899_v53 = vld [vmem:[%s21691_s5 + $0x290] sm:$0xff] }
 0xafe   :  { %v14164_v6 = vadd.f32 %v14152_v0, %v14032_v21  ;;  %v13606_v20 = vadd.f32 %v15523_v13, %v21456_v19  ;;  %v15527_v12 = vadd.f32 %v21386_v29, %v13300_v52  ;;  %v13900_v29 = vld [vmem:[%s21691_s5 + $0x298] sm:$0xff] }
 0xaff   :  { %v13749_v10 = vmax.f32 %v13605_v48, 0.0  ;;  %v13611_v16 = vadd.f32 %v15525_v3, %v21451_v57 }
 0xb00   :  { %v13750_v36 = vmax.f32 %v13606_v20, 0.0  ;;  %v13612_v0 = vadd.f32 %v15527_v12, %v21456_v19 }
 0xb01   :  { %v14037_v7 = vmul.f32 %v13893_v63, %v13749_v10  ;;  %v13755_v41 = vmax.f32 %v13611_v16, 0.0 }
 0xb02   :  { %v14038_v38 = vmul.f32 %v13894_v45, %v13750_v36  ;;  %v13756_v55 = vmax.f32 %v13612_v0, 0.0  ;;  %v13304_v42 = vpop.f32.mrb[104].mxu0 }
 0xb03   :  { %v14169_v62 = vadd.f32 %v14157_v59, %v14037_v7  ;;  %v14043_v44 = vmul.f32 %v13899_v53, %v13755_v41  ;;  %v15529_v32 = vadd.f32 %v21389_v39, %v13304_v42  ;;  %v13306_v50 = vpop.f32.mrb[105].mxu0  ;;  %v13905_v59 = vld [vmem:[%s21691_s5 + $0x2c0] sm:$0xff] }
 0xb04   :  { %v14170_v26 = vadd.f32 %v14158_v37, %v14038_v38  ;;  %v14044_v61 = vmul.f32 %v13900_v29, %v13756_v55  ;;  %v15531_v33 = vadd.f32 %v21392_v4, %v13306_v50  ;;  %v13308_v14 = vpop.f32.mrb[106].mxu0  ;;  %v13906_v4 = vld [vmem:[%s21691_s5 + $0x2c8] sm:$0xff]  ;;  %v13917_v38 = vld [vmem:[%s21691_s5 + $0x320] sm:$0xff] }
 0xb05   :  { %v14175_v51 = vadd.f32 %v14163_v40, %v14043_v44  ;;  %v13617_v27 = vadd.f32 %v15529_v32, %v21451_v57  ;;  %v15533_v18 = vadd.f32 %v21395_v11, %v13308_v14  ;;  %v13310_v23 = vpop.f32.mrb[107].mxu0  ;;  %v13911_v11 = vld [vmem:[%s21691_s5 + $0x2f0] sm:$0xff] }
 0xb06   :  { %v14176_v9 = vadd.f32 %v14164_v6, %v14044_v61  ;;  %v13618_v46 = vadd.f32 %v15531_v33, %v21456_v19  ;;  %v15535_v39 = vadd.f32 %v21398_v60, %v13310_v23  ;;  %v13912_v60 = vld [vmem:[%s21691_s5 + $0x2f8] sm:$0xff] }
 0xb07   :  { %v13761_v8 = vmax.f32 %v13617_v27, 0.0  ;;  %v13623_v37 = vadd.f32 %v15533_v18, %v21451_v57 }
 0xb08   :  { %v13762_v21 = vmax.f32 %v13618_v46, 0.0  ;;  %v13624_v13 = vadd.f32 %v15535_v39, %v21456_v19 }
 0xb09   :  { %v14049_v25 = vmul.f32 %v13905_v59, %v13761_v8  ;;  %v13767_v40 = vmax.f32 %v13623_v37, 0.0 }
 0xb0a   :  { %v14050_v48 = vmul.f32 %v13906_v4, %v13762_v21  ;;  %v13768_v3 = vmax.f32 %v13624_v13, 0.0  ;;  %v13314_v52 = vpop.f32.mrb[108].mxu0  ;;  %v13929_v13 = vld [vmem:[%s21691_s5 + $0x380] sm:$0xff] }
 0xb0b   :  { %v14181_v6 = vadd.f32 %v14169_v62, %v14049_v25  ;;  %v14055_v63 = vmul.f32 %v13911_v11, %v13767_v40  ;;  %v15537_v20 = vadd.f32 %v21401_v54, %v13314_v52  ;;  %v13316_v12 = vpop.f32.mrb[109].mxu0 }
 0xb0c   :  { %v14182_v10 = vadd.f32 %v14170_v26, %v14050_v48  ;;  %v14056_v45 = vmul.f32 %v13912_v60, %v13768_v3  ;;  %v15539_v16 = vadd.f32 %v21404_v17, %v13316_v12  ;;  %v13318_v36 = vpop.f32.mrb[110].mxu0  ;;  %v13918_v17 = vld [vmem:[%s21691_s5 + $0x328] sm:$0xff] }
 0xb0d   :  { %v14187_v53 = vadd.f32 %v14175_v51, %v14055_v63  ;;  %v13629_v0 = vadd.f32 %v15537_v20, %v21451_v57  ;;  %v15541_v7 = vadd.f32 %v21407_v2, %v13318_v36  ;;  %v13320_v41 = vpop.f32.mrb[111].mxu0  ;;  %v13923_v2 = vld [vmem:[%s21691_s5 + $0x350] sm:$0xff] }
 0xb0e   :  { %v14188_v29 = vadd.f32 %v14176_v9, %v14056_v45  ;;  %v13630_v55 = vadd.f32 %v15539_v16, %v21456_v19  ;;  %v15543_v54 = vadd.f32 %v21410_v24, %v13320_v41  ;;  %v13924_v24 = vld [vmem:[%s21691_s5 + $0x358] sm:$0xff] }
 0xb0f   :  { %v13773_v42 = vmax.f32 %v13629_v0, 0.0  ;;  %v13635_v62 = vadd.f32 %v15541_v7, %v21451_v57 }
 0xb10   :  { %v13774_v44 = vmax.f32 %v13630_v55, 0.0  ;;  %v13636_v32 = vadd.f32 %v15543_v54, %v21456_v19 }
 0xb11   :  { %v14061_v50 = vmul.f32 %v13917_v38, %v13773_v42  ;;  %v13779_v26 = vmax.f32 %v13635_v62, 0.0 }
 0xb12   :  { %v14062_v61 = vmul.f32 %v13918_v17, %v13774_v44  ;;  %v13780_v33 = vmax.f32 %v13636_v32, 0.0  ;;  %v13324_v14 = vpop.f32.mrb[112].mxu0  ;;  %v13941_v17 = vld [vmem:[%s21691_s5 + $0x3e0] sm:$0xff] }
 0xb13   :  { %v14193_v51 = vadd.f32 %v14181_v6, %v14061_v50  ;;  %v14067_v27 = vmul.f32 %v13923_v2, %v13779_v26  ;;  %v15545_v18 = vadd.f32 %v21413_v43, %v13324_v14  ;;  %v13326_v23 = vpop.f32.mrb[113].mxu0 }
 0xb14   :  { %v14194_v9 = vadd.f32 %v14182_v10, %v14062_v61  ;;  %v14068_v59 = vmul.f32 %v13924_v24, %v13780_v33  ;;  %v15547_v46 = vadd.f32 %v21416_v47, %v13326_v23  ;;  %v13328_v39 = vpop.f32.mrb[114].mxu0  ;;  %v13930_v47 = vld [vmem:[%s21691_s5 + $0x388] sm:$0xff] }
 0xb15   :  { %v14199_v8 = vadd.f32 %v14187_v53, %v14067_v27  ;;  %v13641_v4 = vadd.f32 %v15545_v18, %v21451_v57  ;;  %v15549_v37 = vadd.f32 %v21419_v15, %v13328_v39  ;;  %v13330_v21 = vpop.f32.mrb[115].mxu0  ;;  %v13935_v15 = vld [vmem:[%s21691_s5 + $0x3b0] sm:$0xff] }
 0xb16   :  { %v14200_v11 = vadd.f32 %v14188_v29, %v14068_v59  ;;  %v13642_v25 = vadd.f32 %v15547_v46, %v21456_v19  ;;  %v15551_v43 = vadd.f32 %v21422_v1, %v13330_v21  ;;  %v13936_v1 = vld [vmem:[%s21691_s5 + $0x3b8] sm:$0xff] }
 0xb17   :  { %v13785_v40 = vmax.f32 %v13641_v4, 0.0  ;;  %v13647_v60 = vadd.f32 %v15549_v37, %v21451_v57 }
 0xb18   :  { %v13786_v48 = vmax.f32 %v13642_v25, 0.0  ;;  %v13648_v3 = vadd.f32 %v15551_v43, %v21456_v19 }
 0xb19   :  { %v14073_v52 = vmul.f32 %v13929_v13, %v13785_v40  ;;  %v13791_v6 = vmax.f32 %v13647_v60, 0.0  ;;  %v13953_v13 = vld [vmem:[%s21691_s5 + $0x440] sm:$0xff] }
 0xb1a   :  { %v14074_v63 = vmul.f32 %v13930_v47, %v13786_v48  ;;  %v13792_v20 = vmax.f32 %v13648_v3, 0.0  ;;  %v13334_v12 = vpop.f32.mrb[116].mxu0 }
 0xb1b   :  { %v14205_v10 = vadd.f32 %v14193_v51, %v14073_v52  ;;  %v14079_v45 = vmul.f32 %v13935_v15, %v13791_v6  ;;  %v15553_v16 = vadd.f32 %v21425_v58, %v13334_v12  ;;  %v13336_v36 = vpop.f32.mrb[117].mxu0 }
 0xb1c   :  { %v14206_v53 = vadd.f32 %v14194_v9, %v14074_v63  ;;  %v14080_v0 = vmul.f32 %v13936_v1, %v13792_v20  ;;  %v15555_v7 = vadd.f32 %v21428_v28, %v13336_v36  ;;  %v13338_v41 = vpop.f32.mrb[118].mxu0  ;;  %v13942_v28 = vld [vmem:[%s21691_s5 + $0x3e8] sm:$0xff] }
 0xb1d   :  { %v14211_v29 = vadd.f32 %v14199_v8, %v14079_v45  ;;  %v13653_v38 = vadd.f32 %v15553_v16, %v21451_v57  ;;  %v15557_v55 = vadd.f32 %v21431_v5, %v13338_v41  ;;  %v13340_v54 = vpop.f32.mrb[119].mxu0  ;;  %v13947_v5 = vld [vmem:[%s21691_s5 + $0x410] sm:$0xff] }
 0xb1e   :  { %v14212_v42 = vadd.f32 %v14200_v11, %v14080_v0  ;;  %v13654_v62 = vadd.f32 %v15555_v7, %v21456_v19  ;;  %v15559_v58 = vadd.f32 %v21434_v35, %v13340_v54  ;;  %v13948_v35 = vld [vmem:[%s21691_s5 + $0x418] sm:$0xff] }
 0xb1f   :  { %v13797_v44 = vmax.f32 %v13653_v38, 0.0  ;;  %v13659_v2 = vadd.f32 %v15557_v55, %v21451_v57 }
 0xb20   :  { %v13798_v32 = vmax.f32 %v13654_v62, 0.0  ;;  %v13660_v50 = vadd.f32 %v15559_v58, %v21456_v19 }
 0xb21   :  { %v14085_v26 = vmul.f32 %v13941_v17, %v13797_v44  ;;  %v13803_v24 = vmax.f32 %v13659_v2, 0.0 }
 0xb22   :  { %v14086_v61 = vmul.f32 %v13942_v28, %v13798_v32  ;;  %v13804_v33 = vmax.f32 %v13660_v50, 0.0  ;;  %v13344_v14 = vpop.f32.mrb[120].mxu0 }
 0xb23   :  { %v14217_v51 = vadd.f32 %v14205_v10, %v14085_v26  ;;  %v14091_v27 = vmul.f32 %v13947_v5, %v13803_v24  ;;  %v15561_v18 = vadd.f32 %v21437_v34, %v13344_v14  ;;  %v13346_v23 = vpop.f32.mrb[121].mxu0 }
 0xb24   :  { %v14218_v9 = vadd.f32 %v14206_v53, %v14086_v61  ;;  %v14092_v59 = vmul.f32 %v13948_v35, %v13804_v33  ;;  %v15563_v46 = vadd.f32 %v21440_v30, %v13346_v23  ;;  %v13348_v39 = vpop.f32.mrb[122].mxu0  ;;  %v13954_v30 = vld [vmem:[%s21691_s5 + $0x448] sm:$0xff] }
 0xb25   :  { %v14223_v8 = vadd.f32 %v14211_v29, %v14091_v27  ;;  %v13665_v4 = vadd.f32 %v15561_v18, %v21451_v57  ;;  %v15565_v37 = vadd.f32 %v21443_v49, %v13348_v39  ;;  %v13350_v21 = vpop.f32.mrb[123].mxu0  ;;  %v13959_v49 = vld [vmem:[%s21691_s5 + $0x470] sm:$0xff] }
 0xb26   :  { %v14224_v11 = vadd.f32 %v14212_v42, %v14092_v59  ;;  %v13666_v25 = vadd.f32 %v15563_v46, %v21456_v19  ;;  %v15567_v34 = vadd.f32 %v21446_v22, %v13350_v21  ;;  %v13960_v22 = vld [vmem:[%s21691_s5 + $0x478] sm:$0xff] }
 0xb27   :  { %v13809_v43 = vmax.f32 %v13665_v4, 0.0  ;;  %v13671_v40 = vadd.f32 %v15565_v37, %v21451_v57 }
 0xb28   :  { %v13810_v47 = vmax.f32 %v13666_v25, 0.0  ;;  %v13672_v60 = vadd.f32 %v15567_v34, %v21456_v19 }
 0xb29   :  { %v14097_v48 = vmul.f32 %v13953_v13, %v13809_v43  ;;  %v13815_v15 = vmax.f32 %v13671_v40, 0.0 }
 0xb2a   :  { %v14098_v3 = vmul.f32 %v13954_v30, %v13810_v47  ;;  %v13816_v52 = vmax.f32 %v13672_v60, 0.0 }
 0xb2b   :  { %v14229_v6 = vadd.f32 %v14217_v51, %v14097_v48  ;;  %v14103_v1 = vmul.f32 %v13959_v49, %v13815_v15 }
 0xb2c   :  { %v14230_v63 = vadd.f32 %v14218_v9, %v14098_v3  ;;  %v14104_v20 = vmul.f32 %v13960_v22, %v13816_v52 }
 0xb2d   :  { %v14243_v57 = vadd.f32 %v21334_v56, %v14229_v6  ;;  %v14235_v12 = vadd.f32 %v14223_v8, %v14103_v1 }
 0xb2e   :  { %v14236_v10 = vadd.f32 %v14224_v11, %v14104_v20 }
 0xb2f   :  { %v14245_v45 = vadd.f32 %v14243_v57, %v14230_v63  ;;  %v14244_v16 = vadd.f32 %v21337_v31, %v14235_v12 }
 0xb31   :  { %14247 = vst [vmem:[%s21692_s6] sm:$0xff] %v14245_v45  ;;  %v14246_v19 = vadd.f32 %v14244_v16, %v14236_v10 }
 0xb33   :  { %14248 = vst [vmem:[%s21692_s6 + $0x8] sm:$0xff] %v14246_v19 }
 0xb34   :  { %14253 = vsyncpa [#allocation3], 1 }
 0xb35   :  { %14254 = vsyncpa [#allocation5], 1 }
 0xb36   :  { %14255 = vsyncpa [#allocation8], 1 }

</bundles_post_ra>
